<compile_context>
chip_gen: v6e
topology: v6e:2x2x1
jax: 0.10.0
libtpu: 0.0.40
codegen_flags: <defaults>
</compile_context>

<pallas_src>
import jax
import jax.numpy as jnp
from jax.experimental import pallas as pl
from jax.experimental.pallas import tpu as pltpu

EPSILON = 1e-4
LANE = 128


def _round_up(x, m):
    return ((x + m - 1) // m) * m


# -----------------------------------------------------------------------------
# Weight preparation (run ONCE, outside the per-call jit path)
# -----------------------------------------------------------------------------
def _place_gates(w, H, Hp, n_blocks, block_of_gate):
    """w: (rows, 4H), gate order [i f g o].  Returns (rows, n_blocks*Hp) with
    gate k's H real columns placed at the first H lanes of column block
    block_of_gate[k]; all other lanes zero (keeps padded lanes provably zero)."""
    rows = w.shape[0]
    out = jnp.zeros((rows, n_blocks * Hp), w.dtype)
    for k in range(4):
        blk = block_of_gate[k]
        out = out.at[:, blk * Hp: blk * Hp + H].set(w[:, k * H:(k + 1) * H])
    return out


def _pad_rows(w, rows_p):
    r = w.shape[0]
    if r == rows_p:
        return w
    return jnp.pad(w, ((0, rows_p - r), (0, 0)))


def prepare_params(params, compute_dtype=jnp.bfloat16):
    """Pad / fuse / interleave / bf16-cast all weights for the fused kernel."""
    H = params["lstm1"]["fw"]["w_hh_t"].shape[0]
    Hp = _round_up(H, LANE)
    FWD, BWD, SEQ = (0, 2, 4, 6), (1, 3, 5, 7), (0, 1, 2, 3)
    p1f, p1b = params["lstm1"]["fw"], params["lstm1"]["bw"]
    p2f, p2b = params["lstm2"]["fw"], params["lstm2"]["bw"]
    cast = lambda a: a.astype(compute_dtype)
    f32 = lambda a: a.astype(jnp.float32)

    # Layer 1: schedule-ordered input weight (2*Din, 8Hp).  Rows 0:Din multiply
    # x[s] (fwd gate blocks), rows Din:2Din multiply x[T-1-s] (bwd gate blocks).
    w1_in = jnp.concatenate(
        [_place_gates(p1f["w_ih_t"], H, Hp, 8, FWD),
         _place_gates(p1b["w_ih_t"], H, Hp, 8, BWD)], axis=0)
    b1 = (_place_gates(p1f["b"], H, Hp, 8, FWD)
          + _place_gates(p1b["b"], H, Hp, 8, BWD))
    # Layer 1: block-diagonal fused recurrent weight (2Hp, 8Hp).
    w1_hh = jnp.concatenate(
        [_pad_rows(_place_gates(p1f["w_hh_t"], H, Hp, 8, FWD), Hp),
         _pad_rows(_place_gates(p1b["w_hh_t"], H, Hp, 8, BWD), Hp)], axis=0)

    # Layer 2 forward: split the (2H, 4H) input weight by which half of the
    # layer-1 output (hf vs hb) multiplies it.
    w2f_ih = _place_gates(p2f["w_ih_t"], H, Hp, 4, SEQ)
    w2f_top = _pad_rows(w2f_ih[0:H], Hp)
    w2f_bot = _pad_rows(w2f_ih[H:2 * H], Hp)
    b2f = _place_gates(p2f["b"], H, Hp, 4, SEQ)
    w2f_hh = _pad_rows(_place_gates(p2f["w_hh_t"], H, Hp, 4, SEQ), Hp)
    # Layer 2 backward: only the first reverse step (t = T-1, zero state) is
    # ever read -> no recurrent weight needed.
    w2b_ih = _place_gates(p2b["w_ih_t"], H, Hp, 4, SEQ)
    w2b_top = _pad_rows(w2b_ih[0:H], Hp)
    w2b_bot = _pad_rows(w2b_ih[H:2 * H], Hp)
    b2b = _place_gates(p2b["b"], H, Hp, 4, SEQ)

    # Head: fused [mu | sigma] weight, rows split by layer-2 fwd/bwd halves.
    w_mu, w_sg = params["mu"]["w_t"], params["sigma"]["w_t"]
    wh_top = jnp.concatenate([_pad_rows(w_mu[0:H], Hp),
                              _pad_rows(w_sg[0:H], Hp)], axis=1)
    wh_bot = jnp.concatenate([_pad_rows(w_mu[H:2 * H], Hp),
                              _pad_rows(w_sg[H:2 * H], Hp)], axis=1)
    bh = jnp.concatenate([params["mu"]["b"], params["sigma"]["b"]], axis=1)

    return dict(
        w1_in=cast(w1_in), b1=f32(b1), w1_hh=cast(w1_hh),
        w2f_top=cast(w2f_top), w2f_bot=cast(w2f_bot), b2f=f32(b2f),
        w2f_hh=cast(w2f_hh),
        w2b_top=cast(w2b_top), w2b_bot=cast(w2b_bot), b2b=f32(b2b),
        wh_top=cast(wh_top), wh_bot=cast(wh_bot), bh=f32(bh),
    )


# -----------------------------------------------------------------------------
# Fused encoder kernel
# -----------------------------------------------------------------------------
def _encoder_kernel(xs_ref, w1_in_ref, b1_ref, w1_hh_ref,
                    w2f_top_ref, w2f_bot_ref, b2f_ref, w2f_hh_ref,
                    w2b_top_ref, w2b_bot_ref, b2b_ref,
                    wh_top_ref, wh_bot_ref, bh_ref, noise_ref,
                    out_ref,
                    gx1_scr, gx2_scr):
    f32, bf16 = jnp.float32, jnp.bfloat16
    B, L = noise_ref.shape
    TB = xs_ref.shape[0]
    T = TB // B
    Hp = w2f_hh_ref.shape[0]

    def sig(v):                       # sigmoid via tanh: 1 EUP op + cheap FMA
        return 0.5 * jnp.tanh(0.5 * v) + 0.5

    # --- Phase 0: ONE batched layer-1 input projection (schedule order) -----
    # Row block s of gx1 holds the interleaved gates [i_f i_b|f_f f_b|g_f g_b|
    # o_f o_b] where the fwd gates use x[s] and the bwd gates use x[T-1-s].
    gx1_scr[...] = (jnp.dot(xs_ref[...], w1_in_ref[...],
                            preferred_element_type=f32) + b1_ref[...])
    # Pre-init layer-2 forward gates with their bias (time order).
    gx2_scr[...] = jnp.broadcast_to(b2f_ref[...], gx2_scr.shape)

    w1_hh = w1_hh_ref[...]            # (2Hp, 8Hp) bf16, block-diagonal
    w2f_top = w2f_top_ref[...]        # (Hp, 4Hp)  bf16
    w2f_bot = w2f_bot_ref[...]

    # --- Phase 1: fused bidirectional layer-1 recurrence ---------------------
    # One block-diagonal recurrent matmul + one activation pass per step; the
    # layer-2 input projections are folded in as off-critical-path filler.
    h_cat = jnp.zeros((B, 2 * Hp), f32)     # [hf(time s) | hb(time T-1-s)]
    c_cat = jnp.zeros((B, 2 * Hp), f32)
    hb_t_last = None
    hf_t_last = None
    for s in range(T):                      # T static -> fully unrolled
        g = gx1_scr[pl.ds(s * B, B), :] + jnp.dot(
            h_cat.astype(bf16), w1_hh, preferred_element_type=f32)
        i = sig(g[:, 0 * Hp:2 * Hp])
        f = sig(g[:, 2 * Hp:4 * Hp])
        gg = jnp.tanh(g[:, 4 * Hp:6 * Hp])
        o = sig(g[:, 6 * Hp:8 * Hp])
        c_cat = f * c_cat + i * gg
        h_cat = o * jnp.tanh(c_cat)
        hf_b = h_cat[:, 0:Hp].astype(bf16)          # layer-1 fwd @ time s
        hb_b = h_cat[:, Hp:2 * Hp].astype(bf16)     # layer-1 bwd @ time T-1-s
        # Fold layer-2 forward input projection (filler, off the serial path).
        gx2_scr[pl.ds(s * B, B), :] = gx2_scr[pl.ds(s * B, B), :] + jnp.dot(
            hf_b, w2f_top, preferred_element_type=f32)
        t_rev = T - 1 - s
        gx2_scr[pl.ds(t_rev * B, B), :] = gx2_scr[pl.ds(t_rev * B, B), :] + jnp.dot(
            hb_b, w2f_bot, preferred_element_type=f32)
        if s == 0:
            hb_t_last = hb_b                         # layer-1 bwd @ time T-1
        if s == T - 1:
            hf_t_last = hf_b                         # layer-1 fwd @ time T-1

    # --- Phase 2: layer-2 forward recurrence (only its final state is used) --
    w2f_hh = w2f_hh_ref[...]
    h2 = jnp.zeros((B, Hp), f32)
    c2 = jnp.zeros((B, Hp), f32)
    for t in range(T):
        g = gx2_scr[pl.ds(t * B, B), :] + jnp.dot(
            h2.astype(bf16), w2f_hh, preferred_element_type=f32)
        i = sig(g[:, 0:Hp])
        f = sig(g[:, Hp:2 * Hp])
        gg = jnp.tanh(g[:, 2 * Hp:3 * Hp])
        o = sig(g[:, 3 * Hp:4 * Hp])
        c2 = f * c2 + i * gg
        h2 = o * jnp.tanh(c2)

    # --- Phase 3: layer-2 backward, single step at t = T-1, zero state -------
    gb = (jnp.dot(hf_t_last, w2b_top_ref[...], preferred_element_type=f32)
          + jnp.dot(hb_t_last, w2b_bot_ref[...], preferred_element_type=f32)
          + b2b_ref[...])
    cb2 = sig(gb[:, 0:Hp]) * jnp.tanh(gb[:, 2 * Hp:3 * Hp])   # f*c_prev == 0
    hb2 = sig(gb[:, 3 * Hp:4 * Hp]) * jnp.tanh(cb2)

    # --- Phase 4: fused mu|sigma head + reparameterization, one store --------
    head = (jnp.dot(h2.astype(bf16), wh_top_ref[...], preferred_element_type=f32)
            + jnp.dot(hb2.astype(bf16), wh_bot_ref[...], preferred_element_type=f32)
            + bh_ref[...])                                     # (B, 2L)
    mu = head[:, 0:L]
    s_pre = head[:, L:2 * L]
    # softplus with the same threshold-20 overflow guard as F.softplus
    sigma = jnp.where(s_pre > 20.0, s_pre,
                      jnp.log1p(jnp.exp(jnp.minimum(s_pre, 20.0)))) + EPSILON
    z = mu + sigma * noise_ref[...]
    out_ref[...] = jnp.concatenate([z, mu, sigma], axis=1)     # (B, 3L)


# -----------------------------------------------------------------------------
# Wrapper: build the schedule-ordered input slab and launch the fused kernel
# -----------------------------------------------------------------------------
def encoder_forward(weights, x_btd, noise):
    """x_btd: (B, T, enc_in), noise: (B, L) -> (z, mu, sigma)."""
    B, T, Din = x_btd.shape
    Hp = weights["w2f_hh"].shape[0]
    L = noise.shape[1]

    x_tm = jnp.transpose(x_btd, (1, 0, 2))                     # (T, B, Din)
    x_sched = jnp.concatenate([x_tm, x_tm[::-1]], axis=-1)     # [x[s] | x[T-1-s]]
    x_sched = x_sched.reshape(T * B, 2 * Din).astype(jnp.bfloat16)

    vmem = lambda: pl.BlockSpec(memory_space=pltpu.MemorySpace.VMEM)
    out = pl.pallas_call(
        _encoder_kernel,
        out_shape=jax.ShapeDtypeStruct((B, 3 * L), jnp.float32),
        in_specs=[vmem() for _ in range(15)],
        out_specs=vmem(),
        scratch_shapes=[
            pltpu.VMEM((T * B, 8 * Hp), jnp.float32),   # layer-1 gates (schedule order)
            pltpu.VMEM((T * B, 4 * Hp), jnp.float32),   # layer-2 fwd gates (time order)
        ],
    )(x_sched, weights["w1_in"], weights["b1"], weights["w1_hh"],
      weights["w2f_top"], weights["w2f_bot"], weights["b2f"], weights["w2f_hh"],
      weights["w2b_top"], weights["w2b_bot"], weights["b2b"],
      weights["wh_top"], weights["wh_bot"], weights["bh"], noise)
    return out[:, 0:L], out[:, L:2 * L], out[:, 2 * L:3 * L]


# -----------------------------------------------------------------------------
# Pure-JAX reference (mirrors nn.LSTM / the PyTorch module), f32
# -----------------------------------------------------------------------------
def _ref_lstm_dir(x_tm, w_ih_t, w_hh_t, b, reverse):
    T, B, _ = x_tm.shape
    H = w_hh_t.shape[0]
    h = jnp.zeros((B, H), jnp.float32)
    c = jnp.zeros((B, H), jnp.float32)
    outs = [None] * T
    order = range(T - 1, -1, -1) if reverse else range(T)
    for t in order:
        g = x_tm[t] @ w_ih_t + h @ w_hh_t + b
        i = jax.nn.sigmoid(g[:, 0:H])
        f = jax.nn.sigmoid(g[:, H:2 * H])
        gg = jnp.tanh(g[:, 2 * H:3 * H])
        o = jax.nn.sigmoid(g[:, 3 * H:4 * H])
        c = f * c + i * gg
        h = o * jnp.tanh(c)
        outs[t] = h
    return jnp.stack(outs, axis=0)


def encoder_reference(params, x_btd, noise):
    x = jnp.transpose(x_btd, (1, 0, 2))
    for layer in ("lstm1", "lstm2"):
        p = params[layer]
        fwd = _ref_lstm_dir(x, p["fw"]["w_ih_t"], p["fw"]["w_hh_t"], p["fw"]["b"], False)
        bwd = _ref_lstm_dir(x, p["bw"]["w_ih_t"], p["bw"]["w_hh_t"], p["bw"]["b"], True)
        x = jnp.concatenate([fwd, bwd], axis=-1)
    h_last = x[-1]
    mu = h_last @ params["mu"]["w_t"] + params["mu"]["b"]
    s_pre = h_last @ params["sigma"]["w_t"] + params["sigma"]["b"]
    sigma = jnp.where(s_pre > 20.0, s_pre,
                      jnp.log1p(jnp.exp(jnp.minimum(s_pre, 20.0)))) + EPSILON
    return mu + sigma * noise, mu, sigma


# -----------------------------------------------------------------------------
# Deterministic parameter initialization (shapes match the PyTorch module)
# -----------------------------------------------------------------------------
def init_params(key, enc_in_dim, layer_size, latent_dim):
    H = layer_size

    def lstm_dir_params(k, d_in):
        k1, k2, k3, k4 = jax.random.split(k, 4)
        return dict(
            w_ih_t=0.1 * jax.random.normal(k1, (d_in, 4 * H), jnp.float32),
            w_hh_t=0.1 * jax.random.normal(k2, (H, 4 * H), jnp.float32),
            b=0.1 * (jax.random.normal(k3, (1, 4 * H), jnp.float32)
                     + jax.random.normal(k4, (1, 4 * H), jnp.float32)),
        )

    def linear_params(k, d_in, d_out):
        k1, k2 = jax.random.split(k)
        return dict(
            w_t=0.1 * jax.random.normal(k1, (d_in, d_out), jnp.float32),
            b=0.1 * jax.random.normal(k2, (1, d_out), jnp.float32),
        )

    keys = jax.random.split(key, 6)
    return {
        "lstm1": {"fw": lstm_dir_params(keys[0], enc_in_dim),
                  "bw": lstm_dir_params(keys[1], enc_in_dim)},
        "lstm2": {"fw": lstm_dir_params(keys[2], 2 * H),
                  "bw": lstm_dir_params(keys[3], 2 * H)},
        "mu": linear_params(keys[4], 2 * H, latent_dim),
        "sigma": linear_params(keys[5], 2 * H, latent_dim),
    }


if __name__ == "__main__":
    B, T = 2, 8
    ENC_IN, LAYER_SIZE, LATENT = 16, 32, 16

    key = jax.random.PRNGKey(0)
    k_par, k_x, k_noise = jax.random.split(key, 3)

    params = init_params(k_par, ENC_IN, LAYER_SIZE, LATENT)
    x = jax.random.normal(k_x, (B, T, ENC_IN), jnp.float32)
    noise = jax.random.normal(k_noise, (B, LATENT), jnp.float32)  # randn_like

    # Weight padding/fusion/bf16-cast done once, outside the per-call jit path.
    weights = jax.tree_util.tree_map(jax.block_until_ready,
                                     prepare_params(params))

    fwd = jax.jit(encoder_forward)
    z, mu, sigma = fwd(weights, x, noise)
    jax.block_until_ready((z, mu, sigma))

    assert z.shape == (B, LATENT) and mu.shape == (B, LATENT) and sigma.shape == (B, LATENT)
    assert bool(jnp.all(sigma > 0.0))

    # Numerical sanity vs pure-JAX f32 reference (tolerance covers bf16 matmul
    # operands compounding through the T-step recurrence).
    z_r, mu_r, sg_r = encoder_reference(params, x, noise)
    assert bool(jnp.allclose(mu, mu_r, atol=5e-2, rtol=5e-2)), "mu mismatch"
    assert bool(jnp.allclose(sigma, sg_r, atol=5e-2, rtol=5e-2)), "sigma mismatch"
    assert bool(jnp.allclose(z, z_r, atol=5e-2, rtol=5e-2)), "z mismatch"

    print("KERNEL_OK")
</pallas_src>

<mosaic_0001>
module attributes {stable_mosaic.version = 11 : i64} {
  func.func @_encoder_kernel(%arg0: memref<16x32xbf16, #tpu.memory_space<vmem>>, %arg1: memref<32x1024xbf16, #tpu.memory_space<vmem>>, %arg2: memref<1x1024xf32, #tpu.memory_space<vmem>>, %arg3: memref<256x1024xbf16, #tpu.memory_space<vmem>>, %arg4: memref<128x512xbf16, #tpu.memory_space<vmem>>, %arg5: memref<128x512xbf16, #tpu.memory_space<vmem>>, %arg6: memref<1x512xf32, #tpu.memory_space<vmem>>, %arg7: memref<128x512xbf16, #tpu.memory_space<vmem>>, %arg8: memref<128x512xbf16, #tpu.memory_space<vmem>>, %arg9: memref<128x512xbf16, #tpu.memory_space<vmem>>, %arg10: memref<1x512xf32, #tpu.memory_space<vmem>>, %arg11: memref<128x32xbf16, #tpu.memory_space<vmem>>, %arg12: memref<128x32xbf16, #tpu.memory_space<vmem>>, %arg13: memref<1x32xf32, #tpu.memory_space<vmem>>, %arg14: memref<2x16xf32, #tpu.memory_space<vmem>>, %arg15: memref<2x48xf32, #tpu.memory_space<vmem>>, %arg16: memref<16x1024xf32, #tpu.memory_space<vmem>>, %arg17: memref<16x512xf32, #tpu.memory_space<vmem>>) attributes {dimension_semantics = [], scalar_prefetch = 0 : i64, scratch_operands = 2 : i64, tpu.core_type = #tpu.core_type<tc>} {
    %c0 = arith.constant 0 : index
    %c0_0 = arith.constant 0 : index
    %0 = vector.load %arg0[%c0, %c0_0] : memref<16x32xbf16, #tpu.memory_space<vmem>>, vector<16x32xbf16>
    %c0_1 = arith.constant 0 : index
    %c0_2 = arith.constant 0 : index
    %1 = vector.load %arg1[%c0_1, %c0_2] : memref<32x1024xbf16, #tpu.memory_space<vmem>>, vector<32x1024xbf16>
    %cst = arith.constant dense<0.000000e+00> : vector<16x1024xf32>
    %2 = tpu.matmul %0, %1, %cst {dimension_numbers = #tpu.dot_dimension_numbers<[1], [0], [0], [1], [0, 0, 1, 1], [], []>} : vector<16x32xbf16>, vector<32x1024xbf16>, vector<16x1024xf32> -> vector<16x1024xf32>
    %c0_3 = arith.constant 0 : index
    %c0_4 = arith.constant 0 : index
    %3 = vector.load %arg2[%c0_3, %c0_4] : memref<1x1024xf32, #tpu.memory_space<vmem>>, vector<1x1024xf32>
    %4 = vector.broadcast %3 : vector<1x1024xf32> to vector<16x1024xf32>
    %5 = arith.addf %2, %4 : vector<16x1024xf32>
    %c0_5 = arith.constant 0 : index
    %c0_6 = arith.constant 0 : index
    %6 = vector.load %arg16[%c0_5, %c0_6] : memref<16x1024xf32, #tpu.memory_space<vmem>>, vector<16x1024xf32>
    tpu.vector_store %arg16[%c0_5, %c0_6], %5 {strides = array<i32>} : memref<16x1024xf32, #tpu.memory_space<vmem>>, vector<16x1024xf32>,
    %c0_7 = arith.constant 0 : index
    %c0_8 = arith.constant 0 : index
    %7 = vector.load %arg6[%c0_7, %c0_8] : memref<1x512xf32, #tpu.memory_space<vmem>>, vector<1x512xf32>
    %8 = vector.shape_cast %7 : vector<1x512xf32> to vector<1x512xf32>
    %9 = vector.broadcast %8 : vector<1x512xf32> to vector<16x512xf32>
    %c0_9 = arith.constant 0 : index
    %c0_10 = arith.constant 0 : index
    %10 = vector.load %arg17[%c0_9, %c0_10] : memref<16x512xf32, #tpu.memory_space<vmem>>, vector<16x512xf32>
    tpu.vector_store %arg17[%c0_9, %c0_10], %9 {strides = array<i32>} : memref<16x512xf32, #tpu.memory_space<vmem>>, vector<16x512xf32>,
    %c0_11 = arith.constant 0 : index
    %c0_12 = arith.constant 0 : index
    %11 = vector.load %arg3[%c0_11, %c0_12] : memref<256x1024xbf16, #tpu.memory_space<vmem>>, vector<256x1024xbf16>
    %c0_13 = arith.constant 0 : index
    %c0_14 = arith.constant 0 : index
    %12 = vector.load %arg4[%c0_13, %c0_14] : memref<128x512xbf16, #tpu.memory_space<vmem>>, vector<128x512xbf16>
    %c0_15 = arith.constant 0 : index
    %c0_16 = arith.constant 0 : index
    %13 = vector.load %arg5[%c0_15, %c0_16] : memref<128x512xbf16, #tpu.memory_space<vmem>>, vector<128x512xbf16>
    %cst_17 = arith.constant 0.000000e+00 : f32
    %14 = vector.broadcast %cst_17 : f32 to vector<2x256xf32>
    %cst_18 = arith.constant 0.000000e+00 : f32
    %15 = vector.broadcast %cst_18 : f32 to vector<2x256xf32>
    %c0_19 = arith.constant 0 : index
    %c0_20 = arith.constant 0 : index
    %16 = vector.load %arg16[%c0_19, %c0_20] : memref<16x1024xf32, #tpu.memory_space<vmem>>, vector<2x1024xf32>
    %17 = arith.truncf %14 : vector<2x256xf32> to vector<2x256xbf16>
    %cst_21 = arith.constant dense<0.000000e+00> : vector<2x1024xf32>
    %18 = tpu.matmul %17, %11, %cst_21 {dimension_numbers = #tpu.dot_dimension_numbers<[1], [0], [0], [1], [0, 0, 1, 1], [], []>} : vector<2x256xbf16>, vector<256x1024xbf16>, vector<2x1024xf32> -> vector<2x1024xf32>
    %19 = arith.addf %16, %18 : vector<2x1024xf32>
    %20 = vector.extract_strided_slice %19 {offsets = [0, 0], sizes = [2, 256], strides = [1, 1]} : vector<2x1024xf32> to vector<2x256xf32>
    %cst_22 = arith.constant 5.000000e-01 : f32
    %21 = vector.broadcast %cst_22 : f32 to vector<2x256xf32>
    %22 = arith.mulf %21, %20 : vector<2x256xf32>
    %23 = math.tanh %22 : vector<2x256xf32>
    %cst_23 = arith.constant 5.000000e-01 : f32
    %24 = vector.broadcast %cst_23 : f32 to vector<2x256xf32>
    %25 = arith.mulf %24, %23 : vector<2x256xf32>
    %cst_24 = arith.constant 5.000000e-01 : f32
    %26 = vector.broadcast %cst_24 : f32 to vector<2x256xf32>
    %27 = arith.addf %25, %26 : vector<2x256xf32>
    %28 = vector.extract_strided_slice %19 {offsets = [0, 256], sizes = [2, 256], strides = [1, 1]} : vector<2x1024xf32> to vector<2x256xf32>
    %cst_25 = arith.constant 5.000000e-01 : f32
    %29 = vector.broadcast %cst_25 : f32 to vector<2x256xf32>
    %30 = arith.mulf %29, %28 : vector<2x256xf32>
    %31 = math.tanh %30 : vector<2x256xf32>
    %cst_26 = arith.constant 5.000000e-01 : f32
    %32 = vector.broadcast %cst_26 : f32 to vector<2x256xf32>
    %33 = arith.mulf %32, %31 : vector<2x256xf32>
    %cst_27 = arith.constant 5.000000e-01 : f32
    %34 = vector.broadcast %cst_27 : f32 to vector<2x256xf32>
    %35 = arith.addf %33, %34 : vector<2x256xf32>
    %36 = vector.extract_strided_slice %19 {offsets = [0, 512], sizes = [2, 256], strides = [1, 1]} : vector<2x1024xf32> to vector<2x256xf32>
    %37 = math.tanh %36 : vector<2x256xf32>
    %38 = vector.extract_strided_slice %19 {offsets = [0, 768], sizes = [2, 256], strides = [1, 1]} : vector<2x1024xf32> to vector<2x256xf32>
    %cst_28 = arith.constant 5.000000e-01 : f32
    %39 = vector.broadcast %cst_28 : f32 to vector<2x256xf32>
    %40 = arith.mulf %39, %38 : vector<2x256xf32>
    %41 = math.tanh %40 : vector<2x256xf32>
    %cst_29 = arith.constant 5.000000e-01 : f32
    %42 = vector.broadcast %cst_29 : f32 to vector<2x256xf32>
    %43 = arith.mulf %42, %41 : vector<2x256xf32>
    %cst_30 = arith.constant 5.000000e-01 : f32
    %44 = vector.broadcast %cst_30 : f32 to vector<2x256xf32>
    %45 = arith.addf %43, %44 : vector<2x256xf32>
    %46 = arith.mulf %35, %15 : vector<2x256xf32>
    %47 = arith.mulf %27, %37 : vector<2x256xf32>
    %48 = arith.addf %46, %47 : vector<2x256xf32>
    %49 = math.tanh %48 : vector<2x256xf32>
    %50 = arith.mulf %45, %49 : vector<2x256xf32>
    %51 = vector.extract_strided_slice %50 {offsets = [0, 0], sizes = [2, 128], strides = [1, 1]} : vector<2x256xf32> to vector<2x128xf32>
    %52 = arith.truncf %51 : vector<2x128xf32> to vector<2x128xbf16>
    %53 = vector.extract_strided_slice %50 {offsets = [0, 128], sizes = [2, 128], strides = [1, 1]} : vector<2x256xf32> to vector<2x128xf32>
    %54 = arith.truncf %53 : vector<2x128xf32> to vector<2x128xbf16>
    %c0_31 = arith.constant 0 : index
    %c0_32 = arith.constant 0 : index
    %55 = vector.load %arg17[%c0_31, %c0_32] : memref<16x512xf32, #tpu.memory_space<vmem>>, vector<2x512xf32>
    %cst_33 = arith.constant dense<0.000000e+00> : vector<2x512xf32>
    %56 = tpu.matmul %52, %12, %cst_33 {dimension_numbers = #tpu.dot_dimension_numbers<[1], [0], [0], [1], [0, 0, 1, 1], [], []>} : vector<2x128xbf16>, vector<128x512xbf16>, vector<2x512xf32> -> vector<2x512xf32>
    %57 = arith.addf %55, %56 : vector<2x512xf32>
    %c0_34 = arith.constant 0 : index
    %c0_35 = arith.constant 0 : index
    %58 = vector.load %arg17[%c0_34, %c0_35] : memref<16x512xf32, #tpu.memory_space<vmem>>, vector<2x512xf32>
    tpu.vector_store %arg17[%c0_34, %c0_35], %57 {strides = array<i32>} : memref<16x512xf32, #tpu.memory_space<vmem>>, vector<2x512xf32>,
    %c14 = arith.constant 14 : index
    %c0_36 = arith.constant 0 : index
    %59 = vector.load %arg17[%c14, %c0_36] : memref<16x512xf32, #tpu.memory_space<vmem>>, vector<2x512xf32>
    %cst_37 = arith.constant dense<0.000000e+00> : vector<2x512xf32>
    %60 = tpu.matmul %54, %13, %cst_37 {dimension_numbers = #tpu.dot_dimension_numbers<[1], [0], [0], [1], [0, 0, 1, 1], [], []>} : vector<2x128xbf16>, vector<128x512xbf16>, vector<2x512xf32> -> vector<2x512xf32>
    %61 = arith.addf %59, %60 : vector<2x512xf32>
    %c14_38 = arith.constant 14 : index
    %c0_39 = arith.constant 0 : index
    %62 = vector.load %arg17[%c14_38, %c0_39] : memref<16x512xf32, #tpu.memory_space<vmem>>, vector<2x512xf32>
    tpu.vector_store %arg17[%c14_38, %c0_39], %61 {strides = array<i32>} : memref<16x512xf32, #tpu.memory_space<vmem>>, vector<2x512xf32>,
    %c2 = arith.constant 2 : index
    %c0_40 = arith.constant 0 : index
    %63 = vector.load %arg16[%c2, %c0_40] : memref<16x1024xf32, #tpu.memory_space<vmem>>, vector<2x1024xf32>
    %64 = arith.truncf %50 : vector<2x256xf32> to vector<2x256xbf16>
    %cst_41 = arith.constant dense<0.000000e+00> : vector<2x1024xf32>
    %65 = tpu.matmul %64, %11, %cst_41 {dimension_numbers = #tpu.dot_dimension_numbers<[1], [0], [0], [1], [0, 0, 1, 1], [], []>} : vector<2x256xbf16>, vector<256x1024xbf16>, vector<2x1024xf32> -> vector<2x1024xf32>
    %66 = arith.addf %63, %65 : vector<2x1024xf32>
    %67 = vector.extract_strided_slice %66 {offsets = [0, 0], sizes = [2, 256], strides = [1, 1]} : vector<2x1024xf32> to vector<2x256xf32>
    %cst_42 = arith.constant 5.000000e-01 : f32
    %68 = vector.broadcast %cst_42 : f32 to vector<2x256xf32>
    %69 = arith.mulf %68, %67 : vector<2x256xf32>
    %70 = math.tanh %69 : vector<2x256xf32>
    %cst_43 = arith.constant 5.000000e-01 : f32
    %71 = vector.broadcast %cst_43 : f32 to vector<2x256xf32>
    %72 = arith.mulf %71, %70 : vector<2x256xf32>
    %cst_44 = arith.constant 5.000000e-01 : f32
    %73 = vector.broadcast %cst_44 : f32 to vector<2x256xf32>
    %74 = arith.addf %72, %73 : vector<2x256xf32>
    %75 = vector.extract_strided_slice %66 {offsets = [0, 256], sizes = [2, 256], strides = [1, 1]} : vector<2x1024xf32> to vector<2x256xf32>
    %cst_45 = arith.constant 5.000000e-01 : f32
    %76 = vector.broadcast %cst_45 : f32 to vector<2x256xf32>
    %77 = arith.mulf %76, %75 : vector<2x256xf32>
    %78 = math.tanh %77 : vector<2x256xf32>
    %cst_46 = arith.constant 5.000000e-01 : f32
    %79 = vector.broadcast %cst_46 : f32 to vector<2x256xf32>
    %80 = arith.mulf %79, %78 : vector<2x256xf32>
    %cst_47 = arith.constant 5.000000e-01 : f32
    %81 = vector.broadcast %cst_47 : f32 to vector<2x256xf32>
    %82 = arith.addf %80, %81 : vector<2x256xf32>
    %83 = vector.extract_strided_slice %66 {offsets = [0, 512], sizes = [2, 256], strides = [1, 1]} : vector<2x1024xf32> to vector<2x256xf32>
    %84 = math.tanh %83 : vector<2x256xf32>
    %85 = vector.extract_strided_slice %66 {offsets = [0, 768], sizes = [2, 256], strides = [1, 1]} : vector<2x1024xf32> to vector<2x256xf32>
    %cst_48 = arith.constant 5.000000e-01 : f32
    %86 = vector.broadcast %cst_48 : f32 to vector<2x256xf32>
    %87 = arith.mulf %86, %85 : vector<2x256xf32>
    %88 = math.tanh %87 : vector<2x256xf32>
    %cst_49 = arith.constant 5.000000e-01 : f32
    %89 = vector.broadcast %cst_49 : f32 to vector<2x256xf32>
    %90 = arith.mulf %89, %88 : vector<2x256xf32>
    %cst_50 = arith.constant 5.000000e-01 : f32
    %91 = vector.broadcast %cst_50 : f32 to vector<2x256xf32>
    %92 = arith.addf %90, %91 : vector<2x256xf32>
    %93 = arith.mulf %82, %48 : vector<2x256xf32>
    %94 = arith.mulf %74, %84 : vector<2x256xf32>
    %95 = arith.addf %93, %94 : vector<2x256xf32>
    %96 = math.tanh %95 : vector<2x256xf32>
    %97 = arith.mulf %92, %96 : vector<2x256xf32>
    %98 = vector.extract_strided_slice %97 {offsets = [0, 0], sizes = [2, 128], strides = [1, 1]} : vector<2x256xf32> to vector<2x128xf32>
    %99 = arith.truncf %98 : vector<2x128xf32> to vector<2x128xbf16>
    %100 = vector.extract_strided_slice %97 {offsets = [0, 128], sizes = [2, 128], strides = [1, 1]} : vector<2x256xf32> to vector<2x128xf32>
    %101 = arith.truncf %100 : vector<2x128xf32> to vector<2x128xbf16>
    %c2_51 = arith.constant 2 : index
    %c0_52 = arith.constant 0 : index
    %102 = vector.load %arg17[%c2_51, %c0_52] : memref<16x512xf32, #tpu.memory_space<vmem>>, vector<2x512xf32>
    %cst_53 = arith.constant dense<0.000000e+00> : vector<2x512xf32>
    %103 = tpu.matmul %99, %12, %cst_53 {dimension_numbers = #tpu.dot_dimension_numbers<[1], [0], [0], [1], [0, 0, 1, 1], [], []>} : vector<2x128xbf16>, vector<128x512xbf16>, vector<2x512xf32> -> vector<2x512xf32>
    %104 = arith.addf %102, %103 : vector<2x512xf32>
    %c2_54 = arith.constant 2 : index
    %c0_55 = arith.constant 0 : index
    %105 = vector.load %arg17[%c2_54, %c0_55] : memref<16x512xf32, #tpu.memory_space<vmem>>, vector<2x512xf32>
    tpu.vector_store %arg17[%c2_54, %c0_55], %104 {strides = array<i32>} : memref<16x512xf32, #tpu.memory_space<vmem>>, vector<2x512xf32>,
    %c12 = arith.constant 12 : index
    %c0_56 = arith.constant 0 : index
    %106 = vector.load %arg17[%c12, %c0_56] : memref<16x512xf32, #tpu.memory_space<vmem>>, vector<2x512xf32>
    %cst_57 = arith.constant dense<0.000000e+00> : vector<2x512xf32>
    %107 = tpu.matmul %101, %13, %cst_57 {dimension_numbers = #tpu.dot_dimension_numbers<[1], [0], [0], [1], [0, 0, 1, 1], [], []>} : vector<2x128xbf16>, vector<128x512xbf16>, vector<2x512xf32> -> vector<2x512xf32>
    %108 = arith.addf %106, %107 : vector<2x512xf32>
    %c12_58 = arith.constant 12 : index
    %c0_59 = arith.constant 0 : index
    %109 = vector.load %arg17[%c12_58, %c0_59] : memref<16x512xf32, #tpu.memory_space<vmem>>, vector<2x512xf32>
    tpu.vector_store %arg17[%c12_58, %c0_59], %108 {strides = array<i32>} : memref<16x512xf32, #tpu.memory_space<vmem>>, vector<2x512xf32>,
    %c4 = arith.constant 4 : index
    %c0_60 = arith.constant 0 : index
    %110 = vector.load %arg16[%c4, %c0_60] : memref<16x1024xf32, #tpu.memory_space<vmem>>, vector<2x1024xf32>
    %111 = arith.truncf %97 : vector<2x256xf32> to vector<2x256xbf16>
    %cst_61 = arith.constant dense<0.000000e+00> : vector<2x1024xf32>
    %112 = tpu.matmul %111, %11, %cst_61 {dimension_numbers = #tpu.dot_dimension_numbers<[1], [0], [0], [1], [0, 0, 1, 1], [], []>} : vector<2x256xbf16>, vector<256x1024xbf16>, vector<2x1024xf32> -> vector<2x1024xf32>
    %113 = arith.addf %110, %112 : vector<2x1024xf32>
    %114 = vector.extract_strided_slice %113 {offsets = [0, 0], sizes = [2, 256], strides = [1, 1]} : vector<2x1024xf32> to vector<2x256xf32>
    %cst_62 = arith.constant 5.000000e-01 : f32
    %115 = vector.broadcast %cst_62 : f32 to vector<2x256xf32>
    %116 = arith.mulf %115, %114 : vector<2x256xf32>
    %117 = math.tanh %116 : vector<2x256xf32>
    %cst_63 = arith.constant 5.000000e-01 : f32
    %118 = vector.broadcast %cst_63 : f32 to vector<2x256xf32>
    %119 = arith.mulf %118, %117 : vector<2x256xf32>
    %cst_64 = arith.constant 5.000000e-01 : f32
    %120 = vector.broadcast %cst_64 : f32 to vector<2x256xf32>
    %121 = arith.addf %119, %120 : vector<2x256xf32>
    %122 = vector.extract_strided_slice %113 {offsets = [0, 256], sizes = [2, 256], strides = [1, 1]} : vector<2x1024xf32> to vector<2x256xf32>
    %cst_65 = arith.constant 5.000000e-01 : f32
    %123 = vector.broadcast %cst_65 : f32 to vector<2x256xf32>
    %124 = arith.mulf %123, %122 : vector<2x256xf32>
    %125 = math.tanh %124 : vector<2x256xf32>
    %cst_66 = arith.constant 5.000000e-01 : f32
    %126 = vector.broadcast %cst_66 : f32 to vector<2x256xf32>
    %127 = arith.mulf %126, %125 : vector<2x256xf32>
    %cst_67 = arith.constant 5.000000e-01 : f32
    %128 = vector.broadcast %cst_67 : f32 to vector<2x256xf32>
    %129 = arith.addf %127, %128 : vector<2x256xf32>
    %130 = vector.extract_strided_slice %113 {offsets = [0, 512], sizes = [2, 256], strides = [1, 1]} : vector<2x1024xf32> to vector<2x256xf32>
    %131 = math.tanh %130 : vector<2x256xf32>
    %132 = vector.extract_strided_slice %113 {offsets = [0, 768], sizes = [2, 256], strides = [1, 1]} : vector<2x1024xf32> to vector<2x256xf32>
    %cst_68 = arith.constant 5.000000e-01 : f32
    %133 = vector.broadcast %cst_68 : f32 to vector<2x256xf32>
    %134 = arith.mulf %133, %132 : vector<2x256xf32>
    %135 = math.tanh %134 : vector<2x256xf32>
    %cst_69 = arith.constant 5.000000e-01 : f32
    %136 = vector.broadcast %cst_69 : f32 to vector<2x256xf32>
    %137 = arith.mulf %136, %135 : vector<2x256xf32>
    %cst_70 = arith.constant 5.000000e-01 : f32
    %138 = vector.broadcast %cst_70 : f32 to vector<2x256xf32>
    %139 = arith.addf %137, %138 : vector<2x256xf32>
    %140 = arith.mulf %129, %95 : vector<2x256xf32>
    %141 = arith.mulf %121, %131 : vector<2x256xf32>
    %142 = arith.addf %140, %141 : vector<2x256xf32>
    %143 = math.tanh %142 : vector<2x256xf32>
    %144 = arith.mulf %139, %143 : vector<2x256xf32>
    %145 = vector.extract_strided_slice %144 {offsets = [0, 0], sizes = [2, 128], strides = [1, 1]} : vector<2x256xf32> to vector<2x128xf32>
    %146 = arith.truncf %145 : vector<2x128xf32> to vector<2x128xbf16>
    %147 = vector.extract_strided_slice %144 {offsets = [0, 128], sizes = [2, 128], strides = [1, 1]} : vector<2x256xf32> to vector<2x128xf32>
    %148 = arith.truncf %147 : vector<2x128xf32> to vector<2x128xbf16>
    %c4_71 = arith.constant 4 : index
    %c0_72 = arith.constant 0 : index
    %149 = vector.load %arg17[%c4_71, %c0_72] : memref<16x512xf32, #tpu.memory_space<vmem>>, vector<2x512xf32>
    %cst_73 = arith.constant dense<0.000000e+00> : vector<2x512xf32>
    %150 = tpu.matmul %146, %12, %cst_73 {dimension_numbers = #tpu.dot_dimension_numbers<[1], [0], [0], [1], [0, 0, 1, 1], [], []>} : vector<2x128xbf16>, vector<128x512xbf16>, vector<2x512xf32> -> vector<2x512xf32>
    %151 = arith.addf %149, %150 : vector<2x512xf32>
    %c4_74 = arith.constant 4 : index
    %c0_75 = arith.constant 0 : index
    %152 = vector.load %arg17[%c4_74, %c0_75] : memref<16x512xf32, #tpu.memory_space<vmem>>, vector<2x512xf32>
    tpu.vector_store %arg17[%c4_74, %c0_75], %151 {strides = array<i32>} : memref<16x512xf32, #tpu.memory_space<vmem>>, vector<2x512xf32>,
    %c10 = arith.constant 10 : index
    %c0_76 = arith.constant 0 : index
    %153 = vector.load %arg17[%c10, %c0_76] : memref<16x512xf32, #tpu.memory_space<vmem>>, vector<2x512xf32>
    %cst_77 = arith.constant dense<0.000000e+00> : vector<2x512xf32>
    %154 = tpu.matmul %148, %13, %cst_77 {dimension_numbers = #tpu.dot_dimension_numbers<[1], [0], [0], [1], [0, 0, 1, 1], [], []>} : vector<2x128xbf16>, vector<128x512xbf16>, vector<2x512xf32> -> vector<2x512xf32>
    %155 = arith.addf %153, %154 : vector<2x512xf32>
    %c10_78 = arith.constant 10 : index
    %c0_79 = arith.constant 0 : index
    %156 = vector.load %arg17[%c10_78, %c0_79] : memref<16x512xf32, #tpu.memory_space<vmem>>, vector<2x512xf32>
    tpu.vector_store %arg17[%c10_78, %c0_79], %155 {strides = array<i32>} : memref<16x512xf32, #tpu.memory_space<vmem>>, vector<2x512xf32>,
    %c6 = arith.constant 6 : index
    %c0_80 = arith.constant 0 : index
    %157 = vector.load %arg16[%c6, %c0_80] : memref<16x1024xf32, #tpu.memory_space<vmem>>, vector<2x1024xf32>
    %158 = arith.truncf %144 : vector<2x256xf32> to vector<2x256xbf16>
    %cst_81 = arith.constant dense<0.000000e+00> : vector<2x1024xf32>
    %159 = tpu.matmul %158, %11, %cst_81 {dimension_numbers = #tpu.dot_dimension_numbers<[1], [0], [0], [1], [0, 0, 1, 1], [], []>} : vector<2x256xbf16>, vector<256x1024xbf16>, vector<2x1024xf32> -> vector<2x1024xf32>
    %160 = arith.addf %157, %159 : vector<2x1024xf32>
    %161 = vector.extract_strided_slice %160 {offsets = [0, 0], sizes = [2, 256], strides = [1, 1]} : vector<2x1024xf32> to vector<2x256xf32>
    %cst_82 = arith.constant 5.000000e-01 : f32
    %162 = vector.broadcast %cst_82 : f32 to vector<2x256xf32>
    %163 = arith.mulf %162, %161 : vector<2x256xf32>
    %164 = math.tanh %163 : vector<2x256xf32>
    %cst_83 = arith.constant 5.000000e-01 : f32
    %165 = vector.broadcast %cst_83 : f32 to vector<2x256xf32>
    %166 = arith.mulf %165, %164 : vector<2x256xf32>
    %cst_84 = arith.constant 5.000000e-01 : f32
    %167 = vector.broadcast %cst_84 : f32 to vector<2x256xf32>
    %168 = arith.addf %166, %167 : vector<2x256xf32>
    %169 = vector.extract_strided_slice %160 {offsets = [0, 256], sizes = [2, 256], strides = [1, 1]} : vector<2x1024xf32> to vector<2x256xf32>
    %cst_85 = arith.constant 5.000000e-01 : f32
    %170 = vector.broadcast %cst_85 : f32 to vector<2x256xf32>
    %171 = arith.mulf %170, %169 : vector<2x256xf32>
    %172 = math.tanh %171 : vector<2x256xf32>
    %cst_86 = arith.constant 5.000000e-01 : f32
    %173 = vector.broadcast %cst_86 : f32 to vector<2x256xf32>
    %174 = arith.mulf %173, %172 : vector<2x256xf32>
    %cst_87 = arith.constant 5.000000e-01 : f32
    %175 = vector.broadcast %cst_87 : f32 to vector<2x256xf32>
    %176 = arith.addf %174, %175 : vector<2x256xf32>
    %177 = vector.extract_strided_slice %160 {offsets = [0, 512], sizes = [2, 256], strides = [1, 1]} : vector<2x1024xf32> to vector<2x256xf32>
    %178 = math.tanh %177 : vector<2x256xf32>
    %179 = vector.extract_strided_slice %160 {offsets = [0, 768], sizes = [2, 256], strides = [1, 1]} : vector<2x1024xf32> to vector<2x256xf32>
    %cst_88 = arith.constant 5.000000e-01 : f32
    %180 = vector.broadcast %cst_88 : f32 to vector<2x256xf32>
    %181 = arith.mulf %180, %179 : vector<2x256xf32>
    %182 = math.tanh %181 : vector<2x256xf32>
    %cst_89 = arith.constant 5.000000e-01 : f32
    %183 = vector.broadcast %cst_89 : f32 to vector<2x256xf32>
    %184 = arith.mulf %183, %182 : vector<2x256xf32>
    %cst_90 = arith.constant 5.000000e-01 : f32
    %185 = vector.broadcast %cst_90 : f32 to vector<2x256xf32>
    %186 = arith.addf %184, %185 : vector<2x256xf32>
    %187 = arith.mulf %176, %142 : vector<2x256xf32>
    %188 = arith.mulf %168, %178 : vector<2x256xf32>
    %189 = arith.addf %187, %188 : vector<2x256xf32>
    %190 = math.tanh %189 : vector<2x256xf32>
    %191 = arith.mulf %186, %190 : vector<2x256xf32>
    %192 = vector.extract_strided_slice %191 {offsets = [0, 0], sizes = [2, 128], strides = [1, 1]} : vector<2x256xf32> to vector<2x128xf32>
    %193 = arith.truncf %192 : vector<2x128xf32> to vector<2x128xbf16>
    %194 = vector.extract_strided_slice %191 {offsets = [0, 128], sizes = [2, 128], strides = [1, 1]} : vector<2x256xf32> to vector<2x128xf32>
    %195 = arith.truncf %194 : vector<2x128xf32> to vector<2x128xbf16>
    %c6_91 = arith.constant 6 : index
    %c0_92 = arith.constant 0 : index
    %196 = vector.load %arg17[%c6_91, %c0_92] : memref<16x512xf32, #tpu.memory_space<vmem>>, vector<2x512xf32>
    %cst_93 = arith.constant dense<0.000000e+00> : vector<2x512xf32>
    %197 = tpu.matmul %193, %12, %cst_93 {dimension_numbers = #tpu.dot_dimension_numbers<[1], [0], [0], [1], [0, 0, 1, 1], [], []>} : vector<2x128xbf16>, vector<128x512xbf16>, vector<2x512xf32> -> vector<2x512xf32>
    %198 = arith.addf %196, %197 : vector<2x512xf32>
    %c6_94 = arith.constant 6 : index
    %c0_95 = arith.constant 0 : index
    %199 = vector.load %arg17[%c6_94, %c0_95] : memref<16x512xf32, #tpu.memory_space<vmem>>, vector<2x512xf32>
    tpu.vector_store %arg17[%c6_94, %c0_95], %198 {strides = array<i32>} : memref<16x512xf32, #tpu.memory_space<vmem>>, vector<2x512xf32>,
    %c8 = arith.constant 8 : index
    %c0_96 = arith.constant 0 : index
    %200 = vector.load %arg17[%c8, %c0_96] : memref<16x512xf32, #tpu.memory_space<vmem>>, vector<2x512xf32>
    %cst_97 = arith.constant dense<0.000000e+00> : vector<2x512xf32>
    %201 = tpu.matmul %195, %13, %cst_97 {dimension_numbers = #tpu.dot_dimension_numbers<[1], [0], [0], [1], [0, 0, 1, 1], [], []>} : vector<2x128xbf16>, vector<128x512xbf16>, vector<2x512xf32> -> vector<2x512xf32>
    %202 = arith.addf %200, %201 : vector<2x512xf32>
    %c8_98 = arith.constant 8 : index
    %c0_99 = arith.constant 0 : index
    %203 = vector.load %arg17[%c8_98, %c0_99] : memref<16x512xf32, #tpu.memory_space<vmem>>, vector<2x512xf32>
    tpu.vector_store %arg17[%c8_98, %c0_99], %202 {strides = array<i32>} : memref<16x512xf32, #tpu.memory_space<vmem>>, vector<2x512xf32>,
    %c8_100 = arith.constant 8 : index
    %c0_101 = arith.constant 0 : index
    %204 = vector.load %arg16[%c8_100, %c0_101] : memref<16x1024xf32, #tpu.memory_space<vmem>>, vector<2x1024xf32>
    %205 = arith.truncf %191 : vector<2x256xf32> to vector<2x256xbf16>
    %cst_102 = arith.constant dense<0.000000e+00> : vector<2x1024xf32>
    %206 = tpu.matmul %205, %11, %cst_102 {dimension_numbers = #tpu.dot_dimension_numbers<[1], [0], [0], [1], [0, 0, 1, 1], [], []>} : vector<2x256xbf16>, vector<256x1024xbf16>, vector<2x1024xf32> -> vector<2x1024xf32>
    %207 = arith.addf %204, %206 : vector<2x1024xf32>
    %208 = vector.extract_strided_slice %207 {offsets = [0, 0], sizes = [2, 256], strides = [1, 1]} : vector<2x1024xf32> to vector<2x256xf32>
    %cst_103 = arith.constant 5.000000e-01 : f32
    %209 = vector.broadcast %cst_103 : f32 to vector<2x256xf32>
    %210 = arith.mulf %209, %208 : vector<2x256xf32>
    %211 = math.tanh %210 : vector<2x256xf32>
    %cst_104 = arith.constant 5.000000e-01 : f32
    %212 = vector.broadcast %cst_104 : f32 to vector<2x256xf32>
    %213 = arith.mulf %212, %211 : vector<2x256xf32>
    %cst_105 = arith.constant 5.000000e-01 : f32
    %214 = vector.broadcast %cst_105 : f32 to vector<2x256xf32>
    %215 = arith.addf %213, %214 : vector<2x256xf32>
    %216 = vector.extract_strided_slice %207 {offsets = [0, 256], sizes = [2, 256], strides = [1, 1]} : vector<2x1024xf32> to vector<2x256xf32>
    %cst_106 = arith.constant 5.000000e-01 : f32
    %217 = vector.broadcast %cst_106 : f32 to vector<2x256xf32>
    %218 = arith.mulf %217, %216 : vector<2x256xf32>
    %219 = math.tanh %218 : vector<2x256xf32>
    %cst_107 = arith.constant 5.000000e-01 : f32
    %220 = vector.broadcast %cst_107 : f32 to vector<2x256xf32>
    %221 = arith.mulf %220, %219 : vector<2x256xf32>
    %cst_108 = arith.constant 5.000000e-01 : f32
    %222 = vector.broadcast %cst_108 : f32 to vector<2x256xf32>
    %223 = arith.addf %221, %222 : vector<2x256xf32>
    %224 = vector.extract_strided_slice %207 {offsets = [0, 512], sizes = [2, 256], strides = [1, 1]} : vector<2x1024xf32> to vector<2x256xf32>
    %225 = math.tanh %224 : vector<2x256xf32>
    %226 = vector.extract_strided_slice %207 {offsets = [0, 768], sizes = [2, 256], strides = [1, 1]} : vector<2x1024xf32> to vector<2x256xf32>
    %cst_109 = arith.constant 5.000000e-01 : f32
    %227 = vector.broadcast %cst_109 : f32 to vector<2x256xf32>
    %228 = arith.mulf %227, %226 : vector<2x256xf32>
    %229 = math.tanh %228 : vector<2x256xf32>
    %cst_110 = arith.constant 5.000000e-01 : f32
    %230 = vector.broadcast %cst_110 : f32 to vector<2x256xf32>
    %231 = arith.mulf %230, %229 : vector<2x256xf32>
    %cst_111 = arith.constant 5.000000e-01 : f32
    %232 = vector.broadcast %cst_111 : f32 to vector<2x256xf32>
    %233 = arith.addf %231, %232 : vector<2x256xf32>
    %234 = arith.mulf %223, %189 : vector<2x256xf32>
    %235 = arith.mulf %215, %225 : vector<2x256xf32>
    %236 = arith.addf %234, %235 : vector<2x256xf32>
    %237 = math.tanh %236 : vector<2x256xf32>
    %238 = arith.mulf %233, %237 : vector<2x256xf32>
    %239 = vector.extract_strided_slice %238 {offsets = [0, 0], sizes = [2, 128], strides = [1, 1]} : vector<2x256xf32> to vector<2x128xf32>
    %240 = arith.truncf %239 : vector<2x128xf32> to vector<2x128xbf16>
    %241 = vector.extract_strided_slice %238 {offsets = [0, 128], sizes = [2, 128], strides = [1, 1]} : vector<2x256xf32> to vector<2x128xf32>
    %242 = arith.truncf %241 : vector<2x128xf32> to vector<2x128xbf16>
    %c8_112 = arith.constant 8 : index
    %c0_113 = arith.constant 0 : index
    %243 = vector.load %arg17[%c8_112, %c0_113] : memref<16x512xf32, #tpu.memory_space<vmem>>, vector<2x512xf32>
    %cst_114 = arith.constant dense<0.000000e+00> : vector<2x512xf32>
    %244 = tpu.matmul %240, %12, %cst_114 {dimension_numbers = #tpu.dot_dimension_numbers<[1], [0], [0], [1], [0, 0, 1, 1], [], []>} : vector<2x128xbf16>, vector<128x512xbf16>, vector<2x512xf32> -> vector<2x512xf32>
    %245 = arith.addf %243, %244 : vector<2x512xf32>
    %c8_115 = arith.constant 8 : index
    %c0_116 = arith.constant 0 : index
    %246 = vector.load %arg17[%c8_115, %c0_116] : memref<16x512xf32, #tpu.memory_space<vmem>>, vector<2x512xf32>
    tpu.vector_store %arg17[%c8_115, %c0_116], %245 {strides = array<i32>} : memref<16x512xf32, #tpu.memory_space<vmem>>, vector<2x512xf32>,
    %c6_117 = arith.constant 6 : index
    %c0_118 = arith.constant 0 : index
    %247 = vector.load %arg17[%c6_117, %c0_118] : memref<16x512xf32, #tpu.memory_space<vmem>>, vector<2x512xf32>
    %cst_119 = arith.constant dense<0.000000e+00> : vector<2x512xf32>
    %248 = tpu.matmul %242, %13, %cst_119 {dimension_numbers = #tpu.dot_dimension_numbers<[1], [0], [0], [1], [0, 0, 1, 1], [], []>} : vector<2x128xbf16>, vector<128x512xbf16>, vector<2x512xf32> -> vector<2x512xf32>
    %249 = arith.addf %247, %248 : vector<2x512xf32>
    %c6_120 = arith.constant 6 : index
    %c0_121 = arith.constant 0 : index
    %250 = vector.load %arg17[%c6_120, %c0_121] : memref<16x512xf32, #tpu.memory_space<vmem>>, vector<2x512xf32>
    tpu.vector_store %arg17[%c6_120, %c0_121], %249 {strides = array<i32>} : memref<16x512xf32, #tpu.memory_space<vmem>>, vector<2x512xf32>,
    %c10_122 = arith.constant 10 : index
    %c0_123 = arith.constant 0 : index
    %251 = vector.load %arg16[%c10_122, %c0_123] : memref<16x1024xf32, #tpu.memory_space<vmem>>, vector<2x1024xf32>
    %252 = arith.truncf %238 : vector<2x256xf32> to vector<2x256xbf16>
    %cst_124 = arith.constant dense<0.000000e+00> : vector<2x1024xf32>
    %253 = tpu.matmul %252, %11, %cst_124 {dimension_numbers = #tpu.dot_dimension_numbers<[1], [0], [0], [1], [0, 0, 1, 1], [], []>} : vector<2x256xbf16>, vector<256x1024xbf16>, vector<2x1024xf32> -> vector<2x1024xf32>
    %254 = arith.addf %251, %253 : vector<2x1024xf32>
    %255 = vector.extract_strided_slice %254 {offsets = [0, 0], sizes = [2, 256], strides = [1, 1]} : vector<2x1024xf32> to vector<2x256xf32>
    %cst_125 = arith.constant 5.000000e-01 : f32
    %256 = vector.broadcast %cst_125 : f32 to vector<2x256xf32>
    %257 = arith.mulf %256, %255 : vector<2x256xf32>
    %258 = math.tanh %257 : vector<2x256xf32>
    %cst_126 = arith.constant 5.000000e-01 : f32
    %259 = vector.broadcast %cst_126 : f32 to vector<2x256xf32>
    %260 = arith.mulf %259, %258 : vector<2x256xf32>
    %cst_127 = arith.constant 5.000000e-01 : f32
    %261 = vector.broadcast %cst_127 : f32 to vector<2x256xf32>
    %262 = arith.addf %260, %261 : vector<2x256xf32>
    %263 = vector.extract_strided_slice %254 {offsets = [0, 256], sizes = [2, 256], strides = [1, 1]} : vector<2x1024xf32> to vector<2x256xf32>
    %cst_128 = arith.constant 5.000000e-01 : f32
    %264 = vector.broadcast %cst_128 : f32 to vector<2x256xf32>
    %265 = arith.mulf %264, %263 : vector<2x256xf32>
    %266 = math.tanh %265 : vector<2x256xf32>
    %cst_129 = arith.constant 5.000000e-01 : f32
    %267 = vector.broadcast %cst_129 : f32 to vector<2x256xf32>
    %268 = arith.mulf %267, %266 : vector<2x256xf32>
    %cst_130 = arith.constant 5.000000e-01 : f32
    %269 = vector.broadcast %cst_130 : f32 to vector<2x256xf32>
    %270 = arith.addf %268, %269 : vector<2x256xf32>
    %271 = vector.extract_strided_slice %254 {offsets = [0, 512], sizes = [2, 256], strides = [1, 1]} : vector<2x1024xf32> to vector<2x256xf32>
    %272 = math.tanh %271 : vector<2x256xf32>
    %273 = vector.extract_strided_slice %254 {offsets = [0, 768], sizes = [2, 256], strides = [1, 1]} : vector<2x1024xf32> to vector<2x256xf32>
    %cst_131 = arith.constant 5.000000e-01 : f32
    %274 = vector.broadcast %cst_131 : f32 to vector<2x256xf32>
    %275 = arith.mulf %274, %273 : vector<2x256xf32>
    %276 = math.tanh %275 : vector<2x256xf32>
    %cst_132 = arith.constant 5.000000e-01 : f32
    %277 = vector.broadcast %cst_132 : f32 to vector<2x256xf32>
    %278 = arith.mulf %277, %276 : vector<2x256xf32>
    %cst_133 = arith.constant 5.000000e-01 : f32
    %279 = vector.broadcast %cst_133 : f32 to vector<2x256xf32>
    %280 = arith.addf %278, %279 : vector<2x256xf32>
    %281 = arith.mulf %270, %236 : vector<2x256xf32>
    %282 = arith.mulf %262, %272 : vector<2x256xf32>
    %283 = arith.addf %281, %282 : vector<2x256xf32>
    %284 = math.tanh %283 : vector<2x256xf32>
    %285 = arith.mulf %280, %284 : vector<2x256xf32>
    %286 = vector.extract_strided_slice %285 {offsets = [0, 0], sizes = [2, 128], strides = [1, 1]} : vector<2x256xf32> to vector<2x128xf32>
    %287 = arith.truncf %286 : vector<2x128xf32> to vector<2x128xbf16>
    %288 = vector.extract_strided_slice %285 {offsets = [0, 128], sizes = [2, 128], strides = [1, 1]} : vector<2x256xf32> to vector<2x128xf32>
    %289 = arith.truncf %288 : vector<2x128xf32> to vector<2x128xbf16>
    %c10_134 = arith.constant 10 : index
    %c0_135 = arith.constant 0 : index
    %290 = vector.load %arg17[%c10_134, %c0_135] : memref<16x512xf32, #tpu.memory_space<vmem>>, vector<2x512xf32>
    %cst_136 = arith.constant dense<0.000000e+00> : vector<2x512xf32>
    %291 = tpu.matmul %287, %12, %cst_136 {dimension_numbers = #tpu.dot_dimension_numbers<[1], [0], [0], [1], [0, 0, 1, 1], [], []>} : vector<2x128xbf16>, vector<128x512xbf16>, vector<2x512xf32> -> vector<2x512xf32>
    %292 = arith.addf %290, %291 : vector<2x512xf32>
    %c10_137 = arith.constant 10 : index
    %c0_138 = arith.constant 0 : index
    %293 = vector.load %arg17[%c10_137, %c0_138] : memref<16x512xf32, #tpu.memory_space<vmem>>, vector<2x512xf32>
    tpu.vector_store %arg17[%c10_137, %c0_138], %292 {strides = array<i32>} : memref<16x512xf32, #tpu.memory_space<vmem>>, vector<2x512xf32>,
    %c4_139 = arith.constant 4 : index
    %c0_140 = arith.constant 0 : index
    %294 = vector.load %arg17[%c4_139, %c0_140] : memref<16x512xf32, #tpu.memory_space<vmem>>, vector<2x512xf32>
    %cst_141 = arith.constant dense<0.000000e+00> : vector<2x512xf32>
    %295 = tpu.matmul %289, %13, %cst_141 {dimension_numbers = #tpu.dot_dimension_numbers<[1], [0], [0], [1], [0, 0, 1, 1], [], []>} : vector<2x128xbf16>, vector<128x512xbf16>, vector<2x512xf32> -> vector<2x512xf32>
    %296 = arith.addf %294, %295 : vector<2x512xf32>
    %c4_142 = arith.constant 4 : index
    %c0_143 = arith.constant 0 : index
    %297 = vector.load %arg17[%c4_142, %c0_143] : memref<16x512xf32, #tpu.memory_space<vmem>>, vector<2x512xf32>
    tpu.vector_store %arg17[%c4_142, %c0_143], %296 {strides = array<i32>} : memref<16x512xf32, #tpu.memory_space<vmem>>, vector<2x512xf32>,
    %c12_144 = arith.constant 12 : index
    %c0_145 = arith.constant 0 : index
    %298 = vector.load %arg16[%c12_144, %c0_145] : memref<16x1024xf32, #tpu.memory_space<vmem>>, vector<2x1024xf32>
    %299 = arith.truncf %285 : vector<2x256xf32> to vector<2x256xbf16>
    %cst_146 = arith.constant dense<0.000000e+00> : vector<2x1024xf32>
    %300 = tpu.matmul %299, %11, %cst_146 {dimension_numbers = #tpu.dot_dimension_numbers<[1], [0], [0], [1], [0, 0, 1, 1], [], []>} : vector<2x256xbf16>, vector<256x1024xbf16>, vector<2x1024xf32> -> vector<2x1024xf32>
    %301 = arith.addf %298, %300 : vector<2x1024xf32>
    %302 = vector.extract_strided_slice %301 {offsets = [0, 0], sizes = [2, 256], strides = [1, 1]} : vector<2x1024xf32> to vector<2x256xf32>
    %cst_147 = arith.constant 5.000000e-01 : f32
    %303 = vector.broadcast %cst_147 : f32 to vector<2x256xf32>
    %304 = arith.mulf %303, %302 : vector<2x256xf32>
    %305 = math.tanh %304 : vector<2x256xf32>
    %cst_148 = arith.constant 5.000000e-01 : f32
    %306 = vector.broadcast %cst_148 : f32 to vector<2x256xf32>
    %307 = arith.mulf %306, %305 : vector<2x256xf32>
    %cst_149 = arith.constant 5.000000e-01 : f32
    %308 = vector.broadcast %cst_149 : f32 to vector<2x256xf32>
    %309 = arith.addf %307, %308 : vector<2x256xf32>
    %310 = vector.extract_strided_slice %301 {offsets = [0, 256], sizes = [2, 256], strides = [1, 1]} : vector<2x1024xf32> to vector<2x256xf32>
    %cst_150 = arith.constant 5.000000e-01 : f32
    %311 = vector.broadcast %cst_150 : f32 to vector<2x256xf32>
    %312 = arith.mulf %311, %310 : vector<2x256xf32>
    %313 = math.tanh %312 : vector<2x256xf32>
    %cst_151 = arith.constant 5.000000e-01 : f32
    %314 = vector.broadcast %cst_151 : f32 to vector<2x256xf32>
    %315 = arith.mulf %314, %313 : vector<2x256xf32>
    %cst_152 = arith.constant 5.000000e-01 : f32
    %316 = vector.broadcast %cst_152 : f32 to vector<2x256xf32>
    %317 = arith.addf %315, %316 : vector<2x256xf32>
    %318 = vector.extract_strided_slice %301 {offsets = [0, 512], sizes = [2, 256], strides = [1, 1]} : vector<2x1024xf32> to vector<2x256xf32>
    %319 = math.tanh %318 : vector<2x256xf32>
    %320 = vector.extract_strided_slice %301 {offsets = [0, 768], sizes = [2, 256], strides = [1, 1]} : vector<2x1024xf32> to vector<2x256xf32>
    %cst_153 = arith.constant 5.000000e-01 : f32
    %321 = vector.broadcast %cst_153 : f32 to vector<2x256xf32>
    %322 = arith.mulf %321, %320 : vector<2x256xf32>
    %323 = math.tanh %322 : vector<2x256xf32>
    %cst_154 = arith.constant 5.000000e-01 : f32
    %324 = vector.broadcast %cst_154 : f32 to vector<2x256xf32>
    %325 = arith.mulf %324, %323 : vector<2x256xf32>
    %cst_155 = arith.constant 5.000000e-01 : f32
    %326 = vector.broadcast %cst_155 : f32 to vector<2x256xf32>
    %327 = arith.addf %325, %326 : vector<2x256xf32>
    %328 = arith.mulf %317, %283 : vector<2x256xf32>
    %329 = arith.mulf %309, %319 : vector<2x256xf32>
    %330 = arith.addf %328, %329 : vector<2x256xf32>
    %331 = math.tanh %330 : vector<2x256xf32>
    %332 = arith.mulf %327, %331 : vector<2x256xf32>
    %333 = vector.extract_strided_slice %332 {offsets = [0, 0], sizes = [2, 128], strides = [1, 1]} : vector<2x256xf32> to vector<2x128xf32>
    %334 = arith.truncf %333 : vector<2x128xf32> to vector<2x128xbf16>
    %335 = vector.extract_strided_slice %332 {offsets = [0, 128], sizes = [2, 128], strides = [1, 1]} : vector<2x256xf32> to vector<2x128xf32>
    %336 = arith.truncf %335 : vector<2x128xf32> to vector<2x128xbf16>
    %c12_156 = arith.constant 12 : index
    %c0_157 = arith.constant 0 : index
    %337 = vector.load %arg17[%c12_156, %c0_157] : memref<16x512xf32, #tpu.memory_space<vmem>>, vector<2x512xf32>
    %cst_158 = arith.constant dense<0.000000e+00> : vector<2x512xf32>
    %338 = tpu.matmul %334, %12, %cst_158 {dimension_numbers = #tpu.dot_dimension_numbers<[1], [0], [0], [1], [0, 0, 1, 1], [], []>} : vector<2x128xbf16>, vector<128x512xbf16>, vector<2x512xf32> -> vector<2x512xf32>
    %339 = arith.addf %337, %338 : vector<2x512xf32>
    %c12_159 = arith.constant 12 : index
    %c0_160 = arith.constant 0 : index
    %340 = vector.load %arg17[%c12_159, %c0_160] : memref<16x512xf32, #tpu.memory_space<vmem>>, vector<2x512xf32>
    tpu.vector_store %arg17[%c12_159, %c0_160], %339 {strides = array<i32>} : memref<16x512xf32, #tpu.memory_space<vmem>>, vector<2x512xf32>,
    %c2_161 = arith.constant 2 : index
    %c0_162 = arith.constant 0 : index
    %341 = vector.load %arg17[%c2_161, %c0_162] : memref<16x512xf32, #tpu.memory_space<vmem>>, vector<2x512xf32>
    %cst_163 = arith.constant dense<0.000000e+00> : vector<2x512xf32>
    %342 = tpu.matmul %336, %13, %cst_163 {dimension_numbers = #tpu.dot_dimension_numbers<[1], [0], [0], [1], [0, 0, 1, 1], [], []>} : vector<2x128xbf16>, vector<128x512xbf16>, vector<2x512xf32> -> vector<2x512xf32>
    %343 = arith.addf %341, %342 : vector<2x512xf32>
    %c2_164 = arith.constant 2 : index
    %c0_165 = arith.constant 0 : index
    %344 = vector.load %arg17[%c2_164, %c0_165] : memref<16x512xf32, #tpu.memory_space<vmem>>, vector<2x512xf32>
    tpu.vector_store %arg17[%c2_164, %c0_165], %343 {strides = array<i32>} : memref<16x512xf32, #tpu.memory_space<vmem>>, vector<2x512xf32>,
    %c14_166 = arith.constant 14 : index
    %c0_167 = arith.constant 0 : index
    %345 = vector.load %arg16[%c14_166, %c0_167] : memref<16x1024xf32, #tpu.memory_space<vmem>>, vector<2x1024xf32>
    %346 = arith.truncf %332 : vector<2x256xf32> to vector<2x256xbf16>
    %cst_168 = arith.constant dense<0.000000e+00> : vector<2x1024xf32>
    %347 = tpu.matmul %346, %11, %cst_168 {dimension_numbers = #tpu.dot_dimension_numbers<[1], [0], [0], [1], [0, 0, 1, 1], [], []>} : vector<2x256xbf16>, vector<256x1024xbf16>, vector<2x1024xf32> -> vector<2x1024xf32>
    %348 = arith.addf %345, %347 : vector<2x1024xf32>
    %349 = vector.extract_strided_slice %348 {offsets = [0, 0], sizes = [2, 256], strides = [1, 1]} : vector<2x1024xf32> to vector<2x256xf32>
    %cst_169 = arith.constant 5.000000e-01 : f32
    %350 = vector.broadcast %cst_169 : f32 to vector<2x256xf32>
    %351 = arith.mulf %350, %349 : vector<2x256xf32>
    %352 = math.tanh %351 : vector<2x256xf32>
    %cst_170 = arith.constant 5.000000e-01 : f32
    %353 = vector.broadcast %cst_170 : f32 to vector<2x256xf32>
    %354 = arith.mulf %353, %352 : vector<2x256xf32>
    %cst_171 = arith.constant 5.000000e-01 : f32
    %355 = vector.broadcast %cst_171 : f32 to vector<2x256xf32>
    %356 = arith.addf %354, %355 : vector<2x256xf32>
    %357 = vector.extract_strided_slice %348 {offsets = [0, 256], sizes = [2, 256], strides = [1, 1]} : vector<2x1024xf32> to vector<2x256xf32>
    %cst_172 = arith.constant 5.000000e-01 : f32
    %358 = vector.broadcast %cst_172 : f32 to vector<2x256xf32>
    %359 = arith.mulf %358, %357 : vector<2x256xf32>
    %360 = math.tanh %359 : vector<2x256xf32>
    %cst_173 = arith.constant 5.000000e-01 : f32
    %361 = vector.broadcast %cst_173 : f32 to vector<2x256xf32>
    %362 = arith.mulf %361, %360 : vector<2x256xf32>
    %cst_174 = arith.constant 5.000000e-01 : f32
    %363 = vector.broadcast %cst_174 : f32 to vector<2x256xf32>
    %364 = arith.addf %362, %363 : vector<2x256xf32>
    %365 = vector.extract_strided_slice %348 {offsets = [0, 512], sizes = [2, 256], strides = [1, 1]} : vector<2x1024xf32> to vector<2x256xf32>
    %366 = math.tanh %365 : vector<2x256xf32>
    %367 = vector.extract_strided_slice %348 {offsets = [0, 768], sizes = [2, 256], strides = [1, 1]} : vector<2x1024xf32> to vector<2x256xf32>
    %cst_175 = arith.constant 5.000000e-01 : f32
    %368 = vector.broadcast %cst_175 : f32 to vector<2x256xf32>
    %369 = arith.mulf %368, %367 : vector<2x256xf32>
    %370 = math.tanh %369 : vector<2x256xf32>
    %cst_176 = arith.constant 5.000000e-01 : f32
    %371 = vector.broadcast %cst_176 : f32 to vector<2x256xf32>
    %372 = arith.mulf %371, %370 : vector<2x256xf32>
    %cst_177 = arith.constant 5.000000e-01 : f32
    %373 = vector.broadcast %cst_177 : f32 to vector<2x256xf32>
    %374 = arith.addf %372, %373 : vector<2x256xf32>
    %375 = arith.mulf %364, %330 : vector<2x256xf32>
    %376 = arith.mulf %356, %366 : vector<2x256xf32>
    %377 = arith.addf %375, %376 : vector<2x256xf32>
    %378 = math.tanh %377 : vector<2x256xf32>
    %379 = arith.mulf %374, %378 : vector<2x256xf32>
    %380 = vector.extract_strided_slice %379 {offsets = [0, 0], sizes = [2, 128], strides = [1, 1]} : vector<2x256xf32> to vector<2x128xf32>
    %381 = arith.truncf %380 : vector<2x128xf32> to vector<2x128xbf16>
    %382 = vector.extract_strided_slice %379 {offsets = [0, 128], sizes = [2, 128], strides = [1, 1]} : vector<2x256xf32> to vector<2x128xf32>
    %383 = arith.truncf %382 : vector<2x128xf32> to vector<2x128xbf16>
    %c14_178 = arith.constant 14 : index
    %c0_179 = arith.constant 0 : index
    %384 = vector.load %arg17[%c14_178, %c0_179] : memref<16x512xf32, #tpu.memory_space<vmem>>, vector<2x512xf32>
    %cst_180 = arith.constant dense<0.000000e+00> : vector<2x512xf32>
    %385 = tpu.matmul %381, %12, %cst_180 {dimension_numbers = #tpu.dot_dimension_numbers<[1], [0], [0], [1], [0, 0, 1, 1], [], []>} : vector<2x128xbf16>, vector<128x512xbf16>, vector<2x512xf32> -> vector<2x512xf32>
    %386 = arith.addf %384, %385 : vector<2x512xf32>
    %c14_181 = arith.constant 14 : index
    %c0_182 = arith.constant 0 : index
    %387 = vector.load %arg17[%c14_181, %c0_182] : memref<16x512xf32, #tpu.memory_space<vmem>>, vector<2x512xf32>
    tpu.vector_store %arg17[%c14_181, %c0_182], %386 {strides = array<i32>} : memref<16x512xf32, #tpu.memory_space<vmem>>, vector<2x512xf32>,
    %c0_183 = arith.constant 0 : index
    %c0_184 = arith.constant 0 : index
    %388 = vector.load %arg17[%c0_183, %c0_184] : memref<16x512xf32, #tpu.memory_space<vmem>>, vector<2x512xf32>
    %cst_185 = arith.constant dense<0.000000e+00> : vector<2x512xf32>
    %389 = tpu.matmul %383, %13, %cst_185 {dimension_numbers = #tpu.dot_dimension_numbers<[1], [0], [0], [1], [0, 0, 1, 1], [], []>} : vector<2x128xbf16>, vector<128x512xbf16>, vector<2x512xf32> -> vector<2x512xf32>
    %390 = arith.addf %388, %389 : vector<2x512xf32>
    %c0_186 = arith.constant 0 : index
    %c0_187 = arith.constant 0 : index
    %391 = vector.load %arg17[%c0_186, %c0_187] : memref<16x512xf32, #tpu.memory_space<vmem>>, vector<2x512xf32>
    tpu.vector_store %arg17[%c0_186, %c0_187], %390 {strides = array<i32>} : memref<16x512xf32, #tpu.memory_space<vmem>>, vector<2x512xf32>,
    %c0_188 = arith.constant 0 : index
    %c0_189 = arith.constant 0 : index
    %392 = vector.load %arg7[%c0_188, %c0_189] : memref<128x512xbf16, #tpu.memory_space<vmem>>, vector<128x512xbf16>
    %cst_190 = arith.constant 0.000000e+00 : f32
    %393 = vector.broadcast %cst_190 : f32 to vector<2x128xf32>
    %cst_191 = arith.constant 0.000000e+00 : f32
    %394 = vector.broadcast %cst_191 : f32 to vector<2x128xf32>
    %c0_192 = arith.constant 0 : index
    %c0_193 = arith.constant 0 : index
    %395 = vector.load %arg17[%c0_192, %c0_193] : memref<16x512xf32, #tpu.memory_space<vmem>>, vector<2x512xf32>
    %396 = arith.truncf %393 : vector<2x128xf32> to vector<2x128xbf16>
    %cst_194 = arith.constant dense<0.000000e+00> : vector<2x512xf32>
    %397 = tpu.matmul %396, %392, %cst_194 {dimension_numbers = #tpu.dot_dimension_numbers<[1], [0], [0], [1], [0, 0, 1, 1], [], []>} : vector<2x128xbf16>, vector<128x512xbf16>, vector<2x512xf32> -> vector<2x512xf32>
    %398 = arith.addf %395, %397 : vector<2x512xf32>
    %399 = vector.extract_strided_slice %398 {offsets = [0, 0], sizes = [2, 128], strides = [1, 1]} : vector<2x512xf32> to vector<2x128xf32>
    %cst_195 = arith.constant 5.000000e-01 : f32
    %400 = vector.broadcast %cst_195 : f32 to vector<2x128xf32>
    %401 = arith.mulf %400, %399 : vector<2x128xf32>
    %402 = math.tanh %401 : vector<2x128xf32>
    %cst_196 = arith.constant 5.000000e-01 : f32
    %403 = vector.broadcast %cst_196 : f32 to vector<2x128xf32>
    %404 = arith.mulf %403, %402 : vector<2x128xf32>
    %cst_197 = arith.constant 5.000000e-01 : f32
    %405 = vector.broadcast %cst_197 : f32 to vector<2x128xf32>
    %406 = arith.addf %404, %405 : vector<2x128xf32>
    %407 = vector.extract_strided_slice %398 {offsets = [0, 128], sizes = [2, 128], strides = [1, 1]} : vector<2x512xf32> to vector<2x128xf32>
    %cst_198 = arith.constant 5.000000e-01 : f32
    %408 = vector.broadcast %cst_198 : f32 to vector<2x128xf32>
    %409 = arith.mulf %408, %407 : vector<2x128xf32>
    %410 = math.tanh %409 : vector<2x128xf32>
    %cst_199 = arith.constant 5.000000e-01 : f32
    %411 = vector.broadcast %cst_199 : f32 to vector<2x128xf32>
    %412 = arith.mulf %411, %410 : vector<2x128xf32>
    %cst_200 = arith.constant 5.000000e-01 : f32
    %413 = vector.broadcast %cst_200 : f32 to vector<2x128xf32>
    %414 = arith.addf %412, %413 : vector<2x128xf32>
    %415 = vector.extract_strided_slice %398 {offsets = [0, 256], sizes = [2, 128], strides = [1, 1]} : vector<2x512xf32> to vector<2x128xf32>
    %416 = math.tanh %415 : vector<2x128xf32>
    %417 = vector.extract_strided_slice %398 {offsets = [0, 384], sizes = [2, 128], strides = [1, 1]} : vector<2x512xf32> to vector<2x128xf32>
    %cst_201 = arith.constant 5.000000e-01 : f32
    %418 = vector.broadcast %cst_201 : f32 to vector<2x128xf32>
    %419 = arith.mulf %418, %417 : vector<2x128xf32>
    %420 = math.tanh %419 : vector<2x128xf32>
    %cst_202 = arith.constant 5.000000e-01 : f32
    %421 = vector.broadcast %cst_202 : f32 to vector<2x128xf32>
    %422 = arith.mulf %421, %420 : vector<2x128xf32>
    %cst_203 = arith.constant 5.000000e-01 : f32
    %423 = vector.broadcast %cst_203 : f32 to vector<2x128xf32>
    %424 = arith.addf %422, %423 : vector<2x128xf32>
    %425 = arith.mulf %414, %394 : vector<2x128xf32>
    %426 = arith.mulf %406, %416 : vector<2x128xf32>
    %427 = arith.addf %425, %426 : vector<2x128xf32>
    %428 = math.tanh %427 : vector<2x128xf32>
    %429 = arith.mulf %424, %428 : vector<2x128xf32>
    %c2_204 = arith.constant 2 : index
    %c0_205 = arith.constant 0 : index
    %430 = vector.load %arg17[%c2_204, %c0_205] : memref<16x512xf32, #tpu.memory_space<vmem>>, vector<2x512xf32>
    %431 = arith.truncf %429 : vector<2x128xf32> to vector<2x128xbf16>
    %cst_206 = arith.constant dense<0.000000e+00> : vector<2x512xf32>
    %432 = tpu.matmul %431, %392, %cst_206 {dimension_numbers = #tpu.dot_dimension_numbers<[1], [0], [0], [1], [0, 0, 1, 1], [], []>} : vector<2x128xbf16>, vector<128x512xbf16>, vector<2x512xf32> -> vector<2x512xf32>
    %433 = arith.addf %430, %432 : vector<2x512xf32>
    %434 = vector.extract_strided_slice %433 {offsets = [0, 0], sizes = [2, 128], strides = [1, 1]} : vector<2x512xf32> to vector<2x128xf32>
    %cst_207 = arith.constant 5.000000e-01 : f32
    %435 = vector.broadcast %cst_207 : f32 to vector<2x128xf32>
    %436 = arith.mulf %435, %434 : vector<2x128xf32>
    %437 = math.tanh %436 : vector<2x128xf32>
    %cst_208 = arith.constant 5.000000e-01 : f32
    %438 = vector.broadcast %cst_208 : f32 to vector<2x128xf32>
    %439 = arith.mulf %438, %437 : vector<2x128xf32>
    %cst_209 = arith.constant 5.000000e-01 : f32
    %440 = vector.broadcast %cst_209 : f32 to vector<2x128xf32>
    %441 = arith.addf %439, %440 : vector<2x128xf32>
    %442 = vector.extract_strided_slice %433 {offsets = [0, 128], sizes = [2, 128], strides = [1, 1]} : vector<2x512xf32> to vector<2x128xf32>
    %cst_210 = arith.constant 5.000000e-01 : f32
    %443 = vector.broadcast %cst_210 : f32 to vector<2x128xf32>
    %444 = arith.mulf %443, %442 : vector<2x128xf32>
    %445 = math.tanh %444 : vector<2x128xf32>
    %cst_211 = arith.constant 5.000000e-01 : f32
    %446 = vector.broadcast %cst_211 : f32 to vector<2x128xf32>
    %447 = arith.mulf %446, %445 : vector<2x128xf32>
    %cst_212 = arith.constant 5.000000e-01 : f32
    %448 = vector.broadcast %cst_212 : f32 to vector<2x128xf32>
    %449 = arith.addf %447, %448 : vector<2x128xf32>
    %450 = vector.extract_strided_slice %433 {offsets = [0, 256], sizes = [2, 128], strides = [1, 1]} : vector<2x512xf32> to vector<2x128xf32>
    %451 = math.tanh %450 : vector<2x128xf32>
    %452 = vector.extract_strided_slice %433 {offsets = [0, 384], sizes = [2, 128], strides = [1, 1]} : vector<2x512xf32> to vector<2x128xf32>
    %cst_213 = arith.constant 5.000000e-01 : f32
    %453 = vector.broadcast %cst_213 : f32 to vector<2x128xf32>
    %454 = arith.mulf %453, %452 : vector<2x128xf32>
    %455 = math.tanh %454 : vector<2x128xf32>
    %cst_214 = arith.constant 5.000000e-01 : f32
    %456 = vector.broadcast %cst_214 : f32 to vector<2x128xf32>
    %457 = arith.mulf %456, %455 : vector<2x128xf32>
    %cst_215 = arith.constant 5.000000e-01 : f32
    %458 = vector.broadcast %cst_215 : f32 to vector<2x128xf32>
    %459 = arith.addf %457, %458 : vector<2x128xf32>
    %460 = arith.mulf %449, %427 : vector<2x128xf32>
    %461 = arith.mulf %441, %451 : vector<2x128xf32>
    %462 = arith.addf %460, %461 : vector<2x128xf32>
    %463 = math.tanh %462 : vector<2x128xf32>
    %464 = arith.mulf %459, %463 : vector<2x128xf32>
    %c4_216 = arith.constant 4 : index
    %c0_217 = arith.constant 0 : index
    %465 = vector.load %arg17[%c4_216, %c0_217] : memref<16x512xf32, #tpu.memory_space<vmem>>, vector<2x512xf32>
    %466 = arith.truncf %464 : vector<2x128xf32> to vector<2x128xbf16>
    %cst_218 = arith.constant dense<0.000000e+00> : vector<2x512xf32>
    %467 = tpu.matmul %466, %392, %cst_218 {dimension_numbers = #tpu.dot_dimension_numbers<[1], [0], [0], [1], [0, 0, 1, 1], [], []>} : vector<2x128xbf16>, vector<128x512xbf16>, vector<2x512xf32> -> vector<2x512xf32>
    %468 = arith.addf %465, %467 : vector<2x512xf32>
    %469 = vector.extract_strided_slice %468 {offsets = [0, 0], sizes = [2, 128], strides = [1, 1]} : vector<2x512xf32> to vector<2x128xf32>
    %cst_219 = arith.constant 5.000000e-01 : f32
    %470 = vector.broadcast %cst_219 : f32 to vector<2x128xf32>
    %471 = arith.mulf %470, %469 : vector<2x128xf32>
    %472 = math.tanh %471 : vector<2x128xf32>
    %cst_220 = arith.constant 5.000000e-01 : f32
    %473 = vector.broadcast %cst_220 : f32 to vector<2x128xf32>
    %474 = arith.mulf %473, %472 : vector<2x128xf32>
    %cst_221 = arith.constant 5.000000e-01 : f32
    %475 = vector.broadcast %cst_221 : f32 to vector<2x128xf32>
    %476 = arith.addf %474, %475 : vector<2x128xf32>
    %477 = vector.extract_strided_slice %468 {offsets = [0, 128], sizes = [2, 128], strides = [1, 1]} : vector<2x512xf32> to vector<2x128xf32>
    %cst_222 = arith.constant 5.000000e-01 : f32
    %478 = vector.broadcast %cst_222 : f32 to vector<2x128xf32>
    %479 = arith.mulf %478, %477 : vector<2x128xf32>
    %480 = math.tanh %479 : vector<2x128xf32>
    %cst_223 = arith.constant 5.000000e-01 : f32
    %481 = vector.broadcast %cst_223 : f32 to vector<2x128xf32>
    %482 = arith.mulf %481, %480 : vector<2x128xf32>
    %cst_224 = arith.constant 5.000000e-01 : f32
    %483 = vector.broadcast %cst_224 : f32 to vector<2x128xf32>
    %484 = arith.addf %482, %483 : vector<2x128xf32>
    %485 = vector.extract_strided_slice %468 {offsets = [0, 256], sizes = [2, 128], strides = [1, 1]} : vector<2x512xf32> to vector<2x128xf32>
    %486 = math.tanh %485 : vector<2x128xf32>
    %487 = vector.extract_strided_slice %468 {offsets = [0, 384], sizes = [2, 128], strides = [1, 1]} : vector<2x512xf32> to vector<2x128xf32>
    %cst_225 = arith.constant 5.000000e-01 : f32
    %488 = vector.broadcast %cst_225 : f32 to vector<2x128xf32>
    %489 = arith.mulf %488, %487 : vector<2x128xf32>
    %490 = math.tanh %489 : vector<2x128xf32>
    %cst_226 = arith.constant 5.000000e-01 : f32
    %491 = vector.broadcast %cst_226 : f32 to vector<2x128xf32>
    %492 = arith.mulf %491, %490 : vector<2x128xf32>
    %cst_227 = arith.constant 5.000000e-01 : f32
    %493 = vector.broadcast %cst_227 : f32 to vector<2x128xf32>
    %494 = arith.addf %492, %493 : vector<2x128xf32>
    %495 = arith.mulf %484, %462 : vector<2x128xf32>
    %496 = arith.mulf %476, %486 : vector<2x128xf32>
    %497 = arith.addf %495, %496 : vector<2x128xf32>
    %498 = math.tanh %497 : vector<2x128xf32>
    %499 = arith.mulf %494, %498 : vector<2x128xf32>
    %c6_228 = arith.constant 6 : index
    %c0_229 = arith.constant 0 : index
    %500 = vector.load %arg17[%c6_228, %c0_229] : memref<16x512xf32, #tpu.memory_space<vmem>>, vector<2x512xf32>
    %501 = arith.truncf %499 : vector<2x128xf32> to vector<2x128xbf16>
    %cst_230 = arith.constant dense<0.000000e+00> : vector<2x512xf32>
    %502 = tpu.matmul %501, %392, %cst_230 {dimension_numbers = #tpu.dot_dimension_numbers<[1], [0], [0], [1], [0, 0, 1, 1], [], []>} : vector<2x128xbf16>, vector<128x512xbf16>, vector<2x512xf32> -> vector<2x512xf32>
    %503 = arith.addf %500, %502 : vector<2x512xf32>
    %504 = vector.extract_strided_slice %503 {offsets = [0, 0], sizes = [2, 128], strides = [1, 1]} : vector<2x512xf32> to vector<2x128xf32>
    %cst_231 = arith.constant 5.000000e-01 : f32
    %505 = vector.broadcast %cst_231 : f32 to vector<2x128xf32>
    %506 = arith.mulf %505, %504 : vector<2x128xf32>
    %507 = math.tanh %506 : vector<2x128xf32>
    %cst_232 = arith.constant 5.000000e-01 : f32
    %508 = vector.broadcast %cst_232 : f32 to vector<2x128xf32>
    %509 = arith.mulf %508, %507 : vector<2x128xf32>
    %cst_233 = arith.constant 5.000000e-01 : f32
    %510 = vector.broadcast %cst_233 : f32 to vector<2x128xf32>
    %511 = arith.addf %509, %510 : vector<2x128xf32>
    %512 = vector.extract_strided_slice %503 {offsets = [0, 128], sizes = [2, 128], strides = [1, 1]} : vector<2x512xf32> to vector<2x128xf32>
    %cst_234 = arith.constant 5.000000e-01 : f32
    %513 = vector.broadcast %cst_234 : f32 to vector<2x128xf32>
    %514 = arith.mulf %513, %512 : vector<2x128xf32>
    %515 = math.tanh %514 : vector<2x128xf32>
    %cst_235 = arith.constant 5.000000e-01 : f32
    %516 = vector.broadcast %cst_235 : f32 to vector<2x128xf32>
    %517 = arith.mulf %516, %515 : vector<2x128xf32>
    %cst_236 = arith.constant 5.000000e-01 : f32
    %518 = vector.broadcast %cst_236 : f32 to vector<2x128xf32>
    %519 = arith.addf %517, %518 : vector<2x128xf32>
    %520 = vector.extract_strided_slice %503 {offsets = [0, 256], sizes = [2, 128], strides = [1, 1]} : vector<2x512xf32> to vector<2x128xf32>
    %521 = math.tanh %520 : vector<2x128xf32>
    %522 = vector.extract_strided_slice %503 {offsets = [0, 384], sizes = [2, 128], strides = [1, 1]} : vector<2x512xf32> to vector<2x128xf32>
    %cst_237 = arith.constant 5.000000e-01 : f32
    %523 = vector.broadcast %cst_237 : f32 to vector<2x128xf32>
    %524 = arith.mulf %523, %522 : vector<2x128xf32>
    %525 = math.tanh %524 : vector<2x128xf32>
    %cst_238 = arith.constant 5.000000e-01 : f32
    %526 = vector.broadcast %cst_238 : f32 to vector<2x128xf32>
    %527 = arith.mulf %526, %525 : vector<2x128xf32>
    %cst_239 = arith.constant 5.000000e-01 : f32
    %528 = vector.broadcast %cst_239 : f32 to vector<2x128xf32>
    %529 = arith.addf %527, %528 : vector<2x128xf32>
    %530 = arith.mulf %519, %497 : vector<2x128xf32>
    %531 = arith.mulf %511, %521 : vector<2x128xf32>
    %532 = arith.addf %530, %531 : vector<2x128xf32>
    %533 = math.tanh %532 : vector<2x128xf32>
    %534 = arith.mulf %529, %533 : vector<2x128xf32>
    %c8_240 = arith.constant 8 : index
    %c0_241 = arith.constant 0 : index
    %535 = vector.load %arg17[%c8_240, %c0_241] : memref<16x512xf32, #tpu.memory_space<vmem>>, vector<2x512xf32>
    %536 = arith.truncf %534 : vector<2x128xf32> to vector<2x128xbf16>
    %cst_242 = arith.constant dense<0.000000e+00> : vector<2x512xf32>
    %537 = tpu.matmul %536, %392, %cst_242 {dimension_numbers = #tpu.dot_dimension_numbers<[1], [0], [0], [1], [0, 0, 1, 1], [], []>} : vector<2x128xbf16>, vector<128x512xbf16>, vector<2x512xf32> -> vector<2x512xf32>
    %538 = arith.addf %535, %537 : vector<2x512xf32>
    %539 = vector.extract_strided_slice %538 {offsets = [0, 0], sizes = [2, 128], strides = [1, 1]} : vector<2x512xf32> to vector<2x128xf32>
    %cst_243 = arith.constant 5.000000e-01 : f32
    %540 = vector.broadcast %cst_243 : f32 to vector<2x128xf32>
    %541 = arith.mulf %540, %539 : vector<2x128xf32>
    %542 = math.tanh %541 : vector<2x128xf32>
    %cst_244 = arith.constant 5.000000e-01 : f32
    %543 = vector.broadcast %cst_244 : f32 to vector<2x128xf32>
    %544 = arith.mulf %543, %542 : vector<2x128xf32>
    %cst_245 = arith.constant 5.000000e-01 : f32
    %545 = vector.broadcast %cst_245 : f32 to vector<2x128xf32>
    %546 = arith.addf %544, %545 : vector<2x128xf32>
    %547 = vector.extract_strided_slice %538 {offsets = [0, 128], sizes = [2, 128], strides = [1, 1]} : vector<2x512xf32> to vector<2x128xf32>
    %cst_246 = arith.constant 5.000000e-01 : f32
    %548 = vector.broadcast %cst_246 : f32 to vector<2x128xf32>
    %549 = arith.mulf %548, %547 : vector<2x128xf32>
    %550 = math.tanh %549 : vector<2x128xf32>
    %cst_247 = arith.constant 5.000000e-01 : f32
    %551 = vector.broadcast %cst_247 : f32 to vector<2x128xf32>
    %552 = arith.mulf %551, %550 : vector<2x128xf32>
    %cst_248 = arith.constant 5.000000e-01 : f32
    %553 = vector.broadcast %cst_248 : f32 to vector<2x128xf32>
    %554 = arith.addf %552, %553 : vector<2x128xf32>
    %555 = vector.extract_strided_slice %538 {offsets = [0, 256], sizes = [2, 128], strides = [1, 1]} : vector<2x512xf32> to vector<2x128xf32>
    %556 = math.tanh %555 : vector<2x128xf32>
    %557 = vector.extract_strided_slice %538 {offsets = [0, 384], sizes = [2, 128], strides = [1, 1]} : vector<2x512xf32> to vector<2x128xf32>
    %cst_249 = arith.constant 5.000000e-01 : f32
    %558 = vector.broadcast %cst_249 : f32 to vector<2x128xf32>
    %559 = arith.mulf %558, %557 : vector<2x128xf32>
    %560 = math.tanh %559 : vector<2x128xf32>
    %cst_250 = arith.constant 5.000000e-01 : f32
    %561 = vector.broadcast %cst_250 : f32 to vector<2x128xf32>
    %562 = arith.mulf %561, %560 : vector<2x128xf32>
    %cst_251 = arith.constant 5.000000e-01 : f32
    %563 = vector.broadcast %cst_251 : f32 to vector<2x128xf32>
    %564 = arith.addf %562, %563 : vector<2x128xf32>
    %565 = arith.mulf %554, %532 : vector<2x128xf32>
    %566 = arith.mulf %546, %556 : vector<2x128xf32>
    %567 = arith.addf %565, %566 : vector<2x128xf32>
    %568 = math.tanh %567 : vector<2x128xf32>
    %569 = arith.mulf %564, %568 : vector<2x128xf32>
    %c10_252 = arith.constant 10 : index
    %c0_253 = arith.constant 0 : index
    %570 = vector.load %arg17[%c10_252, %c0_253] : memref<16x512xf32, #tpu.memory_space<vmem>>, vector<2x512xf32>
    %571 = arith.truncf %569 : vector<2x128xf32> to vector<2x128xbf16>
    %cst_254 = arith.constant dense<0.000000e+00> : vector<2x512xf32>
    %572 = tpu.matmul %571, %392, %cst_254 {dimension_numbers = #tpu.dot_dimension_numbers<[1], [0], [0], [1], [0, 0, 1, 1], [], []>} : vector<2x128xbf16>, vector<128x512xbf16>, vector<2x512xf32> -> vector<2x512xf32>
    %573 = arith.addf %570, %572 : vector<2x512xf32>
    %574 = vector.extract_strided_slice %573 {offsets = [0, 0], sizes = [2, 128], strides = [1, 1]} : vector<2x512xf32> to vector<2x128xf32>
    %cst_255 = arith.constant 5.000000e-01 : f32
    %575 = vector.broadcast %cst_255 : f32 to vector<2x128xf32>
    %576 = arith.mulf %575, %574 : vector<2x128xf32>
    %577 = math.tanh %576 : vector<2x128xf32>
    %cst_256 = arith.constant 5.000000e-01 : f32
    %578 = vector.broadcast %cst_256 : f32 to vector<2x128xf32>
    %579 = arith.mulf %578, %577 : vector<2x128xf32>
    %cst_257 = arith.constant 5.000000e-01 : f32
    %580 = vector.broadcast %cst_257 : f32 to vector<2x128xf32>
    %581 = arith.addf %579, %580 : vector<2x128xf32>
    %582 = vector.extract_strided_slice %573 {offsets = [0, 128], sizes = [2, 128], strides = [1, 1]} : vector<2x512xf32> to vector<2x128xf32>
    %cst_258 = arith.constant 5.000000e-01 : f32
    %583 = vector.broadcast %cst_258 : f32 to vector<2x128xf32>
    %584 = arith.mulf %583, %582 : vector<2x128xf32>
    %585 = math.tanh %584 : vector<2x128xf32>
    %cst_259 = arith.constant 5.000000e-01 : f32
    %586 = vector.broadcast %cst_259 : f32 to vector<2x128xf32>
    %587 = arith.mulf %586, %585 : vector<2x128xf32>
    %cst_260 = arith.constant 5.000000e-01 : f32
    %588 = vector.broadcast %cst_260 : f32 to vector<2x128xf32>
    %589 = arith.addf %587, %588 : vector<2x128xf32>
    %590 = vector.extract_strided_slice %573 {offsets = [0, 256], sizes = [2, 128], strides = [1, 1]} : vector<2x512xf32> to vector<2x128xf32>
    %591 = math.tanh %590 : vector<2x128xf32>
    %592 = vector.extract_strided_slice %573 {offsets = [0, 384], sizes = [2, 128], strides = [1, 1]} : vector<2x512xf32> to vector<2x128xf32>
    %cst_261 = arith.constant 5.000000e-01 : f32
    %593 = vector.broadcast %cst_261 : f32 to vector<2x128xf32>
    %594 = arith.mulf %593, %592 : vector<2x128xf32>
    %595 = math.tanh %594 : vector<2x128xf32>
    %cst_262 = arith.constant 5.000000e-01 : f32
    %596 = vector.broadcast %cst_262 : f32 to vector<2x128xf32>
    %597 = arith.mulf %596, %595 : vector<2x128xf32>
    %cst_263 = arith.constant 5.000000e-01 : f32
    %598 = vector.broadcast %cst_263 : f32 to vector<2x128xf32>
    %599 = arith.addf %597, %598 : vector<2x128xf32>
    %600 = arith.mulf %589, %567 : vector<2x128xf32>
    %601 = arith.mulf %581, %591 : vector<2x128xf32>
    %602 = arith.addf %600, %601 : vector<2x128xf32>
    %603 = math.tanh %602 : vector<2x128xf32>
    %604 = arith.mulf %599, %603 : vector<2x128xf32>
    %c12_264 = arith.constant 12 : index
    %c0_265 = arith.constant 0 : index
    %605 = vector.load %arg17[%c12_264, %c0_265] : memref<16x512xf32, #tpu.memory_space<vmem>>, vector<2x512xf32>
    %606 = arith.truncf %604 : vector<2x128xf32> to vector<2x128xbf16>
    %cst_266 = arith.constant dense<0.000000e+00> : vector<2x512xf32>
    %607 = tpu.matmul %606, %392, %cst_266 {dimension_numbers = #tpu.dot_dimension_numbers<[1], [0], [0], [1], [0, 0, 1, 1], [], []>} : vector<2x128xbf16>, vector<128x512xbf16>, vector<2x512xf32> -> vector<2x512xf32>
    %608 = arith.addf %605, %607 : vector<2x512xf32>
    %609 = vector.extract_strided_slice %608 {offsets = [0, 0], sizes = [2, 128], strides = [1, 1]} : vector<2x512xf32> to vector<2x128xf32>
    %cst_267 = arith.constant 5.000000e-01 : f32
    %610 = vector.broadcast %cst_267 : f32 to vector<2x128xf32>
    %611 = arith.mulf %610, %609 : vector<2x128xf32>
    %612 = math.tanh %611 : vector<2x128xf32>
    %cst_268 = arith.constant 5.000000e-01 : f32
    %613 = vector.broadcast %cst_268 : f32 to vector<2x128xf32>
    %614 = arith.mulf %613, %612 : vector<2x128xf32>
    %cst_269 = arith.constant 5.000000e-01 : f32
    %615 = vector.broadcast %cst_269 : f32 to vector<2x128xf32>
    %616 = arith.addf %614, %615 : vector<2x128xf32>
    %617 = vector.extract_strided_slice %608 {offsets = [0, 128], sizes = [2, 128], strides = [1, 1]} : vector<2x512xf32> to vector<2x128xf32>
    %cst_270 = arith.constant 5.000000e-01 : f32
    %618 = vector.broadcast %cst_270 : f32 to vector<2x128xf32>
    %619 = arith.mulf %618, %617 : vector<2x128xf32>
    %620 = math.tanh %619 : vector<2x128xf32>
    %cst_271 = arith.constant 5.000000e-01 : f32
    %621 = vector.broadcast %cst_271 : f32 to vector<2x128xf32>
    %622 = arith.mulf %621, %620 : vector<2x128xf32>
    %cst_272 = arith.constant 5.000000e-01 : f32
    %623 = vector.broadcast %cst_272 : f32 to vector<2x128xf32>
    %624 = arith.addf %622, %623 : vector<2x128xf32>
    %625 = vector.extract_strided_slice %608 {offsets = [0, 256], sizes = [2, 128], strides = [1, 1]} : vector<2x512xf32> to vector<2x128xf32>
    %626 = math.tanh %625 : vector<2x128xf32>
    %627 = vector.extract_strided_slice %608 {offsets = [0, 384], sizes = [2, 128], strides = [1, 1]} : vector<2x512xf32> to vector<2x128xf32>
    %cst_273 = arith.constant 5.000000e-01 : f32
    %628 = vector.broadcast %cst_273 : f32 to vector<2x128xf32>
    %629 = arith.mulf %628, %627 : vector<2x128xf32>
    %630 = math.tanh %629 : vector<2x128xf32>
    %cst_274 = arith.constant 5.000000e-01 : f32
    %631 = vector.broadcast %cst_274 : f32 to vector<2x128xf32>
    %632 = arith.mulf %631, %630 : vector<2x128xf32>
    %cst_275 = arith.constant 5.000000e-01 : f32
    %633 = vector.broadcast %cst_275 : f32 to vector<2x128xf32>
    %634 = arith.addf %632, %633 : vector<2x128xf32>
    %635 = arith.mulf %624, %602 : vector<2x128xf32>
    %636 = arith.mulf %616, %626 : vector<2x128xf32>
    %637 = arith.addf %635, %636 : vector<2x128xf32>
    %638 = math.tanh %637 : vector<2x128xf32>
    %639 = arith.mulf %634, %638 : vector<2x128xf32>
    %c14_276 = arith.constant 14 : index
    %c0_277 = arith.constant 0 : index
    %640 = vector.load %arg17[%c14_276, %c0_277] : memref<16x512xf32, #tpu.memory_space<vmem>>, vector<2x512xf32>
    %641 = arith.truncf %639 : vector<2x128xf32> to vector<2x128xbf16>
    %cst_278 = arith.constant dense<0.000000e+00> : vector<2x512xf32>
    %642 = tpu.matmul %641, %392, %cst_278 {dimension_numbers = #tpu.dot_dimension_numbers<[1], [0], [0], [1], [0, 0, 1, 1], [], []>} : vector<2x128xbf16>, vector<128x512xbf16>, vector<2x512xf32> -> vector<2x512xf32>
    %643 = arith.addf %640, %642 : vector<2x512xf32>
    %644 = vector.extract_strided_slice %643 {offsets = [0, 0], sizes = [2, 128], strides = [1, 1]} : vector<2x512xf32> to vector<2x128xf32>
    %cst_279 = arith.constant 5.000000e-01 : f32
    %645 = vector.broadcast %cst_279 : f32 to vector<2x128xf32>
    %646 = arith.mulf %645, %644 : vector<2x128xf32>
    %647 = math.tanh %646 : vector<2x128xf32>
    %cst_280 = arith.constant 5.000000e-01 : f32
    %648 = vector.broadcast %cst_280 : f32 to vector<2x128xf32>
    %649 = arith.mulf %648, %647 : vector<2x128xf32>
    %cst_281 = arith.constant 5.000000e-01 : f32
    %650 = vector.broadcast %cst_281 : f32 to vector<2x128xf32>
    %651 = arith.addf %649, %650 : vector<2x128xf32>
    %652 = vector.extract_strided_slice %643 {offsets = [0, 128], sizes = [2, 128], strides = [1, 1]} : vector<2x512xf32> to vector<2x128xf32>
    %cst_282 = arith.constant 5.000000e-01 : f32
    %653 = vector.broadcast %cst_282 : f32 to vector<2x128xf32>
    %654 = arith.mulf %653, %652 : vector<2x128xf32>
    %655 = math.tanh %654 : vector<2x128xf32>
    %cst_283 = arith.constant 5.000000e-01 : f32
    %656 = vector.broadcast %cst_283 : f32 to vector<2x128xf32>
    %657 = arith.mulf %656, %655 : vector<2x128xf32>
    %cst_284 = arith.constant 5.000000e-01 : f32
    %658 = vector.broadcast %cst_284 : f32 to vector<2x128xf32>
    %659 = arith.addf %657, %658 : vector<2x128xf32>
    %660 = vector.extract_strided_slice %643 {offsets = [0, 256], sizes = [2, 128], strides = [1, 1]} : vector<2x512xf32> to vector<2x128xf32>
    %661 = math.tanh %660 : vector<2x128xf32>
    %662 = vector.extract_strided_slice %643 {offsets = [0, 384], sizes = [2, 128], strides = [1, 1]} : vector<2x512xf32> to vector<2x128xf32>
    %cst_285 = arith.constant 5.000000e-01 : f32
    %663 = vector.broadcast %cst_285 : f32 to vector<2x128xf32>
    %664 = arith.mulf %663, %662 : vector<2x128xf32>
    %665 = math.tanh %664 : vector<2x128xf32>
    %cst_286 = arith.constant 5.000000e-01 : f32
    %666 = vector.broadcast %cst_286 : f32 to vector<2x128xf32>
    %667 = arith.mulf %666, %665 : vector<2x128xf32>
    %cst_287 = arith.constant 5.000000e-01 : f32
    %668 = vector.broadcast %cst_287 : f32 to vector<2x128xf32>
    %669 = arith.addf %667, %668 : vector<2x128xf32>
    %670 = arith.mulf %659, %637 : vector<2x128xf32>
    %671 = arith.mulf %651, %661 : vector<2x128xf32>
    %672 = arith.addf %670, %671 : vector<2x128xf32>
    %673 = math.tanh %672 : vector<2x128xf32>
    %674 = arith.mulf %669, %673 : vector<2x128xf32>
    %c0_288 = arith.constant 0 : index
    %c0_289 = arith.constant 0 : index
    %675 = vector.load %arg8[%c0_288, %c0_289] : memref<128x512xbf16, #tpu.memory_space<vmem>>, vector<128x512xbf16>
    %cst_290 = arith.constant dense<0.000000e+00> : vector<2x512xf32>
    %676 = tpu.matmul %381, %675, %cst_290 {dimension_numbers = #tpu.dot_dimension_numbers<[1], [0], [0], [1], [0, 0, 1, 1], [], []>} : vector<2x128xbf16>, vector<128x512xbf16>, vector<2x512xf32> -> vector<2x512xf32>
    %c0_291 = arith.constant 0 : index
    %c0_292 = arith.constant 0 : index
    %677 = vector.load %arg9[%c0_291, %c0_292] : memref<128x512xbf16, #tpu.memory_space<vmem>>, vector<128x512xbf16>
    %cst_293 = arith.constant dense<0.000000e+00> : vector<2x512xf32>
    %678 = tpu.matmul %54, %677, %cst_293 {dimension_numbers = #tpu.dot_dimension_numbers<[1], [0], [0], [1], [0, 0, 1, 1], [], []>} : vector<2x128xbf16>, vector<128x512xbf16>, vector<2x512xf32> -> vector<2x512xf32>
    %679 = arith.addf %676, %678 : vector<2x512xf32>
    %c0_294 = arith.constant 0 : index
    %c0_295 = arith.constant 0 : index
    %680 = vector.load %arg10[%c0_294, %c0_295] : memref<1x512xf32, #tpu.memory_space<vmem>>, vector<1x512xf32>
    %681 = vector.broadcast %680 : vector<1x512xf32> to vector<2x512xf32>
    %682 = arith.addf %679, %681 : vector<2x512xf32>
    %683 = vector.extract_strided_slice %682 {offsets = [0, 0], sizes = [2, 128], strides = [1, 1]} : vector<2x512xf32> to vector<2x128xf32>
    %cst_296 = arith.constant 5.000000e-01 : f32
    %684 = vector.broadcast %cst_296 : f32 to vector<2x128xf32>
    %685 = arith.mulf %684, %683 : vector<2x128xf32>
    %686 = math.tanh %685 : vector<2x128xf32>
    %cst_297 = arith.constant 5.000000e-01 : f32
    %687 = vector.broadcast %cst_297 : f32 to vector<2x128xf32>
    %688 = arith.mulf %687, %686 : vector<2x128xf32>
    %cst_298 = arith.constant 5.000000e-01 : f32
    %689 = vector.broadcast %cst_298 : f32 to vector<2x128xf32>
    %690 = arith.addf %688, %689 : vector<2x128xf32>
    %691 = vector.extract_strided_slice %682 {offsets = [0, 256], sizes = [2, 128], strides = [1, 1]} : vector<2x512xf32> to vector<2x128xf32>
    %692 = math.tanh %691 : vector<2x128xf32>
    %693 = arith.mulf %690, %692 : vector<2x128xf32>
    %694 = vector.extract_strided_slice %682 {offsets = [0, 384], sizes = [2, 128], strides = [1, 1]} : vector<2x512xf32> to vector<2x128xf32>
    %cst_299 = arith.constant 5.000000e-01 : f32
    %695 = vector.broadcast %cst_299 : f32 to vector<2x128xf32>
    %696 = arith.mulf %695, %694 : vector<2x128xf32>
    %697 = math.tanh %696 : vector<2x128xf32>
    %cst_300 = arith.constant 5.000000e-01 : f32
    %698 = vector.broadcast %cst_300 : f32 to vector<2x128xf32>
    %699 = arith.mulf %698, %697 : vector<2x128xf32>
    %cst_301 = arith.constant 5.000000e-01 : f32
    %700 = vector.broadcast %cst_301 : f32 to vector<2x128xf32>
    %701 = arith.addf %699, %700 : vector<2x128xf32>
    %702 = math.tanh %693 : vector<2x128xf32>
    %703 = arith.mulf %701, %702 : vector<2x128xf32>
    %704 = arith.truncf %674 : vector<2x128xf32> to vector<2x128xbf16>
    %c0_302 = arith.constant 0 : index
    %c0_303 = arith.constant 0 : index
    %705 = vector.load %arg11[%c0_302, %c0_303] : memref<128x32xbf16, #tpu.memory_space<vmem>>, vector<128x32xbf16>
    %cst_304 = arith.constant dense<0.000000e+00> : vector<2x32xf32>
    %706 = tpu.matmul %704, %705, %cst_304 {dimension_numbers = #tpu.dot_dimension_numbers<[1], [0], [0], [1], [0, 0, 1, 1], [], []>} : vector<2x128xbf16>, vector<128x32xbf16>, vector<2x32xf32> -> vector<2x32xf32>
    %707 = arith.truncf %703 : vector<2x128xf32> to vector<2x128xbf16>
    %c0_305 = arith.constant 0 : index
    %c0_306 = arith.constant 0 : index
    %708 = vector.load %arg12[%c0_305, %c0_306] : memref<128x32xbf16, #tpu.memory_space<vmem>>, vector<128x32xbf16>
    %cst_307 = arith.constant dense<0.000000e+00> : vector<2x32xf32>
    %709 = tpu.matmul %707, %708, %cst_307 {dimension_numbers = #tpu.dot_dimension_numbers<[1], [0], [0], [1], [0, 0, 1, 1], [], []>} : vector<2x128xbf16>, vector<128x32xbf16>, vector<2x32xf32> -> vector<2x32xf32>
    %710 = arith.addf %706, %709 : vector<2x32xf32>
    %c0_308 = arith.constant 0 : index
    %c0_309 = arith.constant 0 : index
    %711 = vector.load %arg13[%c0_308, %c0_309] : memref<1x32xf32, #tpu.memory_space<vmem>>, vector<1x32xf32>
    %712 = vector.broadcast %711 : vector<1x32xf32> to vector<2x32xf32>
    %713 = arith.addf %710, %712 : vector<2x32xf32>
    %714 = vector.extract_strided_slice %713 {offsets = [0, 0], sizes = [2, 16], strides = [1, 1]} : vector<2x32xf32> to vector<2x16xf32>
    %715 = vector.extract_strided_slice %713 {offsets = [0, 16], sizes = [2, 16], strides = [1, 1]} : vector<2x32xf32> to vector<2x16xf32>
    %cst_310 = arith.constant 2.000000e+01 : f32
    %716 = vector.broadcast %cst_310 : f32 to vector<2x16xf32>
    %717 = arith.cmpf ogt, %715, %716 : vector<2x16xf32>
    %cst_311 = arith.constant 2.000000e+01 : f32
    %718 = vector.broadcast %cst_311 : f32 to vector<2x16xf32>
    %719 = arith.minimumf %715, %718 : vector<2x16xf32>
    %720 = math.exp %719 : vector<2x16xf32>
    %721 = math.log1p %720 : vector<2x16xf32>
    %722 = arith.select %717, %715, %721 : vector<2x16xi1>, vector<2x16xf32>
    %cst_312 = arith.constant 9.99999974E-5 : f32
    %723 = vector.broadcast %cst_312 : f32 to vector<2x16xf32>
    %724 = arith.addf %722, %723 : vector<2x16xf32>
    %c0_313 = arith.constant 0 : index
    %c0_314 = arith.constant 0 : index
    %725 = vector.load %arg14[%c0_313, %c0_314] : memref<2x16xf32, #tpu.memory_space<vmem>>, vector<2x16xf32>
    %726 = arith.mulf %724, %725 : vector<2x16xf32>
    %727 = arith.addf %714, %726 : vector<2x16xf32>
    %728 = tpu.concatenate %727, %714, %724 in 1 : vector<2x16xf32>, vector<2x16xf32>, vector<2x16xf32> -> vector<2x48xf32>
    %c0_315 = arith.constant 0 : index
    %c0_316 = arith.constant 0 : index
    %729 = vector.load %arg15[%c0_315, %c0_316] : memref<2x48xf32, #tpu.memory_space<vmem>>, vector<2x48xf32>
    tpu.vector_store %arg15[%c0_315, %c0_316], %728 {strides = array<i32>} : memref<2x48xf32, #tpu.memory_space<vmem>>, vector<2x48xf32>,
    return
  }
}

</mosaic_0001>

<bundles_post_ra>
// kernel: encoder_forward.1
= control target key start
LH: loop header
LB: loop body
LE: loop exit
PB: predicated region body
PF: predicated region fallthrough
CT: control target
= control target key end

     0   :  { %20 = vsyncpa [#allocation5], 0  ;;  %s12127_s0 = inlined_call_operand.vmem [shape: bf16[16,32], index: 0, kind: input, shape index: {}]   ;;  %s12128_s1 = inlined_call_operand.hbm [shape: bf16[32,1024], index: 1, kind: input, shape index: {}]   ;;  %s12129_s2 = inlined_call_operand.hbm [shape: f32[1,1024], index: 2, kind: input, shape index: {}]   ;;  %s12130_s3 = inlined_call_operand.hbm [shape: bf16[256,1024], index: 3, kind: input, shape index: {}]   ;;  %s12131_s4 = inlined_call_operand.vmem [shape: bf16[128,512], index: 4, kind: input, shape index: {}]   ;;  %s12132_s5 = inlined_call_operand.hbm [shape: bf16[128,512], index: 5, kind: input, shape index: {}]   ;;  %s12133_s6 = inlined_call_operand.vmem [shape: f32[1,512], index: 6, kind: input, shape index: {}]   ;;  %s12134_s7 = inlined_call_operand.hbm [shape: bf16[128,512], index: 7, kind: input, shape index: {}]   ;;  %s12135_s8 = inlined_call_operand.hbm [shape: bf16[128,512], index: 8, kind: input, shape index: {}]   ;;  %s12136_s9 = inlined_call_operand.hbm [shape: bf16[128,512], index: 9, kind: input, shape index: {}]   ;;  %s12137_s10 = inlined_call_operand.hbm [shape: f32[1,512], index: 10, kind: input, shape index: {}]   ;;  %s12138_s11 = inlined_call_operand.vmem [shape: bf16[128,32], index: 11, kind: input, shape index: {}]   ;;  %s12139_s12 = inlined_call_operand.vmem [shape: bf16[128,32], index: 12, kind: input, shape index: {}]   ;;  %s12140_s13 = inlined_call_operand.vmem [shape: f32[1,32], index: 13, kind: input, shape index: {}]   ;;  %s12141_s14 = inlined_call_operand.hbm [shape: f32[2,16], index: 14, kind: input, shape index: {}]   ;;  %s12142_s15 = inlined_call_operand.vmem [shape: f32[2,48], index: 15, kind: output, shape index: {}]  }
   0x1   :  { %21 = vsyncpa [#allocation7], 0 }
   0x2   :  { %22 = vsyncpa [#allocation10], 0 }
   0x3   :  { %23 = vsyncpa [#allocation13], 0 }
   0x4   :  { %24 = vsyncpa [#allocation16], 0  ;;  %s8642_s18 = smov [#allocation6]   ;;  %s8643_s20 = smov [#allocation9]  }
   0x5   :  { %s45_s19 = sshll.u32 %s8642_s18, 4  ;;  %s68_s21 = sshll.u32 %s8643_s20, 4  ;;  %s46_s19 = int_to_ptr.vmem [resolvable:$true] %s45_s19  ;;  %s69_s21 = int_to_ptr.vmem [resolvable:$true] %s68_s21 }
   0x6   :  { %s8460_s22 = scalar_lea.vmem %s46_s19, 128  ;;  %p8465_p1 = scmp.lt.s32.totalorder %s46_s19, %s46_s19 }
   0x7   :  { %p8461_p0 = scmp.ne.s32.totalorder %s46_s19, %s8460_s22  ;;  %p8466_p2 = scmp.lt.s32.totalorder %s8460_s22, %s8460_s22 }
   0x9   :  { %p8467_p3 = por %p8466_p2, %p8465_p1 }
   0xb   :  { %p8468_p4 = pnand %p8467_p3, %p8461_p0 }
   0xd   :  { %8471 = shalt.err (!%p8468_p4)
}
   0xe   :  { %48 = dma.hbm_to_vmem [thread:$0]  %s12129_s2, 128, %s46_s19, [#allocation7]  }
   0xf   :  { %s8480_s25 = scalar_lea.vmem %s69_s21, 4096  ;;  %p8485_p6 = scmp.lt.s32.totalorder %s69_s21, %s69_s21 }
  0x10   :  { %p8481_p5 = scmp.ne.s32.totalorder %s69_s21, %s8480_s25  ;;  %p8486_p7 = scmp.lt.s32.totalorder %s8480_s25, %s8480_s25 }
  0x12   :  { %p8487_p8 = por %p8486_p7, %p8485_p6 }
  0x14   :  { %p8488_p9 = pnand %p8487_p8, %p8481_p5 }
  0x16   :  { %8491 = shalt.err (!%p8488_p9)
}
  0x17   :  { %s8644_s26 = smov 256   ;;  %s8645_s27 = smov 16  }
  0x18   :  { %74 = dma.hbm_to_vmem [thread:$0]  %s12132_s5, 4096, %s69_s21, [#allocation10], %s8644_s26, %s8644_s26, %s8645_s27  }
  0x19   :  { %s8646_s30 = smov [#allocation12]   ;;  %s8647_s17 = smov [#allocation15]  }
  0x1a   :  { %s94_s16 = sshll.u32 %s8646_s30, 4  ;;  %s119_s2 = sshll.u32 %s8647_s17, 4  ;;  %s95_s16 = int_to_ptr.vmem [resolvable:$true] %s94_s16  ;;  %s120_s2 = int_to_ptr.vmem [resolvable:$true] %s119_s2 }
  0x1b   :  { %s8500_s18 = scalar_lea.vmem %s95_s16, 4096  ;;  %p8505_p11 = scmp.lt.s32.totalorder %s95_s16, %s95_s16 }
  0x1c   :  { %p8501_p10 = scmp.ne.s32.totalorder %s95_s16, %s8500_s18  ;;  %p8506_p12 = scmp.lt.s32.totalorder %s8500_s18, %s8500_s18 }
  0x1e   :  { %p8507_p13 = por %p8506_p12, %p8505_p11 }
  0x20   :  { %p8508_p0 = pnand %p8507_p13, %p8501_p10 }
  0x22   :  { %8511 = shalt.err (!%p8508_p0)
}
  0x23   :  { %100 = dma.hbm_to_vmem [thread:$0]  %s12135_s8, 4096, %s95_s16, [#allocation13], %s8644_s26, %s8644_s26, %s8645_s27  }
  0x24   :  { %s8520_s5 = scalar_lea.vmem %s120_s2, 64  ;;  %p8525_p2 = scmp.lt.s32.totalorder %s120_s2, %s120_s2 }
  0x25   :  { %p8521_p1 = scmp.ne.s32.totalorder %s120_s2, %s8520_s5  ;;  %p8526_p3 = scmp.lt.s32.totalorder %s8520_s5, %s8520_s5 }
  0x27   :  { %p8527_p4 = por %p8526_p3, %p8525_p2 }
  0x29   :  { %p8528_p5 = pnand %p8527_p4, %p8521_p1 }
  0x2b   :  { %8531 = shalt.err (!%p8528_p5)
}
  0x2c   :  { %122 = dma.hbm_to_vmem [thread:$0]  %s12137_s10, 64, %s120_s2, [#allocation16]  }
  0x2d   :  { %s8648_s23 = smov [#allocation4]  }
  0x2e   :  { %s32_s24 = sshll.u32 %s8648_s23, 4  ;;  %s33_s24 = int_to_ptr.vmem [resolvable:$true] %s32_s24 }
  0x2f   :  { %s8540_s25 = scalar_lea.vmem %s33_s24, 2048  ;;  %p8545_p7 = scmp.lt.s32.totalorder %s33_s24, %s33_s24 }
  0x30   :  { %p8541_p6 = scmp.ne.s32.totalorder %s33_s24, %s8540_s25  ;;  %p8546_p8 = scmp.lt.s32.totalorder %s8540_s25, %s8540_s25 }
  0x32   :  { %p8547_p9 = por %p8546_p8, %p8545_p7 }
  0x34   :  { %p8548_p10 = pnand %p8547_p9, %p8541_p6 }
  0x36   :  { %8551 = shalt.err (!%p8548_p10)
}
  0x37   :  { %s8649_s8 = smov 512   ;;  %s8650_s28 = smov 32  }
  0x38   :  { %38 = dma.hbm_to_vmem [thread:$0]  %s12128_s1, 2048, %s33_s24, [#allocation5], %s8649_s8, %s8649_s8, %s8650_s28  }
  0x39   :  { %s8651_s16 = smov [#allocation8]   ;;  %s8652_s10 = smov [#allocation11]  }
  0x3a   :  { %s54_s17 = sshll.u32 %s8651_s16, 4  ;;  %s82_s2 = sshll.u32 %s8652_s10, 4  ;;  %s55_s17 = int_to_ptr.vmem [resolvable:$true] %s54_s17  ;;  %s83_s2 = int_to_ptr.vmem [resolvable:$true] %s82_s2 }
  0x3b   :  { %s8560_s18 = scalar_lea.vmem %s55_s17, 16384  ;;  %p8565_p12 = scmp.lt.s32.totalorder %s55_s17, %s55_s17 }
  0x3c   :  { %p8561_p11 = scmp.ne.s32.totalorder %s55_s17, %s8560_s18  ;;  %p8566_p13 = scmp.lt.s32.totalorder %s8560_s18, %s8560_s18 }
  0x3e   :  { %p8567_p0 = por %p8566_p13, %p8565_p12 }
  0x40   :  { %p8568_p1 = pnand %p8567_p0, %p8561_p11 }
  0x42   :  { %8571 = shalt.err (!%p8568_p1)
}
  0x43   :  { %60 = dma.hbm_to_vmem [thread:$0]  %s12130_s3, 16384, %s55_s17, [#allocation7], %s8649_s8, %s8649_s8, %s8650_s28  }
  0x44   :  { %s8580_s5 = scalar_lea.vmem %s83_s2, 4096  ;;  %p8585_p3 = scmp.lt.s32.totalorder %s83_s2, %s83_s2 }
  0x45   :  { %p8581_p2 = scmp.ne.s32.totalorder %s83_s2, %s8580_s5  ;;  %p8586_p4 = scmp.lt.s32.totalorder %s8580_s5, %s8580_s5 }
  0x47   :  { %p8587_p5 = por %p8586_p4, %p8585_p3 }
  0x49   :  { %p8588_p6 = pnand %p8587_p5, %p8581_p2 }
  0x4b   :  { %8591 = shalt.err (!%p8588_p6)
}
  0x4c   :  { %88 = dma.hbm_to_vmem [thread:$0]  %s12134_s7, 4096, %s83_s2, [#allocation10], %s8644_s26, %s8644_s26, %s8645_s27  }
  0x4d   :  { %s8653_s22 = smov [#allocation14]   ;;  %s8654_s24 = smov [#allocation17]  }
  0x4e   :  { %s106_s23 = sshll.u32 %s8653_s22, 4  ;;  %s135_s3 = sshll.u32 %s8654_s24, 4  ;;  %s107_s23 = int_to_ptr.vmem [resolvable:$true] %s106_s23  ;;  %s136_s3 = int_to_ptr.vmem [resolvable:$true] %s135_s3 }
  0x4f   :  { %s8600_s25 = scalar_lea.vmem %s107_s23, 4096  ;;  %p8605_p8 = scmp.lt.s32.totalorder %s107_s23, %s107_s23 }
  0x50   :  { %p8601_p7 = scmp.ne.s32.totalorder %s107_s23, %s8600_s25  ;;  %p8606_p9 = scmp.lt.s32.totalorder %s8600_s25, %s8600_s25 }
  0x52   :  { %p8607_p10 = por %p8606_p9, %p8605_p8 }
  0x54   :  { %p8608_p11 = pnand %p8607_p10, %p8601_p7 }
  0x56   :  { %8611 = shalt.err (!%p8608_p11)
}
  0x57   :  { %112 = dma.hbm_to_vmem [thread:$0]  %s12136_s9, 4096, %s107_s23, [#allocation13], %s8644_s26, %s8644_s26, %s8645_s27  }
  0x58   :  { %s8620_s7 = scalar_lea.vmem %s136_s3, 32  ;;  %p8625_p13 = scmp.lt.s32.totalorder %s136_s3, %s136_s3 }
  0x59   :  { %p8621_p12 = scmp.ne.s32.totalorder %s136_s3, %s8620_s7  ;;  %p8626_p0 = scmp.lt.s32.totalorder %s8620_s7, %s8620_s7 }
  0x5b   :  { %p8627_p1 = por %p8626_p0, %p8625_p13 }
  0x5d   :  { %p8628_p2 = pnand %p8627_p1, %p8621_p12 }
  0x5f   :  { %8631 = shalt.err (!%p8628_p2)
}
  0x60   :  { %138 = dma.hbm_to_vmem [thread:$0]  %s12141_s14, 32, %s136_s3, [#allocation16]  }
  0x61   :  { %8632 = dma.done.wait [#allocation5], 2048  }
  0x62   :  { %8633 = vsyncadd [#allocation5], 4294965248 }
  0x63   :  { %8634 = dma.done.wait [#allocation7], 16512  }
  0x64   :  { %8635 = vsyncadd [#allocation7], 4294950784 }
  0x65   :  { %8636 = dma.done.wait [#allocation10], 8192  }
  0x66   :  { %8637 = vsyncadd [#allocation10], 4294959104 }
  0x67   :  { %8638 = dma.done.wait [#allocation13], 8192  }
  0x68   :  { %8639 = vsyncadd [#allocation13], 4294959104 }
  0x69   :  { %8640 = dma.done.wait [#allocation16], 96  }
  0x6a   :  { %8641 = vsyncadd [#allocation16], 4294967200  ;;  %v12143_v0 = vmov 0   ;;  %v177_v1 = vld [vmem:[#allocation4 + $0x40] sm:$0xff]  ;;  %v178_v3 = vld [vmem:[#allocation4 + $0x48] sm:$0xff]  ;;  %vm312_vm0 = vcmask 261120  }
  0x6b   :  { %348 = vmatprep.mubr.bf16.mxu0 %v12143_v0  ;;  %391 = vmatprep.mubr.bf16.mxu1 %v12143_v0  ;;  %v181_v2 = vld [vmem:[#allocation4 + $0x60] sm:$0xff]  ;;  %v182_v5 = vld [vmem:[#allocation4 + $0x68] sm:$0xff]  ;;  %v179_v15 = vld [vmem:[#allocation4 + $0x50] sm:$0xff]  ;;  %vm8657_vm1 = vmmov 0   ;;  %vm7304_vm4 = vcmask 130048   ;;  %vm7307_vm5 = vcmask 386048  }
  0x6c   :  { %v7328_v4 = vcombine.high %v177_v1, %v181_v2  ;;  %v7327_v6 = vcombine.low %v177_v1, %v181_v2  ;;  %v169_v7 = vld [vmem:[#allocation4] sm:$0xff]  ;;  %v7330_v9 = vcombine.high %v178_v3, %v182_v5  ;;  %v7329_v10 = vcombine.low %v178_v3, %v182_v5  ;;  %v170_v12 = vld [vmem:[#allocation4 + $0x8] sm:$0xff]  ;;  %v183_v17 = vld [vmem:[#allocation4 + $0x70] sm:$0xff] }
  0x6d   :  { %v173_v8 = vld [vmem:[#allocation4 + $0x20] sm:$0xff]  ;;  %v174_v13 = vld [vmem:[#allocation4 + $0x28] sm:$0xff]  ;;  %v180_v18 = vld [vmem:[#allocation4 + $0x58] sm:$0xff]  ;;  %v7332_v21 = vcombine.high %v179_v15, %v183_v17  ;;  %v7331_v28 = vcombine.low %v179_v15, %v183_v17 }
  0x6e   :  { %v7320_v11 = vcombine.high %v169_v7, %v173_v8  ;;  %328 = vmatprep.subr.bf16.mxu0 %v7328_v4  ;;  %v7322_v14 = vcombine.high %v170_v12, %v174_v13  ;;  %371 = vmatprep.subr.bf16.mxu1 %v7330_v9  ;;  %v7319_v16 = vcombine.low %v169_v7, %v173_v8  ;;  %v184_v19 = vld [vmem:[#allocation4 + $0x78] sm:$0xff]  ;;  %v171_v23 = vld [vmem:[#allocation4 + $0x10] sm:$0xff]  ;;  %v7719_v25 = vld [vmem:[%s12127_s0] sm:$0xff]  }
  0x6f   :  { %329 = vmatpush1.bf16.msra.mxu0 %v7327_v6  ;;  %372 = vmatpush1.bf16.msra.mxu1 %v7329_v10  ;;  %v7321_v20 = vcombine.low %v170_v12, %v174_v13  ;;  %v7334_v22 = vcombine.high %v180_v18, %v184_v19  ;;  %v175_v24 = vld [vmem:[#allocation4 + $0x30] sm:$0xff]  ;;  %v172_v26 = vld [vmem:[#allocation4 + $0x18] sm:$0xff]  ;;  %v7333_v29 = vcombine.low %v180_v18, %v184_v19  ;;  %v590_v32 = vld [vmem:[#allocation8 + $0x1c0] sm:$0xff] }
  0x70   :  { %330 = vmatprep.subr.bf16.mxu0 %v7320_v11  ;;  %373 = vmatprep.subr.bf16.mxu1 %v7322_v14  ;;  %v176_v27 = vld [vmem:[#allocation4 + $0x38] sm:$0xff]  ;;  %v7324_v30 = vcombine.high %v171_v23, %v175_v24  ;;  %v594_v33 = vld [vmem:[#allocation8 + $0x1e0] sm:$0xff]  ;;  %v591_v34 = vld [vmem:[#allocation8 + $0x1c8] sm:$0xff]  ;;  %v7323_v36 = vcombine.low %v171_v23, %v175_v24 }
  0x71   :  { %v7326_v31 = vcombine.high %v172_v26, %v176_v27  ;;  %v595_v35 = vld [vmem:[#allocation8 + $0x1e8] sm:$0xff]  ;;  %v7325_v37 = vcombine.low %v172_v26, %v176_v27  ;;  %v8785_v38 = vcombine.high %v590_v32, %v594_v33  ;;  %v582_v40 = vld [vmem:[#allocation8 + $0x180] sm:$0xff]  ;;  %v8791_v44 = vcombine.low %v590_v32, %v594_v33 }
  0x72   :  { %v8788_v39 = vcombine.high %v591_v34, %v595_v35  ;;  %v586_v41 = vld [vmem:[#allocation8 + $0x1a0] sm:$0xff]  ;;  %v583_v42 = vld [vmem:[#allocation8 + $0x188] sm:$0xff]  ;;  %v8794_v45 = vcombine.low %v591_v34, %v595_v35 }
  0x73   :  { %331 = vmatpush1.bf16.msra.mxu0 %v7319_v16  ;;  %374 = vmatpush1.bf16.msra.mxu1 %v7321_v20  ;;  %v587_v43 = vld [vmem:[#allocation8 + $0x1a8] sm:$0xff]  ;;  %v8796_v46 = vcombine.high %v582_v40, %v586_v41  ;;  %v574_v48 = vld [vmem:[#allocation8 + $0x140] sm:$0xff]  ;;  %v8804_v52 = vcombine.low %v582_v40, %v586_v41 }
  0x74   :  { %414 = vmatprep.subr.bf16.mxu0 %v7332_v21  ;;  %457 = vmatprep.subr.bf16.mxu1 %v7334_v22  ;;  %v8799_v47 = vcombine.high %v583_v42, %v587_v43  ;;  %v578_v49 = vld [vmem:[#allocation8 + $0x160] sm:$0xff]  ;;  %v575_v50 = vld [vmem:[#allocation8 + $0x148] sm:$0xff]  ;;  %v8808_v53 = vcombine.low %v583_v42, %v587_v43 }
  0x75   :  { %v579_v51 = vld [vmem:[#allocation8 + $0x168] sm:$0xff]  ;;  %v8810_v54 = vcombine.high %v574_v48, %v578_v49  ;;  %v566_v56 = vld [vmem:[#allocation8 + $0x100] sm:$0xff]  ;;  %v8818_v60 = vcombine.low %v574_v48, %v578_v49 }
  0x76   :  { %7335 = vmatmul.mubr.msk.bf16.vlgmr.msra.gmra.mxu0 %vm312_vm0, %v7719_v25  ;;  %7336 = vmatmul.mubr.msk.bf16.vlgmr.msra.gmra.mxu1 %vm312_vm0, %v7719_v25  ;;  %v8813_v55 = vcombine.high %v575_v50, %v579_v51  ;;  %v570_v57 = vld [vmem:[#allocation8 + $0x120] sm:$0xff]  ;;  %v567_v58 = vld [vmem:[#allocation8 + $0x108] sm:$0xff]  ;;  %v8822_v61 = vcombine.low %v575_v50, %v579_v51 }
  0x77   :  { %415 = vmatpush1.bf16.msra.mxu0 %v7331_v28  ;;  %458 = vmatpush1.bf16.msra.mxu1 %v7333_v29  ;;  %v571_v59 = vld [vmem:[#allocation8 + $0x128] sm:$0xff]  ;;  %v8824_v62 = vcombine.high %v566_v56, %v570_v57  ;;  %v558_v1 = vld [vmem:[#allocation8 + $0xc0] sm:$0xff]  ;;  %v8830_v5 = vcombine.low %v566_v56, %v570_v57 }
  0x78   :  { %416 = vmatprep.subr.bf16.mxu0 %v7324_v30  ;;  %459 = vmatprep.subr.bf16.mxu1 %v7326_v31  ;;  %v8827_v63 = vcombine.high %v567_v58, %v571_v59  ;;  %v562_v2 = vld [vmem:[#allocation8 + $0xe0] sm:$0xff]  ;;  %v559_v3 = vld [vmem:[#allocation8 + $0xc8] sm:$0xff]  ;;  %v8834_v6 = vcombine.low %v567_v58, %v571_v59 }
  0x79   :  { %434 = vmatprep.mubr.bf16.mxu0 %v12143_v0  ;;  %477 = vmatprep.mubr.bf16.mxu1 %v12143_v0  ;;  %v563_v4 = vld [vmem:[#allocation8 + $0xe8] sm:$0xff]  ;;  %v8836_v7 = vcombine.high %v558_v1, %v562_v2  ;;  %v550_v9 = vld [vmem:[#allocation8 + $0x80] sm:$0xff]  ;;  %v8842_v13 = vcombine.low %v558_v1, %v562_v2 }
  0x7a   :  { %v8839_v8 = vcombine.high %v559_v3, %v563_v4  ;;  %v554_v10 = vld [vmem:[#allocation8 + $0xa0] sm:$0xff]  ;;  %v551_v11 = vld [vmem:[#allocation8 + $0x88] sm:$0xff]  ;;  %v8846_v14 = vcombine.low %v559_v3, %v563_v4 }
  0x7b   :  { %417 = vmatpush1.bf16.msra.mxu0 %v7323_v36  ;;  %460 = vmatpush1.bf16.msra.mxu1 %v7325_v37  ;;  %v555_v12 = vld [vmem:[#allocation8 + $0xa8] sm:$0xff]  ;;  %12584 = vst [vmem:[#allocation24_spill] sm:$0xff] %v8842_v13  ;;  %v8848_v15 = vcombine.high %v550_v9, %v554_v10  ;;  %v542_v17 = vld [vmem:[#allocation8 + $0x40] sm:$0xff]  ;;  %v8854_v21 = vcombine.low %v550_v9, %v554_v10 }
  0x7c   :  { %1374 = vmatprep.subr.bf16.mxu0 %v8785_v38  ;;  %1415 = vmatprep.subr.bf16.mxu1 %v8788_v39  ;;  %12583 = vst [vmem:[#allocation23_spill] sm:$0xff] %v8839_v8  ;;  %12585 = vst [vmem:[#allocation25_spill] sm:$0xff] %v8846_v14  ;;  %v8851_v16 = vcombine.high %v551_v11, %v555_v12  ;;  %v546_v18 = vld [vmem:[#allocation8 + $0x60] sm:$0xff]  ;;  %v543_v19 = vld [vmem:[#allocation8 + $0x48] sm:$0xff]  ;;  %v8858_v22 = vcombine.low %v551_v11, %v555_v12 }
  0x7d   :  { %12586 = vst [vmem:[#allocation26_spill] sm:$0xff] %v8848_v15  ;;  %v547_v20 = vld [vmem:[#allocation8 + $0x68] sm:$0xff]  ;;  %12588 = vst [vmem:[#allocation28_spill] sm:$0xff] %v8854_v21  ;;  %v8860_v23 = vcombine.high %v542_v17, %v546_v18  ;;  %v538_v26 = vld [vmem:[#allocation8 + $0x20] sm:$0xff]  ;;  %v8866_v29 = vcombine.low %v542_v17, %v546_v18 }
  0x7e   :  { %7337 = vmatmul.mubr.msk.bf16.vlgmr.msra.gmra.mxu0 %vm312_vm0, %v7719_v25  ;;  %7338 = vmatmul.mubr.msk.bf16.vlgmr.msra.gmra.mxu1 %vm312_vm0, %v7719_v25  ;;  %12587 = vst [vmem:[#allocation27_spill] sm:$0xff] %v8851_v16  ;;  %12589 = vst [vmem:[#allocation29_spill] sm:$0xff] %v8858_v22  ;;  %v8863_v24 = vcombine.high %v543_v19, %v547_v20  ;;  %v534_v25 = vld [vmem:[#allocation8] sm:$0xff]  ;;  %v535_v27 = vld [vmem:[#allocation8 + $0x8] sm:$0xff]  ;;  %v8870_v30 = vcombine.low %v543_v19, %v547_v20 }
  0x7f   :  { %1375 = vmatpush1.bf16.msra.mxu0 %v8791_v44  ;;  %1416 = vmatpush1.bf16.msra.mxu1 %v8794_v45  ;;  %12590 = vst [vmem:[#allocation30_spill] sm:$0xff] %v8860_v23  ;;  %v539_v28 = vld [vmem:[#allocation8 + $0x28] sm:$0xff]  ;;  %12592 = vst [vmem:[#allocation32_spill] sm:$0xff] %v8866_v29  ;;  %v8872_v31 = vcombine.high %v534_v25, %v538_v26  ;;  %v654_v33 = vld [vmem:[#allocation8 + $0x3c0] sm:$0xff]  ;;  %v8878_v37 = vcombine.low %v534_v25, %v538_v26 }
  0x80   :  { %1376 = vmatprep.subr.bf16.mxu0 %v8796_v46  ;;  %1417 = vmatprep.subr.bf16.mxu1 %v8799_v47  ;;  %12591 = vst [vmem:[#allocation31_spill] sm:$0xff] %v8863_v24  ;;  %12593 = vst [vmem:[#allocation33_spill] sm:$0xff] %v8870_v30  ;;  %v8875_v32 = vcombine.high %v535_v27, %v539_v28  ;;  %v658_v34 = vld [vmem:[#allocation8 + $0x3e0] sm:$0xff]  ;;  %v655_v35 = vld [vmem:[#allocation8 + $0x3c8] sm:$0xff]  ;;  %v8882_v40 = vcombine.low %v535_v27, %v539_v28 }
  0x81   :  { %1406 = vmatprep.mubr.bf16.mxu0 %v12143_v0  ;;  %1447 = vmatprep.mubr.bf16.mxu1 %v12143_v0  ;;  %12594 = vst [vmem:[#allocation34_spill] sm:$0xff] %v8872_v31  ;;  %v659_v36 = vld [vmem:[#allocation8 + $0x3e8] sm:$0xff]  ;;  %12596 = vst [vmem:[#allocation36_spill] sm:$0xff] %v8878_v37  ;;  %v8884_v41 = vcombine.high %v654_v33, %v658_v34  ;;  %v646_v43 = vld [vmem:[#allocation8 + $0x380] sm:$0xff]  ;;  %v8890_v51 = vcombine.low %v654_v33, %v658_v34 }
  0x82   :  { %12595 = vst [vmem:[#allocation35_spill] sm:$0xff] %v8875_v32  ;;  %12597 = vst [vmem:[#allocation37_spill] sm:$0xff] %v8882_v40  ;;  %v8887_v42 = vcombine.high %v655_v35, %v659_v36  ;;  %v650_v48 = vld [vmem:[#allocation8 + $0x3a0] sm:$0xff]  ;;  %v647_v49 = vld [vmem:[#allocation8 + $0x388] sm:$0xff]  ;;  %v8894_v58 = vcombine.low %v655_v35, %v659_v36 }
  0x83   :  { %1377 = vmatpush1.bf16.msra.mxu0 %v8804_v52  ;;  %1418 = vmatpush1.bf16.msra.mxu1 %v8808_v53  ;;  %12598 = vst [vmem:[#allocation38_spill] sm:$0xff] %v8884_v41  ;;  %v651_v50 = vld [vmem:[#allocation8 + $0x3a8] sm:$0xff]  ;;  %12600 = vst [vmem:[#allocation40_spill] sm:$0xff] %v8890_v51  ;;  %v638_v56 = vld [vmem:[#allocation8 + $0x340] sm:$0xff]  ;;  %v8896_v59 = vcombine.high %v646_v43, %v650_v48  ;;  %v8902_v4 = vcombine.low %v646_v43, %v650_v48 }
  0x84   :  { %1378 = vmatprep.subr.bf16.mxu0 %v8810_v54  ;;  %1419 = vmatprep.subr.bf16.mxu1 %v8813_v55  ;;  %12599 = vst [vmem:[#allocation39_spill] sm:$0xff] %v8887_v42  ;;  %v642_v57 = vld [vmem:[#allocation8 + $0x360] sm:$0xff]  ;;  %12601 = vst [vmem:[#allocation41_spill] sm:$0xff] %v8894_v58  ;;  %v639_v1 = vld [vmem:[#allocation8 + $0x348] sm:$0xff]  ;;  %v8899_v3 = vcombine.high %v647_v49, %v651_v50  ;;  %v8906_v11 = vcombine.low %v647_v49, %v651_v50 }
  0x85   :  { %12602 = vst [vmem:[#allocation42_spill] sm:$0xff] %v8896_v59  ;;  %v643_v2 = vld [vmem:[#allocation8 + $0x368] sm:$0xff]  ;;  %12604 = vst [vmem:[#allocation44_spill] sm:$0xff] %v8902_v4  ;;  %v630_v9 = vld [vmem:[#allocation8 + $0x300] sm:$0xff]  ;;  %v8908_v12 = vcombine.high %v638_v56, %v642_v57  ;;  %v8914_v20 = vcombine.low %v638_v56, %v642_v57 }
  0x86   :  { %12603 = vst [vmem:[#allocation43_spill] sm:$0xff] %v8899_v3  ;;  %v634_v10 = vld [vmem:[#allocation8 + $0x320] sm:$0xff]  ;;  %12605 = vst [vmem:[#allocation45_spill] sm:$0xff] %v8906_v11  ;;  %v631_v17 = vld [vmem:[#allocation8 + $0x308] sm:$0xff]  ;;  %v8911_v19 = vcombine.high %v639_v1, %v643_v2  ;;  %v8918_v27 = vcombine.low %v639_v1, %v643_v2 }
  0x87   :  { %1379 = vmatpush1.bf16.msra.mxu0 %v8818_v60  ;;  %1420 = vmatpush1.bf16.msra.mxu1 %v8822_v61  ;;  %12606 = vst [vmem:[#allocation46_spill] sm:$0xff] %v8908_v12  ;;  %v635_v18 = vld [vmem:[#allocation8 + $0x328] sm:$0xff]  ;;  %12608 = vst [vmem:[#allocation48_spill] sm:$0xff] %v8914_v20  ;;  %v622_v25 = vld [vmem:[#allocation8 + $0x2c0] sm:$0xff]  ;;  %v8920_v28 = vcombine.high %v630_v9, %v634_v10  ;;  %v8926_v36 = vcombine.low %v630_v9, %v634_v10 }
  0x88   :  { %1380 = vmatprep.subr.bf16.mxu0 %v8824_v62  ;;  %1421 = vmatprep.subr.bf16.mxu1 %v8827_v63  ;;  %12607 = vst [vmem:[#allocation47_spill] sm:$0xff] %v8911_v19  ;;  %v626_v26 = vld [vmem:[#allocation8 + $0x2e0] sm:$0xff]  ;;  %12609 = vst [vmem:[#allocation49_spill] sm:$0xff] %v8918_v27  ;;  %v623_v33 = vld [vmem:[#allocation8 + $0x2c8] sm:$0xff]  ;;  %v8923_v35 = vcombine.high %v631_v17, %v635_v18  ;;  %v8930_v49 = vcombine.low %v631_v17, %v635_v18 }
  0x89   :  { %12610 = vst [vmem:[#allocation50_spill] sm:$0xff] %v8920_v28  ;;  %v627_v34 = vld [vmem:[#allocation8 + $0x2e8] sm:$0xff]  ;;  %12612 = vst [vmem:[#allocation52_spill] sm:$0xff] %v8926_v36  ;;  %v614_v43 = vld [vmem:[#allocation8 + $0x280] sm:$0xff]  ;;  %v8932_v50 = vcombine.high %v622_v25, %v626_v26  ;;  %v8938_v2 = vcombine.low %v622_v25, %v626_v26 }
  0x8a   :  { %12611 = vst [vmem:[#allocation51_spill] sm:$0xff] %v8923_v35  ;;  %v618_v48 = vld [vmem:[#allocation8 + $0x2a0] sm:$0xff]  ;;  %12613 = vst [vmem:[#allocation53_spill] sm:$0xff] %v8930_v49  ;;  %v615_v56 = vld [vmem:[#allocation8 + $0x288] sm:$0xff]  ;;  %v8935_v1 = vcombine.high %v623_v33, %v627_v34  ;;  %v8942_v17 = vcombine.low %v623_v33, %v627_v34 }
  0x8b   :  { %1381 = vmatpush1.bf16.msra.mxu0 %v8830_v5  ;;  %1422 = vmatpush1.bf16.msra.mxu1 %v8834_v6  ;;  %12614 = vst [vmem:[#allocation54_spill] sm:$0xff] %v8932_v50  ;;  %v619_v57 = vld [vmem:[#allocation8 + $0x2a8] sm:$0xff]  ;;  %12616 = vst [vmem:[#allocation56_spill] sm:$0xff] %v8938_v2  ;;  %v606_v9 = vld [vmem:[#allocation8 + $0x240] sm:$0xff]  ;;  %v8944_v18 = vcombine.high %v614_v43, %v618_v48  ;;  %v8950_v25 = vcombine.low %v614_v43, %v618_v48 }
  0x8c   :  { %1382 = vmatprep.subr.bf16.mxu0 %v8836_v7  ;;  %1423 = vmatprep.subr.bf16.mxu1 %v8839_v8  ;;  %12615 = vst [vmem:[#allocation55_spill] sm:$0xff] %v8935_v1  ;;  %v610_v10 = vld [vmem:[#allocation8 + $0x260] sm:$0xff]  ;;  %12617 = vst [vmem:[#allocation57_spill] sm:$0xff] %v8942_v17  ;;  %v607_v0 = vld [vmem:[#allocation8 + $0x248] sm:$0xff]  ;;  %v8954_v33 = vcombine.low %v615_v56, %v619_v57 }
  0x8d   :  { %12618 = vst [vmem:[#allocation58_spill] sm:$0xff] %v8944_v18  ;;  %12620 = vst [vmem:[#allocation60_spill] sm:$0xff] %v8950_v25  ;;  %v598_v26 = vld [vmem:[#allocation8 + $0x200] sm:$0xff]  ;;  %v8956_v34 = vcombine.high %v606_v9, %v610_v10  ;;  %v8962_v43 = vcombine.low %v606_v9, %v610_v10  ;;  %v592_v48 = vld [vmem:[#allocation8 + $0x1d0] sm:$0xff] }
  0x8e   :  { %12621 = vst [vmem:[#allocation61_spill] sm:$0xff] %v8954_v33  ;;  %v584_v10 = vld [vmem:[#allocation8 + $0x190] sm:$0xff] }
  0x8f   :  { %1383 = vmatpush1.bf16.msra.mxu0 %v8842_v13  ;;  %1424 = vmatpush1.bf16.msra.mxu1 %v8846_v14  ;;  %12622 = vst [vmem:[#allocation62_spill] sm:$0xff] %v8956_v34  ;;  %12624 = vst [vmem:[#allocation64_spill] sm:$0xff] %v8962_v43 }
  0x90   :  { %1384 = vmatprep.subr.bf16.mxu0 %v8848_v15  ;;  %1425 = vmatprep.subr.bf16.mxu1 %v8851_v16 }
  0x93   :  { %1385 = vmatpush1.bf16.msra.mxu0 %v8854_v21  ;;  %1426 = vmatpush1.bf16.msra.mxu1 %v8858_v22 }
  0x94   :  { %1386 = vmatprep.subr.bf16.mxu0 %v8860_v23  ;;  %1427 = vmatprep.subr.bf16.mxu1 %v8863_v24 }
  0x97   :  { %1387 = vmatpush1.bf16.msra.mxu0 %v8866_v29  ;;  %1428 = vmatpush1.bf16.msra.mxu1 %v8870_v30 }
  0x98   :  { %1388 = vmatprep.subr.bf16.mxu0 %v8872_v31  ;;  %1429 = vmatprep.subr.bf16.mxu1 %v8875_v32 }
  0x9b   :  { %1389 = vmatpush1.bf16.msra.mxu0 %v8878_v37  ;;  %1430 = vmatpush1.bf16.msra.mxu1 %v8882_v40 }
  0x9c   :  { %1390 = vmatprep.subr.bf16.mxu0 %v8884_v41  ;;  %1431 = vmatprep.subr.bf16.mxu1 %v8887_v42 }
  0x9f   :  { %1391 = vmatpush2.bf16.msra.mxu0 %v8890_v51  ;;  %1432 = vmatpush2.bf16.msra.mxu1 %v8894_v58 }
  0xa0   :  { %1392 = vmatprep.subr.bf16.mxu0 %v8896_v59  ;;  %1433 = vmatprep.subr.bf16.mxu1 %v8899_v3  ;;  %v565_v3 = vld [vmem:[#allocation8 + $0xf8] sm:$0xff] }
  0xa3   :  { %1393 = vmatpush2.bf16.msra.mxu0 %v8902_v4  ;;  %1434 = vmatpush2.bf16.msra.mxu1 %v8906_v11  ;;  %v561_v4 = vld [vmem:[#allocation8 + $0xd8] sm:$0xff] }
  0xa4   :  { %1394 = vmatprep.subr.bf16.mxu0 %v8908_v12  ;;  %1435 = vmatprep.subr.bf16.mxu1 %v8911_v19  ;;  %v572_v19 = vld [vmem:[#allocation8 + $0x130] sm:$0xff] }
  0xa7   :  { %1395 = vmatpush2.bf16.msra.mxu0 %v8914_v20  ;;  %1436 = vmatpush2.bf16.msra.mxu1 %v8918_v27  ;;  %v187_v27 = vlaneseq }
  0xa8   :  { %1396 = vmatprep.subr.bf16.mxu0 %v8920_v28  ;;  %1437 = vmatprep.subr.bf16.mxu1 %v8923_v35  ;;  %v611_v28 = vld [vmem:[#allocation8 + $0x268] sm:$0xff]  ;;  %v8947_v35 = vcombine.high %v615_v56, %v619_v57 }
  0xa9   :  { %v8966_v56 = vcombine.low %v607_v0, %v611_v28  ;;  %v8973_v20 = vshrl.u32 %v187_v27, 7 }
  0xaa   :  { %12619 = vst [vmem:[#allocation59_spill] sm:$0xff] %v8947_v35 }
  0xab   :  { %1397 = vmatpush2.bf16.msra.mxu0 %v8926_v36  ;;  %1438 = vmatpush2.bf16.msra.mxu1 %v8930_v49  ;;  %v602_v36 = vld [vmem:[#allocation8 + $0x220] sm:$0xff]  ;;  %v603_v49 = vld [vmem:[#allocation8 + $0x228] sm:$0xff]  ;;  %12625 = vst [vmem:[#allocation65_spill] sm:$0xff] %v8966_v56 }
  0xac   :  { %1398 = vmatprep.subr.bf16.mxu0 %v8932_v50  ;;  %1439 = vmatprep.subr.bf16.mxu1 %v8935_v1  ;;  %v599_v50 = vld [vmem:[#allocation8 + $0x208] sm:$0xff]  ;;  %v8959_v1 = vcombine.high %v607_v0, %v611_v28  ;;  %v8968_v57 = vcombine.high %v598_v26, %v602_v36  ;;  %v8976_v9 = vcombine.low %v598_v26, %v602_v36  ;;  %v581_v36 = vld [vmem:[#allocation8 + $0x178] sm:$0xff] }
  0xad   :  { %v8980_v0 = vcombine.low %v599_v50, %v603_v49 }
  0xae   :  { %12623 = vst [vmem:[#allocation63_spill] sm:$0xff] %v8959_v1  ;;  %12626 = vst [vmem:[#allocation66_spill] sm:$0xff] %v8968_v57 }
  0xaf   :  { %1399 = vmatpush2.bf16.msra.mxu0 %v8938_v2  ;;  %1440 = vmatpush2.bf16.msra.mxu1 %v8942_v17  ;;  %v596_v2 = vld [vmem:[#allocation8 + $0x1f0] sm:$0xff]  ;;  %v597_v17 = vld [vmem:[#allocation8 + $0x1f8] sm:$0xff]  ;;  %12628 = vst [vmem:[#allocation68_spill] sm:$0xff] %v8976_v9  ;;  %12629 = vst [vmem:[#allocation69_spill] sm:$0xff] %v8980_v0 }
  0xb0   :  { %1400 = vmatprep.subr.bf16.mxu0 %v8944_v18  ;;  %1441 = vmatprep.subr.bf16.mxu1 %v8947_v35  ;;  %v593_v18 = vld [vmem:[#allocation8 + $0x1d8] sm:$0xff]  ;;  %v8971_v35 = vcombine.high %v599_v50, %v603_v49  ;;  %v8982_v28 = vcombine.high %v592_v48, %v596_v2  ;;  %v8992_v26 = vcombine.low %v592_v48, %v596_v2  ;;  %v576_v49 = vld [vmem:[#allocation8 + $0x150] sm:$0xff]  ;;  %v12636_v2 = vsub.s32 1, %v8973_v20 }
  0xb1   :  { %v8985_v27 = vcombine.high %v593_v18, %v597_v17  ;;  %v580_v50 = vld [vmem:[#allocation8 + $0x170] sm:$0xff]  ;;  %v12638_v48 = vmov 0  }
  0xb2   :  { %12627 = vst [vmem:[#allocation67_spill] sm:$0xff] %v8971_v35  ;;  %12630 = vst [vmem:[#allocation70_spill] sm:$0xff] %v8982_v28  ;;  %v9021_v12 = vcombine.high %v576_v49, %v580_v50 }
  0xb3   :  { %1401 = vmatpush2.bf16.msra.mxu0 %v8950_v25  ;;  %1442 = vmatpush2.bf16.msra.mxu1 %v8954_v33  ;;  %v588_v33 = vld [vmem:[#allocation8 + $0x1b0] sm:$0xff]  ;;  %12631 = vst [vmem:[#allocation71_spill] sm:$0xff] %v8985_v27  ;;  %12633 = vst [vmem:[#allocation73_spill] sm:$0xff] %v8992_v26  ;;  %v577_v25 = vld [vmem:[#allocation8 + $0x158] sm:$0xff] }
  0xb4   :  { %1402 = vmatprep.subr.bf16.mxu0 %v8956_v34  ;;  %1443 = vmatprep.subr.bf16.mxu1 %v8959_v1  ;;  %v585_v34 = vld [vmem:[#allocation8 + $0x198] sm:$0xff]  ;;  %12642 = vst [vmem:[#allocation80_spill] sm:$0xff] %v9021_v12 }
  0xb5   :  { %v589_v1 = vld [vmem:[#allocation8 + $0x1b8] sm:$0xff] }
  0xb7   :  { %1403 = vmatpush2.bf16.msra.mxu0 %v8962_v43  ;;  %1444 = vmatpush2.bf16.msra.mxu1 %v8966_v56  ;;  %v8988_v43 = vsub.s32 0, %v8973_v20  ;;  %v504_v56 = vld [vmem:[%s12133_s6] sm:$0xf] }
  0xb8   :  { %1404 = vmatprep.subr.bf16.mxu0 %v8968_v57  ;;  %1445 = vmatprep.subr.bf16.mxu1 %v8971_v35  ;;  %v8994_v57 = vcombine.low %v593_v18, %v597_v17  ;;  %v9001_v35 = vcombine.high %v584_v10, %v588_v33  ;;  %v513_v17 = vrot.slane %v504_v56, %v12636_v2  ;;  %v9015_v2 = vsub.s32 2, %v8973_v20 }
  0xb9   :  { %12632 = vst [vmem:[#allocation72_spill] sm:$0xff] %v8988_v43  ;;  %v9007_v18 = vcombine.high %v585_v34, %v589_v1 }
  0xba   :  { %12634 = vst [vmem:[#allocation74_spill] sm:$0xff] %v8994_v57  ;;  %12635 = vst [vmem:[#allocation75_spill] sm:$0xff] %v9001_v35 }
  0xbb   :  { %1405 = vmatpush2.bf16.msra.mxu0 %v8976_v9  ;;  %1446 = vmatpush2.bf16.msra.mxu1 %v8980_v0  ;;  %v509_v9 = vrot.slane %v504_v56, %v8988_v43  ;;  %12637 = vst [vmem:[#allocation76_spill] sm:$0xff] %v9007_v18  ;;  %527 = vst [vmem:[#allocation3] sm:$0xff] %v513_v17  ;;  %v568_v0 = vld [vmem:[#allocation8 + $0x110] sm:$0xff] }
  0xbc   :  { %1456 = vmatprep.subr.bf16.mxu0 %v8982_v28  ;;  %1497 = vmatprep.subr.bf16.mxu1 %v8985_v27  ;;  %531 = vst [vmem:[#allocation3 + $0x8] sm:$0xff] %v513_v17  ;;  %v9012_v28 = vcombine.low %v584_v10, %v588_v33  ;;  %12640 = vst [vmem:[#allocation78_spill] sm:$0xff] %v9015_v2  ;;  %v9019_v27 = vcombine.low %v585_v34, %v589_v1  ;;  %v573_v17 = vld [vmem:[#allocation8 + $0x138] sm:$0xff]  ;;  %v9029_v10 = vsub.s32 3, %v8973_v20  ;;  %v560_v34 = vld [vmem:[#allocation8 + $0xd0] sm:$0xff] }
  0xbd   :  { %526 = vst [vmem:[#allocation3 + $0x28] sm:$0xff] %v509_v9  ;;  %530 = vst [vmem:[#allocation3 + $0x18] sm:$0xff] %v509_v9  ;;  %v569_v9 = vld [vmem:[#allocation8 + $0x118] sm:$0xff]  ;;  %v517_v33 = vrot.slane %v504_v56, %v9015_v2  ;;  %v9033_v1 = vcombine.low %v576_v49, %v580_v50  ;;  %v9040_v11 = vcombine.high %v568_v0, %v572_v19 }
  0xbe   :  { %1407 = vmatmul.mubr.bf16.vlgmr.msra.gmra.mxu0 %v12638_v48  ;;  %1448 = vmatmul.mubr.bf16.vlgmr.msra.gmra.mxu1 %v12638_v48  ;;  %12639 = vst [vmem:[#allocation77_spill] sm:$0xff] %v9012_v28  ;;  %12641 = vst [vmem:[#allocation79_spill] sm:$0xff] %v9019_v27  ;;  %v9043_v49 = vcombine.high %v569_v9, %v573_v17  ;;  %v9046_v50 = vcombine.low %v568_v0, %v572_v19  ;;  %v544_v0 = vld [vmem:[#allocation8 + $0x50] sm:$0xff] }
  0xbf   :  { %1457 = vmatpush1.bf16.msra.mxu0 %v8992_v26  ;;  %1498 = vmatpush1.bf16.msra.mxu1 %v8994_v57  ;;  %v9024_v26 = vcombine.high %v577_v25, %v581_v36  ;;  %12644 = vst [vmem:[#allocation82_spill] sm:$0xff] %v9029_v10  ;;  %12645 = vst [vmem:[#allocation83_spill] sm:$0xff] %v9033_v1  ;;  %v9038_v57 = vcombine.low %v577_v25, %v581_v36 }
  0xc0   :  { %1458 = vmatprep.subr.bf16.mxu0 %v9001_v35  ;;  %1499 = vmatprep.subr.bf16.mxu1 %v9007_v18  ;;  %v564_v35 = vld [vmem:[#allocation8 + $0xf0] sm:$0xff]  ;;  %528 = vst [vmem:[#allocation3 + $0x10] sm:$0xff] %v517_v33  ;;  %532 = vst [vmem:[#allocation3 + $0x38] sm:$0xff] %v517_v33  ;;  %v521_v18 = vrot.slane %v504_v56, %v9029_v10  ;;  %v9050_v25 = vcombine.low %v569_v9, %v573_v17 }
  0xc1   :  { %12643 = vst [vmem:[#allocation81_spill] sm:$0xff] %v9024_v26  ;;  %1488 = vmatprep.mubr.bf16.mxu0 %v12638_v48  ;;  %1529 = vmatprep.mubr.bf16.mxu1 %v12638_v48  ;;  %12646 = vst [vmem:[#allocation84_spill] sm:$0xff] %v9038_v57  ;;  %v552_v56 = vld [vmem:[#allocation8 + $0x90] sm:$0xff]  ;;  %v9052_v36 = vcombine.high %v560_v34, %v564_v35  ;;  %v9058_v19 = vcombine.low %v560_v34, %v564_v35 }
  0xc2   :  { %12647 = vst [vmem:[#allocation85_spill] sm:$0xff] %v9040_v11  ;;  %12648 = vst [vmem:[#allocation86_spill] sm:$0xff] %v9043_v49  ;;  %v556_v33 = vld [vmem:[#allocation8 + $0xb0] sm:$0xff]  ;;  %v9062_v9 = vcombine.low %v561_v4, %v565_v3 }
  0xc3   :  { %1459 = vmatpush1.bf16.msra.mxu0 %v9012_v28  ;;  %1500 = vmatpush1.bf16.msra.mxu1 %v9019_v27  ;;  %529 = vst [vmem:[#allocation3 + $0x20] sm:$0xff] %v521_v18  ;;  %533 = vst [vmem:[#allocation3 + $0x30] sm:$0xff] %v521_v18  ;;  %v9055_v27 = vcombine.high %v561_v4, %v565_v3  ;;  %v548_v18 = vld [vmem:[#allocation8 + $0x70] sm:$0xff]  ;;  %v9064_v17 = vcombine.high %v552_v56, %v556_v33 }
  0xc4   :  { %1460 = vmatprep.subr.bf16.mxu0 %v9021_v12  ;;  %1501 = vmatprep.subr.bf16.mxu1 %v9024_v26  ;;  %12649 = vst [vmem:[#allocation87_spill] sm:$0xff] %v9046_v50  ;;  %12650 = vst [vmem:[#allocation88_spill] sm:$0xff] %v9050_v25  ;;  %v553_v12 = vld [vmem:[#allocation8 + $0x98] sm:$0xff]  ;;  %v9070_v35 = vcombine.low %v552_v56, %v556_v33  ;;  %v536_v34 = vld [vmem:[#allocation8 + $0x10] sm:$0xff]  ;;  %v9076_v4 = vcombine.high %v544_v0, %v548_v18 }
  0xc5   :  { %12651 = vst [vmem:[#allocation89_spill] sm:$0xff] %v9052_v36  ;;  %v557_v26 = vld [vmem:[#allocation8 + $0xb8] sm:$0xff]  ;;  %12652 = vst [vmem:[#allocation90_spill] sm:$0xff] %v9055_v27  ;;  %v9082_v56 = vcombine.low %v544_v0, %v548_v18  ;;  %v656_v33 = vld [vmem:[#allocation8 + $0x3d0] sm:$0xff] }
  0xc6   :  { %12653 = vst [vmem:[#allocation91_spill] sm:$0xff] %v9058_v19  ;;  %12654 = vst [vmem:[#allocation92_spill] sm:$0xff] %v9062_v9  ;;  %v9074_v3 = vcombine.low %v553_v12, %v557_v26  ;;  %v648_v18 = vld [vmem:[#allocation8 + $0x390] sm:$0xff] }
  0xc7   :  { %1461 = vmatpush1.bf16.msra.mxu0 %v9033_v1  ;;  %1502 = vmatpush1.bf16.msra.mxu1 %v9038_v57  ;;  %12655 = vst [vmem:[#allocation93_spill] sm:$0xff] %v9064_v17  ;;  %v549_v57 = vld [vmem:[#allocation8 + $0x78] sm:$0xff]  ;;  %12657 = vst [vmem:[#allocation95_spill] sm:$0xff] %v9070_v35 }
  0xc8   :  { %1462 = vmatprep.subr.bf16.mxu0 %v9040_v11  ;;  %1503 = vmatprep.subr.bf16.mxu1 %v9043_v49  ;;  %v545_v11 = vld [vmem:[#allocation8 + $0x58] sm:$0xff]  ;;  %v9067_v49 = vcombine.high %v553_v12, %v557_v26  ;;  %12658 = vst [vmem:[#allocation96_spill] sm:$0xff] %v9074_v3  ;;  %12659 = vst [vmem:[#allocation97_spill] sm:$0xff] %v9076_v4 }
  0xc9   :  { %12661 = vst [vmem:[#allocation99_spill] sm:$0xff] %v9082_v56  ;;  %v9086_v12 = vcombine.low %v545_v11, %v549_v57 }
  0xca   :  { %12656 = vst [vmem:[#allocation94_spill] sm:$0xff] %v9067_v49 }
  0xcb   :  { %1463 = vmatpush1.bf16.msra.mxu0 %v9046_v50  ;;  %1504 = vmatpush1.bf16.msra.mxu1 %v9050_v25  ;;  %v540_v50 = vld [vmem:[#allocation8 + $0x30] sm:$0xff]  ;;  %v541_v25 = vld [vmem:[#allocation8 + $0x38] sm:$0xff]  ;;  %12662 = vst [vmem:[#allocation100_spill] sm:$0xff] %v9086_v12 }
  0xcc   :  { %1464 = vmatprep.subr.bf16.mxu0 %v9052_v36  ;;  %1505 = vmatprep.subr.bf16.mxu1 %v9055_v27  ;;  %v537_v36 = vld [vmem:[#allocation8 + $0x18] sm:$0xff]  ;;  %v9079_v27 = vcombine.high %v545_v11, %v549_v57  ;;  %v9088_v26 = vcombine.high %v536_v34, %v540_v50  ;;  %v9094_v0 = vcombine.low %v536_v34, %v540_v50 }
  0xcd   :  { %v9098_v11 = vcombine.low %v537_v36, %v541_v25 }
  0xce   :  { %12660 = vst [vmem:[#allocation98_spill] sm:$0xff] %v9079_v27  ;;  %12663 = vst [vmem:[#allocation101_spill] sm:$0xff] %v9088_v26 }
  0xcf   :  { %1465 = vmatpush1.bf16.msra.mxu0 %v9058_v19  ;;  %1506 = vmatpush1.bf16.msra.mxu1 %v9062_v9  ;;  %v660_v19 = vld [vmem:[#allocation8 + $0x3f0] sm:$0xff]  ;;  %v661_v9 = vld [vmem:[#allocation8 + $0x3f8] sm:$0xff]  ;;  %12665 = vst [vmem:[#allocation103_spill] sm:$0xff] %v9094_v0  ;;  %12666 = vst [vmem:[#allocation104_spill] sm:$0xff] %v9098_v11 }
  0xd0   :  { %1466 = vmatprep.subr.bf16.mxu0 %v9064_v17  ;;  %1507 = vmatprep.subr.bf16.mxu1 %v9067_v49  ;;  %v657_v17 = vld [vmem:[#allocation8 + $0x3d8] sm:$0xff]  ;;  %v9091_v49 = vcombine.high %v537_v36, %v541_v25  ;;  %v9100_v57 = vcombine.high %v656_v33, %v660_v19  ;;  %v9106_v50 = vcombine.low %v656_v33, %v660_v19 }
  0xd1   :  { %v9110_v34 = vcombine.low %v657_v17, %v661_v9 }
  0xd2   :  { %12664 = vst [vmem:[#allocation102_spill] sm:$0xff] %v9091_v49  ;;  %12667 = vst [vmem:[#allocation105_spill] sm:$0xff] %v9100_v57 }
  0xd3   :  { %1467 = vmatpush1.bf16.msra.mxu0 %v9070_v35  ;;  %1508 = vmatpush1.bf16.msra.mxu1 %v9074_v3  ;;  %v652_v35 = vld [vmem:[#allocation8 + $0x3b0] sm:$0xff]  ;;  %v653_v3 = vld [vmem:[#allocation8 + $0x3b8] sm:$0xff]  ;;  %12669 = vst [vmem:[#allocation107_spill] sm:$0xff] %v9106_v50  ;;  %12670 = vst [vmem:[#allocation108_spill] sm:$0xff] %v9110_v34 }
  0xd4   :  { %1468 = vmatprep.subr.bf16.mxu0 %v9076_v4  ;;  %1509 = vmatprep.subr.bf16.mxu1 %v9079_v27  ;;  %v649_v4 = vld [vmem:[#allocation8 + $0x398] sm:$0xff]  ;;  %v9103_v27 = vcombine.high %v657_v17, %v661_v9  ;;  %v9112_v25 = vcombine.high %v648_v18, %v652_v35  ;;  %v9118_v19 = vcombine.low %v648_v18, %v652_v35 }
  0xd5   :  { %v9115_v36 = vcombine.high %v649_v4, %v653_v3  ;;  %v9122_v9 = vcombine.low %v649_v4, %v653_v3 }
  0xd6   :  { %12668 = vst [vmem:[#allocation106_spill] sm:$0xff] %v9103_v27  ;;  %12671 = vst [vmem:[#allocation109_spill] sm:$0xff] %v9112_v25 }
  0xd7   :  { %1469 = vmatpush1.bf16.msra.mxu0 %v9082_v56  ;;  %1510 = vmatpush1.bf16.msra.mxu1 %v9086_v12  ;;  %12672 = vst [vmem:[#allocation110_spill] sm:$0xff] %v9115_v36  ;;  %v641_v12 = vld [vmem:[#allocation8 + $0x358] sm:$0xff]  ;;  %12673 = vst [vmem:[#allocation111_spill] sm:$0xff] %v9118_v19 }
  0xd8   :  { %1470 = vmatprep.subr.bf16.mxu0 %v9088_v26  ;;  %1511 = vmatprep.subr.bf16.mxu1 %v9091_v49  ;;  %v640_v26 = vld [vmem:[#allocation8 + $0x350] sm:$0xff]  ;;  %v645_v56 = vld [vmem:[#allocation8 + $0x378] sm:$0xff]  ;;  %12674 = vst [vmem:[#allocation112_spill] sm:$0xff] %v9122_v9 }
  0xd9   :  { %v644_v49 = vld [vmem:[#allocation8 + $0x370] sm:$0xff]  ;;  %v9127_v33 = vcombine.high %v641_v12, %v645_v56  ;;  %v9134_v3 = vcombine.low %v641_v12, %v645_v56 }
  0xda   :  { %v9124_v17 = vcombine.high %v640_v26, %v644_v49  ;;  %v9130_v35 = vcombine.low %v640_v26, %v644_v49 }
  0xdb   :  { %1471 = vmatpush1.bf16.msra.mxu0 %v9094_v0  ;;  %1512 = vmatpush1.bf16.msra.mxu1 %v9098_v11  ;;  %12676 = vst [vmem:[#allocation114_spill] sm:$0xff] %v9127_v33  ;;  %v633_v11 = vld [vmem:[#allocation8 + $0x318] sm:$0xff]  ;;  %12678 = vst [vmem:[#allocation116_spill] sm:$0xff] %v9134_v3 }
  0xdc   :  { %1472 = vmatprep.subr.bf16.mxu0 %v9100_v57  ;;  %1513 = vmatprep.subr.bf16.mxu1 %v9103_v27  ;;  %12675 = vst [vmem:[#allocation113_spill] sm:$0xff] %v9124_v17  ;;  %v632_v27 = vld [vmem:[#allocation8 + $0x310] sm:$0xff]  ;;  %v637_v0 = vld [vmem:[#allocation8 + $0x338] sm:$0xff]  ;;  %12677 = vst [vmem:[#allocation115_spill] sm:$0xff] %v9130_v35 }
  0xdd   :  { %v636_v57 = vld [vmem:[#allocation8 + $0x330] sm:$0xff]  ;;  %v9139_v18 = vcombine.high %v633_v11, %v637_v0  ;;  %v9146_v56 = vcombine.low %v633_v11, %v637_v0 }
  0xde   :  { %v9136_v4 = vcombine.high %v632_v27, %v636_v57  ;;  %v9142_v49 = vcombine.low %v632_v27, %v636_v57 }
  0xdf   :  { %1473 = vmatpush2.bf16.msra.mxu0 %v9106_v50  ;;  %1514 = vmatpush2.bf16.msra.mxu1 %v9110_v34  ;;  %12680 = vst [vmem:[#allocation118_spill] sm:$0xff] %v9139_v18  ;;  %v625_v34 = vld [vmem:[#allocation8 + $0x2d8] sm:$0xff]  ;;  %12682 = vst [vmem:[#allocation120_spill] sm:$0xff] %v9146_v56 }
  0xe0   :  { %1474 = vmatprep.subr.bf16.mxu0 %v9112_v25  ;;  %1515 = vmatprep.subr.bf16.mxu1 %v9115_v36  ;;  %12679 = vst [vmem:[#allocation117_spill] sm:$0xff] %v9136_v4  ;;  %v624_v36 = vld [vmem:[#allocation8 + $0x2d0] sm:$0xff]  ;;  %v629_v50 = vld [vmem:[#allocation8 + $0x2f8] sm:$0xff]  ;;  %12681 = vst [vmem:[#allocation119_spill] sm:$0xff] %v9142_v49 }
  0xe1   :  { %v628_v25 = vld [vmem:[#allocation8 + $0x2f0] sm:$0xff]  ;;  %v9151_v26 = vcombine.high %v625_v34, %v629_v50  ;;  %v9158_v0 = vcombine.low %v625_v34, %v629_v50 }
  0xe2   :  { %v9148_v12 = vcombine.high %v624_v36, %v628_v25  ;;  %v9154_v27 = vcombine.low %v624_v36, %v628_v25 }
  0xe3   :  { %1475 = vmatpush2.bf16.msra.mxu0 %v9118_v19  ;;  %1516 = vmatpush2.bf16.msra.mxu1 %v9122_v9  ;;  %12684 = vst [vmem:[#allocation122_spill] sm:$0xff] %v9151_v26  ;;  %v617_v9 = vld [vmem:[#allocation8 + $0x298] sm:$0xff]  ;;  %12686 = vst [vmem:[#allocation124_spill] sm:$0xff] %v9158_v0 }
  0xe4   :  { %1476 = vmatprep.subr.bf16.mxu0 %v9124_v17  ;;  %1517 = vmatprep.subr.bf16.mxu1 %v9127_v33  ;;  %12683 = vst [vmem:[#allocation121_spill] sm:$0xff] %v9148_v12  ;;  %v616_v33 = vld [vmem:[#allocation8 + $0x290] sm:$0xff]  ;;  %v621_v19 = vld [vmem:[#allocation8 + $0x2b8] sm:$0xff]  ;;  %12685 = vst [vmem:[#allocation123_spill] sm:$0xff] %v9154_v27 }
  0xe5   :  { %v620_v17 = vld [vmem:[#allocation8 + $0x2b0] sm:$0xff]  ;;  %v9163_v57 = vcombine.high %v617_v9, %v621_v19  ;;  %v9170_v50 = vcombine.low %v617_v9, %v621_v19 }
  0xe6   :  { %v9160_v11 = vcombine.high %v616_v33, %v620_v17  ;;  %v9166_v25 = vcombine.low %v616_v33, %v620_v17 }
  0xe7   :  { %1477 = vmatpush2.bf16.msra.mxu0 %v9130_v35  ;;  %1518 = vmatpush2.bf16.msra.mxu1 %v9134_v3  ;;  %12688 = vst [vmem:[#allocation126_spill] sm:$0xff] %v9163_v57  ;;  %v609_v3 = vld [vmem:[#allocation8 + $0x258] sm:$0xff]  ;;  %12690 = vst [vmem:[#allocation128_spill] sm:$0xff] %v9170_v50 }
  0xe8   :  { %1478 = vmatprep.subr.bf16.mxu0 %v9136_v4  ;;  %1519 = vmatprep.subr.bf16.mxu1 %v9139_v18  ;;  %12687 = vst [vmem:[#allocation125_spill] sm:$0xff] %v9160_v11  ;;  %v608_v18 = vld [vmem:[#allocation8 + $0x250] sm:$0xff]  ;;  %v613_v35 = vld [vmem:[#allocation8 + $0x278] sm:$0xff]  ;;  %12689 = vst [vmem:[#allocation127_spill] sm:$0xff] %v9166_v25 }
  0xe9   :  { %v612_v4 = vld [vmem:[#allocation8 + $0x270] sm:$0xff]  ;;  %v9175_v36 = vcombine.high %v609_v3, %v613_v35  ;;  %v9182_v19 = vcombine.low %v609_v3, %v613_v35  ;;  %v185_v35 = vld [vmem:[#allocation6] sm:$0xff] }
  0xea   :  { %v9172_v34 = vcombine.high %v608_v18, %v612_v4  ;;  %v9178_v17 = vcombine.low %v608_v18, %v612_v4  ;;  %v190_v3 = vrot.slane %v185_v35, %v8988_v43  ;;  %v198_v18 = vrot.slane %v185_v35, %v9015_v2 }
  0xeb   :  { %1479 = vmatpush2.bf16.msra.mxu0 %v9142_v49  ;;  %1520 = vmatpush2.bf16.msra.mxu1 %v9146_v56  ;;  %12692 = vst [vmem:[#allocation130_spill] sm:$0xff] %v9175_v36  ;;  %v601_v56 = vld [vmem:[#allocation8 + $0x218] sm:$0xff]  ;;  %12694 = vst [vmem:[#allocation132_spill] sm:$0xff] %v9182_v19  ;;  %v209_v43 = vsub.s32 5, %v8973_v20 }
  0xec   :  { %1480 = vmatprep.subr.bf16.mxu0 %v9148_v12  ;;  %1521 = vmatprep.subr.bf16.mxu1 %v9151_v26  ;;  %12691 = vst [vmem:[#allocation129_spill] sm:$0xff] %v9172_v34  ;;  %v600_v26 = vld [vmem:[#allocation8 + $0x210] sm:$0xff]  ;;  %v605_v49 = vld [vmem:[#allocation8 + $0x238] sm:$0xff]  ;;  %12693 = vst [vmem:[#allocation131_spill] sm:$0xff] %v9178_v17 }
  0xed   :  { %v604_v12 = vld [vmem:[#allocation8 + $0x230] sm:$0xff]  ;;  %v9187_v33 = vcombine.high %v601_v56, %v605_v49  ;;  %v9194_v4 = vcombine.low %v601_v56, %v605_v49  ;;  %v12699_v49 = vsub.s32 1, %v8973_v20 }
  0xee   :  { %v9184_v9 = vcombine.high %v600_v26, %v604_v12 }
  0xef   :  { %1481 = vmatpush2.bf16.msra.mxu0 %v9154_v27  ;;  %1522 = vmatpush2.bf16.msra.mxu1 %v9158_v0  ;;  %12696 = vst [vmem:[#allocation134_spill] sm:$0xff] %v9187_v33  ;;  %12698 = vst [vmem:[#allocation136_spill] sm:$0xff] %v9194_v4  ;;  %v194_v56 = vrot.slane %v185_v35, %v12699_v49  ;;  %v217_v49 = vsub.s32 7, %v8973_v20 }
  0xf0   :  { %1482 = vmatprep.subr.bf16.mxu0 %v9160_v11  ;;  %1523 = vmatprep.subr.bf16.mxu1 %v9163_v57  ;;  %12695 = vst [vmem:[#allocation133_spill] sm:$0xff] %v9184_v9  ;;  %v9190_v57 = vcombine.low %v600_v26, %v604_v12  ;;  %v202_v26 = vrot.slane %v185_v35, %v9029_v10 }
  0xf1   :  { %v218_v59 = vrot.slane %v185_v35, %v217_v49  ;;  %v9254_v49 = vld [vmem:[%s12131_s4 + $0xc8] ss:$16 sps:$4 sm:$0xff]  }
  0xf2   :  { %12697 = vst [vmem:[#allocation135_spill] sm:$0xff] %v9190_v57  ;;  %12702 = vst [vmem:[#allocation139_spill] sm:$0xff] %v9254_v49 }
  0xf3   :  { %1483 = vmatpush2.bf16.msra.mxu0 %v9166_v25  ;;  %1524 = vmatpush2.bf16.msra.mxu1 %v9170_v50 }
  0xf4   :  { %1484 = vmatprep.subr.bf16.mxu0 %v9172_v34  ;;  %1525 = vmatprep.subr.bf16.mxu1 %v9175_v36 }
  0xf7   :  { %1485 = vmatpush2.bf16.msra.mxu0 %v9178_v17  ;;  %1526 = vmatpush2.bf16.msra.mxu1 %v9182_v19  ;;  %v213_v17 = vsub.s32 6, %v8973_v20 }
  0xf8   :  { %1486 = vmatprep.subr.bf16.mxu0 %v9184_v9  ;;  %1527 = vmatprep.subr.bf16.mxu1 %v9187_v33  ;;  %v205_v33 = vsub.s32 4, %v8973_v20 }
  0xfb   :  { %1487 = vmatpush2.bf16.msra.mxu0 %v9190_v57  ;;  %1528 = vmatpush2.bf16.msra.mxu1 %v9194_v4 }
  0xfe   :  { %1489 = vmatmul.mubr.bf16.vlgmr.msra.gmra.mxu0 %v12638_v48  ;;  %1530 = vmatmul.mubr.bf16.vlgmr.msra.gmra.mxu1 %v12638_v48 }
  0xff   :  { %1780 = vmatprep.mubr.bf16.mxu0 %v12638_v48  ;;  %1821 = vmatprep.mubr.bf16.mxu1 %v12638_v48 }
 0x136   :  { %v350_v12 = vpop.f32.mrf.mxu0  ;;  %v393_v57 = vpop.f32.mrf.mxu1 }
 0x137   :  { %v351_v4 = vadd.f32 %v350_v12, %v190_v3  ;;  %v394_v19 = vadd.f32 %v393_v57, %v198_v18  ;;  %v206_v12 = vrot.slane %v185_v35, %v205_v33  ;;  %v214_v57 = vrot.slane %v185_v35, %v213_v17  ;;  %v9230_v17 = vld [vmem:[%s12131_s4 + $0xe8] ss:$16 sps:$4 sm:$0xff]  }
 0x138   :  { %v352_v9 = vpop.f32.mrf.mxu0  ;;  %v395_v34 = vpop.f32.mrf.mxu1 }
 0x139   :  { %488 = vst [vmem:[#allocation2 + $0x30] sm:$0xff] %v351_v4  ;;  %v353_v36 = vadd.f32 %v352_v9, %v194_v56  ;;  %490 = vst [vmem:[#allocation2 + $0x58] sm:$0xff] %v394_v19  ;;  %v396_v50 = vadd.f32 %v395_v34, %v202_v26  ;;  %v210_v4 = vrot.slane %v185_v35, %v209_v43 }
 0x13a   :  { %v354_v2 = vpop.f32.mrf.mxu0  ;;  %v397_v25 = vpop.f32.mrf.mxu1 }
 0x13b   :  { %489 = vst [vmem:[#allocation2] sm:$0xff] %v353_v36  ;;  %v355_v10 = vadd.f32 %v354_v2, %v190_v3  ;;  %491 = vst [vmem:[#allocation2 + $0x18] sm:$0xff] %v396_v50  ;;  %v398_v0 = vadd.f32 %v397_v25, %v198_v18 }
 0x13c   :  { %v356_v11 = vpop.f32.mrf.mxu0  ;;  %v399_v9 = vpop.f32.mrf.mxu1 }
 0x13d   :  { %496 = vst [vmem:[#allocation2 + $0x40] sm:$0xff] %v355_v10  ;;  %v357_v27 = vadd.f32 %v356_v11, %v194_v56  ;;  %498 = vst [vmem:[#allocation2 + $0x10] sm:$0xff] %v398_v0  ;;  %v400_v28 = vadd.f32 %v399_v9, %v202_v26  ;;  %v9215_v0 = vld [vmem:[%s12131_s4 + $0xe4] ss:$16 sps:$4 sm:$0xff]   ;;  %v9225_v11 = vld [vmem:[%s12131_s4 + $0xe0] ss:$16 sps:$4 sm:$0xff]  }
 0x13e   :  { %v436_v1 = vpop.f32.mrf.mxu0  ;;  %v479_v19 = vpop.f32.mrf.mxu1  ;;  %1748 = vmatprep.subr.bf16.mxu0 %v9215_v0  ;;  %v9239_v56 = vld [vmem:[%s12131_s4 + $0xc4] ss:$16 sps:$4 sm:$0xff]   ;;  %v9244_v26 = vld [vmem:[%s12131_s4 + $0xcc] ss:$16 sps:$4 sm:$0xff]   ;;  %v9278_v9 = vld [vmem:[%s12131_s4 + $0xa8] ss:$16 sps:$4 sm:$0xff]  }
 0x13f   :  { %497 = vst [vmem:[#allocation2 + $0x20] sm:$0xff] %v357_v27  ;;  %v437_v34 = vadd.f32 %v436_v1, %v206_v12  ;;  %499 = vst [vmem:[#allocation2 + $0x38] sm:$0xff] %v400_v28  ;;  %v480_v2 = vadd.f32 %v479_v19, %v214_v57  ;;  %v9220_v1 = vld [vmem:[%s12131_s4 + $0xec] ss:$16 sps:$4 sm:$0xff]   ;;  %1749 = vmatpush1.bf16.msra.mxu0 %v9225_v11 }
 0x140   :  { %v438_v20 = vpop.f32.mrf.mxu0  ;;  %v481_v33 = vpop.f32.mrf.mxu1  ;;  %1789 = vmatprep.subr.bf16.mxu1 %v9220_v1  ;;  %12700 = vst [vmem:[#allocation137_spill] sm:$0xff] %v9244_v26  ;;  %1750 = vmatprep.subr.bf16.mxu0 %v9239_v56  ;;  %12706 = vst [vmem:[#allocation143_spill] sm:$0xff] %v9278_v9  ;;  %v9292_v19 = vld [vmem:[%s12131_s4 + $0x8c] ss:$16 sps:$4 sm:$0xff]  }
 0x141   :  { %492 = vst [vmem:[#allocation2 + $0x50] sm:$0xff] %v437_v34  ;;  %v439_v36 = vadd.f32 %v438_v20, %v210_v4  ;;  %494 = vst [vmem:[#allocation2 + $0x8] sm:$0xff] %v480_v2  ;;  %v482_v25 = vadd.f32 %v481_v33, %v218_v59  ;;  %1790 = vmatpush1.bf16.msra.mxu1 %v9230_v17  ;;  %v9287_v34 = vld [vmem:[%s12131_s4 + $0x84] ss:$16 sps:$4 sm:$0xff]   ;;  %v9297_v20 = vld [vmem:[%s12131_s4 + $0x80] ss:$16 sps:$4 sm:$0xff]  }
 0x142   :  { %v440_v50 = vpop.f32.mrf.mxu0  ;;  %v483_v43 = vpop.f32.mrf.mxu1  ;;  %1791 = vmatprep.subr.bf16.mxu1 %v9244_v26  ;;  %12707 = vst [vmem:[#allocation144_spill] sm:$0xff] %v9287_v34  ;;  %12708 = vst [vmem:[#allocation145_spill] sm:$0xff] %v9292_v19  ;;  %v9302_v2 = vld [vmem:[%s12131_s4 + $0x88] ss:$16 sps:$4 sm:$0xff]   ;;  %v9316_v33 = vld [vmem:[%s12131_s4 + $0x6c] ss:$16 sps:$4 sm:$0xff]  }
 0x143   :  { %493 = vst [vmem:[#allocation2 + $0x68] sm:$0xff] %v439_v36  ;;  %v441_v10 = vadd.f32 %v440_v50, %v206_v12  ;;  %495 = vst [vmem:[#allocation2 + $0x48] sm:$0xff] %v482_v25  ;;  %v484_v27 = vadd.f32 %v483_v43, %v214_v57  ;;  %v9263_v12 = vld [vmem:[%s12131_s4 + $0xa4] ss:$16 sps:$4 sm:$0xff]   ;;  %v9268_v57 = vld [vmem:[%s12131_s4 + $0xac] ss:$16 sps:$4 sm:$0xff]  }
 0x144   :  { %v442_v28 = vpop.f32.mrf.mxu0  ;;  %v485_v3 = vpop.f32.mrf.mxu1  ;;  %12703 = vst [vmem:[#allocation140_spill] sm:$0xff] %v9263_v12  ;;  %12704 = vst [vmem:[#allocation141_spill] sm:$0xff] %v9268_v57  ;;  %v9311_v36 = vld [vmem:[%s12131_s4 + $0x64] ss:$16 sps:$4 sm:$0xff]   ;;  %v9321_v50 = vld [vmem:[%s12131_s4 + $0x60] ss:$16 sps:$4 sm:$0xff]  }
 0x145   :  { %500 = vst [vmem:[#allocation2 + $0x60] sm:$0xff] %v441_v10  ;;  %v443_v35 = vadd.f32 %v442_v28, %v210_v4  ;;  %502 = vst [vmem:[#allocation2 + $0x78] sm:$0xff] %v484_v27  ;;  %v486_v18 = vadd.f32 %v485_v3, %v218_v59  ;;  %v9249_v59 = vld [vmem:[%s12131_s4 + $0xc0] ss:$16 sps:$4 sm:$0xff]   ;;  %1792 = vmatpush1.bf16.msra.mxu1 %v9254_v49  ;;  %v9326_v25 = vld [vmem:[%s12131_s4 + $0x68] ss:$16 sps:$4 sm:$0xff]  }
 0x146   :  { %12701 = vst [vmem:[#allocation138_spill] sm:$0xff] %v9249_v59  ;;  %1751 = vmatpush1.bf16.msra.mxu0 %v9249_v59  ;;  %v9273_v4 = vld [vmem:[%s12131_s4 + $0xa0] ss:$16 sps:$4 sm:$0xff]   ;;  %1793 = vmatprep.subr.bf16.mxu1 %v9268_v57  ;;  %12709 = vst [vmem:[#allocation146_spill] sm:$0xff] %v9297_v20  ;;  %v9335_v10 = vld [vmem:[%s12131_s4 + $0x44] ss:$16 sps:$4 sm:$0xff]  }
 0x147   :  { %501 = vst [vmem:[#allocation2 + $0x70] sm:$0xff] %v443_v35  ;;  %503 = vst [vmem:[#allocation2 + $0x28] sm:$0xff] %v486_v18  ;;  %1752 = vmatprep.subr.bf16.mxu0 %v9263_v12  ;;  %v9340_v43 = vld [vmem:[%s12131_s4 + $0x4c] ss:$16 sps:$4 sm:$0xff]   ;;  %v9345_v28 = vld [vmem:[%s12131_s4 + $0x40] ss:$16 sps:$4 sm:$0xff]  }
 0x148   :  { %12705 = vst [vmem:[#allocation142_spill] sm:$0xff] %v9273_v4  ;;  %12710 = vst [vmem:[#allocation147_spill] sm:$0xff] %v9302_v2  ;;  %v9350_v27 = vld [vmem:[%s12131_s4 + $0x48] ss:$16 sps:$4 sm:$0xff]   ;;  %v9359_v35 = vld [vmem:[%s12131_s4 + $0x24] ss:$16 sps:$4 sm:$0xff]  }
 0x149   :  { %1794 = vmatpush1.bf16.msra.mxu1 %v9278_v9  ;;  %12711 = vst [vmem:[#allocation148_spill] sm:$0xff] %v9311_v36  ;;  %12712 = vst [vmem:[#allocation149_spill] sm:$0xff] %v9316_v33  ;;  %v9364_v3 = vld [vmem:[%s12131_s4 + $0x2c] ss:$16 sps:$4 sm:$0xff]   ;;  %v9369_v18 = vld [vmem:[%s12131_s4 + $0x20] ss:$16 sps:$4 sm:$0xff]  }
 0x14a   :  { %1753 = vmatpush1.bf16.msra.mxu0 %v9273_v4  ;;  %1795 = vmatprep.subr.bf16.mxu1 %v9292_v19  ;;  %12713 = vst [vmem:[#allocation150_spill] sm:$0xff] %v9321_v50  ;;  %12714 = vst [vmem:[#allocation151_spill] sm:$0xff] %v9326_v25  ;;  %v727_v4 = vld [vmem:[#allocation2] sm:$0x3]  ;;  %v731_v59 = vld [vmem:[#allocation2 + $0x68] sm:$0x3] }
 0x14b   :  { %1754 = vmatprep.subr.bf16.mxu0 %v9287_v34  ;;  %12715 = vst [vmem:[#allocation152_spill] sm:$0xff] %v9335_v10  ;;  %12716 = vst [vmem:[#allocation153_spill] sm:$0xff] %v9340_v43  ;;  %v729_v34 = vld [vmem:[#allocation2 + $0x18] sm:$0x3] }
 0x14c   :  { %12717 = vst [vmem:[#allocation154_spill] sm:$0xff] %v9345_v28  ;;  %12718 = vst [vmem:[#allocation155_spill] sm:$0xff] %v9350_v27 }
 0x14d   :  { %1796 = vmatpush1.bf16.msra.mxu1 %v9302_v2  ;;  %12719 = vst [vmem:[#allocation156_spill] sm:$0xff] %v9359_v35  ;;  %12720 = vst [vmem:[#allocation157_spill] sm:$0xff] %v9364_v3 }
 0x14e   :  { %1755 = vmatpush1.bf16.msra.mxu0 %v9297_v20  ;;  %1797 = vmatprep.subr.bf16.mxu1 %v9316_v33  ;;  %12721 = vst [vmem:[#allocation158_spill] sm:$0xff] %v9369_v18  ;;  %v728_v20 = vld [vmem:[#allocation2 + $0x58] sm:$0x3] }
 0x14f   :  { %1756 = vmatprep.subr.bf16.mxu0 %v9311_v36 }
 0x151   :  { %1798 = vmatpush1.bf16.msra.mxu1 %v9326_v25 }
 0x152   :  { %1757 = vmatpush1.bf16.msra.mxu0 %v9321_v50  ;;  %1799 = vmatprep.subr.bf16.mxu1 %v9340_v43  ;;  %v9388_v43 = vld [vmem:[%s12131_s4 + $0xc] ss:$16 sps:$4 sm:$0xff]  }
 0x153   :  { %1758 = vmatprep.subr.bf16.mxu0 %v9335_v10  ;;  %12724 = vst [vmem:[#allocation161_spill] sm:$0xff] %v9388_v43 }
 0x155   :  { %1800 = vmatpush1.bf16.msra.mxu1 %v9350_v27  ;;  %v9383_v27 = vld [vmem:[%s12131_s4 + $0x4] ss:$16 sps:$4 sm:$0xff]  }
 0x156   :  { %1759 = vmatpush1.bf16.msra.mxu0 %v9345_v28  ;;  %v9374_v28 = vld [vmem:[%s12131_s4 + $0x28] ss:$16 sps:$4 sm:$0xff]   ;;  %1801 = vmatprep.subr.bf16.mxu1 %v9364_v3  ;;  %12723 = vst [vmem:[#allocation160_spill] sm:$0xff] %v9383_v27  ;;  %v9406_v3 = vld [vmem:[#allocation9 + $0xec] ss:$16 sps:$4 sm:$0xff]  }
 0x157   :  { %12722 = vst [vmem:[#allocation159_spill] sm:$0xff] %v9374_v28  ;;  %1760 = vmatprep.subr.bf16.mxu0 %v9359_v35  ;;  %v9393_v35 = vld [vmem:[%s12131_s4] ss:$16 sps:$4 sm:$0xff]   ;;  %12728 = vst [vmem:[#allocation165_spill] sm:$0xff] %v9406_v3 }
 0x158   :  { %12725 = vst [vmem:[#allocation162_spill] sm:$0xff] %v9393_v35 }
 0x159   :  { %1802 = vmatpush1.bf16.msra.mxu1 %v9374_v28  ;;  %v9404_v28 = vld [vmem:[#allocation9 + $0xe4] ss:$16 sps:$4 sm:$0xff]  }
 0x15a   :  { %1761 = vmatpush1.bf16.msra.mxu0 %v9369_v18  ;;  %v9398_v18 = vld [vmem:[%s12131_s4 + $0x8] ss:$16 sps:$4 sm:$0xff]   ;;  %1803 = vmatprep.subr.bf16.mxu1 %v9388_v43  ;;  %12727 = vst [vmem:[#allocation164_spill] sm:$0xff] %v9404_v28 }
 0x15b   :  { %12726 = vst [vmem:[#allocation163_spill] sm:$0xff] %v9398_v18  ;;  %1762 = vmatprep.subr.bf16.mxu0 %v9383_v27 }
 0x15d   :  { %1804 = vmatpush1.bf16.msra.mxu1 %v9398_v18 }
 0x15e   :  { %1763 = vmatpush1.bf16.msra.mxu0 %v9393_v35  ;;  %2043 = vmatprep.subr.bf16.mxu1 %v9406_v3  ;;  %v726_v35 = vld [vmem:[#allocation2 + $0x30] sm:$0x3] }
 0x15f   :  { %2002 = vmatprep.subr.bf16.mxu0 %v9404_v28 }
 0x17e   :  { %v1408_v10 = vpop.f32.mrf.mxu0  ;;  %v1449_v25 = vpop.f32.mrf.mxu1 }
 0x17f   :  { %v1540_v19 = vadd.f32 %v1449_v25, %v728_v20  ;;  %v1538_v18 = vadd.f32 %v1408_v10, %v726_v35 }
 0x180   :  { %v1410_v50 = vpop.f32.mrf.mxu0  ;;  %v1451_v33 = vpop.f32.mrf.mxu1 }
 0x181   :  { %v1541_v9 = vadd.f32 %v1451_v33, %v729_v34  ;;  %v1554_v57 = vmul.f32 0.5, %v1540_v19  ;;  %v1539_v12 = vadd.f32 %v1410_v50, %v727_v4  ;;  %v1546_v28 = vmul.f32 0.5, %v1538_v18  ;;  %v732_v34 = vld [vmem:[#allocation2 + $0x8] sm:$0x3] }
 0x182   :  { %v1412_v36 = vpop.f32.mrf.mxu0  ;;  %v1453_v27 = vpop.f32.mrf.mxu1 }
 0x183   :  { %v1555_v49 = vmul.f32 0.5, %v1541_v9  ;;  %7976 = vtanh.f32 %v1554_v57  ;;  %v1547_v3 = vmul.f32 0.5, %v1539_v12  ;;  %v730_v36 = vld [vmem:[#allocation2 + $0x50] sm:$0x3] }
 0x184   :  { %v1413_v2 = vpop.f32.mrf.mxu0  ;;  %v1454_v43 = vpop.f32.mrf.mxu1  ;;  %7978 = vtanh.f32 %v1546_v28 }
 0x185   :  { %7980 = vtanh.f32 %v1555_v49 }
 0x186   :  { %7982 = vtanh.f32 %v1547_v3 }
 0x190   :  { %v7977_v9 = vpop.eup %7976 }
 0x191   :  { %v7979_v12 = vpop.eup %7978  ;;  %v1558_v10 = vmul.f32 0.5, %v7977_v9 }
 0x192   :  { %v7981_v49 = vpop.eup %7980  ;;  %v1550_v3 = vmul.f32 0.5, %v7979_v12 }
 0x193   :  { %v7983_v35 = vpop.eup %7982  ;;  %v1559_v18 = vmul.f32 0.5, %v7981_v49 }
 0x1be   :  { %v1490_v27 = vpop.f32.mrf.mxu0  ;;  %v1531_v43 = vpop.f32.mrf.mxu1 }
 0x1bf   :  { %v1542_v2 = vadd.f32 %v1490_v27, %v730_v36  ;;  %v1544_v19 = vadd.f32 %v1531_v43, %v732_v34  ;;  %v1560_v36 = vadd.f32 0.5, %v1558_v10  ;;  %v1551_v27 = vmul.f32 0.5, %v7983_v35 }
 0x1c0   :  { %v1492_v26 = vpop.f32.mrf.mxu0  ;;  %v1533_v25 = vpop.f32.mrf.mxu1 }
 0x1c1   :  { %7984 = vtanh.f32 %v1542_v2  ;;  %v1543_v20 = vadd.f32 %v1492_v26, %v731_v59  ;;  %v1564_v28 = vmul.f32 0.5, %v1544_v19  ;;  %v1552_v26 = vadd.f32 0.5, %v1550_v3 }
 0x1c2   :  { %v1494_v33 = vpop.f32.mrf.mxu0  ;;  %v1535_v4 = vpop.f32.mrf.mxu1  ;;  %v1561_v59 = vadd.f32 0.5, %v1559_v18  ;;  %v1553_v43 = vadd.f32 0.5, %v1551_v27  ;;  %v9415_v18 = vld [vmem:[#allocation9 + $0xe0] ss:$16 sps:$4 sm:$0xff]  }
 0x1c3   :  { %7986 = vtanh.f32 %v1543_v20  ;;  %v1572_v33 = vmul.f32 0.0, %v1560_v36  ;;  %v9417_v36 = vld [vmem:[#allocation9 + $0xe8] ss:$16 sps:$4 sm:$0xff]  }
 0x1c4   :  { %v1495_v57 = vpop.f32.mrf.mxu0  ;;  %v1536_v50 = vpop.f32.mrf.mxu1  ;;  %7988 = vtanh.f32 %v1564_v28  ;;  %v1573_v4 = vmul.f32 0.0, %v1561_v59  ;;  %v733_v28 = vld [vmem:[#allocation2 + $0x48] sm:$0x3]  ;;  %v9423_v59 = vld [vmem:[#allocation9 + $0xcc] ss:$16 sps:$4 sm:$0xff]  }
 0x1c5   :  { %v1545_v3 = vadd.f32 %v1533_v25, %v733_v28  ;;  %v9429_v25 = vld [vmem:[#allocation9 + $0xc0] ss:$16 sps:$4 sm:$0xff]   ;;  %v9464_v28 = vld [vmem:[#allocation9 + $0x6c] ss:$16 sps:$4 sm:$0xff]  }
 0x1c6   :  { %12737 = vst [vmem:[#allocation174_spill] sm:$0xff] %v9464_v28 }
 0x1ce   :  { %v7985_v2 = vpop.eup %7984 }
 0x1cf   :  { %v1574_v20 = vmul.f32 %v7985_v2, %v1552_v26  ;;  %v9421_v26 = vld [vmem:[#allocation9 + $0xc4] ss:$16 sps:$4 sm:$0xff]   ;;  %v1565_v2 = vmul.f32 0.5, %v1545_v3  ;;  %v9470_v3 = vld [vmem:[#allocation9 + $0x68] ss:$16 sps:$4 sm:$0xff]  }
 0x1d0   :  { %v7987_v34 = vpop.eup %7986  ;;  %12739 = vst [vmem:[#allocation176_spill] sm:$0xff] %v9470_v3 }
 0x1d1   :  { %v9410_v57 = vadd.f32 %v1574_v20, %v1572_v33  ;;  %v1575_v50 = vmul.f32 %v7987_v34, %v1553_v43  ;;  %v7989_v9 = vpop.eup %7988  ;;  %v9431_v33 = vld [vmem:[#allocation9 + $0xc8] ss:$16 sps:$4 sm:$0xff]   ;;  %v9435_v43 = vld [vmem:[#allocation9 + $0xa4] ss:$16 sps:$4 sm:$0xff]   ;;  %v9437_v20 = vld [vmem:[#allocation9 + $0xac] ss:$16 sps:$4 sm:$0xff]  }
 0x1d2   :  { %v1568_v12 = vmul.f32 0.5, %v7989_v9  ;;  %12729 = vst [vmem:[#allocation166_spill] sm:$0xff] %v9437_v20  ;;  %v9443_v34 = vld [vmem:[#allocation9 + $0xa0] ss:$16 sps:$4 sm:$0xff]   ;;  %v9451_v9 = vld [vmem:[#allocation9 + $0x8c] ss:$16 sps:$4 sm:$0xff]  }
 0x1d3   :  { %7990 = vtanh.f32 %v9410_v57  ;;  %v9413_v19 = vadd.f32 %v1575_v50, %v1573_v4  ;;  %12730 = vst [vmem:[#allocation167_spill] sm:$0xff] %v9443_v34  ;;  %v9445_v4 = vld [vmem:[#allocation9 + $0xa8] ss:$16 sps:$4 sm:$0xff]   ;;  %v9449_v50 = vld [vmem:[#allocation9 + $0x84] ss:$16 sps:$4 sm:$0xff]   ;;  %12733 = vst [vmem:[#allocation170_spill] sm:$0xff] %v9451_v9 }
 0x1d4   :  { %v1570_v49 = vadd.f32 0.5, %v1568_v12  ;;  %7992 = vtanh.f32 %v1565_v2  ;;  %12731 = vst [vmem:[#allocation168_spill] sm:$0xff] %v9445_v4  ;;  %12732 = vst [vmem:[#allocation169_spill] sm:$0xff] %v9449_v50  ;;  %v9455_v12 = vld [vmem:[#allocation9 + $0x80] ss:$16 sps:$4 sm:$0xff]  }
 0x1d5   :  { %12734 = vst [vmem:[#allocation171_spill] sm:$0xff] %v9455_v12  ;;  %7994 = vtanh.f32 %v9413_v19  ;;  %v9474_v2 = vld [vmem:[#allocation9 + $0x44] ss:$16 sps:$4 sm:$0xff]  }
 0x1d6   :  { %12740 = vst [vmem:[#allocation177_spill] sm:$0xff] %v9474_v2 }
 0x1e0   :  { %v7991_v10 = vpop.eup %7990 }
 0x1e1   :  { %v1580_v35 = vmul.f32 %v7991_v10, %v1570_v49  ;;  %v9457_v49 = vld [vmem:[#allocation9 + $0x88] ss:$16 sps:$4 sm:$0xff]   ;;  %v9462_v10 = vld [vmem:[#allocation9 + $0x64] ss:$16 sps:$4 sm:$0xff]  }
 0x1e2   :  { %12735 = vst [vmem:[#allocation172_spill] sm:$0xff] %v9457_v49  ;;  %12736 = vst [vmem:[#allocation173_spill] sm:$0xff] %v9462_v10 }
 0x1e3   :  { %v9419_v27 = vpack.c.bf16 %v1580_v35, %v1580_v35  ;;  %v9468_v35 = vld [vmem:[#allocation9 + $0x60] ss:$16 sps:$4 sm:$0xff]  }
 0x1e4   :  { %12738 = vst [vmem:[#allocation175_spill] sm:$0xff] %v9468_v35 }
 0x1e5   :  { %1781 = vmatmul.mubr.bf16.vlgmr.msra.gmra.mxu0 %v9419_v27  ;;  %1822 = vmatmul.mubr.bf16.vlgmr.msra.gmra.mxu1 %v9419_v27 }
 0x1e6   :  { %2003 = vmatpush1.bf16.msra.mxu0 %v9415_v18  ;;  %2044 = vmatpush1.bf16.msra.mxu1 %v9417_v36 }
 0x1e7   :  { %2004 = vmatprep.subr.bf16.mxu0 %v9421_v26  ;;  %2045 = vmatprep.subr.bf16.mxu1 %v9423_v59 }
 0x1e8   :  { %2034 = vmatprep.mubr.bf16.mxu0 %v12638_v48  ;;  %2075 = vmatprep.mubr.bf16.mxu1 %v12638_v48 }
 0x1ea   :  { %2005 = vmatpush1.bf16.msra.mxu0 %v9429_v25  ;;  %2046 = vmatpush1.bf16.msra.mxu1 %v9431_v33 }
 0x1eb   :  { %2006 = vmatprep.subr.bf16.mxu0 %v9435_v43  ;;  %2047 = vmatprep.subr.bf16.mxu1 %v9437_v20 }
 0x1ee   :  { %2007 = vmatpush1.bf16.msra.mxu0 %v9443_v34  ;;  %2048 = vmatpush1.bf16.msra.mxu1 %v9445_v4 }
 0x1ef   :  { %2008 = vmatprep.subr.bf16.mxu0 %v9449_v50  ;;  %2049 = vmatprep.subr.bf16.mxu1 %v9451_v9  ;;  %v9476_v50 = vld [vmem:[#allocation9 + $0x4c] ss:$16 sps:$4 sm:$0xff]   ;;  %v7993_v9 = vpop.eup %7992 }
 0x1f0   :  { %12741 = vst [vmem:[#allocation178_spill] sm:$0xff] %v9476_v50  ;;  %v1569_v4 = vmul.f32 0.5, %v7993_v9  ;;  %v7995_v34 = vpop.eup %7994  ;;  %v9504_v9 = vld [vmem:[#allocation9] ss:$16 sps:$4 sm:$0xff]  }
 0x1f2   :  { %2009 = vmatpush1.bf16.msra.mxu0 %v9455_v12  ;;  %2050 = vmatpush1.bf16.msra.mxu1 %v9457_v49  ;;  %v9480_v12 = vld [vmem:[#allocation9 + $0x40] ss:$16 sps:$4 sm:$0xff]   ;;  %v9482_v49 = vld [vmem:[#allocation9 + $0x48] ss:$16 sps:$4 sm:$0xff]   ;;  %v1571_v20 = vadd.f32 0.5, %v1569_v4 }
 0x1f3   :  { %2010 = vmatprep.subr.bf16.mxu0 %v9462_v10  ;;  %2051 = vmatprep.subr.bf16.mxu1 %v9464_v28  ;;  %12742 = vst [vmem:[#allocation179_spill] sm:$0xff] %v9480_v12  ;;  %12743 = vst [vmem:[#allocation180_spill] sm:$0xff] %v9482_v49  ;;  %v9486_v10 = vld [vmem:[#allocation9 + $0x24] ss:$16 sps:$4 sm:$0xff]   ;;  %v9488_v28 = vld [vmem:[#allocation9 + $0x2c] ss:$16 sps:$4 sm:$0xff]  }
 0x1f4   :  { %12744 = vst [vmem:[#allocation181_spill] sm:$0xff] %v9488_v28  ;;  %v12748_v4 = vld [vmem:[#allocation44_spill] sm:$0xff] }
 0x1f6   :  { %2011 = vmatpush1.bf16.msra.mxu0 %v9468_v35  ;;  %2052 = vmatpush1.bf16.msra.mxu1 %v9470_v3  ;;  %v9492_v35 = vld [vmem:[#allocation9 + $0x20] ss:$16 sps:$4 sm:$0xff]   ;;  %v9494_v3 = vld [vmem:[#allocation9 + $0x28] ss:$16 sps:$4 sm:$0xff]  }
 0x1f7   :  { %2012 = vmatprep.subr.bf16.mxu0 %v9474_v2  ;;  %2053 = vmatprep.subr.bf16.mxu1 %v9476_v50  ;;  %v9498_v2 = vld [vmem:[#allocation9 + $0x4] ss:$16 sps:$4 sm:$0xff]   ;;  %v9500_v50 = vld [vmem:[#allocation9 + $0xc] ss:$16 sps:$4 sm:$0xff]  }
 0x1fa   :  { %2013 = vmatpush1.bf16.msra.mxu0 %v9480_v12  ;;  %2054 = vmatpush1.bf16.msra.mxu1 %v9482_v49  ;;  %v9506_v49 = vld [vmem:[#allocation9 + $0x8] ss:$16 sps:$4 sm:$0xff]   ;;  %v1581_v12 = vmul.f32 %v7995_v34, %v1571_v20  ;;  %v12746_v20 = vld [vmem:[#allocation42_spill] sm:$0xff] }
 0x1fb   :  { %2014 = vmatprep.subr.bf16.mxu0 %v9486_v10  ;;  %2055 = vmatprep.subr.bf16.mxu1 %v9488_v28  ;;  %v12747_v34 = vld [vmem:[#allocation43_spill] sm:$0xff] }
 0x1fc   :  { %v9512_v28 = vpack.c.bf16 %v1581_v12, %v1581_v12  ;;  %v12749_v12 = vld [vmem:[#allocation45_spill] sm:$0xff] }
 0x1fe   :  { %2015 = vmatpush1.bf16.msra.mxu0 %v9492_v35  ;;  %2056 = vmatpush1.bf16.msra.mxu1 %v9494_v3  ;;  %12745 = vst [vmem:[#allocation182_spill] sm:$0xff] %v9512_v28 }
 0x1ff   :  { %2016 = vmatprep.subr.bf16.mxu0 %v9498_v2  ;;  %2057 = vmatprep.subr.bf16.mxu1 %v9500_v50 }
 0x202   :  { %2017 = vmatpush1.bf16.msra.mxu0 %v9504_v9  ;;  %2058 = vmatpush1.bf16.msra.mxu1 %v9506_v49 }
 0x203   :  { %2112 = vmatprep.subr.bf16.mxu0 %v8785_v38  ;;  %2153 = vmatprep.subr.bf16.mxu1 %v8788_v39 }
 0x205   :  { %2035 = vmatmul.mubr.bf16.vlgmr.msra.gmra.mxu0 %v9512_v28  ;;  %2076 = vmatmul.mubr.bf16.vlgmr.msra.gmra.mxu1 %v9512_v28 }
 0x206   :  { %2113 = vmatpush1.bf16.msra.mxu0 %v8791_v44  ;;  %2144 = vmatprep.mubr.bf16.mxu0 %v9512_v28 }
 0x207   :  { %2154 = vmatpush1.bf16.msra.mxu1 %v8794_v45  ;;  %2185 = vmatprep.mubr.bf16.mxu1 %v9512_v28 }
 0x208   :  { %2114 = vmatprep.subr.bf16.mxu0 %v8796_v46  ;;  %2155 = vmatprep.subr.bf16.mxu1 %v8799_v47 }
 0x20a   :  { %2115 = vmatpush1.bf16.msra.mxu0 %v8804_v52 }
 0x20b   :  { %2156 = vmatpush1.bf16.msra.mxu1 %v8808_v53  ;;  %2116 = vmatprep.subr.bf16.mxu0 %v8810_v54 }
 0x20c   :  { %2157 = vmatprep.subr.bf16.mxu1 %v8813_v55 }
 0x20e   :  { %2117 = vmatpush1.bf16.msra.mxu0 %v8818_v60 }
 0x20f   :  { %2158 = vmatpush1.bf16.msra.mxu1 %v8822_v61  ;;  %2118 = vmatprep.subr.bf16.mxu0 %v8824_v62 }
 0x210   :  { %2159 = vmatprep.subr.bf16.mxu1 %v8827_v63 }
 0x212   :  { %2119 = vmatpush1.bf16.msra.mxu0 %v8830_v5 }
 0x213   :  { %2160 = vmatpush1.bf16.msra.mxu1 %v8834_v6  ;;  %2120 = vmatprep.subr.bf16.mxu0 %v8836_v7 }
 0x214   :  { %2161 = vmatprep.subr.bf16.mxu1 %v8839_v8 }
 0x216   :  { %2121 = vmatpush1.bf16.msra.mxu0 %v8842_v13 }
 0x217   :  { %2162 = vmatpush1.bf16.msra.mxu1 %v8846_v14  ;;  %2122 = vmatprep.subr.bf16.mxu0 %v8848_v15 }
 0x218   :  { %2163 = vmatprep.subr.bf16.mxu1 %v8851_v16 }
 0x21a   :  { %2123 = vmatpush1.bf16.msra.mxu0 %v8854_v21 }
 0x21b   :  { %2164 = vmatpush1.bf16.msra.mxu1 %v8858_v22  ;;  %2124 = vmatprep.subr.bf16.mxu0 %v8860_v23 }
 0x21c   :  { %2165 = vmatprep.subr.bf16.mxu1 %v8863_v24 }
 0x21e   :  { %2125 = vmatpush1.bf16.msra.mxu0 %v8866_v29 }
 0x21f   :  { %2166 = vmatpush1.bf16.msra.mxu1 %v8870_v30  ;;  %2126 = vmatprep.subr.bf16.mxu0 %v8872_v31  ;;  %v1840_v31 = vld [vmem:[#allocation3 + $0x38] sm:$0xc0] }
 0x220   :  { %2167 = vmatprep.subr.bf16.mxu1 %v8875_v32  ;;  %v12750_v32 = vld [vmem:[#allocation46_spill] sm:$0xff] }
 0x222   :  { %2127 = vmatpush1.bf16.msra.mxu0 %v8878_v37  ;;  %v12751_v37 = vld [vmem:[#allocation47_spill] sm:$0xff] }
 0x223   :  { %2168 = vmatpush1.bf16.msra.mxu1 %v8882_v40  ;;  %2128 = vmatprep.subr.bf16.mxu0 %v8884_v41  ;;  %v12752_v40 = vld [vmem:[#allocation48_spill] sm:$0xff]  ;;  %v12753_v41 = vld [vmem:[#allocation49_spill] sm:$0xff] }
 0x224   :  { %2169 = vmatprep.subr.bf16.mxu1 %v8887_v42  ;;  %v12754_v42 = vld [vmem:[#allocation50_spill] sm:$0xff] }
 0x226   :  { %2129 = vmatpush2.bf16.msra.mxu0 %v8890_v51  ;;  %v12755_v51 = vld [vmem:[#allocation51_spill] sm:$0xff] }
 0x227   :  { %2170 = vmatpush2.bf16.msra.mxu1 %v8894_v58  ;;  %2130 = vmatprep.subr.bf16.mxu0 %v12746_v20  ;;  %v12756_v58 = vld [vmem:[#allocation52_spill] sm:$0xff]  ;;  %v12757_v20 = vld [vmem:[#allocation53_spill] sm:$0xff] }
 0x228   :  { %2171 = vmatprep.subr.bf16.mxu1 %v12747_v34  ;;  %v12758_v34 = vld [vmem:[#allocation54_spill] sm:$0xff] }
 0x22a   :  { %2131 = vmatpush2.bf16.msra.mxu0 %v12748_v4  ;;  %v12759_v4 = vld [vmem:[#allocation55_spill] sm:$0xff] }
 0x22b   :  { %2172 = vmatpush2.bf16.msra.mxu1 %v12749_v12  ;;  %2132 = vmatprep.subr.bf16.mxu0 %v12750_v32  ;;  %v12760_v12 = vld [vmem:[#allocation56_spill] sm:$0xff]  ;;  %v12761_v32 = vld [vmem:[#allocation57_spill] sm:$0xff] }
 0x22c   :  { %2173 = vmatprep.subr.bf16.mxu1 %v12751_v37  ;;  %v12762_v37 = vld [vmem:[#allocation58_spill] sm:$0xff] }
 0x22e   :  { %2133 = vmatpush2.bf16.msra.mxu0 %v12752_v40  ;;  %v12763_v40 = vld [vmem:[#allocation59_spill] sm:$0xff] }
 0x22f   :  { %2174 = vmatpush2.bf16.msra.mxu1 %v12753_v41  ;;  %2134 = vmatprep.subr.bf16.mxu0 %v12754_v42  ;;  %v12764_v41 = vld [vmem:[#allocation60_spill] sm:$0xff]  ;;  %v12765_v42 = vld [vmem:[#allocation61_spill] sm:$0xff] }
 0x230   :  { %2175 = vmatprep.subr.bf16.mxu1 %v12755_v51  ;;  %v12766_v51 = vld [vmem:[#allocation62_spill] sm:$0xff] }
 0x232   :  { %2135 = vmatpush2.bf16.msra.mxu0 %v12756_v58  ;;  %v12767_v58 = vld [vmem:[#allocation63_spill] sm:$0xff] }
 0x233   :  { %2176 = vmatpush2.bf16.msra.mxu1 %v12757_v20  ;;  %2136 = vmatprep.subr.bf16.mxu0 %v12758_v34  ;;  %v12768_v20 = vld [vmem:[#allocation64_spill] sm:$0xff]  ;;  %v12769_v34 = vld [vmem:[#allocation65_spill] sm:$0xff] }
 0x234   :  { %2177 = vmatprep.subr.bf16.mxu1 %v12759_v4  ;;  %v12770_v4 = vld [vmem:[#allocation66_spill] sm:$0xff] }
 0x236   :  { %2137 = vmatpush2.bf16.msra.mxu0 %v12760_v12  ;;  %v12771_v12 = vld [vmem:[#allocation67_spill] sm:$0xff] }
 0x237   :  { %2178 = vmatpush2.bf16.msra.mxu1 %v12761_v32  ;;  %2138 = vmatprep.subr.bf16.mxu0 %v12762_v37  ;;  %v12772_v32 = vld [vmem:[#allocation68_spill] sm:$0xff]  ;;  %v12773_v37 = vld [vmem:[#allocation69_spill] sm:$0xff] }
 0x238   :  { %2179 = vmatprep.subr.bf16.mxu1 %v12763_v40  ;;  %v12774_v40 = vld [vmem:[#allocation70_spill] sm:$0xff] }
 0x23a   :  { %2139 = vmatpush2.bf16.msra.mxu0 %v12764_v41  ;;  %v12775_v41 = vld [vmem:[#allocation71_spill] sm:$0xff] }
 0x23b   :  { %2180 = vmatpush2.bf16.msra.mxu1 %v12765_v42  ;;  %2140 = vmatprep.subr.bf16.mxu0 %v12766_v51  ;;  %v12786_v51 = vld [vmem:[#allocation85_spill] sm:$0xff] }
 0x23c   :  { %2181 = vmatprep.subr.bf16.mxu1 %v12767_v58  ;;  %v12776_v58 = vld [vmem:[#allocation73_spill] sm:$0xff] }
 0x23d   :  { %v1838_v42 = vld [vmem:[#allocation3 + $0x18] sm:$0xc0] }
 0x23e   :  { %2141 = vmatpush2.bf16.msra.mxu0 %v12768_v20  ;;  %v12784_v20 = vld [vmem:[#allocation83_spill] sm:$0xff] }
 0x23f   :  { %2182 = vmatpush2.bf16.msra.mxu1 %v12769_v34  ;;  %2142 = vmatprep.subr.bf16.mxu0 %v12770_v4  ;;  %v12777_v34 = vld [vmem:[#allocation74_spill] sm:$0xff]  ;;  %v12783_v4 = vld [vmem:[#allocation81_spill] sm:$0xff] }
 0x240   :  { %2183 = vmatprep.subr.bf16.mxu1 %v12771_v12  ;;  %v12778_v12 = vld [vmem:[#allocation75_spill] sm:$0xff] }
 0x242   :  { %2143 = vmatpush2.bf16.msra.mxu0 %v12772_v32  ;;  %v12779_v32 = vld [vmem:[#allocation76_spill] sm:$0xff] }
 0x243   :  { %2184 = vmatpush2.bf16.msra.mxu1 %v12773_v37  ;;  %2194 = vmatprep.subr.bf16.mxu0 %v12774_v40  ;;  %v12780_v37 = vld [vmem:[#allocation77_spill] sm:$0xff]  ;;  %v12781_v40 = vld [vmem:[#allocation79_spill] sm:$0xff] }
 0x244   :  { %2235 = vmatprep.subr.bf16.mxu1 %v12775_v41  ;;  %v12782_v41 = vld [vmem:[#allocation80_spill] sm:$0xff] }
 0x245   :  { %2145 = vmatmul.mubr.bf16.vlgmr.msra.gmra.mxu0 %v9419_v27 }
 0x246   :  { %2186 = vmatmul.mubr.bf16.vlgmr.msra.gmra.mxu1 %v9419_v27  ;;  %2195 = vmatpush1.bf16.msra.mxu0 %v12776_v58  ;;  %v12785_v58 = vld [vmem:[#allocation84_spill] sm:$0xff] }
 0x247   :  { %2226 = vmatprep.mubr.bf16.mxu0 %v9512_v28  ;;  %2236 = vmatpush1.bf16.msra.mxu1 %v12777_v34  ;;  %v12787_v34 = vld [vmem:[#allocation86_spill] sm:$0xff] }
 0x248   :  { %2267 = vmatprep.mubr.bf16.mxu1 %v9512_v28  ;;  %2196 = vmatprep.subr.bf16.mxu0 %v12778_v12  ;;  %v12788_v28 = vld [vmem:[#allocation87_spill] sm:$0xff]  ;;  %v12789_v12 = vld [vmem:[#allocation88_spill] sm:$0xff] }
 0x249   :  { %2237 = vmatprep.subr.bf16.mxu1 %v12779_v32  ;;  %v12790_v32 = vld [vmem:[#allocation89_spill] sm:$0xff] }
 0x24a   :  { %2197 = vmatpush1.bf16.msra.mxu0 %v12780_v37  ;;  %v12791_v37 = vld [vmem:[#allocation90_spill] sm:$0xff] }
 0x24b   :  { %2238 = vmatpush1.bf16.msra.mxu1 %v12781_v40  ;;  %2198 = vmatprep.subr.bf16.mxu0 %v12782_v41  ;;  %v12792_v40 = vld [vmem:[#allocation91_spill] sm:$0xff]  ;;  %v12793_v41 = vld [vmem:[#allocation92_spill] sm:$0xff] }
 0x24c   :  { %2239 = vmatprep.subr.bf16.mxu1 %v12783_v4  ;;  %v12794_v4 = vld [vmem:[#allocation93_spill] sm:$0xff] }
 0x24e   :  { %2199 = vmatpush1.bf16.msra.mxu0 %v12784_v20  ;;  %v12795_v20 = vld [vmem:[#allocation94_spill] sm:$0xff] }
 0x24f   :  { %2240 = vmatpush1.bf16.msra.mxu1 %v12785_v58  ;;  %2200 = vmatprep.subr.bf16.mxu0 %v12786_v51  ;;  %v12796_v58 = vld [vmem:[#allocation95_spill] sm:$0xff]  ;;  %v12797_v51 = vld [vmem:[#allocation96_spill] sm:$0xff] }
 0x250   :  { %2241 = vmatprep.subr.bf16.mxu1 %v12787_v34  ;;  %v12798_v34 = vld [vmem:[#allocation97_spill] sm:$0xff] }
 0x252   :  { %2201 = vmatpush1.bf16.msra.mxu0 %v12788_v28  ;;  %v12799_v28 = vld [vmem:[#allocation98_spill] sm:$0xff] }
 0x253   :  { %2242 = vmatpush1.bf16.msra.mxu1 %v12789_v12  ;;  %2202 = vmatprep.subr.bf16.mxu0 %v12790_v32  ;;  %v12800_v12 = vld [vmem:[#allocation99_spill] sm:$0xff]  ;;  %v12801_v32 = vld [vmem:[#allocation100_spill] sm:$0xff] }
 0x254   :  { %2243 = vmatprep.subr.bf16.mxu1 %v12791_v37  ;;  %v12802_v37 = vld [vmem:[#allocation101_spill] sm:$0xff] }
 0x256   :  { %2203 = vmatpush1.bf16.msra.mxu0 %v12792_v40  ;;  %v12803_v40 = vld [vmem:[#allocation102_spill] sm:$0xff] }
 0x257   :  { %2244 = vmatpush1.bf16.msra.mxu1 %v12793_v41  ;;  %2204 = vmatprep.subr.bf16.mxu0 %v12794_v4  ;;  %v12804_v41 = vld [vmem:[#allocation103_spill] sm:$0xff]  ;;  %v12805_v4 = vld [vmem:[#allocation104_spill] sm:$0xff] }
 0x258   :  { %2245 = vmatprep.subr.bf16.mxu1 %v12795_v20  ;;  %v12806_v20 = vld [vmem:[#allocation105_spill] sm:$0xff] }
 0x25a   :  { %2205 = vmatpush1.bf16.msra.mxu0 %v12796_v58  ;;  %v12807_v58 = vld [vmem:[#allocation106_spill] sm:$0xff] }
 0x25b   :  { %2246 = vmatpush1.bf16.msra.mxu1 %v12797_v51  ;;  %2206 = vmatprep.subr.bf16.mxu0 %v12798_v34  ;;  %v12808_v51 = vld [vmem:[#allocation107_spill] sm:$0xff]  ;;  %v12809_v34 = vld [vmem:[#allocation108_spill] sm:$0xff] }
 0x25c   :  { %2247 = vmatprep.subr.bf16.mxu1 %v12799_v28  ;;  %v12810_v28 = vld [vmem:[#allocation109_spill] sm:$0xff] }
 0x25e   :  { %2207 = vmatpush1.bf16.msra.mxu0 %v12800_v12  ;;  %v12811_v12 = vld [vmem:[#allocation110_spill] sm:$0xff] }
 0x25f   :  { %2248 = vmatpush1.bf16.msra.mxu1 %v12801_v32  ;;  %2208 = vmatprep.subr.bf16.mxu0 %v12802_v37  ;;  %v12812_v32 = vld [vmem:[#allocation111_spill] sm:$0xff]  ;;  %v12813_v37 = vld [vmem:[#allocation112_spill] sm:$0xff] }
 0x260   :  { %2249 = vmatprep.subr.bf16.mxu1 %v12803_v40  ;;  %v12814_v40 = vld [vmem:[#allocation113_spill] sm:$0xff] }
 0x262   :  { %2209 = vmatpush1.bf16.msra.mxu0 %v12804_v41  ;;  %v12815_v41 = vld [vmem:[#allocation114_spill] sm:$0xff] }
 0x263   :  { %2250 = vmatpush1.bf16.msra.mxu1 %v12805_v4  ;;  %2210 = vmatprep.subr.bf16.mxu0 %v12806_v20  ;;  %v12816_v4 = vld [vmem:[#allocation115_spill] sm:$0xff]  ;;  %v12817_v20 = vld [vmem:[#allocation116_spill] sm:$0xff] }
 0x264   :  { %2251 = vmatprep.subr.bf16.mxu1 %v12807_v58  ;;  %v12818_v58 = vld [vmem:[#allocation117_spill] sm:$0xff] }
 0x266   :  { %2211 = vmatpush2.bf16.msra.mxu0 %v12808_v51  ;;  %v12819_v51 = vld [vmem:[#allocation118_spill] sm:$0xff] }
 0x267   :  { %2252 = vmatpush2.bf16.msra.mxu1 %v12809_v34  ;;  %2212 = vmatprep.subr.bf16.mxu0 %v12810_v28  ;;  %v12820_v34 = vld [vmem:[#allocation119_spill] sm:$0xff]  ;;  %v12821_v28 = vld [vmem:[#allocation120_spill] sm:$0xff] }
 0x268   :  { %2253 = vmatprep.subr.bf16.mxu1 %v12811_v12  ;;  %v12822_v12 = vld [vmem:[#allocation121_spill] sm:$0xff] }
 0x26a   :  { %2213 = vmatpush2.bf16.msra.mxu0 %v12812_v32  ;;  %v12823_v32 = vld [vmem:[#allocation122_spill] sm:$0xff] }
 0x26b   :  { %2254 = vmatpush2.bf16.msra.mxu1 %v12813_v37  ;;  %2214 = vmatprep.subr.bf16.mxu0 %v12814_v40  ;;  %v12824_v37 = vld [vmem:[#allocation123_spill] sm:$0xff]  ;;  %v12825_v40 = vld [vmem:[#allocation124_spill] sm:$0xff] }
 0x26c   :  { %2255 = vmatprep.subr.bf16.mxu1 %v12815_v41  ;;  %v12826_v41 = vld [vmem:[#allocation125_spill] sm:$0xff] }
 0x26e   :  { %2215 = vmatpush2.bf16.msra.mxu0 %v12816_v4  ;;  %v12827_v4 = vld [vmem:[#allocation126_spill] sm:$0xff] }
 0x26f   :  { %2256 = vmatpush2.bf16.msra.mxu1 %v12817_v20  ;;  %2216 = vmatprep.subr.bf16.mxu0 %v12818_v58  ;;  %v12828_v20 = vld [vmem:[#allocation127_spill] sm:$0xff]  ;;  %v12829_v58 = vld [vmem:[#allocation128_spill] sm:$0xff] }
 0x270   :  { %2257 = vmatprep.subr.bf16.mxu1 %v12819_v51  ;;  %v12830_v51 = vld [vmem:[#allocation129_spill] sm:$0xff] }
 0x272   :  { %2217 = vmatpush2.bf16.msra.mxu0 %v12820_v34  ;;  %v12831_v34 = vld [vmem:[#allocation130_spill] sm:$0xff] }
 0x273   :  { %2258 = vmatpush2.bf16.msra.mxu1 %v12821_v28  ;;  %2218 = vmatprep.subr.bf16.mxu0 %v12822_v12  ;;  %v12832_v28 = vld [vmem:[#allocation131_spill] sm:$0xff]  ;;  %v12833_v12 = vld [vmem:[#allocation132_spill] sm:$0xff] }
 0x274   :  { %2259 = vmatprep.subr.bf16.mxu1 %v12823_v32  ;;  %v12834_v32 = vld [vmem:[#allocation133_spill] sm:$0xff] }
 0x276   :  { %2219 = vmatpush2.bf16.msra.mxu0 %v12824_v37  ;;  %v12835_v37 = vld [vmem:[#allocation134_spill] sm:$0xff] }
 0x277   :  { %2260 = vmatpush2.bf16.msra.mxu1 %v12825_v40  ;;  %2220 = vmatprep.subr.bf16.mxu0 %v12826_v41  ;;  %v12836_v40 = vld [vmem:[#allocation135_spill] sm:$0xff]  ;;  %v12837_v41 = vld [vmem:[#allocation136_spill] sm:$0xff] }
 0x278   :  { %2261 = vmatprep.subr.bf16.mxu1 %v12827_v4 }
 0x27a   :  { %2221 = vmatpush2.bf16.msra.mxu0 %v12828_v20 }
 0x27b   :  { %2262 = vmatpush2.bf16.msra.mxu1 %v12829_v58  ;;  %2222 = vmatprep.subr.bf16.mxu0 %v12830_v51 }
 0x27c   :  { %2263 = vmatprep.subr.bf16.mxu1 %v12831_v34  ;;  %v1585_v34 = vld [vmem:[#allocation3] sm:$0x3] }
 0x27e   :  { %2223 = vmatpush2.bf16.msra.mxu0 %v12832_v28  ;;  %v12864_v28 = vld [vmem:[#allocation163_spill] sm:$0xff] }
 0x27f   :  { %2264 = vmatpush2.bf16.msra.mxu1 %v12833_v12  ;;  %2224 = vmatprep.subr.bf16.mxu0 %v12834_v32  ;;  %v12838_v32 = vld [vmem:[#allocation137_spill] sm:$0xff]  ;;  %v12849_v12 = vld [vmem:[#allocation148_spill] sm:$0xff] }
 0x280   :  { %2265 = vmatprep.subr.bf16.mxu1 %v12835_v37  ;;  %v12848_v37 = vld [vmem:[#allocation147_spill] sm:$0xff] }
 0x282   :  { %2225 = vmatpush2.bf16.msra.mxu0 %v12836_v40  ;;  %v12842_v40 = vld [vmem:[#allocation141_spill] sm:$0xff] }
 0x283   :  { %2266 = vmatpush2.bf16.msra.mxu1 %v12837_v41  ;;  %2359 = vmatprep.subr.bf16.mxu0 %v9215_v0  ;;  %v12839_v41 = vld [vmem:[#allocation138_spill] sm:$0xff]  ;;  %v12840_v0 = vld [vmem:[#allocation139_spill] sm:$0xff] }
 0x284   :  { %2400 = vmatprep.subr.bf16.mxu1 %v9220_v1  ;;  %v12841_v1 = vld [vmem:[#allocation140_spill] sm:$0xff] }
 0x285   :  { %2227 = vmatmul.mubr.bf16.vlgmr.msra.gmra.mxu0 %v9419_v27 }
 0x286   :  { %2268 = vmatmul.mubr.bf16.vlgmr.msra.gmra.mxu1 %v9419_v27  ;;  %2360 = vmatpush1.bf16.msra.mxu0 %v9225_v11  ;;  %v12843_v27 = vld [vmem:[#allocation142_spill] sm:$0xff]  ;;  %v12844_v11 = vld [vmem:[#allocation143_spill] sm:$0xff] }
 0x287   :  { %2401 = vmatpush1.bf16.msra.mxu1 %v9230_v17  ;;  %2361 = vmatprep.subr.bf16.mxu0 %v9239_v56  ;;  %v12845_v17 = vld [vmem:[#allocation144_spill] sm:$0xff]  ;;  %v12846_v56 = vld [vmem:[#allocation145_spill] sm:$0xff] }
 0x288   :  { %2402 = vmatprep.subr.bf16.mxu1 %v12838_v32  ;;  %2391 = vmatprep.mubr.bf16.mxu0 %v12638_v48  ;;  %v12847_v32 = vld [vmem:[#allocation146_spill] sm:$0xff] }
 0x289   :  { %2432 = vmatprep.mubr.bf16.mxu1 %v12638_v48 }
 0x28a   :  { %2362 = vmatpush1.bf16.msra.mxu0 %v12839_v41  ;;  %v12850_v41 = vld [vmem:[#allocation149_spill] sm:$0xff] }
 0x28b   :  { %2403 = vmatpush1.bf16.msra.mxu1 %v12840_v0  ;;  %2363 = vmatprep.subr.bf16.mxu0 %v12841_v1  ;;  %v12851_v0 = vld [vmem:[#allocation150_spill] sm:$0xff]  ;;  %v12852_v1 = vld [vmem:[#allocation151_spill] sm:$0xff] }
 0x28c   :  { %2404 = vmatprep.subr.bf16.mxu1 %v12842_v40  ;;  %v12853_v40 = vld [vmem:[#allocation152_spill] sm:$0xff] }
 0x28e   :  { %2364 = vmatpush1.bf16.msra.mxu0 %v12843_v27  ;;  %v12854_v27 = vld [vmem:[#allocation153_spill] sm:$0xff] }
 0x28f   :  { %2405 = vmatpush1.bf16.msra.mxu1 %v12844_v11  ;;  %2365 = vmatprep.subr.bf16.mxu0 %v12845_v17  ;;  %v12855_v11 = vld [vmem:[#allocation154_spill] sm:$0xff]  ;;  %v12856_v17 = vld [vmem:[#allocation155_spill] sm:$0xff] }
 0x290   :  { %2406 = vmatprep.subr.bf16.mxu1 %v12846_v56  ;;  %v12857_v56 = vld [vmem:[#allocation156_spill] sm:$0xff] }
 0x292   :  { %2366 = vmatpush1.bf16.msra.mxu0 %v12847_v32  ;;  %v12858_v32 = vld [vmem:[#allocation157_spill] sm:$0xff] }
 0x293   :  { %2407 = vmatpush1.bf16.msra.mxu1 %v12848_v37  ;;  %2367 = vmatprep.subr.bf16.mxu0 %v12849_v12  ;;  %v12859_v37 = vld [vmem:[#allocation158_spill] sm:$0xff]  ;;  %v12860_v12 = vld [vmem:[#allocation159_spill] sm:$0xff] }
 0x294   :  { %2408 = vmatprep.subr.bf16.mxu1 %v12850_v41  ;;  %v12861_v41 = vld [vmem:[#allocation160_spill] sm:$0xff] }
 0x296   :  { %2368 = vmatpush1.bf16.msra.mxu0 %v12851_v0  ;;  %v12862_v0 = vld [vmem:[#allocation161_spill] sm:$0xff] }
 0x297   :  { %2409 = vmatpush1.bf16.msra.mxu1 %v12852_v1  ;;  %2369 = vmatprep.subr.bf16.mxu0 %v12853_v40  ;;  %v12863_v1 = vld [vmem:[#allocation162_spill] sm:$0xff] }
 0x298   :  { %2410 = vmatprep.subr.bf16.mxu1 %v12854_v27  ;;  %v1584_v40 = vld [vmem:[#allocation3 + $0x28] sm:$0x3]  ;;  %v1586_v27 = vld [vmem:[#allocation3 + $0x10] sm:$0x3] }
 0x29a   :  { %2370 = vmatpush1.bf16.msra.mxu0 %v12855_v11  ;;  %v12865_v11 = vld [vmem:[#allocation164_spill] sm:$0xff] }
 0x29b   :  { %2411 = vmatpush1.bf16.msra.mxu1 %v12856_v17  ;;  %2371 = vmatprep.subr.bf16.mxu0 %v12857_v56  ;;  %v12866_v17 = vld [vmem:[#allocation165_spill] sm:$0xff] }
 0x29c   :  { %2412 = vmatprep.subr.bf16.mxu1 %v12858_v32 }
 0x29e   :  { %2372 = vmatpush1.bf16.msra.mxu0 %v12859_v37  ;;  %v1587_v37 = vld [vmem:[#allocation3 + $0x20] sm:$0x3] }
 0x29f   :  { %2413 = vmatpush1.bf16.msra.mxu1 %v12860_v12  ;;  %2373 = vmatprep.subr.bf16.mxu0 %v12861_v41 }
 0x2a0   :  { %2414 = vmatprep.subr.bf16.mxu1 %v12862_v0 }
 0x2a2   :  { %2374 = vmatpush1.bf16.msra.mxu0 %v12863_v1 }
 0x2a3   :  { %2415 = vmatpush1.bf16.msra.mxu1 %v12864_v28  ;;  %2468 = vmatprep.subr.bf16.mxu0 %v12865_v11 }
 0x2a4   :  { %2509 = vmatprep.subr.bf16.mxu1 %v12866_v17 }
 0x2a5   :  { %v1782_v56 = vpop.f32.mrf.mxu0  ;;  %v1823_v32 = vpop.f32.mrf.mxu1 }
 0x2a6   :  { %v1830_v51 = vadd.f32 %v1782_v56, %v1584_v40  ;;  %v1832_v12 = vadd.f32 %v1823_v32, %v1586_v27  ;;  %v1839_v40 = vld [vmem:[#allocation3 + $0x8] sm:$0xc0]  ;;  %v1841_v56 = vld [vmem:[#allocation3 + $0x30] sm:$0xc0] }
 0x2a7   :  { %v1784_v58 = vpop.f32.mrf.mxu0  ;;  %v1825_v41 = vpop.f32.mrf.mxu1 }
 0x2a8   :  { %1834 = vst [vmem:[#allocation3 + $0x28] sm:$0x3] %v1830_v51  ;;  %1836 = vst [vmem:[#allocation3 + $0x10] sm:$0x3] %v1832_v12  ;;  %v1831_v0 = vadd.f32 %v1784_v58, %v1585_v34  ;;  %v1833_v1 = vadd.f32 %v1825_v41, %v1587_v37 }
 0x2a9   :  { %v1786_v20 = vpop.f32.mrf.mxu0  ;;  %v1827_v4 = vpop.f32.mrf.mxu1 }
 0x2aa   :  { %1835 = vst [vmem:[#allocation3] sm:$0x3] %v1831_v0  ;;  %1837 = vst [vmem:[#allocation3 + $0x20] sm:$0x3] %v1833_v1 }
 0x2ab   :  { %v1787_v28 = vpop.f32.mrf.mxu0  ;;  %v1828_v11 = vpop.f32.mrf.mxu1 }
 0x2c5   :  { %v2036_v17 = vpop.f32.mrf.mxu0  ;;  %v2077_v30 = vpop.f32.mrf.mxu1 }
 0x2c6   :  { %v2088_v29 = vrot.slane %v2036_v17, 2  ;;  %v2090_v24 = vrot.slane %v2077_v30, 2 }
 0x2c7   :  { %v2038_v27 = vpop.f32.mrf.mxu0  ;;  %v2079_v32 = vpop.f32.mrf.mxu1 }
 0x2c8   :  { %v2096_v51 = vadd.f32 %v2088_v29, %v1838_v42  ;;  %v2098_v12 = vadd.f32 %v2090_v24, %v1840_v31  ;;  %v2089_v58 = vrot.slane %v2038_v27, 2  ;;  %v2091_v34 = vrot.slane %v2079_v32, 2  ;;  %v2107_v29 = vld [vmem:[#allocation2 + $0x18] sm:$0xc] }
 0x2c9   :  { %v2040_v20 = vpop.f32.mrf.mxu0  ;;  %v2081_v4 = vpop.f32.mrf.mxu1 }
 0x2ca   :  { %2100 = vst [vmem:[#allocation3 + $0x18] sm:$0xc0] %v2096_v51  ;;  %2102 = vst [vmem:[#allocation3 + $0x38] sm:$0xc0] %v2098_v12  ;;  %v2097_v37 = vadd.f32 %v2089_v58, %v1839_v40  ;;  %v2099_v41 = vadd.f32 %v2091_v34, %v1841_v56  ;;  %v2337_v12 = vrot.slane %v9413_v19, 6 }
 0x2cb   :  { %v2041_v0 = vpop.f32.mrf.mxu0  ;;  %v2082_v1 = vpop.f32.mrf.mxu1  ;;  %v2106_v4 = vld [vmem:[#allocation2 + $0x58] sm:$0xc]  ;;  %v2108_v19 = vld [vmem:[#allocation2 + $0x50] sm:$0xc] }
 0x2cc   :  { %2101 = vst [vmem:[#allocation3 + $0x8] sm:$0xc0] %v2097_v37  ;;  %2103 = vst [vmem:[#allocation3 + $0x30] sm:$0xc0] %v2099_v41  ;;  %v2104_v0 = vld [vmem:[#allocation2 + $0x30] sm:$0xc] }
 0x2cd   :  { %v2105_v1 = vld [vmem:[#allocation2] sm:$0xc] }
 0x305   :  { %v2146_v28 = vpop.f32.mrf.mxu0 }
 0x306   :  { %v2187_v30 = vpop.f32.mrf.mxu1  ;;  %v2284_v20 = vrot.slane %v2146_v28, 6 }
 0x307   :  { %v2148_v11 = vpop.f32.mrf.mxu0  ;;  %v2286_v34 = vrot.slane %v2187_v30, 6 }
 0x308   :  { %v2189_v17 = vpop.f32.mrf.mxu1  ;;  %v2285_v41 = vrot.slane %v2148_v11, 6  ;;  %v2109_v11 = vld [vmem:[#allocation2 + $0x68] sm:$0xc] }
 0x309   :  { %v2287_v23 = vrot.slane %v2189_v17, 6  ;;  %v2150_v22 = vpop.f32.mrf.mxu0  ;;  %v2302_v37 = vadd.f32 %v2286_v34, %v2106_v4 }
 0x30a   :  { %v2191_v24 = vpop.f32.mrf.mxu1  ;;  %v2300_v22 = vadd.f32 %v2284_v20, %v2104_v0  ;;  %v2110_v20 = vld [vmem:[#allocation2 + $0x8] sm:$0xc] }
 0x30b   :  { %v2303_v31 = vadd.f32 %v2287_v23, %v2107_v29  ;;  %v2151_v42 = vpop.f32.mrf.mxu0  ;;  %v2316_v17 = vmul.f32 0.5, %v2302_v37  ;;  %v2301_v23 = vadd.f32 %v2285_v41, %v2105_v1 }
 0x30c   :  { %v2192_v27 = vpop.f32.mrf.mxu1  ;;  %v2308_v29 = vmul.f32 0.5, %v2300_v22 }
 0x30d   :  { %v2317_v32 = vmul.f32 0.5, %v2303_v31  ;;  %v2309_v24 = vmul.f32 0.5, %v2301_v23 }
 0x30f   :  { %7996 = vtanh.f32 %v2317_v32 }
 0x310   :  { %7998 = vtanh.f32 %v2316_v17 }
 0x311   :  { %8000 = vtanh.f32 %v2308_v29 }
 0x312   :  { %8002 = vtanh.f32 %v2309_v24 }
 0x31c   :  { %v7997_v51 = vpop.eup %7996 }
 0x31d   :  { %v2321_v40 = vmul.f32 0.5, %v7997_v51  ;;  %v7999_v0 = vpop.eup %7998 }
 0x31e   :  { %v8001_v22 = vpop.eup %8000  ;;  %v2320_v1 = vmul.f32 0.5, %v7999_v0 }
 0x31f   :  { %v2323_v56 = vadd.f32 0.5, %v2321_v40  ;;  %v8003_v23 = vpop.eup %8002  ;;  %v2312_v29 = vmul.f32 0.5, %v8001_v22 }
 0x320   :  { %v2322_v24 = vadd.f32 0.5, %v2320_v1 }
 0x321   :  { %v2341_v58 = vmul.f32 %v2337_v12, %v2323_v56 }
 0x345   :  { %v2228_v31 = vpop.f32.mrf.mxu0 }
 0x346   :  { %v2288_v42 = vrot.slane %v2228_v31, 6  ;;  %v2269_v27 = vpop.f32.mrf.mxu1  ;;  %v2313_v31 = vmul.f32 0.5, %v8003_v23 }
 0x347   :  { %v2230_v32 = vpop.f32.mrf.mxu0  ;;  %v2290_v28 = vrot.slane %v2269_v27, 6  ;;  %v2336_v27 = vrot.slane %v9410_v57, 6 }
 0x348   :  { %v2304_v30 = vadd.f32 %v2288_v42, %v2108_v19  ;;  %v2289_v51 = vrot.slane %v2230_v32, 6  ;;  %v2271_v40 = vpop.f32.mrf.mxu1  ;;  %v2314_v42 = vadd.f32 0.5, %v2312_v29  ;;  %v12872_v29 = vld [vmem:[#allocation171_spill] sm:$0xff] }
 0x349   :  { %v2232_v56 = vpop.f32.mrf.mxu0  ;;  %v2306_v37 = vadd.f32 %v2290_v28, %v2110_v20  ;;  %v2340_v32 = vmul.f32 %v2336_v27, %v2322_v24  ;;  %v12875_v24 = vld [vmem:[#allocation174_spill] sm:$0xff]  ;;  %v12878_v27 = vld [vmem:[#allocation177_spill] sm:$0xff] }
 0x34a   :  { %8004 = vtanh.f32 %v2304_v30  ;;  %v2305_v12 = vadd.f32 %v2289_v51, %v2109_v11  ;;  %v2273_v34 = vpop.f32.mrf.mxu1  ;;  %v2315_v30 = vadd.f32 0.5, %v2313_v31  ;;  %v12876_v31 = vld [vmem:[#allocation175_spill] sm:$0xff] }
 0x34b   :  { %v2233_v4 = vpop.f32.mrf.mxu0  ;;  %v2326_v17 = vmul.f32 0.5, %v2306_v37  ;;  %v2111_v37 = vld [vmem:[#allocation2 + $0x48] sm:$0xc] }
 0x34c   :  { %8006 = vtanh.f32 %v2305_v12  ;;  %v2274_v41 = vpop.f32.mrf.mxu1  ;;  %v2291_v4 = vrot.slane %v2271_v40, 6 }
 0x34d   :  { %8008 = vtanh.f32 %v2326_v17 }
 0x34e   :  { %v2307_v0 = vadd.f32 %v2291_v4, %v2111_v37  ;;  %v12890_v37 = vld [vmem:[#allocation36_spill] sm:$0xff] }
 0x350   :  { %v2327_v17 = vmul.f32 0.5, %v2307_v0  ;;  %v12892_v0 = vld [vmem:[#allocation38_spill] sm:$0xff] }
 0x357   :  { %v8005_v19 = vpop.eup %8004 }
 0x358   :  { %v2342_v51 = vmul.f32 %v8005_v19, %v2314_v42  ;;  %v12877_v42 = vld [vmem:[#allocation176_spill] sm:$0xff]  ;;  %v12879_v19 = vld [vmem:[#allocation178_spill] sm:$0xff] }
 0x359   :  { %v8007_v11 = vpop.eup %8006 }
 0x35a   :  { %v9690_v28 = vadd.f32 %v2342_v51, %v2340_v32  ;;  %v2343_v56 = vmul.f32 %v8007_v11, %v2315_v30  ;;  %v8009_v34 = vpop.eup %8008  ;;  %v12880_v51 = vld [vmem:[#allocation179_spill] sm:$0xff]  ;;  %v12881_v11 = vld [vmem:[#allocation180_spill] sm:$0xff] }
 0x35b   :  { %v2330_v20 = vmul.f32 0.5, %v8009_v34  ;;  %v12882_v34 = vld [vmem:[#allocation181_spill] sm:$0xff] }
 0x35c   :  { %8010 = vtanh.f32 %v9690_v28  ;;  %v9693_v12 = vadd.f32 %v2343_v56, %v2341_v58  ;;  %v12867_v58 = vld [vmem:[#allocation166_spill] sm:$0xff] }
 0x35d   :  { %v2332_v41 = vadd.f32 0.5, %v2330_v20  ;;  %8012 = vtanh.f32 %v2327_v17  ;;  %v12896_v17 = vld [vmem:[#allocation42_spill] sm:$0xff] }
 0x35e   :  { %8014 = vtanh.f32 %v9693_v12 }
 0x369   :  { %v8011_v22 = vpop.eup %8010 }
 0x36a   :  { %v2348_v57 = vmul.f32 %v8011_v22, %v2332_v41  ;;  %v8013_v40 = vpop.eup %8012  ;;  %v12891_v41 = vld [vmem:[#allocation37_spill] sm:$0xff]  ;;  %v12893_v22 = vld [vmem:[#allocation39_spill] sm:$0xff] }
 0x36b   :  { %v8015_v32 = vpop.eup %8014 }
 0x36c   :  { %v2350_v1 = vpack.c.bf16 %v2348_v57, %v2348_v57  ;;  %v12894_v57 = vld [vmem:[#allocation40_spill] sm:$0xff] }
 0x36e   :  { %v9695_v23 = vrot.slane %v2350_v1, 1  ;;  %v12895_v1 = vld [vmem:[#allocation41_spill] sm:$0xff] }
 0x370   :  { %2392 = vmatmul.mubr.bf16.vlgmr.msra.gmra.mxu0 %v9695_v23  ;;  %2433 = vmatmul.mubr.bf16.vlgmr.msra.gmra.mxu1 %v9695_v23 }
 0x371   :  { %2469 = vmatpush1.bf16.msra.mxu0 %v9415_v18  ;;  %2510 = vmatpush1.bf16.msra.mxu1 %v9417_v36  ;;  %v12868_v18 = vld [vmem:[#allocation167_spill] sm:$0xff]  ;;  %v12869_v36 = vld [vmem:[#allocation168_spill] sm:$0xff] }
 0x372   :  { %2470 = vmatprep.subr.bf16.mxu0 %v9421_v26  ;;  %2511 = vmatprep.subr.bf16.mxu1 %v9423_v59  ;;  %v12870_v26 = vld [vmem:[#allocation169_spill] sm:$0xff]  ;;  %v12871_v59 = vld [vmem:[#allocation170_spill] sm:$0xff] }
 0x373   :  { %2500 = vmatprep.mubr.bf16.mxu0 %v12638_v48  ;;  %2541 = vmatprep.mubr.bf16.mxu1 %v12638_v48 }
 0x375   :  { %2471 = vmatpush1.bf16.msra.mxu0 %v9429_v25  ;;  %2512 = vmatpush1.bf16.msra.mxu1 %v9431_v33  ;;  %v12873_v25 = vld [vmem:[#allocation172_spill] sm:$0xff]  ;;  %v12874_v33 = vld [vmem:[#allocation173_spill] sm:$0xff] }
 0x376   :  { %2472 = vmatprep.subr.bf16.mxu0 %v9435_v43  ;;  %2513 = vmatprep.subr.bf16.mxu1 %v12867_v58  ;;  %v2331_v43 = vmul.f32 0.5, %v8013_v40  ;;  %v12897_v58 = vld [vmem:[#allocation43_spill] sm:$0xff]  ;;  %v12902_v40 = vld [vmem:[#allocation48_spill] sm:$0xff] }
 0x378   :  { %v2333_v30 = vadd.f32 0.5, %v2331_v43  ;;  %v12907_v43 = vld [vmem:[#allocation53_spill] sm:$0xff] }
 0x379   :  { %2473 = vmatpush1.bf16.msra.mxu0 %v12868_v18  ;;  %2514 = vmatpush1.bf16.msra.mxu1 %v12869_v36  ;;  %v12898_v18 = vld [vmem:[#allocation44_spill] sm:$0xff]  ;;  %v12899_v36 = vld [vmem:[#allocation45_spill] sm:$0xff] }
 0x37a   :  { %2474 = vmatprep.subr.bf16.mxu0 %v12870_v26  ;;  %2515 = vmatprep.subr.bf16.mxu1 %v12871_v59  ;;  %v2349_v56 = vmul.f32 %v8015_v32, %v2333_v30  ;;  %v12900_v26 = vld [vmem:[#allocation46_spill] sm:$0xff]  ;;  %v12901_v59 = vld [vmem:[#allocation47_spill] sm:$0xff] }
 0x37b   :  { %v12912_v32 = vld [vmem:[#allocation58_spill] sm:$0xff]  ;;  %v12913_v30 = vld [vmem:[#allocation59_spill] sm:$0xff] }
 0x37c   :  { %v2351_v20 = vpack.c.bf16 %v2349_v56, %v2349_v56  ;;  %v12916_v56 = vld [vmem:[#allocation62_spill] sm:$0xff] }
 0x37d   :  { %2475 = vmatpush1.bf16.msra.mxu0 %v12872_v29  ;;  %2516 = vmatpush1.bf16.msra.mxu1 %v12873_v25  ;;  %v12903_v29 = vld [vmem:[#allocation49_spill] sm:$0xff]  ;;  %v12904_v25 = vld [vmem:[#allocation50_spill] sm:$0xff] }
 0x37e   :  { %2476 = vmatprep.subr.bf16.mxu0 %v12874_v33  ;;  %2517 = vmatprep.subr.bf16.mxu1 %v12875_v24  ;;  %v9732_v4 = vrot.slane %v2351_v20, 1  ;;  %v12905_v33 = vld [vmem:[#allocation51_spill] sm:$0xff]  ;;  %v12906_v24 = vld [vmem:[#allocation52_spill] sm:$0xff] }
 0x37f   :  { %v12918_v20 = vld [vmem:[#allocation64_spill] sm:$0xff] }
 0x381   :  { %2477 = vmatpush1.bf16.msra.mxu0 %v12876_v31  ;;  %2518 = vmatpush1.bf16.msra.mxu1 %v12877_v42  ;;  %v12908_v31 = vld [vmem:[#allocation54_spill] sm:$0xff]  ;;  %v12909_v42 = vld [vmem:[#allocation55_spill] sm:$0xff] }
 0x382   :  { %2478 = vmatprep.subr.bf16.mxu0 %v12878_v27  ;;  %2519 = vmatprep.subr.bf16.mxu1 %v12879_v19  ;;  %v12910_v27 = vld [vmem:[#allocation56_spill] sm:$0xff]  ;;  %v12911_v19 = vld [vmem:[#allocation57_spill] sm:$0xff] }
 0x385   :  { %2479 = vmatpush1.bf16.msra.mxu0 %v12880_v51  ;;  %2520 = vmatpush1.bf16.msra.mxu1 %v12881_v11  ;;  %v12914_v51 = vld [vmem:[#allocation60_spill] sm:$0xff]  ;;  %v12915_v11 = vld [vmem:[#allocation61_spill] sm:$0xff] }
 0x386   :  { %2480 = vmatprep.subr.bf16.mxu0 %v9486_v10  ;;  %2521 = vmatprep.subr.bf16.mxu1 %v12882_v34  ;;  %v12885_v10 = vld [vmem:[#allocation31_spill] sm:$0xff] }
 0x387   :  { %v12917_v34 = vld [vmem:[#allocation63_spill] sm:$0xff] }
 0x389   :  { %2481 = vmatpush1.bf16.msra.mxu0 %v9492_v35  ;;  %2522 = vmatpush1.bf16.msra.mxu1 %v9494_v3  ;;  %v12886_v35 = vld [vmem:[#allocation32_spill] sm:$0xff]  ;;  %v12887_v3 = vld [vmem:[#allocation33_spill] sm:$0xff] }
 0x38a   :  { %2482 = vmatprep.subr.bf16.mxu0 %v9498_v2  ;;  %2523 = vmatprep.subr.bf16.mxu1 %v9500_v50  ;;  %v12883_v50 = vld [vmem:[#allocation29_spill] sm:$0xff]  ;;  %v12888_v2 = vld [vmem:[#allocation34_spill] sm:$0xff] }
 0x38d   :  { %2483 = vmatpush1.bf16.msra.mxu0 %v9504_v9  ;;  %2524 = vmatpush1.bf16.msra.mxu1 %v9506_v49  ;;  %v12884_v49 = vld [vmem:[#allocation30_spill] sm:$0xff]  ;;  %v12889_v9 = vld [vmem:[#allocation35_spill] sm:$0xff] }
 0x38e   :  { %2578 = vmatprep.subr.bf16.mxu0 %v8785_v38  ;;  %2619 = vmatprep.subr.bf16.mxu1 %v8788_v39 }
 0x390   :  { %2501 = vmatmul.mubr.bf16.vlgmr.msra.gmra.mxu0 %v9732_v4  ;;  %2542 = vmatmul.mubr.bf16.vlgmr.msra.gmra.mxu1 %v9732_v4 }
 0x391   :  { %2579 = vmatpush1.bf16.msra.mxu0 %v8791_v44  ;;  %2610 = vmatprep.mubr.bf16.mxu0 %v9732_v4 }
 0x392   :  { %2620 = vmatpush1.bf16.msra.mxu1 %v8794_v45  ;;  %2651 = vmatprep.mubr.bf16.mxu1 %v9732_v4 }
 0x393   :  { %2580 = vmatprep.subr.bf16.mxu0 %v8796_v46  ;;  %2621 = vmatprep.subr.bf16.mxu1 %v8799_v47 }
 0x395   :  { %2581 = vmatpush1.bf16.msra.mxu0 %v8804_v52 }
 0x396   :  { %2622 = vmatpush1.bf16.msra.mxu1 %v8808_v53  ;;  %2582 = vmatprep.subr.bf16.mxu0 %v8810_v54 }
 0x397   :  { %2623 = vmatprep.subr.bf16.mxu1 %v8813_v55 }
 0x399   :  { %2583 = vmatpush1.bf16.msra.mxu0 %v8818_v60 }
 0x39a   :  { %2624 = vmatpush1.bf16.msra.mxu1 %v8822_v61  ;;  %2584 = vmatprep.subr.bf16.mxu0 %v8824_v62 }
 0x39b   :  { %2625 = vmatprep.subr.bf16.mxu1 %v8827_v63 }
 0x39d   :  { %2585 = vmatpush1.bf16.msra.mxu0 %v8830_v5 }
 0x39e   :  { %2626 = vmatpush1.bf16.msra.mxu1 %v8834_v6  ;;  %2586 = vmatprep.subr.bf16.mxu0 %v8836_v7 }
 0x39f   :  { %2627 = vmatprep.subr.bf16.mxu1 %v8839_v8 }
 0x3a1   :  { %2587 = vmatpush1.bf16.msra.mxu0 %v8842_v13 }
 0x3a2   :  { %2628 = vmatpush1.bf16.msra.mxu1 %v8846_v14  ;;  %2588 = vmatprep.subr.bf16.mxu0 %v8848_v15 }
 0x3a3   :  { %2629 = vmatprep.subr.bf16.mxu1 %v8851_v16 }
 0x3a5   :  { %2589 = vmatpush1.bf16.msra.mxu0 %v8854_v21 }
 0x3a6   :  { %2630 = vmatpush1.bf16.msra.mxu1 %v12883_v50  ;;  %2590 = vmatprep.subr.bf16.mxu0 %v12884_v49 }
 0x3a7   :  { %2631 = vmatprep.subr.bf16.mxu1 %v12885_v10 }
 0x3a9   :  { %2591 = vmatpush1.bf16.msra.mxu0 %v12886_v35 }
 0x3aa   :  { %2632 = vmatpush1.bf16.msra.mxu1 %v12887_v3  ;;  %2592 = vmatprep.subr.bf16.mxu0 %v12888_v2 }
 0x3ab   :  { %2633 = vmatprep.subr.bf16.mxu1 %v12889_v9 }
 0x3ad   :  { %2593 = vmatpush1.bf16.msra.mxu0 %v12890_v37 }
 0x3ae   :  { %2634 = vmatpush1.bf16.msra.mxu1 %v12891_v41  ;;  %2594 = vmatprep.subr.bf16.mxu0 %v12892_v0 }
 0x3af   :  { %2635 = vmatprep.subr.bf16.mxu1 %v12893_v22 }
 0x3b1   :  { %2595 = vmatpush2.bf16.msra.mxu0 %v12894_v57 }
 0x3b2   :  { %2636 = vmatpush2.bf16.msra.mxu1 %v12895_v1  ;;  %2596 = vmatprep.subr.bf16.mxu0 %v12896_v17 }
 0x3b3   :  { %2637 = vmatprep.subr.bf16.mxu1 %v12897_v58 }
 0x3b5   :  { %2597 = vmatpush2.bf16.msra.mxu0 %v12898_v18 }
 0x3b6   :  { %2638 = vmatpush2.bf16.msra.mxu1 %v12899_v36  ;;  %2598 = vmatprep.subr.bf16.mxu0 %v12900_v26  ;;  %v2463_v26 = vld [vmem:[#allocation3 + $0x38] sm:$0x30] }
 0x3b7   :  { %2639 = vmatprep.subr.bf16.mxu1 %v12901_v59 }
 0x3b9   :  { %2599 = vmatpush2.bf16.msra.mxu0 %v12902_v40 }
 0x3ba   :  { %2640 = vmatpush2.bf16.msra.mxu1 %v12903_v29  ;;  %2600 = vmatprep.subr.bf16.mxu0 %v12904_v25 }
 0x3bb   :  { %2641 = vmatprep.subr.bf16.mxu1 %v12905_v33 }
 0x3bd   :  { %2601 = vmatpush2.bf16.msra.mxu0 %v12906_v24 }
 0x3be   :  { %2642 = vmatpush2.bf16.msra.mxu1 %v12907_v43  ;;  %2602 = vmatprep.subr.bf16.mxu0 %v12908_v31  ;;  %v12919_v31 = vld [vmem:[#allocation65_spill] sm:$0xff] }
 0x3bf   :  { %2643 = vmatprep.subr.bf16.mxu1 %v12909_v42  ;;  %v12920_v42 = vld [vmem:[#allocation66_spill] sm:$0xff] }
 0x3c1   :  { %2603 = vmatpush2.bf16.msra.mxu0 %v12910_v27  ;;  %v12921_v27 = vld [vmem:[#allocation67_spill] sm:$0xff] }
 0x3c2   :  { %2644 = vmatpush2.bf16.msra.mxu1 %v12911_v19  ;;  %2604 = vmatprep.subr.bf16.mxu0 %v12912_v32  ;;  %v12922_v19 = vld [vmem:[#allocation68_spill] sm:$0xff]  ;;  %v12923_v32 = vld [vmem:[#allocation69_spill] sm:$0xff] }
 0x3c3   :  { %2645 = vmatprep.subr.bf16.mxu1 %v12913_v30  ;;  %v12924_v30 = vld [vmem:[#allocation70_spill] sm:$0xff] }
 0x3c5   :  { %2605 = vmatpush2.bf16.msra.mxu0 %v12914_v51  ;;  %v12925_v51 = vld [vmem:[#allocation71_spill] sm:$0xff] }
 0x3c6   :  { %2646 = vmatpush2.bf16.msra.mxu1 %v12915_v11  ;;  %2606 = vmatprep.subr.bf16.mxu0 %v12916_v56  ;;  %v12936_v56 = vld [vmem:[#allocation85_spill] sm:$0xff] }
 0x3c7   :  { %2647 = vmatprep.subr.bf16.mxu1 %v12917_v34  ;;  %v12926_v34 = vld [vmem:[#allocation73_spill] sm:$0xff] }
 0x3c9   :  { %2607 = vmatpush2.bf16.msra.mxu0 %v12918_v20  ;;  %v12934_v20 = vld [vmem:[#allocation83_spill] sm:$0xff] }
 0x3ca   :  { %2648 = vmatpush2.bf16.msra.mxu1 %v12919_v31  ;;  %2608 = vmatprep.subr.bf16.mxu0 %v12920_v42  ;;  %v12927_v31 = vld [vmem:[#allocation74_spill] sm:$0xff]  ;;  %v12933_v42 = vld [vmem:[#allocation81_spill] sm:$0xff] }
 0x3cb   :  { %2649 = vmatprep.subr.bf16.mxu1 %v12921_v27  ;;  %v12928_v27 = vld [vmem:[#allocation75_spill] sm:$0xff] }
 0x3cd   :  { %2609 = vmatpush2.bf16.msra.mxu0 %v12922_v19  ;;  %v12929_v19 = vld [vmem:[#allocation76_spill] sm:$0xff] }
 0x3ce   :  { %2650 = vmatpush2.bf16.msra.mxu1 %v12923_v32  ;;  %2660 = vmatprep.subr.bf16.mxu0 %v12924_v30  ;;  %v12930_v32 = vld [vmem:[#allocation77_spill] sm:$0xff]  ;;  %v12931_v30 = vld [vmem:[#allocation79_spill] sm:$0xff] }
 0x3cf   :  { %2701 = vmatprep.subr.bf16.mxu1 %v12925_v51  ;;  %v12932_v51 = vld [vmem:[#allocation80_spill] sm:$0xff] }
 0x3d0   :  { %2611 = vmatmul.mubr.bf16.vlgmr.msra.gmra.mxu0 %v9695_v23 }
 0x3d1   :  { %2652 = vmatmul.mubr.bf16.vlgmr.msra.gmra.mxu1 %v9695_v23  ;;  %2661 = vmatpush1.bf16.msra.mxu0 %v12926_v34  ;;  %v12935_v34 = vld [vmem:[#allocation84_spill] sm:$0xff] }
 0x3d2   :  { %2692 = vmatprep.mubr.bf16.mxu0 %v9732_v4  ;;  %2702 = vmatpush1.bf16.msra.mxu1 %v12927_v31  ;;  %v12937_v31 = vld [vmem:[#allocation86_spill] sm:$0xff] }
 0x3d3   :  { %2733 = vmatprep.mubr.bf16.mxu1 %v9732_v4  ;;  %2662 = vmatprep.subr.bf16.mxu0 %v12928_v27  ;;  %v12938_v4 = vld [vmem:[#allocation87_spill] sm:$0xff]  ;;  %v12939_v27 = vld [vmem:[#allocation88_spill] sm:$0xff] }
 0x3d4   :  { %2703 = vmatprep.subr.bf16.mxu1 %v12929_v19  ;;  %v12940_v19 = vld [vmem:[#allocation89_spill] sm:$0xff] }
 0x3d5   :  { %2663 = vmatpush1.bf16.msra.mxu0 %v12930_v32  ;;  %v12941_v32 = vld [vmem:[#allocation90_spill] sm:$0xff] }
 0x3d6   :  { %2704 = vmatpush1.bf16.msra.mxu1 %v12931_v30  ;;  %2664 = vmatprep.subr.bf16.mxu0 %v12932_v51  ;;  %v12942_v30 = vld [vmem:[#allocation91_spill] sm:$0xff]  ;;  %v12943_v51 = vld [vmem:[#allocation92_spill] sm:$0xff] }
 0x3d7   :  { %2705 = vmatprep.subr.bf16.mxu1 %v12933_v42  ;;  %v12944_v42 = vld [vmem:[#allocation93_spill] sm:$0xff] }
 0x3d9   :  { %2665 = vmatpush1.bf16.msra.mxu0 %v12934_v20  ;;  %v12945_v20 = vld [vmem:[#allocation94_spill] sm:$0xff] }
 0x3da   :  { %2706 = vmatpush1.bf16.msra.mxu1 %v12935_v34  ;;  %2666 = vmatprep.subr.bf16.mxu0 %v12936_v56  ;;  %v12946_v34 = vld [vmem:[#allocation95_spill] sm:$0xff]  ;;  %v12947_v56 = vld [vmem:[#allocation96_spill] sm:$0xff] }
 0x3db   :  { %2707 = vmatprep.subr.bf16.mxu1 %v12937_v31  ;;  %v12948_v31 = vld [vmem:[#allocation97_spill] sm:$0xff] }
 0x3dd   :  { %2667 = vmatpush1.bf16.msra.mxu0 %v12938_v4  ;;  %v12949_v4 = vld [vmem:[#allocation98_spill] sm:$0xff] }
 0x3de   :  { %2708 = vmatpush1.bf16.msra.mxu1 %v12939_v27  ;;  %2668 = vmatprep.subr.bf16.mxu0 %v12940_v19  ;;  %v12950_v27 = vld [vmem:[#allocation99_spill] sm:$0xff]  ;;  %v12951_v19 = vld [vmem:[#allocation100_spill] sm:$0xff] }
 0x3df   :  { %2709 = vmatprep.subr.bf16.mxu1 %v12941_v32  ;;  %v12952_v32 = vld [vmem:[#allocation101_spill] sm:$0xff] }
 0x3e1   :  { %2669 = vmatpush1.bf16.msra.mxu0 %v12942_v30  ;;  %v12953_v30 = vld [vmem:[#allocation102_spill] sm:$0xff] }
 0x3e2   :  { %2710 = vmatpush1.bf16.msra.mxu1 %v12943_v51  ;;  %2670 = vmatprep.subr.bf16.mxu0 %v12944_v42  ;;  %v12954_v51 = vld [vmem:[#allocation103_spill] sm:$0xff]  ;;  %v12955_v42 = vld [vmem:[#allocation104_spill] sm:$0xff] }
 0x3e3   :  { %2711 = vmatprep.subr.bf16.mxu1 %v12945_v20  ;;  %v12956_v20 = vld [vmem:[#allocation105_spill] sm:$0xff] }
 0x3e5   :  { %2671 = vmatpush1.bf16.msra.mxu0 %v12946_v34  ;;  %v12957_v34 = vld [vmem:[#allocation106_spill] sm:$0xff] }
 0x3e6   :  { %2712 = vmatpush1.bf16.msra.mxu1 %v12947_v56  ;;  %2672 = vmatprep.subr.bf16.mxu0 %v12948_v31  ;;  %v12958_v56 = vld [vmem:[#allocation107_spill] sm:$0xff]  ;;  %v12959_v31 = vld [vmem:[#allocation108_spill] sm:$0xff] }
 0x3e7   :  { %2713 = vmatprep.subr.bf16.mxu1 %v12949_v4  ;;  %v12960_v4 = vld [vmem:[#allocation109_spill] sm:$0xff] }
 0x3e9   :  { %2673 = vmatpush1.bf16.msra.mxu0 %v12950_v27  ;;  %v12961_v27 = vld [vmem:[#allocation110_spill] sm:$0xff] }
 0x3ea   :  { %2714 = vmatpush1.bf16.msra.mxu1 %v12951_v19  ;;  %2674 = vmatprep.subr.bf16.mxu0 %v12952_v32  ;;  %v12962_v19 = vld [vmem:[#allocation111_spill] sm:$0xff]  ;;  %v12963_v32 = vld [vmem:[#allocation112_spill] sm:$0xff] }
 0x3eb   :  { %2715 = vmatprep.subr.bf16.mxu1 %v12953_v30  ;;  %v12964_v30 = vld [vmem:[#allocation113_spill] sm:$0xff] }
 0x3ed   :  { %2675 = vmatpush1.bf16.msra.mxu0 %v12954_v51  ;;  %v12965_v51 = vld [vmem:[#allocation114_spill] sm:$0xff] }
 0x3ee   :  { %2716 = vmatpush1.bf16.msra.mxu1 %v12955_v42  ;;  %2676 = vmatprep.subr.bf16.mxu0 %v12956_v20  ;;  %v12966_v42 = vld [vmem:[#allocation115_spill] sm:$0xff]  ;;  %v12967_v20 = vld [vmem:[#allocation116_spill] sm:$0xff] }
 0x3ef   :  { %2717 = vmatprep.subr.bf16.mxu1 %v12957_v34  ;;  %v12968_v34 = vld [vmem:[#allocation117_spill] sm:$0xff] }
 0x3f1   :  { %2677 = vmatpush2.bf16.msra.mxu0 %v12958_v56  ;;  %v12969_v56 = vld [vmem:[#allocation118_spill] sm:$0xff] }
 0x3f2   :  { %2718 = vmatpush2.bf16.msra.mxu1 %v12959_v31  ;;  %2678 = vmatprep.subr.bf16.mxu0 %v12960_v4  ;;  %v12970_v31 = vld [vmem:[#allocation119_spill] sm:$0xff]  ;;  %v12971_v4 = vld [vmem:[#allocation120_spill] sm:$0xff] }
 0x3f3   :  { %2719 = vmatprep.subr.bf16.mxu1 %v12961_v27  ;;  %v12972_v27 = vld [vmem:[#allocation121_spill] sm:$0xff] }
 0x3f5   :  { %2679 = vmatpush2.bf16.msra.mxu0 %v12962_v19  ;;  %v12973_v19 = vld [vmem:[#allocation122_spill] sm:$0xff] }
 0x3f6   :  { %2720 = vmatpush2.bf16.msra.mxu1 %v12963_v32  ;;  %2680 = vmatprep.subr.bf16.mxu0 %v12964_v30  ;;  %v12974_v32 = vld [vmem:[#allocation123_spill] sm:$0xff]  ;;  %v12975_v30 = vld [vmem:[#allocation124_spill] sm:$0xff] }
 0x3f7   :  { %2721 = vmatprep.subr.bf16.mxu1 %v12965_v51  ;;  %v12976_v51 = vld [vmem:[#allocation125_spill] sm:$0xff] }
 0x3f9   :  { %2681 = vmatpush2.bf16.msra.mxu0 %v12966_v42  ;;  %v12977_v42 = vld [vmem:[#allocation126_spill] sm:$0xff] }
 0x3fa   :  { %2722 = vmatpush2.bf16.msra.mxu1 %v12967_v20  ;;  %2682 = vmatprep.subr.bf16.mxu0 %v12968_v34  ;;  %v12978_v20 = vld [vmem:[#allocation127_spill] sm:$0xff]  ;;  %v12979_v34 = vld [vmem:[#allocation128_spill] sm:$0xff] }
 0x3fb   :  { %2723 = vmatprep.subr.bf16.mxu1 %v12969_v56  ;;  %v12980_v56 = vld [vmem:[#allocation129_spill] sm:$0xff] }
 0x3fd   :  { %2683 = vmatpush2.bf16.msra.mxu0 %v12970_v31  ;;  %v12981_v31 = vld [vmem:[#allocation130_spill] sm:$0xff] }
 0x3fe   :  { %2724 = vmatpush2.bf16.msra.mxu1 %v12971_v4  ;;  %2684 = vmatprep.subr.bf16.mxu0 %v12972_v27  ;;  %v12982_v4 = vld [vmem:[#allocation131_spill] sm:$0xff]  ;;  %v12983_v27 = vld [vmem:[#allocation132_spill] sm:$0xff] }
 0x3ff   :  { %2725 = vmatprep.subr.bf16.mxu1 %v12973_v19  ;;  %v12984_v19 = vld [vmem:[#allocation133_spill] sm:$0xff] }
 0x401   :  { %2685 = vmatpush2.bf16.msra.mxu0 %v12974_v32  ;;  %v12985_v32 = vld [vmem:[#allocation134_spill] sm:$0xff] }
 0x402   :  { %2726 = vmatpush2.bf16.msra.mxu1 %v12975_v30  ;;  %2686 = vmatprep.subr.bf16.mxu0 %v12976_v51  ;;  %v12986_v30 = vld [vmem:[#allocation135_spill] sm:$0xff]  ;;  %v12987_v51 = vld [vmem:[#allocation136_spill] sm:$0xff] }
 0x403   :  { %2727 = vmatprep.subr.bf16.mxu1 %v12977_v42  ;;  %v2355_v42 = vld [vmem:[#allocation3 + $0x20] sm:$0xc] }
 0x405   :  { %2687 = vmatpush2.bf16.msra.mxu0 %v12978_v20 }
 0x406   :  { %2728 = vmatpush2.bf16.msra.mxu1 %v12979_v34  ;;  %2688 = vmatprep.subr.bf16.mxu0 %v12980_v56  ;;  %v9873_v34 = vld [vmem:[%s12131_s4 + $0xe4] ss:$16 sps:$4 sm:$0xff]   ;;  %v2353_v56 = vld [vmem:[#allocation3] sm:$0xc] }
 0x407   :  { %2729 = vmatprep.subr.bf16.mxu1 %v12981_v31  ;;  %12988 = vst [vmem:[#allocation137_spill] sm:$0xff] %v9873_v34 }
 0x409   :  { %2689 = vmatpush2.bf16.msra.mxu0 %v12982_v4  ;;  %v9879_v4 = vld [vmem:[%s12131_s4 + $0xec] ss:$16 sps:$4 sm:$0xff]  }
 0x40a   :  { %2730 = vmatpush2.bf16.msra.mxu1 %v12983_v27  ;;  %2690 = vmatprep.subr.bf16.mxu0 %v12984_v19  ;;  %12989 = vst [vmem:[#allocation138_spill] sm:$0xff] %v9879_v4  ;;  %v2354_v19 = vld [vmem:[#allocation3 + $0x10] sm:$0xc] }
 0x40b   :  { %2731 = vmatprep.subr.bf16.mxu1 %v12985_v32 }
 0x40d   :  { %2691 = vmatpush2.bf16.msra.mxu0 %v12986_v30  ;;  %v10069_v30 = vld [vmem:[#allocation9 + $0xec] ss:$16 sps:$4 sm:$0xff]  }
 0x40e   :  { %2732 = vmatpush2.bf16.msra.mxu1 %v12987_v51  ;;  %2825 = vmatprep.subr.bf16.mxu0 %v9873_v34  ;;  %v9887_v51 = vld [vmem:[%s12131_s4 + $0xe0] ss:$16 sps:$4 sm:$0xff]   ;;  %v9893_v34 = vld [vmem:[%s12131_s4 + $0xe8] ss:$16 sps:$4 sm:$0xff]   ;;  %13021 = vst [vmem:[#allocation170_spill] sm:$0xff] %v10069_v30 }
 0x40f   :  { %2866 = vmatprep.subr.bf16.mxu1 %v9879_v4  ;;  %12990 = vst [vmem:[#allocation139_spill] sm:$0xff] %v9887_v51  ;;  %12991 = vst [vmem:[#allocation140_spill] sm:$0xff] %v9893_v34  ;;  %v9899_v4 = vld [vmem:[%s12131_s4 + $0xc4] ss:$16 sps:$4 sm:$0xff]  }
 0x410   :  { %2693 = vmatmul.mubr.bf16.vlgmr.msra.gmra.mxu0 %v9695_v23  ;;  %12992 = vst [vmem:[#allocation141_spill] sm:$0xff] %v9899_v4 }
 0x411   :  { %2734 = vmatmul.mubr.bf16.vlgmr.msra.gmra.mxu1 %v9695_v23  ;;  %2826 = vmatpush1.bf16.msra.mxu0 %v9887_v51  ;;  %v9905_v23 = vld [vmem:[%s12131_s4 + $0xcc] ss:$16 sps:$4 sm:$0xff]  }
 0x412   :  { %2867 = vmatpush1.bf16.msra.mxu1 %v9893_v34  ;;  %2827 = vmatprep.subr.bf16.mxu0 %v9899_v4  ;;  %12993 = vst [vmem:[#allocation142_spill] sm:$0xff] %v9905_v23  ;;  %v9913_v34 = vld [vmem:[%s12131_s4 + $0xc0] ss:$16 sps:$4 sm:$0xff]   ;;  %v9919_v4 = vld [vmem:[%s12131_s4 + $0xc8] ss:$16 sps:$4 sm:$0xff]  }
 0x413   :  { %2868 = vmatprep.subr.bf16.mxu1 %v9905_v23  ;;  %2857 = vmatprep.mubr.bf16.mxu0 %v12638_v48  ;;  %12994 = vst [vmem:[#allocation143_spill] sm:$0xff] %v9913_v34  ;;  %12995 = vst [vmem:[#allocation144_spill] sm:$0xff] %v9919_v4  ;;  %v9925_v23 = vld [vmem:[%s12131_s4 + $0xa4] ss:$16 sps:$4 sm:$0xff]   ;;  %v9931_v51 = vld [vmem:[%s12131_s4 + $0xac] ss:$16 sps:$4 sm:$0xff]  }
 0x414   :  { %2898 = vmatprep.mubr.bf16.mxu1 %v12638_v48  ;;  %12996 = vst [vmem:[#allocation145_spill] sm:$0xff] %v9925_v23  ;;  %12997 = vst [vmem:[#allocation146_spill] sm:$0xff] %v9931_v51 }
 0x415   :  { %2828 = vmatpush1.bf16.msra.mxu0 %v9913_v34  ;;  %v9937_v34 = vld [vmem:[%s12131_s4 + $0xa0] ss:$16 sps:$4 sm:$0xff]  }
 0x416   :  { %2869 = vmatpush1.bf16.msra.mxu1 %v9919_v4  ;;  %2829 = vmatprep.subr.bf16.mxu0 %v9925_v23  ;;  %12998 = vst [vmem:[#allocation147_spill] sm:$0xff] %v9937_v34  ;;  %v9943_v4 = vld [vmem:[%s12131_s4 + $0xa8] ss:$16 sps:$4 sm:$0xff]   ;;  %v9949_v23 = vld [vmem:[%s12131_s4 + $0x84] ss:$16 sps:$4 sm:$0xff]  }
 0x417   :  { %2870 = vmatprep.subr.bf16.mxu1 %v9931_v51  ;;  %12999 = vst [vmem:[#allocation148_spill] sm:$0xff] %v9943_v4  ;;  %13000 = vst [vmem:[#allocation149_spill] sm:$0xff] %v9949_v23  ;;  %v9955_v51 = vld [vmem:[%s12131_s4 + $0x8c] ss:$16 sps:$4 sm:$0xff]  }
 0x418   :  { %13001 = vst [vmem:[#allocation150_spill] sm:$0xff] %v9955_v51 }
 0x419   :  { %2830 = vmatpush1.bf16.msra.mxu0 %v9937_v34  ;;  %v9961_v34 = vld [vmem:[%s12131_s4 + $0x80] ss:$16 sps:$4 sm:$0xff]  }
 0x41a   :  { %2871 = vmatpush1.bf16.msra.mxu1 %v9943_v4  ;;  %2831 = vmatprep.subr.bf16.mxu0 %v9949_v23  ;;  %13002 = vst [vmem:[#allocation151_spill] sm:$0xff] %v9961_v34  ;;  %v9967_v4 = vld [vmem:[%s12131_s4 + $0x88] ss:$16 sps:$4 sm:$0xff]   ;;  %v9973_v23 = vld [vmem:[%s12131_s4 + $0x64] ss:$16 sps:$4 sm:$0xff]  }
 0x41b   :  { %2872 = vmatprep.subr.bf16.mxu1 %v9955_v51  ;;  %13003 = vst [vmem:[#allocation152_spill] sm:$0xff] %v9967_v4  ;;  %13004 = vst [vmem:[#allocation153_spill] sm:$0xff] %v9973_v23  ;;  %v9979_v51 = vld [vmem:[%s12131_s4 + $0x6c] ss:$16 sps:$4 sm:$0xff]  }
 0x41c   :  { %13005 = vst [vmem:[#allocation154_spill] sm:$0xff] %v9979_v51 }
 0x41d   :  { %2832 = vmatpush1.bf16.msra.mxu0 %v9961_v34  ;;  %v9985_v34 = vld [vmem:[%s12131_s4 + $0x60] ss:$16 sps:$4 sm:$0xff]  }
 0x41e   :  { %2873 = vmatpush1.bf16.msra.mxu1 %v9967_v4  ;;  %2833 = vmatprep.subr.bf16.mxu0 %v9973_v23  ;;  %13006 = vst [vmem:[#allocation155_spill] sm:$0xff] %v9985_v34  ;;  %v9991_v4 = vld [vmem:[%s12131_s4 + $0x68] ss:$16 sps:$4 sm:$0xff]   ;;  %v9997_v23 = vld [vmem:[%s12131_s4 + $0x44] ss:$16 sps:$4 sm:$0xff]  }
 0x41f   :  { %2874 = vmatprep.subr.bf16.mxu1 %v9979_v51  ;;  %13007 = vst [vmem:[#allocation156_spill] sm:$0xff] %v9991_v4  ;;  %13008 = vst [vmem:[#allocation157_spill] sm:$0xff] %v9997_v23  ;;  %v10003_v51 = vld [vmem:[%s12131_s4 + $0x4c] ss:$16 sps:$4 sm:$0xff]  }
 0x420   :  { %13009 = vst [vmem:[#allocation158_spill] sm:$0xff] %v10003_v51 }
 0x421   :  { %2834 = vmatpush1.bf16.msra.mxu0 %v9985_v34  ;;  %v10009_v34 = vld [vmem:[%s12131_s4 + $0x40] ss:$16 sps:$4 sm:$0xff]  }
 0x422   :  { %2875 = vmatpush1.bf16.msra.mxu1 %v9991_v4  ;;  %2835 = vmatprep.subr.bf16.mxu0 %v9997_v23  ;;  %13010 = vst [vmem:[#allocation159_spill] sm:$0xff] %v10009_v34  ;;  %v10015_v4 = vld [vmem:[%s12131_s4 + $0x48] ss:$16 sps:$4 sm:$0xff]   ;;  %v10021_v23 = vld [vmem:[%s12131_s4 + $0x24] ss:$16 sps:$4 sm:$0xff]  }
 0x423   :  { %2876 = vmatprep.subr.bf16.mxu1 %v10003_v51  ;;  %13011 = vst [vmem:[#allocation160_spill] sm:$0xff] %v10015_v4  ;;  %13012 = vst [vmem:[#allocation161_spill] sm:$0xff] %v10021_v23  ;;  %v10027_v51 = vld [vmem:[%s12131_s4 + $0x2c] ss:$16 sps:$4 sm:$0xff]  }
 0x424   :  { %13013 = vst [vmem:[#allocation162_spill] sm:$0xff] %v10027_v51 }
 0x425   :  { %2836 = vmatpush1.bf16.msra.mxu0 %v10009_v34  ;;  %v10033_v34 = vld [vmem:[%s12131_s4 + $0x20] ss:$16 sps:$4 sm:$0xff]  }
 0x426   :  { %2877 = vmatpush1.bf16.msra.mxu1 %v10015_v4  ;;  %2837 = vmatprep.subr.bf16.mxu0 %v10021_v23  ;;  %13014 = vst [vmem:[#allocation163_spill] sm:$0xff] %v10033_v34  ;;  %v10039_v4 = vld [vmem:[%s12131_s4 + $0x28] ss:$16 sps:$4 sm:$0xff]   ;;  %v10045_v23 = vld [vmem:[%s12131_s4 + $0x4] ss:$16 sps:$4 sm:$0xff]  }
 0x427   :  { %2878 = vmatprep.subr.bf16.mxu1 %v10027_v51  ;;  %13015 = vst [vmem:[#allocation164_spill] sm:$0xff] %v10039_v4  ;;  %13016 = vst [vmem:[#allocation165_spill] sm:$0xff] %v10045_v23  ;;  %v10051_v51 = vld [vmem:[%s12131_s4 + $0xc] ss:$16 sps:$4 sm:$0xff]  }
 0x428   :  { %13017 = vst [vmem:[#allocation166_spill] sm:$0xff] %v10051_v51 }
 0x429   :  { %2838 = vmatpush1.bf16.msra.mxu0 %v10033_v34  ;;  %v10057_v34 = vld [vmem:[%s12131_s4] ss:$16 sps:$4 sm:$0xff]  }
 0x42a   :  { %2879 = vmatpush1.bf16.msra.mxu1 %v10039_v4  ;;  %2839 = vmatprep.subr.bf16.mxu0 %v10045_v23  ;;  %13018 = vst [vmem:[#allocation167_spill] sm:$0xff] %v10057_v34  ;;  %v10063_v4 = vld [vmem:[%s12131_s4 + $0x8] ss:$16 sps:$4 sm:$0xff]   ;;  %v10066_v23 = vld [vmem:[#allocation9 + $0xe4] ss:$16 sps:$4 sm:$0xff]  }
 0x42b   :  { %2880 = vmatprep.subr.bf16.mxu1 %v10051_v51  ;;  %13019 = vst [vmem:[#allocation168_spill] sm:$0xff] %v10063_v4  ;;  %13020 = vst [vmem:[#allocation169_spill] sm:$0xff] %v10066_v23  ;;  %v2352_v51 = vld [vmem:[#allocation3 + $0x28] sm:$0xc] }
 0x42d   :  { %2840 = vmatpush1.bf16.msra.mxu0 %v10057_v34 }
 0x42e   :  { %2881 = vmatpush1.bf16.msra.mxu1 %v10063_v4  ;;  %2934 = vmatprep.subr.bf16.mxu0 %v10066_v23 }
 0x42f   :  { %2975 = vmatprep.subr.bf16.mxu1 %v10069_v30 }
 0x430   :  { %v2393_v32 = vpop.f32.mrf.mxu0  ;;  %v2434_v27 = vpop.f32.mrf.mxu1 }
 0x431   :  { %v2445_v34 = vrot.slane %v2393_v32, 6  ;;  %v2447_v31 = vrot.slane %v2434_v27, 6  ;;  %v2461_v32 = vld [vmem:[#allocation3 + $0x18] sm:$0x30] }
 0x432   :  { %v2395_v20 = vpop.f32.mrf.mxu0  ;;  %v2436_v11 = vpop.f32.mrf.mxu1 }
 0x433   :  { %v2453_v43 = vadd.f32 %v2445_v34, %v2352_v51  ;;  %v2455_v4 = vadd.f32 %v2447_v31, %v2354_v19  ;;  %v2446_v24 = vrot.slane %v2395_v20, 6  ;;  %v2448_v33 = vrot.slane %v2436_v11, 6  ;;  %v2462_v51 = vld [vmem:[#allocation3 + $0x8] sm:$0x30]  ;;  %v2464_v19 = vld [vmem:[#allocation3 + $0x30] sm:$0x30] }
 0x434   :  { %v2397_v25 = vpop.f32.mrf.mxu0  ;;  %v2438_v23 = vpop.f32.mrf.mxu1 }
 0x435   :  { %2457 = vst [vmem:[#allocation3 + $0x28] sm:$0xc] %v2453_v43  ;;  %2459 = vst [vmem:[#allocation3 + $0x10] sm:$0xc] %v2455_v4  ;;  %v2454_v29 = vadd.f32 %v2446_v24, %v2353_v56  ;;  %v2456_v30 = vadd.f32 %v2448_v33, %v2355_v42 }
 0x436   :  { %v2398_v40 = vpop.f32.mrf.mxu0  ;;  %v2439_v59 = vpop.f32.mrf.mxu1 }
 0x437   :  { %2458 = vst [vmem:[#allocation3] sm:$0xc] %v2454_v29  ;;  %2460 = vst [vmem:[#allocation3 + $0x20] sm:$0xc] %v2456_v30 }
 0x450   :  { %v2502_v27 = vpop.f32.mrf.mxu0  ;;  %v2543_v36 = vpop.f32.mrf.mxu1 }
 0x451   :  { %v2554_v18 = vrot.slane %v2502_v27, 4  ;;  %v2556_v58 = vrot.slane %v2543_v36, 4 }
 0x452   :  { %v2504_v31 = vpop.f32.mrf.mxu0  ;;  %v2545_v11 = vpop.f32.mrf.mxu1 }
 0x453   :  { %v2562_v25 = vadd.f32 %v2554_v18, %v2461_v32  ;;  %v2564_v34 = vadd.f32 %v2556_v58, %v2463_v26  ;;  %v2555_v43 = vrot.slane %v2504_v31, 4  ;;  %v2557_v20 = vrot.slane %v2545_v11, 4  ;;  %v2573_v18 = vld [vmem:[#allocation2 + $0x18] sm:$0x30] }
 0x454   :  { %v2506_v24 = vpop.f32.mrf.mxu0  ;;  %v2547_v33 = vpop.f32.mrf.mxu1 }
 0x455   :  { %2566 = vst [vmem:[#allocation3 + $0x18] sm:$0x30] %v2562_v25  ;;  %2568 = vst [vmem:[#allocation3 + $0x38] sm:$0x30] %v2564_v34  ;;  %v2563_v59 = vadd.f32 %v2555_v43, %v2462_v51  ;;  %v2565_v40 = vadd.f32 %v2557_v20, %v2464_v19  ;;  %v2803_v34 = vrot.slane %v9693_v12, 6 }
 0x456   :  { %v2507_v29 = vpop.f32.mrf.mxu0  ;;  %v2548_v42 = vpop.f32.mrf.mxu1  ;;  %v2572_v33 = vld [vmem:[#allocation2 + $0x58] sm:$0x30]  ;;  %v2574_v12 = vld [vmem:[#allocation2 + $0x50] sm:$0x30] }
 0x457   :  { %2567 = vst [vmem:[#allocation3 + $0x8] sm:$0x30] %v2563_v59  ;;  %2569 = vst [vmem:[#allocation3 + $0x30] sm:$0x30] %v2565_v40  ;;  %v2570_v29 = vld [vmem:[#allocation2 + $0x30] sm:$0x30] }
 0x490   :  { %v2612_v30 = vpop.f32.mrf.mxu0 }
 0x491   :  { %v2653_v36 = vpop.f32.mrf.mxu1  ;;  %v2750_v24 = vrot.slane %v2612_v30, 4 }
 0x492   :  { %v2614_v56 = vpop.f32.mrf.mxu0  ;;  %v2752_v20 = vrot.slane %v2653_v36, 4 }
 0x493   :  { %v2655_v4 = vpop.f32.mrf.mxu1  ;;  %v2751_v40 = vrot.slane %v2614_v56, 4  ;;  %v2766_v42 = vadd.f32 %v2750_v24, %v2570_v29  ;;  %v2575_v56 = vld [vmem:[#allocation2 + $0x68] sm:$0x30] }
 0x494   :  { %v2753_v23 = vrot.slane %v2655_v4, 4  ;;  %v2616_v27 = vpop.f32.mrf.mxu0  ;;  %v2768_v59 = vadd.f32 %v2752_v20, %v2572_v33  ;;  %v2571_v4 = vld [vmem:[#allocation2] sm:$0x30]  ;;  %v2576_v24 = vld [vmem:[#allocation2 + $0x8] sm:$0x30] }
 0x495   :  { %v2657_v58 = vpop.f32.mrf.mxu1 }
 0x496   :  { %v2769_v26 = vadd.f32 %v2753_v23, %v2573_v18  ;;  %v2617_v32 = vpop.f32.mrf.mxu0  ;;  %v2782_v27 = vmul.f32 0.5, %v2768_v59  ;;  %v2767_v23 = vadd.f32 %v2751_v40, %v2571_v4  ;;  %v2774_v18 = vmul.f32 0.5, %v2766_v42 }
 0x497   :  { %v2658_v31 = vpop.f32.mrf.mxu1 }
 0x498   :  { %v2783_v11 = vmul.f32 0.5, %v2769_v26  ;;  %v2775_v58 = vmul.f32 0.5, %v2767_v23 }
 0x49a   :  { %8016 = vtanh.f32 %v2783_v11 }
 0x49b   :  { %8018 = vtanh.f32 %v2782_v27 }
 0x49c   :  { %8020 = vtanh.f32 %v2774_v18 }
 0x49d   :  { %8022 = vtanh.f32 %v2775_v58 }
 0x4a7   :  { %v8017_v25 = vpop.eup %8016 }
 0x4a8   :  { %v2787_v51 = vmul.f32 0.5, %v8017_v25  ;;  %v8019_v29 = vpop.eup %8018 }
 0x4a9   :  { %v8021_v42 = vpop.eup %8020  ;;  %v2786_v4 = vmul.f32 0.5, %v8019_v29 }
 0x4aa   :  { %v2789_v19 = vadd.f32 0.5, %v2787_v51  ;;  %v8023_v23 = vpop.eup %8022  ;;  %v2778_v18 = vmul.f32 0.5, %v8021_v42 }
 0x4ab   :  { %v2788_v58 = vadd.f32 0.5, %v2786_v4 }
 0x4ac   :  { %v2807_v43 = vmul.f32 %v2803_v34, %v2789_v19 }
 0x4d0   :  { %v2694_v26 = vpop.f32.mrf.mxu0 }
 0x4d1   :  { %v2754_v32 = vrot.slane %v2694_v26, 4  ;;  %v2735_v31 = vpop.f32.mrf.mxu1  ;;  %v2779_v26 = vmul.f32 0.5, %v8023_v23 }
 0x4d2   :  { %v2696_v11 = vpop.f32.mrf.mxu0  ;;  %v2756_v30 = vrot.slane %v2735_v31, 4  ;;  %v2802_v31 = vrot.slane %v9690_v28, 6 }
 0x4d3   :  { %v2770_v36 = vadd.f32 %v2754_v32, %v2574_v12  ;;  %v2755_v25 = vrot.slane %v2696_v11, 4  ;;  %v2737_v51 = vpop.f32.mrf.mxu1  ;;  %v2780_v32 = vadd.f32 0.5, %v2778_v18  ;;  %v10083_v18 = vld [vmem:[#allocation9 + $0xe0] ss:$16 sps:$4 sm:$0xff]  }
 0x4d4   :  { %v2698_v19 = vpop.f32.mrf.mxu0  ;;  %v2772_v59 = vadd.f32 %v2756_v30, %v2576_v24  ;;  %v2806_v11 = vmul.f32 %v2802_v31, %v2788_v58  ;;  %v10092_v58 = vld [vmem:[#allocation9 + $0xcc] ss:$16 sps:$4 sm:$0xff]   ;;  %v10104_v31 = vld [vmem:[#allocation9 + $0xa4] ss:$16 sps:$4 sm:$0xff]  }
 0x4d5   :  { %8024 = vtanh.f32 %v2770_v36  ;;  %v2771_v34 = vadd.f32 %v2755_v25, %v2575_v56  ;;  %v2739_v20 = vpop.f32.mrf.mxu1  ;;  %v2781_v36 = vadd.f32 0.5, %v2779_v26  ;;  %v10097_v26 = vld [vmem:[#allocation9 + $0xc0] ss:$16 sps:$4 sm:$0xff]  }
 0x4d6   :  { %v2699_v33 = vpop.f32.mrf.mxu0  ;;  %v2792_v27 = vmul.f32 0.5, %v2772_v59  ;;  %v2577_v59 = vld [vmem:[#allocation2 + $0x48] sm:$0x30] }
 0x4d7   :  { %8026 = vtanh.f32 %v2771_v34  ;;  %v2740_v40 = vpop.f32.mrf.mxu1  ;;  %v2757_v33 = vrot.slane %v2737_v51, 4  ;;  %v10089_v51 = vld [vmem:[#allocation9 + $0xc4] ss:$16 sps:$4 sm:$0xff]  }
 0x4d8   :  { %8028 = vtanh.f32 %v2792_v27 }
 0x4d9   :  { %v2773_v29 = vadd.f32 %v2757_v33, %v2577_v59  ;;  %v10128_v33 = vld [vmem:[#allocation9 + $0x64] ss:$16 sps:$4 sm:$0xff]   ;;  %v10131_v59 = vld [vmem:[#allocation9 + $0x6c] ss:$16 sps:$4 sm:$0xff]  }
 0x4da   :  { %13023 = vst [vmem:[#allocation172_spill] sm:$0xff] %v10128_v33  ;;  %13024 = vst [vmem:[#allocation173_spill] sm:$0xff] %v10131_v59 }
 0x4db   :  { %v2793_v27 = vmul.f32 0.5, %v2773_v29  ;;  %v10134_v29 = vld [vmem:[#allocation9 + $0x60] ss:$16 sps:$4 sm:$0xff]  }
 0x4dc   :  { %13025 = vst [vmem:[#allocation174_spill] sm:$0xff] %v10134_v29 }
 0x4e2   :  { %v8025_v12 = vpop.eup %8024 }
 0x4e3   :  { %v2808_v25 = vmul.f32 %v8025_v12, %v2780_v32  ;;  %v10100_v32 = vld [vmem:[#allocation9 + $0xc8] ss:$16 sps:$4 sm:$0xff]   ;;  %v10107_v12 = vld [vmem:[#allocation9 + $0xac] ss:$16 sps:$4 sm:$0xff]  }
 0x4e4   :  { %v8027_v56 = vpop.eup %8026 }
 0x4e5   :  { %v10074_v30 = vadd.f32 %v2808_v25, %v2806_v11  ;;  %v2809_v19 = vmul.f32 %v8027_v56, %v2781_v36  ;;  %v8029_v20 = vpop.eup %8028  ;;  %v10110_v11 = vld [vmem:[#allocation9 + $0xa0] ss:$16 sps:$4 sm:$0xff]   ;;  %v10113_v36 = vld [vmem:[#allocation9 + $0xa8] ss:$16 sps:$4 sm:$0xff]   ;;  %v10116_v25 = vld [vmem:[#allocation9 + $0x84] ss:$16 sps:$4 sm:$0xff]  }
 0x4e6   :  { %v2796_v24 = vmul.f32 0.5, %v8029_v20  ;;  %v10119_v56 = vld [vmem:[#allocation9 + $0x8c] ss:$16 sps:$4 sm:$0xff]   ;;  %v10122_v20 = vld [vmem:[#allocation9 + $0x80] ss:$16 sps:$4 sm:$0xff]  }
 0x4e7   :  { %8030 = vtanh.f32 %v10074_v30  ;;  %v10077_v34 = vadd.f32 %v2809_v19, %v2807_v43  ;;  %v10086_v43 = vld [vmem:[#allocation9 + $0xe8] ss:$16 sps:$4 sm:$0xff]  }
 0x4e8   :  { %v2798_v40 = vadd.f32 0.5, %v2796_v24  ;;  %8032 = vtanh.f32 %v2793_v27  ;;  %v10125_v24 = vld [vmem:[#allocation9 + $0x88] ss:$16 sps:$4 sm:$0xff]  }
 0x4e9   :  { %8034 = vtanh.f32 %v10077_v34  ;;  %13022 = vst [vmem:[#allocation171_spill] sm:$0xff] %v10125_v24 }
 0x4f4   :  { %v8031_v42 = vpop.eup %8030 }
 0x4f5   :  { %v2814_v28 = vmul.f32 %v8031_v42, %v2798_v40  ;;  %v8033_v19 = vpop.eup %8032  ;;  %v10137_v42 = vld [vmem:[#allocation9 + $0x68] ss:$16 sps:$4 sm:$0xff]  }
 0x4f6   :  { %v2797_v40 = vmul.f32 0.5, %v8033_v19  ;;  %13026 = vst [vmem:[#allocation175_spill] sm:$0xff] %v10137_v42  ;;  %v8035_v27 = vpop.eup %8034  ;;  %v10149_v19 = vld [vmem:[#allocation9 + $0x48] ss:$16 sps:$4 sm:$0xff]  }
 0x4f7   :  { %v2816_v4 = vpack.c.bf16 %v2814_v28, %v2814_v28  ;;  %v10140_v28 = vld [vmem:[#allocation9 + $0x44] ss:$16 sps:$4 sm:$0xff]  }
 0x4f8   :  { %13027 = vst [vmem:[#allocation176_spill] sm:$0xff] %v10140_v28 }
 0x4f9   :  { %v10079_v23 = vrot.slane %v2816_v4, 2  ;;  %v10143_v4 = vld [vmem:[#allocation9 + $0x4c] ss:$16 sps:$4 sm:$0xff]  }
 0x4fa   :  { %13028 = vst [vmem:[#allocation177_spill] sm:$0xff] %v10143_v4 }
 0x4fb   :  { %2858 = vmatmul.mubr.bf16.vlgmr.msra.gmra.mxu0 %v10079_v23  ;;  %2899 = vmatmul.mubr.bf16.vlgmr.msra.gmra.mxu1 %v10079_v23 }
 0x4fc   :  { %2935 = vmatpush1.bf16.msra.mxu0 %v10083_v18  ;;  %2976 = vmatpush1.bf16.msra.mxu1 %v10086_v43 }
 0x4fd   :  { %2936 = vmatprep.subr.bf16.mxu0 %v10089_v51  ;;  %2977 = vmatprep.subr.bf16.mxu1 %v10092_v58 }
 0x4fe   :  { %2966 = vmatprep.mubr.bf16.mxu0 %v12638_v48  ;;  %3007 = vmatprep.mubr.bf16.mxu1 %v12638_v48 }
 0x500   :  { %2937 = vmatpush1.bf16.msra.mxu0 %v10097_v26  ;;  %2978 = vmatpush1.bf16.msra.mxu1 %v10100_v32 }
 0x501   :  { %2938 = vmatprep.subr.bf16.mxu0 %v10104_v31  ;;  %2979 = vmatprep.subr.bf16.mxu1 %v10107_v12 }
 0x504   :  { %2939 = vmatpush1.bf16.msra.mxu0 %v10110_v11  ;;  %2980 = vmatpush1.bf16.msra.mxu1 %v10113_v36 }
 0x505   :  { %2940 = vmatprep.subr.bf16.mxu0 %v10116_v25  ;;  %2981 = vmatprep.subr.bf16.mxu1 %v10119_v56 }
 0x508   :  { %2941 = vmatpush1.bf16.msra.mxu0 %v10122_v20  ;;  %2982 = vmatpush1.bf16.msra.mxu1 %v10125_v24  ;;  %v10164_v24 = vld [vmem:[#allocation9 + $0x4] ss:$16 sps:$4 sm:$0xff]  }
 0x509   :  { %2942 = vmatprep.subr.bf16.mxu0 %v10128_v33  ;;  %2983 = vmatprep.subr.bf16.mxu1 %v10131_v59  ;;  %v2799_v33 = vadd.f32 0.5, %v2797_v40  ;;  %v10146_v59 = vld [vmem:[#allocation9 + $0x40] ss:$16 sps:$4 sm:$0xff]   ;;  %v10161_v40 = vld [vmem:[#allocation9 + $0x28] ss:$16 sps:$4 sm:$0xff]  }
 0x50a   :  { %13029 = vst [vmem:[#allocation178_spill] sm:$0xff] %v10146_v59 }
 0x50c   :  { %2943 = vmatpush1.bf16.msra.mxu0 %v10134_v29  ;;  %2984 = vmatpush1.bf16.msra.mxu1 %v10137_v42  ;;  %v2815_v29 = vmul.f32 %v8035_v27, %v2799_v33  ;;  %v10152_v42 = vld [vmem:[#allocation9 + $0x24] ss:$16 sps:$4 sm:$0xff]   ;;  %v10167_v33 = vld [vmem:[#allocation9 + $0xc] ss:$16 sps:$4 sm:$0xff]   ;;  %v10170_v27 = vld [vmem:[#allocation9] ss:$16 sps:$4 sm:$0xff]  }
 0x50d   :  { %2944 = vmatprep.subr.bf16.mxu0 %v10140_v28  ;;  %2985 = vmatprep.subr.bf16.mxu1 %v10143_v4  ;;  %v10155_v28 = vld [vmem:[#allocation9 + $0x2c] ss:$16 sps:$4 sm:$0xff]   ;;  %v10158_v4 = vld [vmem:[#allocation9 + $0x20] ss:$16 sps:$4 sm:$0xff]  }
 0x50e   :  { %13030 = vst [vmem:[#allocation179_spill] sm:$0xff] %v10155_v28  ;;  %13031 = vst [vmem:[#allocation180_spill] sm:$0xff] %v10158_v4 }
 0x510   :  { %2945 = vmatpush1.bf16.msra.mxu0 %v10146_v59  ;;  %2986 = vmatpush1.bf16.msra.mxu1 %v10149_v19  ;;  %v2817_v59 = vpack.c.bf16 %v2815_v29, %v2815_v29  ;;  %v13033_v29 = vld [vmem:[#allocation44_spill] sm:$0xff] }
 0x511   :  { %2946 = vmatprep.subr.bf16.mxu0 %v10152_v42  ;;  %2987 = vmatprep.subr.bf16.mxu1 %v10155_v28  ;;  %v10173_v28 = vld [vmem:[#allocation9 + $0x8] ss:$16 sps:$4 sm:$0xff]  }
 0x514   :  { %2947 = vmatpush1.bf16.msra.mxu0 %v10158_v4  ;;  %2988 = vmatpush1.bf16.msra.mxu1 %v10161_v40  ;;  %v10176_v4 = vrot.slane %v2817_v59, 2  ;;  %v13032_v59 = vld [vmem:[#allocation43_spill] sm:$0xff] }
 0x515   :  { %2948 = vmatprep.subr.bf16.mxu0 %v10164_v24  ;;  %2989 = vmatprep.subr.bf16.mxu1 %v10167_v33 }
 0x518   :  { %2949 = vmatpush1.bf16.msra.mxu0 %v10170_v27  ;;  %2990 = vmatpush1.bf16.msra.mxu1 %v10173_v28 }
 0x519   :  { %3044 = vmatprep.subr.bf16.mxu0 %v8785_v38  ;;  %3085 = vmatprep.subr.bf16.mxu1 %v8788_v39 }
 0x51b   :  { %2967 = vmatmul.mubr.bf16.vlgmr.msra.gmra.mxu0 %v10176_v4  ;;  %3008 = vmatmul.mubr.bf16.vlgmr.msra.gmra.mxu1 %v10176_v4 }
 0x51c   :  { %3045 = vmatpush1.bf16.msra.mxu0 %v8791_v44  ;;  %3076 = vmatprep.mubr.bf16.mxu0 %v10176_v4 }
 0x51d   :  { %3086 = vmatpush1.bf16.msra.mxu1 %v8794_v45  ;;  %3117 = vmatprep.mubr.bf16.mxu1 %v10176_v4 }
 0x51e   :  { %3046 = vmatprep.subr.bf16.mxu0 %v8796_v46  ;;  %3087 = vmatprep.subr.bf16.mxu1 %v8799_v47 }
 0x520   :  { %3047 = vmatpush1.bf16.msra.mxu0 %v8804_v52 }
 0x521   :  { %3088 = vmatpush1.bf16.msra.mxu1 %v8808_v53  ;;  %3048 = vmatprep.subr.bf16.mxu0 %v8810_v54 }
 0x522   :  { %3089 = vmatprep.subr.bf16.mxu1 %v8813_v55 }
 0x524   :  { %3049 = vmatpush1.bf16.msra.mxu0 %v8818_v60 }
 0x525   :  { %3090 = vmatpush1.bf16.msra.mxu1 %v8822_v61  ;;  %3050 = vmatprep.subr.bf16.mxu0 %v8824_v62 }
 0x526   :  { %3091 = vmatprep.subr.bf16.mxu1 %v8827_v63 }
 0x528   :  { %3051 = vmatpush1.bf16.msra.mxu0 %v8830_v5 }
 0x529   :  { %3092 = vmatpush1.bf16.msra.mxu1 %v8834_v6  ;;  %3052 = vmatprep.subr.bf16.mxu0 %v8836_v7 }
 0x52a   :  { %3093 = vmatprep.subr.bf16.mxu1 %v8839_v8 }
 0x52c   :  { %3053 = vmatpush1.bf16.msra.mxu0 %v8842_v13 }
 0x52d   :  { %3094 = vmatpush1.bf16.msra.mxu1 %v8846_v14  ;;  %3054 = vmatprep.subr.bf16.mxu0 %v8848_v15  ;;  %v2929_v15 = vld [vmem:[#allocation3 + $0x38] sm:$0xc] }
 0x52e   :  { %3095 = vmatprep.subr.bf16.mxu1 %v8851_v16 }
 0x530   :  { %3055 = vmatpush1.bf16.msra.mxu0 %v8854_v21 }
 0x531   :  { %3096 = vmatpush1.bf16.msra.mxu1 %v12883_v50  ;;  %3056 = vmatprep.subr.bf16.mxu0 %v12884_v49 }
 0x532   :  { %3097 = vmatprep.subr.bf16.mxu1 %v12885_v10 }
 0x534   :  { %3057 = vmatpush1.bf16.msra.mxu0 %v12886_v35  ;;  %v2821_v35 = vld [vmem:[#allocation3 + $0x20] sm:$0x30] }
 0x535   :  { %3098 = vmatpush1.bf16.msra.mxu1 %v12887_v3  ;;  %3058 = vmatprep.subr.bf16.mxu0 %v12888_v2  ;;  %v13034_v2 = vld [vmem:[#allocation45_spill] sm:$0xff] }
 0x536   :  { %3099 = vmatprep.subr.bf16.mxu1 %v12889_v9  ;;  %v13035_v9 = vld [vmem:[#allocation46_spill] sm:$0xff]  ;;  %v2819_v3 = vld [vmem:[#allocation3] sm:$0x30] }
 0x538   :  { %3059 = vmatpush1.bf16.msra.mxu0 %v12890_v37  ;;  %v13036_v37 = vld [vmem:[#allocation47_spill] sm:$0xff] }
 0x539   :  { %3100 = vmatpush1.bf16.msra.mxu1 %v12891_v41  ;;  %3060 = vmatprep.subr.bf16.mxu0 %v12892_v0  ;;  %v13037_v41 = vld [vmem:[#allocation48_spill] sm:$0xff]  ;;  %v13038_v0 = vld [vmem:[#allocation49_spill] sm:$0xff] }
 0x53a   :  { %3101 = vmatprep.subr.bf16.mxu1 %v12893_v22  ;;  %v13039_v22 = vld [vmem:[#allocation50_spill] sm:$0xff] }
 0x53c   :  { %3061 = vmatpush2.bf16.msra.mxu0 %v12894_v57  ;;  %v13040_v57 = vld [vmem:[#allocation51_spill] sm:$0xff] }
 0x53d   :  { %3102 = vmatpush2.bf16.msra.mxu1 %v12895_v1  ;;  %3062 = vmatprep.subr.bf16.mxu0 %v12896_v17  ;;  %v13041_v1 = vld [vmem:[#allocation52_spill] sm:$0xff]  ;;  %v13042_v17 = vld [vmem:[#allocation53_spill] sm:$0xff] }
 0x53e   :  { %3103 = vmatprep.subr.bf16.mxu1 %v13032_v59  ;;  %v13043_v59 = vld [vmem:[#allocation54_spill] sm:$0xff] }
 0x540   :  { %3063 = vmatpush2.bf16.msra.mxu0 %v13033_v29  ;;  %v13044_v29 = vld [vmem:[#allocation55_spill] sm:$0xff] }
 0x541   :  { %3104 = vmatpush2.bf16.msra.mxu1 %v13034_v2  ;;  %3064 = vmatprep.subr.bf16.mxu0 %v13035_v9  ;;  %v13045_v2 = vld [vmem:[#allocation56_spill] sm:$0xff]  ;;  %v13046_v9 = vld [vmem:[#allocation57_spill] sm:$0xff] }
 0x542   :  { %3105 = vmatprep.subr.bf16.mxu1 %v13036_v37  ;;  %v13047_v37 = vld [vmem:[#allocation58_spill] sm:$0xff] }
 0x544   :  { %3065 = vmatpush2.bf16.msra.mxu0 %v13037_v41  ;;  %v13048_v41 = vld [vmem:[#allocation59_spill] sm:$0xff] }
 0x545   :  { %3106 = vmatpush2.bf16.msra.mxu1 %v13038_v0  ;;  %3066 = vmatprep.subr.bf16.mxu0 %v13039_v22  ;;  %v13049_v0 = vld [vmem:[#allocation60_spill] sm:$0xff]  ;;  %v13050_v22 = vld [vmem:[#allocation61_spill] sm:$0xff] }
 0x546   :  { %3107 = vmatprep.subr.bf16.mxu1 %v13040_v57  ;;  %v13051_v57 = vld [vmem:[#allocation62_spill] sm:$0xff] }
 0x548   :  { %3067 = vmatpush2.bf16.msra.mxu0 %v13041_v1  ;;  %v13052_v1 = vld [vmem:[#allocation63_spill] sm:$0xff] }
 0x549   :  { %3108 = vmatpush2.bf16.msra.mxu1 %v13042_v17  ;;  %3068 = vmatprep.subr.bf16.mxu0 %v13043_v59  ;;  %v13053_v17 = vld [vmem:[#allocation64_spill] sm:$0xff]  ;;  %v13054_v59 = vld [vmem:[#allocation65_spill] sm:$0xff] }
 0x54a   :  { %3109 = vmatprep.subr.bf16.mxu1 %v13044_v29  ;;  %v13055_v29 = vld [vmem:[#allocation66_spill] sm:$0xff] }
 0x54c   :  { %3069 = vmatpush2.bf16.msra.mxu0 %v13045_v2  ;;  %v13056_v2 = vld [vmem:[#allocation67_spill] sm:$0xff] }
 0x54d   :  { %3110 = vmatpush2.bf16.msra.mxu1 %v13046_v9  ;;  %3070 = vmatprep.subr.bf16.mxu0 %v13047_v37  ;;  %v13057_v9 = vld [vmem:[#allocation68_spill] sm:$0xff]  ;;  %v13058_v37 = vld [vmem:[#allocation69_spill] sm:$0xff] }
 0x54e   :  { %3111 = vmatprep.subr.bf16.mxu1 %v13048_v41  ;;  %v13059_v41 = vld [vmem:[#allocation70_spill] sm:$0xff] }
 0x550   :  { %3071 = vmatpush2.bf16.msra.mxu0 %v13049_v0  ;;  %v13060_v0 = vld [vmem:[#allocation71_spill] sm:$0xff] }
 0x551   :  { %3112 = vmatpush2.bf16.msra.mxu1 %v13050_v22  ;;  %3072 = vmatprep.subr.bf16.mxu0 %v13051_v57  ;;  %v13071_v57 = vld [vmem:[#allocation85_spill] sm:$0xff] }
 0x552   :  { %3113 = vmatprep.subr.bf16.mxu1 %v13052_v1  ;;  %v13061_v1 = vld [vmem:[#allocation73_spill] sm:$0xff] }
 0x554   :  { %3073 = vmatpush2.bf16.msra.mxu0 %v13053_v17  ;;  %v13069_v17 = vld [vmem:[#allocation83_spill] sm:$0xff] }
 0x555   :  { %3114 = vmatpush2.bf16.msra.mxu1 %v13054_v59  ;;  %3074 = vmatprep.subr.bf16.mxu0 %v13055_v29  ;;  %v13062_v59 = vld [vmem:[#allocation74_spill] sm:$0xff]  ;;  %v13068_v29 = vld [vmem:[#allocation81_spill] sm:$0xff] }
 0x556   :  { %3115 = vmatprep.subr.bf16.mxu1 %v13056_v2  ;;  %v13063_v2 = vld [vmem:[#allocation75_spill] sm:$0xff] }
 0x558   :  { %3075 = vmatpush2.bf16.msra.mxu0 %v13057_v9  ;;  %v13064_v9 = vld [vmem:[#allocation76_spill] sm:$0xff] }
 0x559   :  { %3116 = vmatpush2.bf16.msra.mxu1 %v13058_v37  ;;  %3126 = vmatprep.subr.bf16.mxu0 %v13059_v41  ;;  %v13065_v37 = vld [vmem:[#allocation77_spill] sm:$0xff]  ;;  %v13066_v41 = vld [vmem:[#allocation79_spill] sm:$0xff] }
 0x55a   :  { %3167 = vmatprep.subr.bf16.mxu1 %v13060_v0  ;;  %v13067_v0 = vld [vmem:[#allocation80_spill] sm:$0xff] }
 0x55b   :  { %3077 = vmatmul.mubr.bf16.vlgmr.msra.gmra.mxu0 %v10079_v23 }
 0x55c   :  { %3118 = vmatmul.mubr.bf16.vlgmr.msra.gmra.mxu1 %v10079_v23  ;;  %3127 = vmatpush1.bf16.msra.mxu0 %v13061_v1  ;;  %v13070_v1 = vld [vmem:[#allocation84_spill] sm:$0xff] }
 0x55d   :  { %3158 = vmatprep.mubr.bf16.mxu0 %v10176_v4  ;;  %3168 = vmatpush1.bf16.msra.mxu1 %v13062_v59  ;;  %v13072_v59 = vld [vmem:[#allocation86_spill] sm:$0xff] }
 0x55e   :  { %3199 = vmatprep.mubr.bf16.mxu1 %v10176_v4  ;;  %3128 = vmatprep.subr.bf16.mxu0 %v13063_v2  ;;  %v13073_v4 = vld [vmem:[#allocation87_spill] sm:$0xff]  ;;  %v13074_v2 = vld [vmem:[#allocation88_spill] sm:$0xff] }
 0x55f   :  { %3169 = vmatprep.subr.bf16.mxu1 %v13064_v9  ;;  %v13075_v9 = vld [vmem:[#allocation89_spill] sm:$0xff] }
 0x560   :  { %3129 = vmatpush1.bf16.msra.mxu0 %v13065_v37  ;;  %v13076_v37 = vld [vmem:[#allocation90_spill] sm:$0xff] }
 0x561   :  { %3170 = vmatpush1.bf16.msra.mxu1 %v13066_v41  ;;  %3130 = vmatprep.subr.bf16.mxu0 %v13067_v0  ;;  %v13077_v41 = vld [vmem:[#allocation91_spill] sm:$0xff]  ;;  %v13078_v0 = vld [vmem:[#allocation92_spill] sm:$0xff] }
 0x562   :  { %3171 = vmatprep.subr.bf16.mxu1 %v13068_v29  ;;  %v13079_v29 = vld [vmem:[#allocation93_spill] sm:$0xff] }
 0x564   :  { %3131 = vmatpush1.bf16.msra.mxu0 %v13069_v17  ;;  %v13080_v17 = vld [vmem:[#allocation94_spill] sm:$0xff] }
 0x565   :  { %3172 = vmatpush1.bf16.msra.mxu1 %v13070_v1  ;;  %3132 = vmatprep.subr.bf16.mxu0 %v13071_v57  ;;  %v13081_v1 = vld [vmem:[#allocation95_spill] sm:$0xff]  ;;  %v13082_v57 = vld [vmem:[#allocation96_spill] sm:$0xff] }
 0x566   :  { %3173 = vmatprep.subr.bf16.mxu1 %v13072_v59  ;;  %v13083_v59 = vld [vmem:[#allocation97_spill] sm:$0xff] }
 0x568   :  { %3133 = vmatpush1.bf16.msra.mxu0 %v13073_v4  ;;  %v13084_v4 = vld [vmem:[#allocation98_spill] sm:$0xff] }
 0x569   :  { %3174 = vmatpush1.bf16.msra.mxu1 %v13074_v2  ;;  %3134 = vmatprep.subr.bf16.mxu0 %v13075_v9  ;;  %v13085_v2 = vld [vmem:[#allocation99_spill] sm:$0xff]  ;;  %v13086_v9 = vld [vmem:[#allocation100_spill] sm:$0xff] }
 0x56a   :  { %3175 = vmatprep.subr.bf16.mxu1 %v13076_v37  ;;  %v13087_v37 = vld [vmem:[#allocation101_spill] sm:$0xff] }
 0x56c   :  { %3135 = vmatpush1.bf16.msra.mxu0 %v13077_v41  ;;  %v13088_v41 = vld [vmem:[#allocation102_spill] sm:$0xff] }
 0x56d   :  { %3176 = vmatpush1.bf16.msra.mxu1 %v13078_v0  ;;  %3136 = vmatprep.subr.bf16.mxu0 %v13079_v29  ;;  %v13089_v0 = vld [vmem:[#allocation103_spill] sm:$0xff]  ;;  %v13090_v29 = vld [vmem:[#allocation104_spill] sm:$0xff] }
 0x56e   :  { %3177 = vmatprep.subr.bf16.mxu1 %v13080_v17  ;;  %v13091_v17 = vld [vmem:[#allocation105_spill] sm:$0xff] }
 0x570   :  { %3137 = vmatpush1.bf16.msra.mxu0 %v13081_v1  ;;  %v13092_v1 = vld [vmem:[#allocation106_spill] sm:$0xff] }
 0x571   :  { %3178 = vmatpush1.bf16.msra.mxu1 %v13082_v57  ;;  %3138 = vmatprep.subr.bf16.mxu0 %v13083_v59  ;;  %v13093_v57 = vld [vmem:[#allocation107_spill] sm:$0xff]  ;;  %v13094_v59 = vld [vmem:[#allocation108_spill] sm:$0xff] }
 0x572   :  { %3179 = vmatprep.subr.bf16.mxu1 %v13084_v4  ;;  %v13095_v4 = vld [vmem:[#allocation109_spill] sm:$0xff] }
 0x574   :  { %3139 = vmatpush1.bf16.msra.mxu0 %v13085_v2  ;;  %v13096_v2 = vld [vmem:[#allocation110_spill] sm:$0xff] }
 0x575   :  { %3180 = vmatpush1.bf16.msra.mxu1 %v13086_v9  ;;  %3140 = vmatprep.subr.bf16.mxu0 %v13087_v37  ;;  %v13097_v9 = vld [vmem:[#allocation111_spill] sm:$0xff]  ;;  %v13098_v37 = vld [vmem:[#allocation112_spill] sm:$0xff] }
 0x576   :  { %3181 = vmatprep.subr.bf16.mxu1 %v13088_v41  ;;  %v13099_v41 = vld [vmem:[#allocation113_spill] sm:$0xff] }
 0x578   :  { %3141 = vmatpush1.bf16.msra.mxu0 %v13089_v0  ;;  %v13100_v0 = vld [vmem:[#allocation114_spill] sm:$0xff] }
 0x579   :  { %3182 = vmatpush1.bf16.msra.mxu1 %v13090_v29  ;;  %3142 = vmatprep.subr.bf16.mxu0 %v13091_v17  ;;  %v13101_v29 = vld [vmem:[#allocation115_spill] sm:$0xff]  ;;  %v13102_v17 = vld [vmem:[#allocation116_spill] sm:$0xff] }
 0x57a   :  { %3183 = vmatprep.subr.bf16.mxu1 %v13092_v1  ;;  %v13103_v1 = vld [vmem:[#allocation117_spill] sm:$0xff] }
 0x57c   :  { %3143 = vmatpush2.bf16.msra.mxu0 %v13093_v57  ;;  %v13104_v57 = vld [vmem:[#allocation118_spill] sm:$0xff] }
 0x57d   :  { %3184 = vmatpush2.bf16.msra.mxu1 %v13094_v59  ;;  %3144 = vmatprep.subr.bf16.mxu0 %v13095_v4  ;;  %v13105_v59 = vld [vmem:[#allocation119_spill] sm:$0xff]  ;;  %v13106_v4 = vld [vmem:[#allocation120_spill] sm:$0xff] }
 0x57e   :  { %3185 = vmatprep.subr.bf16.mxu1 %v13096_v2  ;;  %v13107_v2 = vld [vmem:[#allocation121_spill] sm:$0xff] }
 0x580   :  { %3145 = vmatpush2.bf16.msra.mxu0 %v13097_v9  ;;  %v13108_v9 = vld [vmem:[#allocation122_spill] sm:$0xff] }
 0x581   :  { %3186 = vmatpush2.bf16.msra.mxu1 %v13098_v37  ;;  %3146 = vmatprep.subr.bf16.mxu0 %v13099_v41  ;;  %v13109_v37 = vld [vmem:[#allocation123_spill] sm:$0xff]  ;;  %v13110_v41 = vld [vmem:[#allocation124_spill] sm:$0xff] }
 0x582   :  { %3187 = vmatprep.subr.bf16.mxu1 %v13100_v0  ;;  %v13111_v0 = vld [vmem:[#allocation125_spill] sm:$0xff] }
 0x584   :  { %3147 = vmatpush2.bf16.msra.mxu0 %v13101_v29  ;;  %v13112_v29 = vld [vmem:[#allocation126_spill] sm:$0xff] }
 0x585   :  { %3188 = vmatpush2.bf16.msra.mxu1 %v13102_v17  ;;  %3148 = vmatprep.subr.bf16.mxu0 %v13103_v1  ;;  %v13113_v17 = vld [vmem:[#allocation127_spill] sm:$0xff]  ;;  %v13114_v1 = vld [vmem:[#allocation128_spill] sm:$0xff] }
 0x586   :  { %3189 = vmatprep.subr.bf16.mxu1 %v13104_v57  ;;  %v13115_v57 = vld [vmem:[#allocation129_spill] sm:$0xff] }
 0x588   :  { %3149 = vmatpush2.bf16.msra.mxu0 %v13105_v59  ;;  %v13116_v59 = vld [vmem:[#allocation130_spill] sm:$0xff] }
 0x589   :  { %3190 = vmatpush2.bf16.msra.mxu1 %v13106_v4  ;;  %3150 = vmatprep.subr.bf16.mxu0 %v13107_v2  ;;  %v13117_v4 = vld [vmem:[#allocation131_spill] sm:$0xff]  ;;  %v13118_v2 = vld [vmem:[#allocation132_spill] sm:$0xff] }
 0x58a   :  { %3191 = vmatprep.subr.bf16.mxu1 %v13108_v9  ;;  %v13119_v9 = vld [vmem:[#allocation133_spill] sm:$0xff] }
 0x58c   :  { %3151 = vmatpush2.bf16.msra.mxu0 %v13109_v37  ;;  %v13120_v37 = vld [vmem:[#allocation134_spill] sm:$0xff] }
 0x58d   :  { %3192 = vmatpush2.bf16.msra.mxu1 %v13110_v41  ;;  %3152 = vmatprep.subr.bf16.mxu0 %v13111_v0  ;;  %v13121_v41 = vld [vmem:[#allocation135_spill] sm:$0xff]  ;;  %v13122_v0 = vld [vmem:[#allocation136_spill] sm:$0xff] }
 0x58e   :  { %3193 = vmatprep.subr.bf16.mxu1 %v13112_v29  ;;  %v13123_v29 = vld [vmem:[#allocation137_spill] sm:$0xff] }
 0x590   :  { %3153 = vmatpush2.bf16.msra.mxu0 %v13113_v17  ;;  %v13124_v17 = vld [vmem:[#allocation138_spill] sm:$0xff] }
 0x591   :  { %3194 = vmatpush2.bf16.msra.mxu1 %v13114_v1  ;;  %3154 = vmatprep.subr.bf16.mxu0 %v13115_v57  ;;  %v13139_v57 = vld [vmem:[#allocation153_spill] sm:$0xff]  ;;  %v2820_v1 = vld [vmem:[#allocation3 + $0x10] sm:$0x30] }
 0x592   :  { %3195 = vmatprep.subr.bf16.mxu1 %v13116_v59  ;;  %v13125_v59 = vld [vmem:[#allocation139_spill] sm:$0xff] }
 0x594   :  { %3155 = vmatpush2.bf16.msra.mxu0 %v13117_v4  ;;  %v13126_v4 = vld [vmem:[#allocation140_spill] sm:$0xff] }
 0x595   :  { %3196 = vmatpush2.bf16.msra.mxu1 %v13118_v2  ;;  %3156 = vmatprep.subr.bf16.mxu0 %v13119_v9  ;;  %v13127_v2 = vld [vmem:[#allocation141_spill] sm:$0xff]  ;;  %v13128_v9 = vld [vmem:[#allocation142_spill] sm:$0xff] }
 0x596   :  { %3197 = vmatprep.subr.bf16.mxu1 %v13120_v37  ;;  %v13138_v37 = vld [vmem:[#allocation152_spill] sm:$0xff] }
 0x598   :  { %3157 = vmatpush2.bf16.msra.mxu0 %v13121_v41  ;;  %v13132_v41 = vld [vmem:[#allocation146_spill] sm:$0xff] }
 0x599   :  { %3198 = vmatpush2.bf16.msra.mxu1 %v13122_v0  ;;  %3291 = vmatprep.subr.bf16.mxu0 %v13123_v29  ;;  %v13129_v0 = vld [vmem:[#allocation143_spill] sm:$0xff]  ;;  %v13130_v29 = vld [vmem:[#allocation144_spill] sm:$0xff] }
 0x59a   :  { %3332 = vmatprep.subr.bf16.mxu1 %v13124_v17  ;;  %v13131_v17 = vld [vmem:[#allocation145_spill] sm:$0xff] }
 0x59b   :  { %3159 = vmatmul.mubr.bf16.vlgmr.msra.gmra.mxu0 %v10079_v23 }
 0x59c   :  { %3200 = vmatmul.mubr.bf16.vlgmr.msra.gmra.mxu1 %v10079_v23  ;;  %3292 = vmatpush1.bf16.msra.mxu0 %v13125_v59  ;;  %v13133_v23 = vld [vmem:[#allocation147_spill] sm:$0xff]  ;;  %v13134_v59 = vld [vmem:[#allocation148_spill] sm:$0xff] }
 0x59d   :  { %3333 = vmatpush1.bf16.msra.mxu1 %v13126_v4  ;;  %3293 = vmatprep.subr.bf16.mxu0 %v13127_v2  ;;  %v13135_v4 = vld [vmem:[#allocation149_spill] sm:$0xff]  ;;  %v13136_v2 = vld [vmem:[#allocation150_spill] sm:$0xff] }
 0x59e   :  { %3334 = vmatprep.subr.bf16.mxu1 %v13128_v9  ;;  %3323 = vmatprep.mubr.bf16.mxu0 %v12638_v48  ;;  %v13137_v9 = vld [vmem:[#allocation151_spill] sm:$0xff] }
 0x59f   :  { %3364 = vmatprep.mubr.bf16.mxu1 %v12638_v48 }
 0x5a0   :  { %3294 = vmatpush1.bf16.msra.mxu0 %v13129_v0  ;;  %v13140_v0 = vld [vmem:[#allocation154_spill] sm:$0xff] }
 0x5a1   :  { %3335 = vmatpush1.bf16.msra.mxu1 %v13130_v29  ;;  %3295 = vmatprep.subr.bf16.mxu0 %v13131_v17  ;;  %v13141_v29 = vld [vmem:[#allocation155_spill] sm:$0xff]  ;;  %v13142_v17 = vld [vmem:[#allocation156_spill] sm:$0xff] }
 0x5a2   :  { %3336 = vmatprep.subr.bf16.mxu1 %v13132_v41  ;;  %v13143_v41 = vld [vmem:[#allocation157_spill] sm:$0xff] }
 0x5a4   :  { %3296 = vmatpush1.bf16.msra.mxu0 %v13133_v23  ;;  %v13144_v23 = vld [vmem:[#allocation158_spill] sm:$0xff] }
 0x5a5   :  { %3337 = vmatpush1.bf16.msra.mxu1 %v13134_v59  ;;  %3297 = vmatprep.subr.bf16.mxu0 %v13135_v4  ;;  %v13145_v59 = vld [vmem:[#allocation159_spill] sm:$0xff]  ;;  %v13146_v4 = vld [vmem:[#allocation160_spill] sm:$0xff] }
 0x5a6   :  { %3338 = vmatprep.subr.bf16.mxu1 %v13136_v2  ;;  %v13147_v2 = vld [vmem:[#allocation161_spill] sm:$0xff] }
 0x5a8   :  { %3298 = vmatpush1.bf16.msra.mxu0 %v13137_v9  ;;  %v13148_v9 = vld [vmem:[#allocation162_spill] sm:$0xff] }
 0x5a9   :  { %3339 = vmatpush1.bf16.msra.mxu1 %v13138_v37  ;;  %3299 = vmatprep.subr.bf16.mxu0 %v13139_v57  ;;  %v13149_v37 = vld [vmem:[#allocation163_spill] sm:$0xff]  ;;  %v13150_v57 = vld [vmem:[#allocation164_spill] sm:$0xff] }
 0x5aa   :  { %3340 = vmatprep.subr.bf16.mxu1 %v13140_v0  ;;  %v13151_v0 = vld [vmem:[#allocation165_spill] sm:$0xff] }
 0x5ac   :  { %3300 = vmatpush1.bf16.msra.mxu0 %v13141_v29  ;;  %v13152_v29 = vld [vmem:[#allocation166_spill] sm:$0xff] }
 0x5ad   :  { %3341 = vmatpush1.bf16.msra.mxu1 %v13142_v17  ;;  %3301 = vmatprep.subr.bf16.mxu0 %v13143_v41  ;;  %v13153_v17 = vld [vmem:[#allocation167_spill] sm:$0xff]  ;;  %v13154_v41 = vld [vmem:[#allocation168_spill] sm:$0xff] }
 0x5ae   :  { %3342 = vmatprep.subr.bf16.mxu1 %v13144_v23  ;;  %v13155_v23 = vld [vmem:[#allocation169_spill] sm:$0xff] }
 0x5b0   :  { %3302 = vmatpush1.bf16.msra.mxu0 %v13145_v59  ;;  %v13156_v59 = vld [vmem:[#allocation170_spill] sm:$0xff] }
 0x5b1   :  { %3343 = vmatpush1.bf16.msra.mxu1 %v13146_v4  ;;  %3303 = vmatprep.subr.bf16.mxu0 %v13147_v2  ;;  %v2818_v4 = vld [vmem:[#allocation3 + $0x28] sm:$0x30] }
 0x5b2   :  { %3344 = vmatprep.subr.bf16.mxu1 %v13148_v9 }
 0x5b4   :  { %3304 = vmatpush1.bf16.msra.mxu0 %v13149_v37 }
 0x5b5   :  { %3345 = vmatpush1.bf16.msra.mxu1 %v13150_v57  ;;  %3305 = vmatprep.subr.bf16.mxu0 %v13151_v0 }
 0x5b6   :  { %3346 = vmatprep.subr.bf16.mxu1 %v13152_v29 }
 0x5b8   :  { %3306 = vmatpush1.bf16.msra.mxu0 %v13153_v17 }
 0x5b9   :  { %3347 = vmatpush1.bf16.msra.mxu1 %v13154_v41  ;;  %3400 = vmatprep.subr.bf16.mxu0 %v13155_v23 }
 0x5ba   :  { %3441 = vmatprep.subr.bf16.mxu1 %v13156_v59 }
 0x5bb   :  { %v2859_v2 = vpop.f32.mrf.mxu0  ;;  %v2900_v9 = vpop.f32.mrf.mxu1 }
 0x5bc   :  { %v2911_v22 = vrot.slane %v2859_v2, 4  ;;  %v2913_v37 = vrot.slane %v2900_v9, 4  ;;  %v2927_v2 = vld [vmem:[#allocation3 + $0x18] sm:$0xc] }
 0x5bd   :  { %v2861_v57 = vpop.f32.mrf.mxu0  ;;  %v2902_v0 = vpop.f32.mrf.mxu1 }
 0x5be   :  { %v2919_v10 = vadd.f32 %v2911_v22, %v2818_v4  ;;  %v2921_v29 = vadd.f32 %v2913_v37, %v2820_v1  ;;  %v2912_v49 = vrot.slane %v2861_v57, 4  ;;  %v2914_v17 = vrot.slane %v2902_v0, 4  ;;  %v2928_v22 = vld [vmem:[#allocation3 + $0x8] sm:$0xc]  ;;  %v2930_v4 = vld [vmem:[#allocation3 + $0x30] sm:$0xc] }
 0x5bf   :  { %v2863_v50 = vpop.f32.mrf.mxu0  ;;  %v2904_v41 = vpop.f32.mrf.mxu1 }
 0x5c0   :  { %2923 = vst [vmem:[#allocation3 + $0x28] sm:$0x30] %v2919_v10  ;;  %2925 = vst [vmem:[#allocation3 + $0x10] sm:$0x30] %v2921_v29  ;;  %v2920_v23 = vadd.f32 %v2912_v49, %v2819_v3  ;;  %v2922_v59 = vadd.f32 %v2914_v17, %v2821_v35 }
 0x5c1   :  { %v2864_v21 = vpop.f32.mrf.mxu0  ;;  %v2905_v16 = vpop.f32.mrf.mxu1 }
 0x5c2   :  { %2924 = vst [vmem:[#allocation3] sm:$0x30] %v2920_v23  ;;  %2926 = vst [vmem:[#allocation3 + $0x20] sm:$0x30] %v2922_v59 }
 0x5db   :  { %v2968_v9 = vpop.f32.mrf.mxu0  ;;  %v3009_v14 = vpop.f32.mrf.mxu1 }
 0x5dc   :  { %v3020_v13 = vrot.slane %v2968_v9, 6  ;;  %v3022_v8 = vrot.slane %v3009_v14, 6 }
 0x5dd   :  { %v2970_v1 = vpop.f32.mrf.mxu0  ;;  %v3011_v37 = vpop.f32.mrf.mxu1 }
 0x5de   :  { %v3028_v50 = vadd.f32 %v3020_v13, %v2927_v2  ;;  %v3030_v57 = vadd.f32 %v3022_v8, %v2929_v15  ;;  %v3021_v10 = vrot.slane %v2970_v1, 6  ;;  %v3023_v0 = vrot.slane %v3011_v37, 6  ;;  %v3039_v13 = vld [vmem:[#allocation2 + $0x18] sm:$0xc0] }
 0x5df   :  { %v2972_v49 = vpop.f32.mrf.mxu0  ;;  %v3013_v35 = vpop.f32.mrf.mxu1 }
 0x5e0   :  { %3032 = vst [vmem:[#allocation3 + $0x18] sm:$0xc] %v3028_v50  ;;  %3034 = vst [vmem:[#allocation3 + $0x38] sm:$0xc] %v3030_v57  ;;  %v3029_v16 = vadd.f32 %v3021_v10, %v2928_v22  ;;  %v3031_v21 = vadd.f32 %v3023_v0, %v2930_v4  ;;  %v3269_v57 = vrot.slane %v10077_v34, 6 }
 0x5e1   :  { %v2973_v3 = vpop.f32.mrf.mxu0  ;;  %v3014_v29 = vpop.f32.mrf.mxu1  ;;  %v3038_v35 = vld [vmem:[#allocation2 + $0x58] sm:$0xc0]  ;;  %v3040_v34 = vld [vmem:[#allocation2 + $0x50] sm:$0xc0] }
 0x5e2   :  { %3033 = vst [vmem:[#allocation3 + $0x8] sm:$0xc] %v3029_v16  ;;  %3035 = vst [vmem:[#allocation3 + $0x30] sm:$0xc] %v3031_v21  ;;  %v3036_v3 = vld [vmem:[#allocation2 + $0x30] sm:$0xc0] }
 0x61b   :  { %v3078_v17 = vpop.f32.mrf.mxu0 }
 0x61c   :  { %v3119_v14 = vpop.f32.mrf.mxu1  ;;  %v3216_v49 = vrot.slane %v3078_v17, 2 }
 0x61d   :  { %v3080_v41 = vpop.f32.mrf.mxu0  ;;  %v3218_v0 = vrot.slane %v3119_v14, 2 }
 0x61e   :  { %v3121_v23 = vpop.f32.mrf.mxu1  ;;  %v3217_v21 = vrot.slane %v3080_v41, 2  ;;  %v3232_v29 = vadd.f32 %v3216_v49, %v3036_v3  ;;  %v3041_v41 = vld [vmem:[#allocation2 + $0x68] sm:$0xc0] }
 0x61f   :  { %v3219_v59 = vrot.slane %v3121_v23, 2  ;;  %v3082_v9 = vpop.f32.mrf.mxu0  ;;  %v3234_v16 = vadd.f32 %v3218_v0, %v3038_v35  ;;  %v3037_v23 = vld [vmem:[#allocation2] sm:$0xc0]  ;;  %v3042_v49 = vld [vmem:[#allocation2 + $0x8] sm:$0xc0] }
 0x620   :  { %v3123_v8 = vpop.f32.mrf.mxu1 }
 0x621   :  { %v3235_v15 = vadd.f32 %v3219_v59, %v3039_v13  ;;  %v3083_v2 = vpop.f32.mrf.mxu0  ;;  %v3248_v9 = vmul.f32 0.5, %v3234_v16  ;;  %v3233_v59 = vadd.f32 %v3217_v21, %v3037_v23  ;;  %v3240_v13 = vmul.f32 0.5, %v3232_v29 }
 0x622   :  { %v3124_v1 = vpop.f32.mrf.mxu1 }
 0x623   :  { %v3249_v37 = vmul.f32 0.5, %v3235_v15  ;;  %v3241_v8 = vmul.f32 0.5, %v3233_v59 }
 0x625   :  { %8036 = vtanh.f32 %v3249_v37 }
 0x626   :  { %8038 = vtanh.f32 %v3248_v9 }
 0x627   :  { %8040 = vtanh.f32 %v3240_v13 }
 0x628   :  { %8042 = vtanh.f32 %v3241_v8 }
 0x632   :  { %v8037_v50 = vpop.eup %8036 }
 0x633   :  { %v3253_v22 = vmul.f32 0.5, %v8037_v50  ;;  %v8039_v3 = vpop.eup %8038 }
 0x634   :  { %v8041_v29 = vpop.eup %8040  ;;  %v3252_v23 = vmul.f32 0.5, %v8039_v3 }
 0x635   :  { %v3255_v4 = vadd.f32 0.5, %v3253_v22  ;;  %v8043_v59 = vpop.eup %8042  ;;  %v3244_v13 = vmul.f32 0.5, %v8041_v29 }
 0x636   :  { %v3254_v8 = vadd.f32 0.5, %v3252_v23 }
 0x637   :  { %v3273_v10 = vmul.f32 %v3269_v57, %v3255_v4 }
 0x65b   :  { %v3160_v15 = vpop.f32.mrf.mxu0 }
 0x65c   :  { %v3220_v2 = vrot.slane %v3160_v15, 2  ;;  %v3201_v1 = vpop.f32.mrf.mxu1  ;;  %v3245_v15 = vmul.f32 0.5, %v8043_v59 }
 0x65d   :  { %v3162_v37 = vpop.f32.mrf.mxu0  ;;  %v3222_v17 = vrot.slane %v3201_v1, 2  ;;  %v3268_v1 = vrot.slane %v10074_v30, 6 }
 0x65e   :  { %v3236_v14 = vadd.f32 %v3220_v2, %v3040_v34  ;;  %v3221_v50 = vrot.slane %v3162_v37, 2  ;;  %v3203_v22 = vpop.f32.mrf.mxu1  ;;  %v3246_v2 = vadd.f32 0.5, %v3244_v13 }
 0x65f   :  { %v3164_v4 = vpop.f32.mrf.mxu0  ;;  %v3238_v16 = vadd.f32 %v3222_v17, %v3042_v49  ;;  %v3272_v37 = vmul.f32 %v3268_v1, %v3254_v8  ;;  %v13176_v1 = vld [vmem:[#allocation32_spill] sm:$0xff] }
 0x660   :  { %8044 = vtanh.f32 %v3236_v14  ;;  %v3237_v57 = vadd.f32 %v3221_v50, %v3041_v41  ;;  %v3205_v0 = vpop.f32.mrf.mxu1  ;;  %v3247_v14 = vadd.f32 0.5, %v3245_v15  ;;  %v13174_v15 = vld [vmem:[#allocation30_spill] sm:$0xff] }
 0x661   :  { %v3165_v35 = vpop.f32.mrf.mxu0  ;;  %v3258_v9 = vmul.f32 0.5, %v3238_v16  ;;  %v3043_v16 = vld [vmem:[#allocation2 + $0x48] sm:$0xc0] }
 0x662   :  { %8046 = vtanh.f32 %v3237_v57  ;;  %v3206_v21 = vpop.f32.mrf.mxu1  ;;  %v3223_v35 = vrot.slane %v3203_v22, 2  ;;  %v13166_v22 = vld [vmem:[#allocation180_spill] sm:$0xff] }
 0x663   :  { %8048 = vtanh.f32 %v3258_v9 }
 0x664   :  { %v3239_v3 = vadd.f32 %v3223_v35, %v3043_v16  ;;  %v13185_v35 = vld [vmem:[#allocation41_spill] sm:$0xff]  ;;  %v13186_v16 = vld [vmem:[#allocation42_spill] sm:$0xff] }
 0x666   :  { %v3259_v9 = vmul.f32 0.5, %v3239_v3  ;;  %v13188_v3 = vld [vmem:[#allocation44_spill] sm:$0xff] }
 0x66d   :  { %v8045_v34 = vpop.eup %8044 }
 0x66e   :  { %v3274_v50 = vmul.f32 %v8045_v34, %v3246_v2  ;;  %v13175_v2 = vld [vmem:[#allocation31_spill] sm:$0xff]  ;;  %v13177_v34 = vld [vmem:[#allocation33_spill] sm:$0xff] }
 0x66f   :  { %v8047_v41 = vpop.eup %8046 }
 0x670   :  { %v10354_v17 = vadd.f32 %v3274_v50, %v3272_v37  ;;  %v3275_v4 = vmul.f32 %v8047_v41, %v3247_v14  ;;  %v8049_v0 = vpop.eup %8048  ;;  %v13178_v37 = vld [vmem:[#allocation34_spill] sm:$0xff]  ;;  %v13179_v14 = vld [vmem:[#allocation35_spill] sm:$0xff]  ;;  %v13180_v50 = vld [vmem:[#allocation36_spill] sm:$0xff] }
 0x671   :  { %v3262_v49 = vmul.f32 0.5, %v8049_v0  ;;  %v13181_v41 = vld [vmem:[#allocation37_spill] sm:$0xff]  ;;  %v13183_v0 = vld [vmem:[#allocation39_spill] sm:$0xff] }
 0x672   :  { %8050 = vtanh.f32 %v10354_v17  ;;  %v10357_v57 = vadd.f32 %v3275_v4, %v3273_v10  ;;  %v13165_v10 = vld [vmem:[#allocation179_spill] sm:$0xff]  ;;  %v13182_v4 = vld [vmem:[#allocation38_spill] sm:$0xff] }
 0x673   :  { %v3264_v21 = vadd.f32 0.5, %v3262_v49  ;;  %8052 = vtanh.f32 %v3259_v9  ;;  %v13184_v49 = vld [vmem:[#allocation40_spill] sm:$0xff] }
 0x674   :  { %8054 = vtanh.f32 %v10357_v57  ;;  %v13192_v9 = vld [vmem:[#allocation48_spill] sm:$0xff] }
 0x67f   :  { %v8051_v29 = vpop.eup %8050 }
 0x680   :  { %v3280_v30 = vmul.f32 %v8051_v29, %v3264_v21  ;;  %v13187_v21 = vld [vmem:[#allocation43_spill] sm:$0xff]  ;;  %v13189_v29 = vld [vmem:[#allocation45_spill] sm:$0xff] }
 0x682   :  { %v3282_v23 = vpack.c.bf16 %v3280_v30, %v3280_v30  ;;  %v13190_v30 = vld [vmem:[#allocation46_spill] sm:$0xff] }
 0x684   :  { %v10359_v59 = vrot.slane %v3282_v23, 3  ;;  %v13191_v23 = vld [vmem:[#allocation47_spill] sm:$0xff] }
 0x686   :  { %3324 = vmatmul.mubr.bf16.vlgmr.msra.gmra.mxu0 %v10359_v59  ;;  %3365 = vmatmul.mubr.bf16.vlgmr.msra.gmra.mxu1 %v10359_v59 }
 0x687   :  { %3401 = vmatpush1.bf16.msra.mxu0 %v10083_v18  ;;  %3442 = vmatpush1.bf16.msra.mxu1 %v10086_v43  ;;  %v8053_v18 = vpop.eup %8052  ;;  %v13157_v43 = vld [vmem:[#allocation171_spill] sm:$0xff] }
 0x688   :  { %3402 = vmatprep.subr.bf16.mxu0 %v10089_v51  ;;  %3443 = vmatprep.subr.bf16.mxu1 %v10092_v58  ;;  %v13158_v51 = vld [vmem:[#allocation172_spill] sm:$0xff]  ;;  %v13159_v58 = vld [vmem:[#allocation173_spill] sm:$0xff] }
 0x689   :  { %3432 = vmatprep.mubr.bf16.mxu0 %v12638_v48  ;;  %3473 = vmatprep.mubr.bf16.mxu1 %v12638_v48 }
 0x68b   :  { %3403 = vmatpush1.bf16.msra.mxu0 %v10097_v26  ;;  %3444 = vmatpush1.bf16.msra.mxu1 %v10100_v32  ;;  %v3263_v26 = vmul.f32 0.5, %v8053_v18  ;;  %v13160_v32 = vld [vmem:[#allocation174_spill] sm:$0xff]  ;;  %v13193_v18 = vld [vmem:[#allocation49_spill] sm:$0xff] }
 0x68c   :  { %3404 = vmatprep.subr.bf16.mxu0 %v10104_v31  ;;  %3445 = vmatprep.subr.bf16.mxu1 %v10107_v12  ;;  %v13161_v31 = vld [vmem:[#allocation175_spill] sm:$0xff]  ;;  %v13162_v12 = vld [vmem:[#allocation176_spill] sm:$0xff] }
 0x68f   :  { %3405 = vmatpush1.bf16.msra.mxu0 %v10110_v11  ;;  %3446 = vmatpush1.bf16.msra.mxu1 %v10113_v36  ;;  %v13163_v11 = vld [vmem:[#allocation177_spill] sm:$0xff]  ;;  %v8055_v36 = vpop.eup %8054 }
 0x690   :  { %3406 = vmatprep.subr.bf16.mxu0 %v10116_v25  ;;  %3447 = vmatprep.subr.bf16.mxu1 %v10119_v56  ;;  %v3265_v25 = vadd.f32 0.5, %v3263_v26  ;;  %v13164_v56 = vld [vmem:[#allocation178_spill] sm:$0xff]  ;;  %v13197_v26 = vld [vmem:[#allocation53_spill] sm:$0xff] }
 0x693   :  { %3407 = vmatpush1.bf16.msra.mxu0 %v10122_v20  ;;  %3448 = vmatpush1.bf16.msra.mxu1 %v13157_v43  ;;  %v3281_v20 = vmul.f32 %v8055_v36, %v3265_v25  ;;  %v13194_v43 = vld [vmem:[#allocation50_spill] sm:$0xff]  ;;  %v13203_v25 = vld [vmem:[#allocation59_spill] sm:$0xff] }
 0x694   :  { %3408 = vmatprep.subr.bf16.mxu0 %v13158_v51  ;;  %3449 = vmatprep.subr.bf16.mxu1 %v13159_v58  ;;  %v13195_v51 = vld [vmem:[#allocation51_spill] sm:$0xff]  ;;  %v13196_v58 = vld [vmem:[#allocation52_spill] sm:$0xff]  ;;  %v13202_v36 = vld [vmem:[#allocation58_spill] sm:$0xff] }
 0x695   :  { %v3283_v13 = vpack.c.bf16 %v3281_v20, %v3281_v20  ;;  %v13205_v20 = vld [vmem:[#allocation61_spill] sm:$0xff] }
 0x697   :  { %3409 = vmatpush1.bf16.msra.mxu0 %v13160_v32  ;;  %3450 = vmatpush1.bf16.msra.mxu1 %v13161_v31  ;;  %v10396_v8 = vrot.slane %v3283_v13, 3  ;;  %v13198_v32 = vld [vmem:[#allocation54_spill] sm:$0xff]  ;;  %v13199_v31 = vld [vmem:[#allocation55_spill] sm:$0xff]  ;;  %v13208_v13 = vld [vmem:[#allocation64_spill] sm:$0xff] }
 0x698   :  { %3410 = vmatprep.subr.bf16.mxu0 %v13162_v12  ;;  %3451 = vmatprep.subr.bf16.mxu1 %v13163_v11  ;;  %v13200_v12 = vld [vmem:[#allocation56_spill] sm:$0xff]  ;;  %v13201_v11 = vld [vmem:[#allocation57_spill] sm:$0xff] }
 0x69b   :  { %3411 = vmatpush1.bf16.msra.mxu0 %v13164_v56  ;;  %3452 = vmatpush1.bf16.msra.mxu1 %v10149_v19  ;;  %v13170_v19 = vld [vmem:[#allocation26_spill] sm:$0xff]  ;;  %v13204_v56 = vld [vmem:[#allocation60_spill] sm:$0xff] }
 0x69c   :  { %3412 = vmatprep.subr.bf16.mxu0 %v10152_v42  ;;  %3453 = vmatprep.subr.bf16.mxu1 %v13165_v10  ;;  %v13168_v42 = vld [vmem:[#allocation24_spill] sm:$0xff]  ;;  %v13206_v10 = vld [vmem:[#allocation62_spill] sm:$0xff] }
 0x69f   :  { %3413 = vmatpush1.bf16.msra.mxu0 %v13166_v22  ;;  %3454 = vmatpush1.bf16.msra.mxu1 %v10161_v40  ;;  %v13171_v40 = vld [vmem:[#allocation27_spill] sm:$0xff] }
 0x6a0   :  { %3414 = vmatprep.subr.bf16.mxu0 %v10164_v24  ;;  %3455 = vmatprep.subr.bf16.mxu1 %v10167_v33  ;;  %v13167_v24 = vld [vmem:[#allocation23_spill] sm:$0xff]  ;;  %v13172_v33 = vld [vmem:[#allocation28_spill] sm:$0xff] }
 0x6a1   :  { %v13207_v22 = vld [vmem:[#allocation63_spill] sm:$0xff] }
 0x6a3   :  { %3415 = vmatpush1.bf16.msra.mxu0 %v10170_v27  ;;  %3456 = vmatpush1.bf16.msra.mxu1 %v10173_v28  ;;  %v13169_v28 = vld [vmem:[#allocation25_spill] sm:$0xff] }
 0x6a4   :  { %3498 = vmatprep.subr.bf16.mxu0 %v8785_v38  ;;  %3539 = vmatprep.subr.bf16.mxu1 %v8788_v39  ;;  %v13173_v27 = vld [vmem:[#allocation29_spill] sm:$0xff] }
 0x6a6   :  { %3433 = vmatmul.mubr.bf16.vlgmr.msra.gmra.mxu0 %v10396_v8  ;;  %3474 = vmatmul.mubr.bf16.vlgmr.msra.gmra.mxu1 %v10396_v8 }
 0x6a7   :  { %3499 = vmatpush1.bf16.msra.mxu0 %v8791_v44  ;;  %3530 = vmatprep.mubr.bf16.mxu0 %v10396_v8 }
 0x6a8   :  { %3540 = vmatpush1.bf16.msra.mxu1 %v8794_v45  ;;  %3571 = vmatprep.mubr.bf16.mxu1 %v10396_v8 }
 0x6a9   :  { %3500 = vmatprep.subr.bf16.mxu0 %v8796_v46  ;;  %3541 = vmatprep.subr.bf16.mxu1 %v8799_v47 }
 0x6ab   :  { %3501 = vmatpush1.bf16.msra.mxu0 %v8804_v52 }
 0x6ac   :  { %3542 = vmatpush1.bf16.msra.mxu1 %v8808_v53  ;;  %3502 = vmatprep.subr.bf16.mxu0 %v8810_v54 }
 0x6ad   :  { %3543 = vmatprep.subr.bf16.mxu1 %v8813_v55 }
 0x6af   :  { %3503 = vmatpush1.bf16.msra.mxu0 %v8818_v60 }
 0x6b0   :  { %3544 = vmatpush1.bf16.msra.mxu1 %v8822_v61  ;;  %3504 = vmatprep.subr.bf16.mxu0 %v8824_v62 }
 0x6b1   :  { %3545 = vmatprep.subr.bf16.mxu1 %v8827_v63 }
 0x6b3   :  { %3505 = vmatpush1.bf16.msra.mxu0 %v8830_v5 }
 0x6b4   :  { %3546 = vmatpush1.bf16.msra.mxu1 %v8834_v6  ;;  %3506 = vmatprep.subr.bf16.mxu0 %v8836_v7 }
 0x6b5   :  { %3547 = vmatprep.subr.bf16.mxu1 %v13167_v24 }
 0x6b7   :  { %3507 = vmatpush1.bf16.msra.mxu0 %v13168_v42 }
 0x6b8   :  { %3548 = vmatpush1.bf16.msra.mxu1 %v13169_v28  ;;  %3508 = vmatprep.subr.bf16.mxu0 %v13170_v19 }
 0x6b9   :  { %3549 = vmatprep.subr.bf16.mxu1 %v13171_v40 }
 0x6bb   :  { %3509 = vmatpush1.bf16.msra.mxu0 %v13172_v33 }
 0x6bc   :  { %3550 = vmatpush1.bf16.msra.mxu1 %v13173_v27  ;;  %3510 = vmatprep.subr.bf16.mxu0 %v13174_v15 }
 0x6bd   :  { %3551 = vmatprep.subr.bf16.mxu1 %v13175_v2 }
 0x6bf   :  { %3511 = vmatpush1.bf16.msra.mxu0 %v13176_v1 }
 0x6c0   :  { %3552 = vmatpush1.bf16.msra.mxu1 %v13177_v34  ;;  %3512 = vmatprep.subr.bf16.mxu0 %v13178_v37 }
 0x6c1   :  { %3553 = vmatprep.subr.bf16.mxu1 %v13179_v14 }
 0x6c3   :  { %3513 = vmatpush1.bf16.msra.mxu0 %v13180_v50 }
 0x6c4   :  { %3554 = vmatpush1.bf16.msra.mxu1 %v13181_v41  ;;  %3514 = vmatprep.subr.bf16.mxu0 %v13182_v4 }
 0x6c5   :  { %3555 = vmatprep.subr.bf16.mxu1 %v13183_v0 }
 0x6c7   :  { %3515 = vmatpush2.bf16.msra.mxu0 %v13184_v49 }
 0x6c8   :  { %3556 = vmatpush2.bf16.msra.mxu1 %v13185_v35  ;;  %3516 = vmatprep.subr.bf16.mxu0 %v13186_v16 }
 0x6c9   :  { %3557 = vmatprep.subr.bf16.mxu1 %v13187_v21  ;;  %v3396_v21 = vld [vmem:[#allocation3 + $0x30] sm:$0x3] }
 0x6cb   :  { %3517 = vmatpush2.bf16.msra.mxu0 %v13188_v3  ;;  %v3394_v3 = vld [vmem:[#allocation3 + $0x8] sm:$0x3] }
 0x6cc   :  { %3558 = vmatpush2.bf16.msra.mxu1 %v13189_v29  ;;  %3518 = vmatprep.subr.bf16.mxu0 %v13190_v30 }
 0x6cd   :  { %3559 = vmatprep.subr.bf16.mxu1 %v13191_v23 }
 0x6cf   :  { %3519 = vmatpush2.bf16.msra.mxu0 %v13192_v9 }
 0x6d0   :  { %3560 = vmatpush2.bf16.msra.mxu1 %v13193_v18  ;;  %3520 = vmatprep.subr.bf16.mxu0 %v13194_v43 }
 0x6d1   :  { %3561 = vmatprep.subr.bf16.mxu1 %v13195_v51 }
 0x6d3   :  { %3521 = vmatpush2.bf16.msra.mxu0 %v13196_v58 }
 0x6d4   :  { %3562 = vmatpush2.bf16.msra.mxu1 %v13197_v26  ;;  %3522 = vmatprep.subr.bf16.mxu0 %v13198_v32  ;;  %v13209_v32 = vld [vmem:[#allocation65_spill] sm:$0xff] }
 0x6d5   :  { %3563 = vmatprep.subr.bf16.mxu1 %v13199_v31  ;;  %v13210_v31 = vld [vmem:[#allocation66_spill] sm:$0xff] }
 0x6d7   :  { %3523 = vmatpush2.bf16.msra.mxu0 %v13200_v12  ;;  %v13211_v12 = vld [vmem:[#allocation67_spill] sm:$0xff] }
 0x6d8   :  { %3564 = vmatpush2.bf16.msra.mxu1 %v13201_v11  ;;  %3524 = vmatprep.subr.bf16.mxu0 %v13202_v36  ;;  %v13212_v11 = vld [vmem:[#allocation68_spill] sm:$0xff]  ;;  %v13213_v36 = vld [vmem:[#allocation69_spill] sm:$0xff] }
 0x6d9   :  { %3565 = vmatprep.subr.bf16.mxu1 %v13203_v25  ;;  %v13214_v25 = vld [vmem:[#allocation70_spill] sm:$0xff] }
 0x6db   :  { %3525 = vmatpush2.bf16.msra.mxu0 %v13204_v56  ;;  %v13215_v56 = vld [vmem:[#allocation71_spill] sm:$0xff] }
 0x6dc   :  { %3566 = vmatpush2.bf16.msra.mxu1 %v13205_v20  ;;  %3526 = vmatprep.subr.bf16.mxu0 %v13206_v10  ;;  %v13226_v10 = vld [vmem:[#allocation85_spill] sm:$0xff] }
 0x6dd   :  { %3567 = vmatprep.subr.bf16.mxu1 %v13207_v22  ;;  %v13216_v22 = vld [vmem:[#allocation73_spill] sm:$0xff] }
 0x6df   :  { %3527 = vmatpush2.bf16.msra.mxu0 %v13208_v13  ;;  %v13224_v13 = vld [vmem:[#allocation83_spill] sm:$0xff] }
 0x6e0   :  { %3568 = vmatpush2.bf16.msra.mxu1 %v13209_v32  ;;  %3528 = vmatprep.subr.bf16.mxu0 %v13210_v31  ;;  %v13217_v32 = vld [vmem:[#allocation74_spill] sm:$0xff]  ;;  %v13223_v31 = vld [vmem:[#allocation81_spill] sm:$0xff] }
 0x6e1   :  { %3569 = vmatprep.subr.bf16.mxu1 %v13211_v12  ;;  %v13218_v12 = vld [vmem:[#allocation75_spill] sm:$0xff] }
 0x6e3   :  { %3529 = vmatpush2.bf16.msra.mxu0 %v13212_v11  ;;  %v13219_v11 = vld [vmem:[#allocation76_spill] sm:$0xff] }
 0x6e4   :  { %3570 = vmatpush2.bf16.msra.mxu1 %v13213_v36  ;;  %3580 = vmatprep.subr.bf16.mxu0 %v13214_v25  ;;  %v13220_v36 = vld [vmem:[#allocation77_spill] sm:$0xff]  ;;  %v13221_v25 = vld [vmem:[#allocation79_spill] sm:$0xff] }
 0x6e5   :  { %3621 = vmatprep.subr.bf16.mxu1 %v13215_v56  ;;  %v13222_v56 = vld [vmem:[#allocation80_spill] sm:$0xff] }
 0x6e6   :  { %3531 = vmatmul.mubr.bf16.vlgmr.msra.gmra.mxu0 %v10359_v59 }
 0x6e7   :  { %3572 = vmatmul.mubr.bf16.vlgmr.msra.gmra.mxu1 %v10359_v59  ;;  %3581 = vmatpush1.bf16.msra.mxu0 %v13216_v22  ;;  %v13225_v22 = vld [vmem:[#allocation84_spill] sm:$0xff] }
 0x6e8   :  { %3612 = vmatprep.mubr.bf16.mxu0 %v10396_v8  ;;  %3622 = vmatpush1.bf16.msra.mxu1 %v13217_v32  ;;  %v13227_v32 = vld [vmem:[#allocation86_spill] sm:$0xff] }
 0x6e9   :  { %3653 = vmatprep.mubr.bf16.mxu1 %v10396_v8  ;;  %3582 = vmatprep.subr.bf16.mxu0 %v13218_v12  ;;  %v13228_v8 = vld [vmem:[#allocation87_spill] sm:$0xff]  ;;  %v13229_v12 = vld [vmem:[#allocation88_spill] sm:$0xff] }
 0x6ea   :  { %3623 = vmatprep.subr.bf16.mxu1 %v13219_v11  ;;  %v13230_v11 = vld [vmem:[#allocation89_spill] sm:$0xff] }
 0x6eb   :  { %3583 = vmatpush1.bf16.msra.mxu0 %v13220_v36  ;;  %v13231_v36 = vld [vmem:[#allocation90_spill] sm:$0xff] }
 0x6ec   :  { %3624 = vmatpush1.bf16.msra.mxu1 %v13221_v25  ;;  %3584 = vmatprep.subr.bf16.mxu0 %v13222_v56  ;;  %v13232_v25 = vld [vmem:[#allocation91_spill] sm:$0xff]  ;;  %v13233_v56 = vld [vmem:[#allocation92_spill] sm:$0xff] }
 0x6ed   :  { %3625 = vmatprep.subr.bf16.mxu1 %v13223_v31  ;;  %v13234_v31 = vld [vmem:[#allocation93_spill] sm:$0xff] }
 0x6ef   :  { %3585 = vmatpush1.bf16.msra.mxu0 %v13224_v13  ;;  %v13235_v13 = vld [vmem:[#allocation94_spill] sm:$0xff] }
 0x6f0   :  { %3626 = vmatpush1.bf16.msra.mxu1 %v13225_v22  ;;  %3586 = vmatprep.subr.bf16.mxu0 %v13226_v10  ;;  %v13236_v22 = vld [vmem:[#allocation95_spill] sm:$0xff]  ;;  %v13237_v10 = vld [vmem:[#allocation96_spill] sm:$0xff] }
 0x6f1   :  { %3627 = vmatprep.subr.bf16.mxu1 %v13227_v32  ;;  %v13238_v32 = vld [vmem:[#allocation97_spill] sm:$0xff] }
 0x6f3   :  { %3587 = vmatpush1.bf16.msra.mxu0 %v13228_v8  ;;  %v13239_v8 = vld [vmem:[#allocation98_spill] sm:$0xff] }
 0x6f4   :  { %3628 = vmatpush1.bf16.msra.mxu1 %v13229_v12  ;;  %3588 = vmatprep.subr.bf16.mxu0 %v13230_v11  ;;  %v13240_v12 = vld [vmem:[#allocation99_spill] sm:$0xff]  ;;  %v13241_v11 = vld [vmem:[#allocation100_spill] sm:$0xff] }
 0x6f5   :  { %3629 = vmatprep.subr.bf16.mxu1 %v13231_v36  ;;  %v13242_v36 = vld [vmem:[#allocation101_spill] sm:$0xff] }
 0x6f7   :  { %3589 = vmatpush1.bf16.msra.mxu0 %v13232_v25  ;;  %v13243_v25 = vld [vmem:[#allocation102_spill] sm:$0xff] }
 0x6f8   :  { %3630 = vmatpush1.bf16.msra.mxu1 %v13233_v56  ;;  %3590 = vmatprep.subr.bf16.mxu0 %v13234_v31  ;;  %v13244_v56 = vld [vmem:[#allocation103_spill] sm:$0xff]  ;;  %v13245_v31 = vld [vmem:[#allocation104_spill] sm:$0xff] }
 0x6f9   :  { %3631 = vmatprep.subr.bf16.mxu1 %v13235_v13  ;;  %v13246_v13 = vld [vmem:[#allocation105_spill] sm:$0xff] }
 0x6fb   :  { %3591 = vmatpush1.bf16.msra.mxu0 %v13236_v22  ;;  %v13247_v22 = vld [vmem:[#allocation106_spill] sm:$0xff] }
 0x6fc   :  { %3632 = vmatpush1.bf16.msra.mxu1 %v13237_v10  ;;  %3592 = vmatprep.subr.bf16.mxu0 %v13238_v32  ;;  %v13248_v10 = vld [vmem:[#allocation107_spill] sm:$0xff]  ;;  %v13249_v32 = vld [vmem:[#allocation108_spill] sm:$0xff] }
 0x6fd   :  { %3633 = vmatprep.subr.bf16.mxu1 %v13239_v8  ;;  %v13250_v8 = vld [vmem:[#allocation109_spill] sm:$0xff] }
 0x6ff   :  { %3593 = vmatpush1.bf16.msra.mxu0 %v13240_v12  ;;  %v13251_v12 = vld [vmem:[#allocation110_spill] sm:$0xff] }
 0x700   :  { %3634 = vmatpush1.bf16.msra.mxu1 %v13241_v11  ;;  %3594 = vmatprep.subr.bf16.mxu0 %v13242_v36  ;;  %v13252_v11 = vld [vmem:[#allocation111_spill] sm:$0xff]  ;;  %v13253_v36 = vld [vmem:[#allocation112_spill] sm:$0xff] }
 0x701   :  { %3635 = vmatprep.subr.bf16.mxu1 %v13243_v25  ;;  %v13254_v25 = vld [vmem:[#allocation113_spill] sm:$0xff] }
 0x703   :  { %3595 = vmatpush1.bf16.msra.mxu0 %v13244_v56  ;;  %v13255_v56 = vld [vmem:[#allocation114_spill] sm:$0xff] }
 0x704   :  { %3636 = vmatpush1.bf16.msra.mxu1 %v13245_v31  ;;  %3596 = vmatprep.subr.bf16.mxu0 %v13246_v13  ;;  %v13256_v31 = vld [vmem:[#allocation115_spill] sm:$0xff]  ;;  %v13257_v13 = vld [vmem:[#allocation116_spill] sm:$0xff] }
 0x705   :  { %3637 = vmatprep.subr.bf16.mxu1 %v13247_v22  ;;  %v13258_v22 = vld [vmem:[#allocation117_spill] sm:$0xff] }
 0x707   :  { %3597 = vmatpush2.bf16.msra.mxu0 %v13248_v10  ;;  %v13259_v10 = vld [vmem:[#allocation118_spill] sm:$0xff] }
 0x708   :  { %3638 = vmatpush2.bf16.msra.mxu1 %v13249_v32  ;;  %3598 = vmatprep.subr.bf16.mxu0 %v13250_v8  ;;  %v13260_v32 = vld [vmem:[#allocation119_spill] sm:$0xff]  ;;  %v13261_v8 = vld [vmem:[#allocation120_spill] sm:$0xff] }
 0x709   :  { %3639 = vmatprep.subr.bf16.mxu1 %v13251_v12  ;;  %v13262_v12 = vld [vmem:[#allocation121_spill] sm:$0xff] }
 0x70b   :  { %3599 = vmatpush2.bf16.msra.mxu0 %v13252_v11  ;;  %v13263_v11 = vld [vmem:[#allocation122_spill] sm:$0xff] }
 0x70c   :  { %3640 = vmatpush2.bf16.msra.mxu1 %v13253_v36  ;;  %3600 = vmatprep.subr.bf16.mxu0 %v13254_v25  ;;  %v13264_v36 = vld [vmem:[#allocation123_spill] sm:$0xff]  ;;  %v13265_v25 = vld [vmem:[#allocation124_spill] sm:$0xff] }
 0x70d   :  { %3641 = vmatprep.subr.bf16.mxu1 %v13255_v56  ;;  %v13266_v56 = vld [vmem:[#allocation125_spill] sm:$0xff] }
 0x70f   :  { %3601 = vmatpush2.bf16.msra.mxu0 %v13256_v31  ;;  %v13267_v31 = vld [vmem:[#allocation126_spill] sm:$0xff] }
 0x710   :  { %3642 = vmatpush2.bf16.msra.mxu1 %v13257_v13  ;;  %3602 = vmatprep.subr.bf16.mxu0 %v13258_v22  ;;  %v13268_v13 = vld [vmem:[#allocation127_spill] sm:$0xff]  ;;  %v13269_v22 = vld [vmem:[#allocation128_spill] sm:$0xff] }
 0x711   :  { %3643 = vmatprep.subr.bf16.mxu1 %v13259_v10  ;;  %v13270_v10 = vld [vmem:[#allocation129_spill] sm:$0xff] }
 0x713   :  { %3603 = vmatpush2.bf16.msra.mxu0 %v13260_v32  ;;  %v13271_v32 = vld [vmem:[#allocation130_spill] sm:$0xff] }
 0x714   :  { %3644 = vmatpush2.bf16.msra.mxu1 %v13261_v8  ;;  %3604 = vmatprep.subr.bf16.mxu0 %v13262_v12  ;;  %v13272_v8 = vld [vmem:[#allocation131_spill] sm:$0xff]  ;;  %v13273_v12 = vld [vmem:[#allocation132_spill] sm:$0xff] }
 0x715   :  { %3645 = vmatprep.subr.bf16.mxu1 %v13263_v11  ;;  %v13274_v11 = vld [vmem:[#allocation133_spill] sm:$0xff] }
 0x717   :  { %3605 = vmatpush2.bf16.msra.mxu0 %v13264_v36  ;;  %v13275_v36 = vld [vmem:[#allocation134_spill] sm:$0xff] }
 0x718   :  { %3646 = vmatpush2.bf16.msra.mxu1 %v13265_v25  ;;  %3606 = vmatprep.subr.bf16.mxu0 %v13266_v56  ;;  %v13276_v25 = vld [vmem:[#allocation135_spill] sm:$0xff]  ;;  %v13277_v56 = vld [vmem:[#allocation136_spill] sm:$0xff] }
 0x719   :  { %3647 = vmatprep.subr.bf16.mxu1 %v13267_v31  ;;  %v3287_v31 = vld [vmem:[#allocation3 + $0x20] sm:$0xc0] }
 0x71b   :  { %3607 = vmatpush2.bf16.msra.mxu0 %v13268_v13 }
 0x71c   :  { %3648 = vmatpush2.bf16.msra.mxu1 %v13269_v22  ;;  %3608 = vmatprep.subr.bf16.mxu0 %v13270_v10  ;;  %v10537_v22 = vld [vmem:[%s12131_s4 + $0xe4] ss:$16 sps:$4 sm:$0xff]  }
 0x71d   :  { %3649 = vmatprep.subr.bf16.mxu1 %v13271_v32  ;;  %13278 = vst [vmem:[#allocation181_spill] sm:$0xff] %v10537_v22  ;;  %v3285_v10 = vld [vmem:[#allocation3] sm:$0xc0] }
 0x71f   :  { %3609 = vmatpush2.bf16.msra.mxu0 %v13272_v8  ;;  %v10543_v8 = vld [vmem:[%s12131_s4 + $0xec] ss:$16 sps:$4 sm:$0xff]  }
 0x720   :  { %3650 = vmatpush2.bf16.msra.mxu1 %v13273_v12  ;;  %3610 = vmatprep.subr.bf16.mxu0 %v13274_v11  ;;  %13279 = vst [vmem:[#allocation137_spill] sm:$0xff] %v10543_v8  ;;  %v3286_v11 = vld [vmem:[#allocation3 + $0x10] sm:$0xc0] }
 0x721   :  { %3651 = vmatprep.subr.bf16.mxu1 %v13275_v36 }
 0x723   :  { %3611 = vmatpush2.bf16.msra.mxu0 %v13276_v25  ;;  %v10733_v25 = vld [vmem:[#allocation9 + $0xec] ss:$16 sps:$4 sm:$0xff]  }
 0x724   :  { %3652 = vmatpush2.bf16.msra.mxu1 %v13277_v56  ;;  %3718 = vmatprep.subr.bf16.mxu0 %v10537_v22  ;;  %v10551_v56 = vld [vmem:[%s12131_s4 + $0xe0] ss:$16 sps:$4 sm:$0xff]   ;;  %v10557_v22 = vld [vmem:[%s12131_s4 + $0xe8] ss:$16 sps:$4 sm:$0xff]   ;;  %13311 = vst [vmem:[#allocation169_spill] sm:$0xff] %v10733_v25 }
 0x725   :  { %3759 = vmatprep.subr.bf16.mxu1 %v10543_v8  ;;  %13280 = vst [vmem:[#allocation138_spill] sm:$0xff] %v10551_v56  ;;  %13281 = vst [vmem:[#allocation139_spill] sm:$0xff] %v10557_v22  ;;  %v10563_v8 = vld [vmem:[%s12131_s4 + $0xc4] ss:$16 sps:$4 sm:$0xff]  }
 0x726   :  { %3613 = vmatmul.mubr.bf16.vlgmr.msra.gmra.mxu0 %v10359_v59  ;;  %13282 = vst [vmem:[#allocation140_spill] sm:$0xff] %v10563_v8 }
 0x727   :  { %3654 = vmatmul.mubr.bf16.vlgmr.msra.gmra.mxu1 %v10359_v59  ;;  %3719 = vmatpush1.bf16.msra.mxu0 %v10551_v56  ;;  %v10569_v59 = vld [vmem:[%s12131_s4 + $0xcc] ss:$16 sps:$4 sm:$0xff]  }
 0x728   :  { %3760 = vmatpush1.bf16.msra.mxu1 %v10557_v22  ;;  %3720 = vmatprep.subr.bf16.mxu0 %v10563_v8  ;;  %13283 = vst [vmem:[#allocation141_spill] sm:$0xff] %v10569_v59  ;;  %v10577_v22 = vld [vmem:[%s12131_s4 + $0xc0] ss:$16 sps:$4 sm:$0xff]   ;;  %v10583_v8 = vld [vmem:[%s12131_s4 + $0xc8] ss:$16 sps:$4 sm:$0xff]  }
 0x729   :  { %3761 = vmatprep.subr.bf16.mxu1 %v10569_v59  ;;  %3750 = vmatprep.mubr.bf16.mxu0 %v12638_v48  ;;  %13284 = vst [vmem:[#allocation142_spill] sm:$0xff] %v10577_v22  ;;  %13285 = vst [vmem:[#allocation143_spill] sm:$0xff] %v10583_v8  ;;  %v10589_v59 = vld [vmem:[%s12131_s4 + $0xa4] ss:$16 sps:$4 sm:$0xff]   ;;  %v10595_v56 = vld [vmem:[%s12131_s4 + $0xac] ss:$16 sps:$4 sm:$0xff]  }
 0x72a   :  { %3791 = vmatprep.mubr.bf16.mxu1 %v12638_v48  ;;  %13286 = vst [vmem:[#allocation144_spill] sm:$0xff] %v10589_v59  ;;  %13287 = vst [vmem:[#allocation145_spill] sm:$0xff] %v10595_v56 }
 0x72b   :  { %3721 = vmatpush1.bf16.msra.mxu0 %v10577_v22  ;;  %v10601_v22 = vld [vmem:[%s12131_s4 + $0xa0] ss:$16 sps:$4 sm:$0xff]  }
 0x72c   :  { %3762 = vmatpush1.bf16.msra.mxu1 %v10583_v8  ;;  %3722 = vmatprep.subr.bf16.mxu0 %v10589_v59  ;;  %13288 = vst [vmem:[#allocation146_spill] sm:$0xff] %v10601_v22  ;;  %v10607_v8 = vld [vmem:[%s12131_s4 + $0xa8] ss:$16 sps:$4 sm:$0xff]   ;;  %v10613_v59 = vld [vmem:[%s12131_s4 + $0x84] ss:$16 sps:$4 sm:$0xff]  }
 0x72d   :  { %3763 = vmatprep.subr.bf16.mxu1 %v10595_v56  ;;  %13289 = vst [vmem:[#allocation147_spill] sm:$0xff] %v10607_v8  ;;  %13290 = vst [vmem:[#allocation148_spill] sm:$0xff] %v10613_v59  ;;  %v10619_v56 = vld [vmem:[%s12131_s4 + $0x8c] ss:$16 sps:$4 sm:$0xff]  }
 0x72e   :  { %13291 = vst [vmem:[#allocation149_spill] sm:$0xff] %v10619_v56 }
 0x72f   :  { %3723 = vmatpush1.bf16.msra.mxu0 %v10601_v22  ;;  %v10625_v22 = vld [vmem:[%s12131_s4 + $0x80] ss:$16 sps:$4 sm:$0xff]  }
 0x730   :  { %3764 = vmatpush1.bf16.msra.mxu1 %v10607_v8  ;;  %3724 = vmatprep.subr.bf16.mxu0 %v10613_v59  ;;  %13292 = vst [vmem:[#allocation150_spill] sm:$0xff] %v10625_v22  ;;  %v10631_v8 = vld [vmem:[%s12131_s4 + $0x88] ss:$16 sps:$4 sm:$0xff]   ;;  %v10637_v59 = vld [vmem:[%s12131_s4 + $0x64] ss:$16 sps:$4 sm:$0xff]  }
 0x731   :  { %3765 = vmatprep.subr.bf16.mxu1 %v10619_v56  ;;  %13293 = vst [vmem:[#allocation151_spill] sm:$0xff] %v10631_v8  ;;  %13294 = vst [vmem:[#allocation152_spill] sm:$0xff] %v10637_v59  ;;  %v10643_v56 = vld [vmem:[%s12131_s4 + $0x6c] ss:$16 sps:$4 sm:$0xff]  }
 0x732   :  { %13295 = vst [vmem:[#allocation153_spill] sm:$0xff] %v10643_v56 }
 0x733   :  { %3725 = vmatpush1.bf16.msra.mxu0 %v10625_v22  ;;  %v10649_v22 = vld [vmem:[%s12131_s4 + $0x60] ss:$16 sps:$4 sm:$0xff]  }
 0x734   :  { %3766 = vmatpush1.bf16.msra.mxu1 %v10631_v8  ;;  %3726 = vmatprep.subr.bf16.mxu0 %v10637_v59  ;;  %13296 = vst [vmem:[#allocation154_spill] sm:$0xff] %v10649_v22  ;;  %v10655_v8 = vld [vmem:[%s12131_s4 + $0x68] ss:$16 sps:$4 sm:$0xff]   ;;  %v10661_v59 = vld [vmem:[%s12131_s4 + $0x44] ss:$16 sps:$4 sm:$0xff]  }
 0x735   :  { %3767 = vmatprep.subr.bf16.mxu1 %v10643_v56  ;;  %13297 = vst [vmem:[#allocation155_spill] sm:$0xff] %v10655_v8  ;;  %13298 = vst [vmem:[#allocation156_spill] sm:$0xff] %v10661_v59  ;;  %v10667_v56 = vld [vmem:[%s12131_s4 + $0x4c] ss:$16 sps:$4 sm:$0xff]  }
 0x736   :  { %13299 = vst [vmem:[#allocation157_spill] sm:$0xff] %v10667_v56 }
 0x737   :  { %3727 = vmatpush1.bf16.msra.mxu0 %v10649_v22  ;;  %v10673_v22 = vld [vmem:[%s12131_s4 + $0x40] ss:$16 sps:$4 sm:$0xff]  }
 0x738   :  { %3768 = vmatpush1.bf16.msra.mxu1 %v10655_v8  ;;  %3728 = vmatprep.subr.bf16.mxu0 %v10661_v59  ;;  %13300 = vst [vmem:[#allocation158_spill] sm:$0xff] %v10673_v22  ;;  %v10679_v8 = vld [vmem:[%s12131_s4 + $0x48] ss:$16 sps:$4 sm:$0xff]   ;;  %v10685_v59 = vld [vmem:[%s12131_s4 + $0x24] ss:$16 sps:$4 sm:$0xff]  }
 0x739   :  { %3769 = vmatprep.subr.bf16.mxu1 %v10667_v56  ;;  %13301 = vst [vmem:[#allocation159_spill] sm:$0xff] %v10679_v8  ;;  %13302 = vst [vmem:[#allocation160_spill] sm:$0xff] %v10685_v59  ;;  %v10691_v56 = vld [vmem:[%s12131_s4 + $0x2c] ss:$16 sps:$4 sm:$0xff]  }
 0x73a   :  { %13303 = vst [vmem:[#allocation161_spill] sm:$0xff] %v10691_v56 }
 0x73b   :  { %3729 = vmatpush1.bf16.msra.mxu0 %v10673_v22  ;;  %v10697_v22 = vld [vmem:[%s12131_s4 + $0x20] ss:$16 sps:$4 sm:$0xff]  }
 0x73c   :  { %3770 = vmatpush1.bf16.msra.mxu1 %v10679_v8  ;;  %3730 = vmatprep.subr.bf16.mxu0 %v10685_v59  ;;  %13304 = vst [vmem:[#allocation162_spill] sm:$0xff] %v10697_v22  ;;  %v10703_v8 = vld [vmem:[%s12131_s4 + $0x28] ss:$16 sps:$4 sm:$0xff]   ;;  %v10709_v59 = vld [vmem:[%s12131_s4 + $0x4] ss:$16 sps:$4 sm:$0xff]  }
 0x73d   :  { %3771 = vmatprep.subr.bf16.mxu1 %v10691_v56  ;;  %13305 = vst [vmem:[#allocation163_spill] sm:$0xff] %v10703_v8  ;;  %13306 = vst [vmem:[#allocation164_spill] sm:$0xff] %v10709_v59  ;;  %v10715_v56 = vld [vmem:[%s12131_s4 + $0xc] ss:$16 sps:$4 sm:$0xff]  }
 0x73e   :  { %13307 = vst [vmem:[#allocation165_spill] sm:$0xff] %v10715_v56 }
 0x73f   :  { %3731 = vmatpush1.bf16.msra.mxu0 %v10697_v22  ;;  %v10721_v22 = vld [vmem:[%s12131_s4] ss:$16 sps:$4 sm:$0xff]  }
 0x740   :  { %3772 = vmatpush1.bf16.msra.mxu1 %v10703_v8  ;;  %3732 = vmatprep.subr.bf16.mxu0 %v10709_v59  ;;  %13308 = vst [vmem:[#allocation166_spill] sm:$0xff] %v10721_v22  ;;  %v10727_v8 = vld [vmem:[%s12131_s4 + $0x8] ss:$16 sps:$4 sm:$0xff]   ;;  %v10730_v59 = vld [vmem:[#allocation9 + $0xe4] ss:$16 sps:$4 sm:$0xff]  }
 0x741   :  { %3773 = vmatprep.subr.bf16.mxu1 %v10715_v56  ;;  %13309 = vst [vmem:[#allocation167_spill] sm:$0xff] %v10727_v8  ;;  %13310 = vst [vmem:[#allocation168_spill] sm:$0xff] %v10730_v59  ;;  %v3284_v56 = vld [vmem:[#allocation3 + $0x28] sm:$0xc0] }
 0x743   :  { %3733 = vmatpush1.bf16.msra.mxu0 %v10721_v22 }
 0x744   :  { %3774 = vmatpush1.bf16.msra.mxu1 %v10727_v8  ;;  %3812 = vmatprep.subr.bf16.mxu0 %v10730_v59 }
 0x745   :  { %3853 = vmatprep.subr.bf16.mxu1 %v10733_v25 }
 0x746   :  { %v3325_v36 = vpop.f32.mrf.mxu0  ;;  %v3366_v12 = vpop.f32.mrf.mxu1 }
 0x747   :  { %v3377_v22 = vrot.slane %v3325_v36, 2  ;;  %v3379_v32 = vrot.slane %v3366_v12, 2  ;;  %v3393_v36 = vld [vmem:[#allocation3 + $0x18] sm:$0x3] }
 0x748   :  { %v3327_v13 = vpop.f32.mrf.mxu0  ;;  %v3368_v20 = vpop.f32.mrf.mxu1  ;;  %v3395_v12 = vld [vmem:[#allocation3 + $0x38] sm:$0x3] }
 0x749   :  { %v3385_v26 = vadd.f32 %v3377_v22, %v3284_v56  ;;  %v3387_v8 = vadd.f32 %v3379_v32, %v3286_v11  ;;  %v3378_v58 = vrot.slane %v3327_v13, 2  ;;  %v3380_v51 = vrot.slane %v3368_v20, 2 }
 0x74a   :  { %v3329_v43 = vpop.f32.mrf.mxu0  ;;  %v3370_v59 = vpop.f32.mrf.mxu1 }
 0x74b   :  { %3389 = vst [vmem:[#allocation3 + $0x28] sm:$0xc0] %v3385_v26  ;;  %3391 = vst [vmem:[#allocation3 + $0x10] sm:$0xc0] %v3387_v8  ;;  %v3386_v18 = vadd.f32 %v3378_v58, %v3285_v10  ;;  %v3388_v25 = vadd.f32 %v3380_v51, %v3287_v31  ;;  %v3493_v10 = vld [vmem:[#allocation2 + $0x38] sm:$0x3] }
 0x74c   :  { %v3330_v9 = vpop.f32.mrf.mxu0  ;;  %v3371_v23 = vpop.f32.mrf.mxu1 }
 0x74d   :  { %3390 = vst [vmem:[#allocation3] sm:$0xc0] %v3386_v18  ;;  %3392 = vst [vmem:[#allocation3 + $0x20] sm:$0xc0] %v3388_v25 }
 0x766   :  { %v3434_v30 = vpop.f32.mrf.mxu0  ;;  %v3475_v29 = vpop.f32.mrf.mxu1 }
 0x767   :  { %v3482_v56 = vadd.f32 %v3434_v30, %v3393_v36  ;;  %v3484_v32 = vadd.f32 %v3475_v29, %v3395_v12 }
 0x768   :  { %v3436_v11 = vpop.f32.mrf.mxu0  ;;  %v3477_v20 = vpop.f32.mrf.mxu1 }
 0x769   :  { %3486 = vst [vmem:[#allocation3 + $0x18] sm:$0x3] %v3482_v56  ;;  %3488 = vst [vmem:[#allocation3 + $0x38] sm:$0x3] %v3484_v32  ;;  %v3483_v43 = vadd.f32 %v3436_v11, %v3394_v3  ;;  %v3485_v26 = vadd.f32 %v3477_v20, %v3396_v21  ;;  %v3699_v56 = vrot.slane %v10357_v57, 6 }
 0x76a   :  { %v3438_v58 = vpop.f32.mrf.mxu0  ;;  %v3479_v51 = vpop.f32.mrf.mxu1  ;;  %v3492_v11 = vld [vmem:[#allocation2 + $0x10] sm:$0x3] }
 0x76b   :  { %3487 = vst [vmem:[#allocation3 + $0x8] sm:$0x3] %v3483_v43  ;;  %3489 = vst [vmem:[#allocation3 + $0x30] sm:$0x3] %v3485_v26  ;;  %v3490_v43 = vld [vmem:[#allocation2 + $0x40] sm:$0x3] }
 0x76c   :  { %v3439_v23 = vpop.f32.mrf.mxu0  ;;  %v3480_v9 = vpop.f32.mrf.mxu1  ;;  %v3491_v58 = vld [vmem:[#allocation2 + $0x20] sm:$0x3] }
 0x7a6   :  { %v3532_v18 = vpop.f32.mrf.mxu0 }
 0x7a7   :  { %v3573_v31 = vpop.f32.mrf.mxu1  ;;  %v3662_v26 = vadd.f32 %v3532_v18, %v3490_v43 }
 0x7a8   :  { %v3534_v25 = vpop.f32.mrf.mxu0  ;;  %v3664_v20 = vadd.f32 %v3573_v31, %v3492_v11  ;;  %v3496_v31 = vld [vmem:[#allocation2 + $0x78] sm:$0x3] }
 0x7a9   :  { %v3575_v22 = vpop.f32.mrf.mxu1  ;;  %v3663_v23 = vadd.f32 %v3534_v25, %v3491_v58  ;;  %v3670_v9 = vmul.f32 0.5, %v3662_v26 }
 0x7aa   :  { %v3665_v13 = vadd.f32 %v3575_v22, %v3493_v10  ;;  %v3536_v30 = vpop.f32.mrf.mxu0  ;;  %v3678_v51 = vmul.f32 0.5, %v3664_v20  ;;  %v3494_v22 = vld [vmem:[#allocation2 + $0x60] sm:$0x3] }
 0x7ab   :  { %v3577_v29 = vpop.f32.mrf.mxu1  ;;  %v3671_v10 = vmul.f32 0.5, %v3663_v23 }
 0x7ac   :  { %v3679_v8 = vmul.f32 0.5, %v3665_v13  ;;  %v3537_v59 = vpop.f32.mrf.mxu0 }
 0x7ad   :  { %v3578_v36 = vpop.f32.mrf.mxu1 }
 0x7ae   :  { %8056 = vtanh.f32 %v3679_v8  ;;  %v3495_v8 = vld [vmem:[#allocation2 + $0x70] sm:$0x3] }
 0x7af   :  { %8058 = vtanh.f32 %v3678_v51 }
 0x7b0   :  { %8060 = vtanh.f32 %v3670_v9 }
 0x7b1   :  { %8062 = vtanh.f32 %v3671_v10  ;;  %v3698_v10 = vrot.slane %v10354_v17, 6 }
 0x7bb   :  { %v8057_v3 = vpop.eup %8056 }
 0x7bc   :  { %v3683_v21 = vmul.f32 0.5, %v8057_v3  ;;  %v8059_v25 = vpop.eup %8058 }
 0x7bd   :  { %v8061_v11 = vpop.eup %8060  ;;  %v3682_v20 = vmul.f32 0.5, %v8059_v25 }
 0x7be   :  { %v3685_v12 = vadd.f32 0.5, %v3683_v21  ;;  %v8063_v26 = vpop.eup %8062  ;;  %v3674_v58 = vmul.f32 0.5, %v8061_v11 }
 0x7bf   :  { %v3684_v51 = vadd.f32 0.5, %v3682_v20  ;;  %v3675_v23 = vmul.f32 0.5, %v8063_v26  ;;  %v10753_v26 = vld [vmem:[#allocation9 + $0xc4] ss:$16 sps:$4 sm:$0xff]  }
 0x7c0   :  { %v3703_v32 = vmul.f32 %v3699_v56, %v3685_v12  ;;  %v3676_v9 = vadd.f32 0.5, %v3674_v58  ;;  %v10761_v58 = vld [vmem:[#allocation9 + $0xc0] ss:$16 sps:$4 sm:$0xff]  }
 0x7e6   :  { %v3614_v13 = vpop.f32.mrf.mxu0 }
 0x7e7   :  { %v3666_v30 = vadd.f32 %v3614_v13, %v3494_v22  ;;  %v3655_v29 = vpop.f32.mrf.mxu1  ;;  %v3702_v13 = vmul.f32 %v3698_v10, %v3684_v51  ;;  %v10764_v51 = vld [vmem:[#allocation9 + $0xc8] ss:$16 sps:$4 sm:$0xff]   ;;  %v10773_v10 = vld [vmem:[#allocation9 + $0xa0] ss:$16 sps:$4 sm:$0xff]  }
 0x7e8   :  { %v3616_v59 = vpop.f32.mrf.mxu0  ;;  %v3668_v18 = vadd.f32 %v3655_v29, %v3496_v31 }
 0x7e9   :  { %8064 = vtanh.f32 %v3666_v30  ;;  %v3667_v57 = vadd.f32 %v3616_v59, %v3495_v8  ;;  %v3657_v36 = vpop.f32.mrf.mxu1  ;;  %v3677_v30 = vadd.f32 0.5, %v3675_v23  ;;  %v10767_v23 = vld [vmem:[#allocation9 + $0xa4] ss:$16 sps:$4 sm:$0xff]  }
 0x7ea   :  { %v3618_v3 = vpop.f32.mrf.mxu0  ;;  %v3688_v43 = vmul.f32 0.5, %v3668_v18 }
 0x7eb   :  { %8066 = vtanh.f32 %v3667_v57  ;;  %v3659_v21 = vpop.f32.mrf.mxu1 }
 0x7ec   :  { %v3619_v12 = vpop.f32.mrf.mxu0  ;;  %8068 = vtanh.f32 %v3688_v43  ;;  %v10747_v43 = vld [vmem:[#allocation9 + $0xe0] ss:$16 sps:$4 sm:$0xff]  }
 0x7ed   :  { %v3660_v56 = vpop.f32.mrf.mxu1  ;;  %v3497_v12 = vld [vmem:[#allocation2 + $0x28] sm:$0x3] }
 0x7ee   :  { %v3669_v11 = vadd.f32 %v3657_v36, %v3497_v12  ;;  %v10756_v36 = vld [vmem:[#allocation9 + $0xcc] ss:$16 sps:$4 sm:$0xff]   ;;  %v10804_v12 = vld [vmem:[#allocation9 + $0x44] ss:$16 sps:$4 sm:$0xff]  }
 0x7ef   :  { %13316 = vst [vmem:[#allocation174_spill] sm:$0xff] %v10804_v12 }
 0x7f0   :  { %v3689_v20 = vmul.f32 0.5, %v3669_v11 }
 0x7f6   :  { %v8065_v22 = vpop.eup %8064 }
 0x7f7   :  { %v3704_v29 = vmul.f32 %v8065_v22, %v3676_v9  ;;  %v10770_v9 = vld [vmem:[#allocation9 + $0xac] ss:$16 sps:$4 sm:$0xff]   ;;  %v10776_v22 = vld [vmem:[#allocation9 + $0xa8] ss:$16 sps:$4 sm:$0xff]  }
 0x7f8   :  { %v8067_v8 = vpop.eup %8066 }
 0x7f9   :  { %v10738_v59 = vadd.f32 %v3704_v29, %v3702_v13  ;;  %v3705_v57 = vmul.f32 %v8067_v8, %v3677_v30  ;;  %v8069_v3 = vpop.eup %8068  ;;  %v10780_v13 = vld [vmem:[#allocation9 + $0x84] ss:$16 sps:$4 sm:$0xff]   ;;  %v10783_v30 = vld [vmem:[#allocation9 + $0x8c] ss:$16 sps:$4 sm:$0xff]   ;;  %v10786_v29 = vld [vmem:[#allocation9 + $0x80] ss:$16 sps:$4 sm:$0xff]  }
 0x7fa   :  { %v3692_v18 = vmul.f32 0.5, %v8069_v3  ;;  %v10789_v8 = vld [vmem:[#allocation9 + $0x88] ss:$16 sps:$4 sm:$0xff]   ;;  %v10795_v3 = vld [vmem:[#allocation9 + $0x6c] ss:$16 sps:$4 sm:$0xff]  }
 0x7fb   :  { %8070 = vtanh.f32 %v10738_v59  ;;  %v10741_v31 = vadd.f32 %v3705_v57, %v3703_v32  ;;  %v10750_v32 = vld [vmem:[#allocation9 + $0xe8] ss:$16 sps:$4 sm:$0xff]   ;;  %v10792_v57 = vld [vmem:[#allocation9 + $0x64] ss:$16 sps:$4 sm:$0xff]   ;;  %13313 = vst [vmem:[#allocation171_spill] sm:$0xff] %v10795_v3 }
 0x7fc   :  { %v3694_v21 = vadd.f32 0.5, %v3692_v18  ;;  %8072 = vtanh.f32 %v3689_v20  ;;  %13312 = vst [vmem:[#allocation170_spill] sm:$0xff] %v10792_v57  ;;  %v10810_v20 = vld [vmem:[#allocation9 + $0x40] ss:$16 sps:$4 sm:$0xff]  }
 0x7fd   :  { %8074 = vtanh.f32 %v10741_v31  ;;  %13318 = vst [vmem:[#allocation176_spill] sm:$0xff] %v10810_v20 }
 0x808   :  { %v8071_v25 = vpop.eup %8070 }
 0x809   :  { %v3710_v56 = vmul.f32 %v8071_v25, %v3694_v21  ;;  %v8073_v18 = vpop.eup %8072  ;;  %v10798_v21 = vld [vmem:[#allocation9 + $0x60] ss:$16 sps:$4 sm:$0xff]   ;;  %v10801_v25 = vld [vmem:[#allocation9 + $0x68] ss:$16 sps:$4 sm:$0xff]  }
 0x80a   :  { %13314 = vst [vmem:[#allocation172_spill] sm:$0xff] %v10798_v21  ;;  %13315 = vst [vmem:[#allocation173_spill] sm:$0xff] %v10801_v25  ;;  %v3693_v11 = vmul.f32 0.5, %v8073_v18  ;;  %v10825_v18 = vld [vmem:[#allocation9 + $0x28] ss:$16 sps:$4 sm:$0xff]  }
 0x80b   :  { %v10743_v17 = vpack.c.bf16 %v3710_v56, %v3710_v56  ;;  %v10807_v56 = vld [vmem:[#allocation9 + $0x4c] ss:$16 sps:$4 sm:$0xff]  }
 0x80c   :  { %13317 = vst [vmem:[#allocation175_spill] sm:$0xff] %v10807_v56 }
 0x80d   :  { %3751 = vmatmul.mubr.bf16.vlgmr.msra.gmra.mxu0 %v10743_v17  ;;  %3792 = vmatmul.mubr.bf16.vlgmr.msra.gmra.mxu1 %v10743_v17 }
 0x80e   :  { %3813 = vmatpush1.bf16.msra.mxu0 %v10747_v43  ;;  %3854 = vmatpush1.bf16.msra.mxu1 %v10750_v32 }
 0x80f   :  { %3814 = vmatprep.subr.bf16.mxu0 %v10753_v26  ;;  %3855 = vmatprep.subr.bf16.mxu1 %v10756_v36 }
 0x810   :  { %3844 = vmatprep.mubr.bf16.mxu0 %v12638_v48  ;;  %3885 = vmatprep.mubr.bf16.mxu1 %v12638_v48 }
 0x812   :  { %3815 = vmatpush1.bf16.msra.mxu0 %v10761_v58  ;;  %3856 = vmatpush1.bf16.msra.mxu1 %v10764_v51 }
 0x813   :  { %3816 = vmatprep.subr.bf16.mxu0 %v10767_v23  ;;  %3857 = vmatprep.subr.bf16.mxu1 %v10770_v9 }
 0x816   :  { %3817 = vmatpush1.bf16.msra.mxu0 %v10773_v10  ;;  %3858 = vmatpush1.bf16.msra.mxu1 %v10776_v22 }
 0x817   :  { %3818 = vmatprep.subr.bf16.mxu0 %v10780_v13  ;;  %3859 = vmatprep.subr.bf16.mxu1 %v10783_v30 }
 0x81a   :  { %3819 = vmatpush1.bf16.msra.mxu0 %v10786_v29  ;;  %3860 = vmatpush1.bf16.msra.mxu1 %v10789_v8 }
 0x81b   :  { %3820 = vmatprep.subr.bf16.mxu0 %v10792_v57  ;;  %3861 = vmatprep.subr.bf16.mxu1 %v10795_v3  ;;  %v10813_v3 = vld [vmem:[#allocation9 + $0x48] ss:$16 sps:$4 sm:$0xff]   ;;  %v3695_v57 = vadd.f32 0.5, %v3693_v11 }
 0x81c   :  { %13319 = vst [vmem:[#allocation177_spill] sm:$0xff] %v10813_v3  ;;  %v10837_v11 = vld [vmem:[#allocation9 + $0x8] ss:$16 sps:$4 sm:$0xff]  }
 0x81e   :  { %3821 = vmatpush1.bf16.msra.mxu0 %v10798_v21  ;;  %3862 = vmatpush1.bf16.msra.mxu1 %v10801_v25  ;;  %v10816_v21 = vld [vmem:[#allocation9 + $0x24] ss:$16 sps:$4 sm:$0xff]   ;;  %v10819_v25 = vld [vmem:[#allocation9 + $0x2c] ss:$16 sps:$4 sm:$0xff]  }
 0x81f   :  { %3822 = vmatprep.subr.bf16.mxu0 %v10804_v12  ;;  %3863 = vmatprep.subr.bf16.mxu1 %v10807_v56  ;;  %13320 = vst [vmem:[#allocation178_spill] sm:$0xff] %v10816_v21  ;;  %13321 = vst [vmem:[#allocation179_spill] sm:$0xff] %v10819_v25  ;;  %v8075_v12 = vpop.eup %8074  ;;  %v10822_v56 = vld [vmem:[#allocation9 + $0x20] ss:$16 sps:$4 sm:$0xff]  }
 0x820   :  { %13322 = vst [vmem:[#allocation180_spill] sm:$0xff] %v10822_v56 }
 0x822   :  { %3823 = vmatpush1.bf16.msra.mxu0 %v10810_v20  ;;  %3864 = vmatpush1.bf16.msra.mxu1 %v10813_v3  ;;  %v3711_v20 = vmul.f32 %v8075_v12, %v3695_v57  ;;  %v10828_v3 = vld [vmem:[#allocation9 + $0x4] ss:$16 sps:$4 sm:$0xff]  }
 0x823   :  { %3824 = vmatprep.subr.bf16.mxu0 %v10816_v21  ;;  %3865 = vmatprep.subr.bf16.mxu1 %v10819_v25  ;;  %v10831_v21 = vld [vmem:[#allocation9 + $0xc] ss:$16 sps:$4 sm:$0xff]   ;;  %v10834_v25 = vld [vmem:[#allocation9] ss:$16 sps:$4 sm:$0xff]  }
 0x824   :  { %v13323_v57 = vld [vmem:[#allocation43_spill] sm:$0xff]  ;;  %v13324_v12 = vld [vmem:[#allocation44_spill] sm:$0xff] }
 0x826   :  { %3825 = vmatpush1.bf16.msra.mxu0 %v10822_v56  ;;  %3866 = vmatpush1.bf16.msra.mxu1 %v10825_v18  ;;  %v10840_v56 = vpack.c.bf16 %v3711_v20, %v3711_v20  ;;  %v13325_v20 = vld [vmem:[#allocation45_spill] sm:$0xff] }
 0x827   :  { %3826 = vmatprep.subr.bf16.mxu0 %v10828_v3  ;;  %3867 = vmatprep.subr.bf16.mxu1 %v10831_v21 }
 0x82a   :  { %3827 = vmatpush1.bf16.msra.mxu0 %v10834_v25  ;;  %3868 = vmatpush1.bf16.msra.mxu1 %v10837_v11 }
 0x82b   :  { %3922 = vmatprep.subr.bf16.mxu0 %v8785_v38  ;;  %3963 = vmatprep.subr.bf16.mxu1 %v8788_v39 }
 0x82d   :  { %3845 = vmatmul.mubr.bf16.vlgmr.msra.gmra.mxu0 %v10840_v56  ;;  %3886 = vmatmul.mubr.bf16.vlgmr.msra.gmra.mxu1 %v10840_v56 }
 0x82e   :  { %3923 = vmatpush1.bf16.msra.mxu0 %v8791_v44  ;;  %3954 = vmatprep.mubr.bf16.mxu0 %v10840_v56 }
 0x82f   :  { %3964 = vmatpush1.bf16.msra.mxu1 %v8794_v45  ;;  %3995 = vmatprep.mubr.bf16.mxu1 %v10840_v56 }
 0x830   :  { %3924 = vmatprep.subr.bf16.mxu0 %v8796_v46  ;;  %3965 = vmatprep.subr.bf16.mxu1 %v8799_v47 }
 0x832   :  { %3925 = vmatpush1.bf16.msra.mxu0 %v8804_v52 }
 0x833   :  { %3966 = vmatpush1.bf16.msra.mxu1 %v8808_v53  ;;  %3926 = vmatprep.subr.bf16.mxu0 %v8810_v54 }
 0x834   :  { %3967 = vmatprep.subr.bf16.mxu1 %v8813_v55 }
 0x836   :  { %3927 = vmatpush1.bf16.msra.mxu0 %v8818_v60 }
 0x837   :  { %3968 = vmatpush1.bf16.msra.mxu1 %v8822_v61  ;;  %3928 = vmatprep.subr.bf16.mxu0 %v8824_v62 }
 0x838   :  { %3969 = vmatprep.subr.bf16.mxu1 %v8827_v63 }
 0x83a   :  { %3929 = vmatpush1.bf16.msra.mxu0 %v8830_v5 }
 0x83b   :  { %3970 = vmatpush1.bf16.msra.mxu1 %v8834_v6  ;;  %3930 = vmatprep.subr.bf16.mxu0 %v8836_v7 }
 0x83c   :  { %3971 = vmatprep.subr.bf16.mxu1 %v13167_v24 }
 0x83e   :  { %3931 = vmatpush1.bf16.msra.mxu0 %v13168_v42 }
 0x83f   :  { %3972 = vmatpush1.bf16.msra.mxu1 %v13169_v28  ;;  %3932 = vmatprep.subr.bf16.mxu0 %v13170_v19  ;;  %v3915_v28 = vld [vmem:[#allocation2 + $0x20] sm:$0xc] }
 0x840   :  { %3973 = vmatprep.subr.bf16.mxu1 %v13171_v40 }
 0x842   :  { %3933 = vmatpush1.bf16.msra.mxu0 %v13172_v33 }
 0x843   :  { %3974 = vmatpush1.bf16.msra.mxu1 %v13173_v27  ;;  %3934 = vmatprep.subr.bf16.mxu0 %v13174_v15 }
 0x844   :  { %3975 = vmatprep.subr.bf16.mxu1 %v13175_v2 }
 0x846   :  { %3935 = vmatpush1.bf16.msra.mxu0 %v13176_v1 }
 0x847   :  { %3976 = vmatpush1.bf16.msra.mxu1 %v13177_v34  ;;  %3936 = vmatprep.subr.bf16.mxu0 %v13178_v37  ;;  %v3715_v37 = vld [vmem:[#allocation3 + $0x8] sm:$0x3]  ;;  %v3717_v34 = vld [vmem:[#allocation3 + $0x30] sm:$0x3] }
 0x848   :  { %3977 = vmatprep.subr.bf16.mxu1 %v13179_v14  ;;  %v13326_v14 = vld [vmem:[#allocation46_spill] sm:$0xff] }
 0x84a   :  { %3937 = vmatpush1.bf16.msra.mxu0 %v13180_v50  ;;  %v13327_v50 = vld [vmem:[#allocation47_spill] sm:$0xff] }
 0x84b   :  { %3978 = vmatpush1.bf16.msra.mxu1 %v13181_v41  ;;  %3938 = vmatprep.subr.bf16.mxu0 %v13182_v4  ;;  %v13328_v41 = vld [vmem:[#allocation48_spill] sm:$0xff]  ;;  %v13329_v4 = vld [vmem:[#allocation49_spill] sm:$0xff] }
 0x84c   :  { %3979 = vmatprep.subr.bf16.mxu1 %v13183_v0  ;;  %v13330_v0 = vld [vmem:[#allocation50_spill] sm:$0xff] }
 0x84e   :  { %3939 = vmatpush2.bf16.msra.mxu0 %v13184_v49  ;;  %v13331_v49 = vld [vmem:[#allocation51_spill] sm:$0xff] }
 0x84f   :  { %3980 = vmatpush2.bf16.msra.mxu1 %v13185_v35  ;;  %3940 = vmatprep.subr.bf16.mxu0 %v13186_v16  ;;  %v13332_v35 = vld [vmem:[#allocation52_spill] sm:$0xff]  ;;  %v13333_v16 = vld [vmem:[#allocation53_spill] sm:$0xff] }
 0x850   :  { %3981 = vmatprep.subr.bf16.mxu1 %v13323_v57  ;;  %v13334_v57 = vld [vmem:[#allocation54_spill] sm:$0xff] }
 0x852   :  { %3941 = vmatpush2.bf16.msra.mxu0 %v13324_v12  ;;  %v13335_v12 = vld [vmem:[#allocation55_spill] sm:$0xff] }
 0x853   :  { %3982 = vmatpush2.bf16.msra.mxu1 %v13325_v20  ;;  %3942 = vmatprep.subr.bf16.mxu0 %v13326_v14  ;;  %v13336_v20 = vld [vmem:[#allocation56_spill] sm:$0xff]  ;;  %v13337_v14 = vld [vmem:[#allocation57_spill] sm:$0xff] }
 0x854   :  { %3983 = vmatprep.subr.bf16.mxu1 %v13327_v50  ;;  %v13338_v50 = vld [vmem:[#allocation58_spill] sm:$0xff] }
 0x856   :  { %3943 = vmatpush2.bf16.msra.mxu0 %v13328_v41  ;;  %v13339_v41 = vld [vmem:[#allocation59_spill] sm:$0xff] }
 0x857   :  { %3984 = vmatpush2.bf16.msra.mxu1 %v13329_v4  ;;  %3944 = vmatprep.subr.bf16.mxu0 %v13330_v0  ;;  %v13340_v4 = vld [vmem:[#allocation60_spill] sm:$0xff]  ;;  %v13341_v0 = vld [vmem:[#allocation61_spill] sm:$0xff] }
 0x858   :  { %3985 = vmatprep.subr.bf16.mxu1 %v13331_v49  ;;  %v13342_v49 = vld [vmem:[#allocation62_spill] sm:$0xff] }
 0x85a   :  { %3945 = vmatpush2.bf16.msra.mxu0 %v13332_v35  ;;  %v13343_v35 = vld [vmem:[#allocation63_spill] sm:$0xff] }
 0x85b   :  { %3986 = vmatpush2.bf16.msra.mxu1 %v13333_v16  ;;  %3946 = vmatprep.subr.bf16.mxu0 %v13334_v57  ;;  %v13344_v16 = vld [vmem:[#allocation64_spill] sm:$0xff]  ;;  %v13345_v57 = vld [vmem:[#allocation65_spill] sm:$0xff] }
 0x85c   :  { %3987 = vmatprep.subr.bf16.mxu1 %v13335_v12  ;;  %v13346_v12 = vld [vmem:[#allocation66_spill] sm:$0xff] }
 0x85e   :  { %3947 = vmatpush2.bf16.msra.mxu0 %v13336_v20  ;;  %v13347_v20 = vld [vmem:[#allocation67_spill] sm:$0xff] }
 0x85f   :  { %3988 = vmatpush2.bf16.msra.mxu1 %v13337_v14  ;;  %3948 = vmatprep.subr.bf16.mxu0 %v13338_v50  ;;  %v13348_v14 = vld [vmem:[#allocation68_spill] sm:$0xff]  ;;  %v13349_v50 = vld [vmem:[#allocation69_spill] sm:$0xff] }
 0x860   :  { %3989 = vmatprep.subr.bf16.mxu1 %v13339_v41  ;;  %v13350_v41 = vld [vmem:[#allocation70_spill] sm:$0xff] }
 0x862   :  { %3949 = vmatpush2.bf16.msra.mxu0 %v13340_v4  ;;  %v13351_v4 = vld [vmem:[#allocation71_spill] sm:$0xff] }
 0x863   :  { %3990 = vmatpush2.bf16.msra.mxu1 %v13341_v0  ;;  %3950 = vmatprep.subr.bf16.mxu0 %v13342_v49  ;;  %v13362_v49 = vld [vmem:[#allocation85_spill] sm:$0xff] }
 0x864   :  { %3991 = vmatprep.subr.bf16.mxu1 %v13343_v35  ;;  %v13352_v35 = vld [vmem:[#allocation73_spill] sm:$0xff] }
 0x866   :  { %3951 = vmatpush2.bf16.msra.mxu0 %v13344_v16  ;;  %v13360_v16 = vld [vmem:[#allocation83_spill] sm:$0xff] }
 0x867   :  { %3992 = vmatpush2.bf16.msra.mxu1 %v13345_v57  ;;  %3952 = vmatprep.subr.bf16.mxu0 %v13346_v12  ;;  %v13353_v57 = vld [vmem:[#allocation74_spill] sm:$0xff]  ;;  %v13359_v12 = vld [vmem:[#allocation81_spill] sm:$0xff] }
 0x868   :  { %3993 = vmatprep.subr.bf16.mxu1 %v13347_v20  ;;  %v13354_v20 = vld [vmem:[#allocation75_spill] sm:$0xff] }
 0x86a   :  { %3953 = vmatpush2.bf16.msra.mxu0 %v13348_v14  ;;  %v13355_v14 = vld [vmem:[#allocation76_spill] sm:$0xff] }
 0x86b   :  { %3994 = vmatpush2.bf16.msra.mxu1 %v13349_v50  ;;  %4004 = vmatprep.subr.bf16.mxu0 %v13350_v41  ;;  %v13356_v50 = vld [vmem:[#allocation77_spill] sm:$0xff]  ;;  %v13357_v41 = vld [vmem:[#allocation79_spill] sm:$0xff] }
 0x86c   :  { %4045 = vmatprep.subr.bf16.mxu1 %v13351_v4  ;;  %v13358_v4 = vld [vmem:[#allocation80_spill] sm:$0xff] }
 0x86d   :  { %3955 = vmatmul.mubr.bf16.vlgmr.msra.gmra.mxu0 %v10743_v17 }
 0x86e   :  { %3996 = vmatmul.mubr.bf16.vlgmr.msra.gmra.mxu1 %v10743_v17  ;;  %4005 = vmatpush1.bf16.msra.mxu0 %v13352_v35  ;;  %v13361_v35 = vld [vmem:[#allocation84_spill] sm:$0xff] }
 0x86f   :  { %4036 = vmatprep.mubr.bf16.mxu0 %v10840_v56  ;;  %4046 = vmatpush1.bf16.msra.mxu1 %v13353_v57  ;;  %v13363_v57 = vld [vmem:[#allocation86_spill] sm:$0xff] }
 0x870   :  { %4077 = vmatprep.mubr.bf16.mxu1 %v10840_v56  ;;  %4006 = vmatprep.subr.bf16.mxu0 %v13354_v20  ;;  %v13364_v56 = vld [vmem:[#allocation87_spill] sm:$0xff]  ;;  %v13365_v20 = vld [vmem:[#allocation88_spill] sm:$0xff] }
 0x871   :  { %4047 = vmatprep.subr.bf16.mxu1 %v13355_v14  ;;  %v13366_v14 = vld [vmem:[#allocation89_spill] sm:$0xff] }
 0x872   :  { %4007 = vmatpush1.bf16.msra.mxu0 %v13356_v50  ;;  %v13367_v50 = vld [vmem:[#allocation90_spill] sm:$0xff] }
 0x873   :  { %4048 = vmatpush1.bf16.msra.mxu1 %v13357_v41  ;;  %4008 = vmatprep.subr.bf16.mxu0 %v13358_v4  ;;  %v13368_v41 = vld [vmem:[#allocation91_spill] sm:$0xff]  ;;  %v13369_v4 = vld [vmem:[#allocation92_spill] sm:$0xff] }
 0x874   :  { %4049 = vmatprep.subr.bf16.mxu1 %v13359_v12  ;;  %v13370_v12 = vld [vmem:[#allocation93_spill] sm:$0xff] }
 0x876   :  { %4009 = vmatpush1.bf16.msra.mxu0 %v13360_v16  ;;  %v13371_v16 = vld [vmem:[#allocation94_spill] sm:$0xff] }
 0x877   :  { %4050 = vmatpush1.bf16.msra.mxu1 %v13361_v35  ;;  %4010 = vmatprep.subr.bf16.mxu0 %v13362_v49  ;;  %v13372_v35 = vld [vmem:[#allocation95_spill] sm:$0xff]  ;;  %v13373_v49 = vld [vmem:[#allocation96_spill] sm:$0xff] }
 0x878   :  { %4051 = vmatprep.subr.bf16.mxu1 %v13363_v57  ;;  %v13374_v57 = vld [vmem:[#allocation97_spill] sm:$0xff] }
 0x87a   :  { %4011 = vmatpush1.bf16.msra.mxu0 %v13364_v56  ;;  %v13375_v56 = vld [vmem:[#allocation98_spill] sm:$0xff] }
 0x87b   :  { %4052 = vmatpush1.bf16.msra.mxu1 %v13365_v20  ;;  %4012 = vmatprep.subr.bf16.mxu0 %v13366_v14  ;;  %v13376_v20 = vld [vmem:[#allocation99_spill] sm:$0xff]  ;;  %v13377_v14 = vld [vmem:[#allocation100_spill] sm:$0xff] }
 0x87c   :  { %4053 = vmatprep.subr.bf16.mxu1 %v13367_v50  ;;  %v13378_v50 = vld [vmem:[#allocation101_spill] sm:$0xff] }
 0x87e   :  { %4013 = vmatpush1.bf16.msra.mxu0 %v13368_v41  ;;  %v13379_v41 = vld [vmem:[#allocation102_spill] sm:$0xff] }
 0x87f   :  { %4054 = vmatpush1.bf16.msra.mxu1 %v13369_v4  ;;  %4014 = vmatprep.subr.bf16.mxu0 %v13370_v12  ;;  %v13380_v4 = vld [vmem:[#allocation103_spill] sm:$0xff]  ;;  %v13381_v12 = vld [vmem:[#allocation104_spill] sm:$0xff] }
 0x880   :  { %4055 = vmatprep.subr.bf16.mxu1 %v13371_v16  ;;  %v13382_v16 = vld [vmem:[#allocation105_spill] sm:$0xff] }
 0x882   :  { %4015 = vmatpush1.bf16.msra.mxu0 %v13372_v35  ;;  %v13383_v35 = vld [vmem:[#allocation106_spill] sm:$0xff] }
 0x883   :  { %4056 = vmatpush1.bf16.msra.mxu1 %v13373_v49  ;;  %4016 = vmatprep.subr.bf16.mxu0 %v13374_v57  ;;  %v13384_v49 = vld [vmem:[#allocation107_spill] sm:$0xff]  ;;  %v13385_v57 = vld [vmem:[#allocation108_spill] sm:$0xff] }
 0x884   :  { %4057 = vmatprep.subr.bf16.mxu1 %v13375_v56  ;;  %v13386_v56 = vld [vmem:[#allocation109_spill] sm:$0xff] }
 0x886   :  { %4017 = vmatpush1.bf16.msra.mxu0 %v13376_v20  ;;  %v13387_v20 = vld [vmem:[#allocation110_spill] sm:$0xff] }
 0x887   :  { %4058 = vmatpush1.bf16.msra.mxu1 %v13377_v14  ;;  %4018 = vmatprep.subr.bf16.mxu0 %v13378_v50  ;;  %v13388_v14 = vld [vmem:[#allocation111_spill] sm:$0xff]  ;;  %v13389_v50 = vld [vmem:[#allocation112_spill] sm:$0xff] }
 0x888   :  { %4059 = vmatprep.subr.bf16.mxu1 %v13379_v41  ;;  %v13390_v41 = vld [vmem:[#allocation113_spill] sm:$0xff] }
 0x88a   :  { %4019 = vmatpush1.bf16.msra.mxu0 %v13380_v4  ;;  %v13391_v4 = vld [vmem:[#allocation114_spill] sm:$0xff] }
 0x88b   :  { %4060 = vmatpush1.bf16.msra.mxu1 %v13381_v12  ;;  %4020 = vmatprep.subr.bf16.mxu0 %v13382_v16  ;;  %v13392_v12 = vld [vmem:[#allocation115_spill] sm:$0xff]  ;;  %v13393_v16 = vld [vmem:[#allocation116_spill] sm:$0xff] }
 0x88c   :  { %4061 = vmatprep.subr.bf16.mxu1 %v13383_v35  ;;  %v13394_v35 = vld [vmem:[#allocation117_spill] sm:$0xff] }
 0x88e   :  { %4021 = vmatpush2.bf16.msra.mxu0 %v13384_v49  ;;  %v13395_v49 = vld [vmem:[#allocation118_spill] sm:$0xff] }
 0x88f   :  { %4062 = vmatpush2.bf16.msra.mxu1 %v13385_v57  ;;  %4022 = vmatprep.subr.bf16.mxu0 %v13386_v56  ;;  %v13396_v57 = vld [vmem:[#allocation119_spill] sm:$0xff]  ;;  %v13397_v56 = vld [vmem:[#allocation120_spill] sm:$0xff] }
 0x890   :  { %4063 = vmatprep.subr.bf16.mxu1 %v13387_v20  ;;  %v13398_v20 = vld [vmem:[#allocation121_spill] sm:$0xff] }
 0x892   :  { %4023 = vmatpush2.bf16.msra.mxu0 %v13388_v14  ;;  %v13399_v14 = vld [vmem:[#allocation122_spill] sm:$0xff] }
 0x893   :  { %4064 = vmatpush2.bf16.msra.mxu1 %v13389_v50  ;;  %4024 = vmatprep.subr.bf16.mxu0 %v13390_v41  ;;  %v13400_v50 = vld [vmem:[#allocation123_spill] sm:$0xff]  ;;  %v13401_v41 = vld [vmem:[#allocation124_spill] sm:$0xff] }
 0x894   :  { %4065 = vmatprep.subr.bf16.mxu1 %v13391_v4  ;;  %v13402_v4 = vld [vmem:[#allocation125_spill] sm:$0xff] }
 0x896   :  { %4025 = vmatpush2.bf16.msra.mxu0 %v13392_v12  ;;  %v13403_v12 = vld [vmem:[#allocation126_spill] sm:$0xff] }
 0x897   :  { %4066 = vmatpush2.bf16.msra.mxu1 %v13393_v16  ;;  %4026 = vmatprep.subr.bf16.mxu0 %v13394_v35  ;;  %v13404_v16 = vld [vmem:[#allocation127_spill] sm:$0xff]  ;;  %v13405_v35 = vld [vmem:[#allocation128_spill] sm:$0xff] }
 0x898   :  { %4067 = vmatprep.subr.bf16.mxu1 %v13395_v49  ;;  %v13406_v49 = vld [vmem:[#allocation129_spill] sm:$0xff] }
 0x89a   :  { %4027 = vmatpush2.bf16.msra.mxu0 %v13396_v57  ;;  %v13407_v57 = vld [vmem:[#allocation130_spill] sm:$0xff] }
 0x89b   :  { %4068 = vmatpush2.bf16.msra.mxu1 %v13397_v56  ;;  %4028 = vmatprep.subr.bf16.mxu0 %v13398_v20  ;;  %v13408_v56 = vld [vmem:[#allocation131_spill] sm:$0xff]  ;;  %v13409_v20 = vld [vmem:[#allocation132_spill] sm:$0xff] }
 0x89c   :  { %4069 = vmatprep.subr.bf16.mxu1 %v13399_v14  ;;  %v13410_v14 = vld [vmem:[#allocation133_spill] sm:$0xff] }
 0x89e   :  { %4029 = vmatpush2.bf16.msra.mxu0 %v13400_v50  ;;  %v13411_v50 = vld [vmem:[#allocation134_spill] sm:$0xff] }
 0x89f   :  { %4070 = vmatpush2.bf16.msra.mxu1 %v13401_v41  ;;  %4030 = vmatprep.subr.bf16.mxu0 %v13402_v4  ;;  %v13412_v41 = vld [vmem:[#allocation135_spill] sm:$0xff]  ;;  %v13413_v4 = vld [vmem:[#allocation136_spill] sm:$0xff] }
 0x8a0   :  { %4071 = vmatprep.subr.bf16.mxu1 %v13403_v12  ;;  %v13414_v12 = vld [vmem:[#allocation181_spill] sm:$0xff] }
 0x8a2   :  { %4031 = vmatpush2.bf16.msra.mxu0 %v13404_v16  ;;  %v13415_v16 = vld [vmem:[#allocation137_spill] sm:$0xff] }
 0x8a3   :  { %4072 = vmatpush2.bf16.msra.mxu1 %v13405_v35  ;;  %4032 = vmatprep.subr.bf16.mxu0 %v13406_v49  ;;  %v13430_v49 = vld [vmem:[#allocation152_spill] sm:$0xff] }
 0x8a4   :  { %4073 = vmatprep.subr.bf16.mxu1 %v13407_v57  ;;  %v13416_v57 = vld [vmem:[#allocation138_spill] sm:$0xff]  ;;  %v3716_v35 = vld [vmem:[#allocation3 + $0x38] sm:$0x3] }
 0x8a6   :  { %4033 = vmatpush2.bf16.msra.mxu0 %v13408_v56  ;;  %v13417_v56 = vld [vmem:[#allocation139_spill] sm:$0xff] }
 0x8a7   :  { %4074 = vmatpush2.bf16.msra.mxu1 %v13409_v20  ;;  %4034 = vmatprep.subr.bf16.mxu0 %v13410_v14  ;;  %v13418_v20 = vld [vmem:[#allocation140_spill] sm:$0xff]  ;;  %v13419_v14 = vld [vmem:[#allocation141_spill] sm:$0xff] }
 0x8a8   :  { %4075 = vmatprep.subr.bf16.mxu1 %v13411_v50  ;;  %v13429_v50 = vld [vmem:[#allocation151_spill] sm:$0xff] }
 0x8aa   :  { %4035 = vmatpush2.bf16.msra.mxu0 %v13412_v41  ;;  %v13423_v41 = vld [vmem:[#allocation145_spill] sm:$0xff] }
 0x8ab   :  { %4076 = vmatpush2.bf16.msra.mxu1 %v13413_v4  ;;  %4169 = vmatprep.subr.bf16.mxu0 %v13414_v12  ;;  %v13420_v4 = vld [vmem:[#allocation142_spill] sm:$0xff]  ;;  %v13421_v12 = vld [vmem:[#allocation143_spill] sm:$0xff] }
 0x8ac   :  { %4210 = vmatprep.subr.bf16.mxu1 %v13415_v16  ;;  %v13422_v16 = vld [vmem:[#allocation144_spill] sm:$0xff] }
 0x8ad   :  { %4037 = vmatmul.mubr.bf16.vlgmr.msra.gmra.mxu0 %v10743_v17 }
 0x8ae   :  { %4078 = vmatmul.mubr.bf16.vlgmr.msra.gmra.mxu1 %v10743_v17  ;;  %4170 = vmatpush1.bf16.msra.mxu0 %v13416_v57  ;;  %v13424_v17 = vld [vmem:[#allocation146_spill] sm:$0xff]  ;;  %v13425_v57 = vld [vmem:[#allocation147_spill] sm:$0xff] }
 0x8af   :  { %4211 = vmatpush1.bf16.msra.mxu1 %v13417_v56  ;;  %4171 = vmatprep.subr.bf16.mxu0 %v13418_v20  ;;  %v13426_v56 = vld [vmem:[#allocation148_spill] sm:$0xff]  ;;  %v13427_v20 = vld [vmem:[#allocation149_spill] sm:$0xff] }
 0x8b0   :  { %4212 = vmatprep.subr.bf16.mxu1 %v13419_v14  ;;  %4201 = vmatprep.mubr.bf16.mxu0 %v12638_v48  ;;  %v13428_v14 = vld [vmem:[#allocation150_spill] sm:$0xff] }
 0x8b1   :  { %4242 = vmatprep.mubr.bf16.mxu1 %v12638_v48 }
 0x8b2   :  { %4172 = vmatpush1.bf16.msra.mxu0 %v13420_v4  ;;  %v13431_v4 = vld [vmem:[#allocation153_spill] sm:$0xff] }
 0x8b3   :  { %4213 = vmatpush1.bf16.msra.mxu1 %v13421_v12  ;;  %4173 = vmatprep.subr.bf16.mxu0 %v13422_v16  ;;  %v13432_v12 = vld [vmem:[#allocation154_spill] sm:$0xff]  ;;  %v13433_v16 = vld [vmem:[#allocation155_spill] sm:$0xff] }
 0x8b4   :  { %4214 = vmatprep.subr.bf16.mxu1 %v13423_v41  ;;  %v13434_v41 = vld [vmem:[#allocation156_spill] sm:$0xff] }
 0x8b6   :  { %4174 = vmatpush1.bf16.msra.mxu0 %v13424_v17  ;;  %v13435_v17 = vld [vmem:[#allocation157_spill] sm:$0xff] }
 0x8b7   :  { %4215 = vmatpush1.bf16.msra.mxu1 %v13425_v57  ;;  %4175 = vmatprep.subr.bf16.mxu0 %v13426_v56  ;;  %v13436_v57 = vld [vmem:[#allocation158_spill] sm:$0xff]  ;;  %v13437_v56 = vld [vmem:[#allocation159_spill] sm:$0xff] }
 0x8b8   :  { %4216 = vmatprep.subr.bf16.mxu1 %v13427_v20  ;;  %v13438_v20 = vld [vmem:[#allocation160_spill] sm:$0xff] }
 0x8ba   :  { %4176 = vmatpush1.bf16.msra.mxu0 %v13428_v14  ;;  %v13439_v14 = vld [vmem:[#allocation161_spill] sm:$0xff] }
 0x8bb   :  { %4217 = vmatpush1.bf16.msra.mxu1 %v13429_v50  ;;  %4177 = vmatprep.subr.bf16.mxu0 %v13430_v49  ;;  %v13440_v50 = vld [vmem:[#allocation162_spill] sm:$0xff]  ;;  %v13441_v49 = vld [vmem:[#allocation163_spill] sm:$0xff] }
 0x8bc   :  { %4218 = vmatprep.subr.bf16.mxu1 %v13431_v4  ;;  %v13442_v4 = vld [vmem:[#allocation164_spill] sm:$0xff] }
 0x8be   :  { %4178 = vmatpush1.bf16.msra.mxu0 %v13432_v12  ;;  %v13443_v12 = vld [vmem:[#allocation165_spill] sm:$0xff] }
 0x8bf   :  { %4219 = vmatpush1.bf16.msra.mxu1 %v13433_v16  ;;  %4179 = vmatprep.subr.bf16.mxu0 %v13434_v41  ;;  %v13444_v16 = vld [vmem:[#allocation166_spill] sm:$0xff]  ;;  %v13445_v41 = vld [vmem:[#allocation167_spill] sm:$0xff] }
 0x8c0   :  { %4220 = vmatprep.subr.bf16.mxu1 %v13435_v17  ;;  %v13446_v17 = vld [vmem:[#allocation168_spill] sm:$0xff] }
 0x8c2   :  { %4180 = vmatpush1.bf16.msra.mxu0 %v13436_v57  ;;  %v13447_v57 = vld [vmem:[#allocation169_spill] sm:$0xff] }
 0x8c3   :  { %4221 = vmatpush1.bf16.msra.mxu1 %v13437_v56  ;;  %4181 = vmatprep.subr.bf16.mxu0 %v13438_v20  ;;  %v3714_v56 = vld [vmem:[#allocation3 + $0x18] sm:$0x3] }
 0x8c4   :  { %4222 = vmatprep.subr.bf16.mxu1 %v13439_v14 }
 0x8c6   :  { %4182 = vmatpush1.bf16.msra.mxu0 %v13440_v50 }
 0x8c7   :  { %4223 = vmatpush1.bf16.msra.mxu1 %v13441_v49  ;;  %4183 = vmatprep.subr.bf16.mxu0 %v13442_v4 }
 0x8c8   :  { %4224 = vmatprep.subr.bf16.mxu1 %v13443_v12 }
 0x8ca   :  { %4184 = vmatpush1.bf16.msra.mxu0 %v13444_v16 }
 0x8cb   :  { %4225 = vmatpush1.bf16.msra.mxu1 %v13445_v41  ;;  %4278 = vmatprep.subr.bf16.mxu0 %v13446_v17 }
 0x8cc   :  { %4319 = vmatprep.subr.bf16.mxu1 %v13447_v57 }
 0x8cd   :  { %v3752_v20 = vpop.f32.mrf.mxu0  ;;  %v3793_v14 = vpop.f32.mrf.mxu1 }
 0x8ce   :  { %v3800_v0 = vadd.f32 %v3752_v20, %v3714_v56  ;;  %v3802_v50 = vadd.f32 %v3793_v14, %v3716_v35  ;;  %v3808_v56 = vld [vmem:[#allocation3 + $0x28] sm:$0xc0]  ;;  %v3810_v35 = vld [vmem:[#allocation3 + $0x10] sm:$0xc0] }
 0x8cf   :  { %v3754_v49 = vpop.f32.mrf.mxu0  ;;  %v3795_v4 = vpop.f32.mrf.mxu1 }
 0x8d0   :  { %3804 = vst [vmem:[#allocation3 + $0x18] sm:$0x3] %v3800_v0  ;;  %3806 = vst [vmem:[#allocation3 + $0x38] sm:$0x3] %v3802_v50  ;;  %v3801_v12 = vadd.f32 %v3754_v49, %v3715_v37  ;;  %v3803_v16 = vadd.f32 %v3795_v4, %v3717_v34  ;;  %v3809_v37 = vld [vmem:[#allocation3] sm:$0xc0] }
 0x8d1   :  { %v3756_v1 = vpop.f32.mrf.mxu0  ;;  %v3797_v41 = vpop.f32.mrf.mxu1  ;;  %v3811_v34 = vld [vmem:[#allocation3 + $0x20] sm:$0xc0] }
 0x8d2   :  { %3805 = vst [vmem:[#allocation3 + $0x8] sm:$0x3] %v3801_v12  ;;  %3807 = vst [vmem:[#allocation3 + $0x30] sm:$0x3] %v3803_v16 }
 0x8d3   :  { %v3757_v17 = vpop.f32.mrf.mxu0  ;;  %v3798_v57 = vpop.f32.mrf.mxu1 }
 0x8ed   :  { %v3846_v2 = vpop.f32.mrf.mxu0  ;;  %v3887_v15 = vpop.f32.mrf.mxu1 }
 0x8ee   :  { %v3898_v27 = vrot.slane %v3846_v2, 2  ;;  %v3900_v33 = vrot.slane %v3887_v15, 2 }
 0x8ef   :  { %v3848_v20 = vpop.f32.mrf.mxu0  ;;  %v3889_v14 = vpop.f32.mrf.mxu1 }
 0x8f0   :  { %v3906_v40 = vadd.f32 %v3898_v27, %v3808_v56  ;;  %v3908_v19 = vadd.f32 %v3900_v33, %v3810_v35  ;;  %v3899_v0 = vrot.slane %v3848_v20, 2  ;;  %v3901_v50 = vrot.slane %v3889_v14, 2  ;;  %v3917_v56 = vld [vmem:[#allocation2 + $0x38] sm:$0xc] }
 0x8f1   :  { %v3850_v1 = vpop.f32.mrf.mxu0  ;;  %v3891_v49 = vpop.f32.mrf.mxu1 }
 0x8f2   :  { %3910 = vst [vmem:[#allocation3 + $0x28] sm:$0xc0] %v3906_v40  ;;  %3912 = vst [vmem:[#allocation3 + $0x10] sm:$0xc0] %v3908_v19  ;;  %v3907_v4 = vadd.f32 %v3899_v0, %v3809_v37  ;;  %v3909_v12 = vadd.f32 %v3901_v50, %v3811_v34  ;;  %v4147_v50 = vrot.slane %v10741_v31, 6 }
 0x8f3   :  { %v3851_v16 = vpop.f32.mrf.mxu0  ;;  %v3892_v41 = vpop.f32.mrf.mxu1  ;;  %v3918_v31 = vld [vmem:[#allocation2 + $0x60] sm:$0xc] }
 0x8f4   :  { %3911 = vst [vmem:[#allocation3] sm:$0xc0] %v3907_v4  ;;  %3913 = vst [vmem:[#allocation3 + $0x20] sm:$0xc0] %v3909_v12  ;;  %v3916_v12 = vld [vmem:[#allocation2 + $0x10] sm:$0xc] }
 0x92d   :  { %v3956_v15 = vpop.f32.mrf.mxu0 }
 0x92e   :  { %v3997_v2 = vpop.f32.mrf.mxu1  ;;  %v4094_v4 = vrot.slane %v3956_v15, 6 }
 0x92f   :  { %v3958_v17 = vpop.f32.mrf.mxu0  ;;  %v4096_v34 = vrot.slane %v3997_v2, 6 }
 0x930   :  { %v3999_v57 = vpop.f32.mrf.mxu1  ;;  %v4095_v41 = vrot.slane %v3958_v17, 6  ;;  %v3919_v17 = vld [vmem:[#allocation2 + $0x70] sm:$0xc] }
 0x931   :  { %v4097_v27 = vrot.slane %v3999_v57, 6  ;;  %v3960_v33 = vpop.f32.mrf.mxu0  ;;  %v4112_v16 = vadd.f32 %v4096_v34, %v3916_v12  ;;  %v3914_v57 = vld [vmem:[#allocation2 + $0x40] sm:$0xc] }
 0x932   :  { %v4001_v35 = vpop.f32.mrf.mxu1  ;;  %v4110_v33 = vadd.f32 %v4094_v4, %v3914_v57 }
 0x933   :  { %v4113_v20 = vadd.f32 %v4097_v27, %v3917_v56  ;;  %v3961_v14 = vpop.f32.mrf.mxu0  ;;  %v4126_v35 = vmul.f32 0.5, %v4112_v16  ;;  %v4111_v27 = vadd.f32 %v4095_v41, %v3915_v28  ;;  %v3920_v28 = vld [vmem:[#allocation2 + $0x78] sm:$0xc] }
 0x934   :  { %v4002_v1 = vpop.f32.mrf.mxu1  ;;  %v4118_v56 = vmul.f32 0.5, %v4110_v33 }
 0x935   :  { %v4127_v49 = vmul.f32 0.5, %v4113_v20  ;;  %v4119_v20 = vmul.f32 0.5, %v4111_v27 }
 0x937   :  { %8076 = vtanh.f32 %v4127_v49 }
 0x938   :  { %8078 = vtanh.f32 %v4126_v35 }
 0x939   :  { %8080 = vtanh.f32 %v4118_v56 }
 0x93a   :  { %8082 = vtanh.f32 %v4119_v20 }
 0x944   :  { %v8077_v19 = vpop.eup %8076 }
 0x945   :  { %v4131_v40 = vmul.f32 0.5, %v8077_v19  ;;  %v8079_v57 = vpop.eup %8078 }
 0x946   :  { %v8081_v33 = vpop.eup %8080  ;;  %v4130_v35 = vmul.f32 0.5, %v8079_v57 }
 0x947   :  { %v4133_v0 = vadd.f32 0.5, %v4131_v40  ;;  %v8083_v56 = vpop.eup %8082  ;;  %v4122_v20 = vmul.f32 0.5, %v8081_v33 }
 0x949   :  { %v4151_v37 = vmul.f32 %v4147_v50, %v4133_v0 }
 0x96d   :  { %v4038_v14 = vpop.f32.mrf.mxu0 }
 0x96e   :  { %v4098_v1 = vrot.slane %v4038_v14, 6  ;;  %v4079_v49 = vpop.f32.mrf.mxu1  ;;  %v4132_v14 = vadd.f32 0.5, %v4130_v35 }
 0x96f   :  { %v4040_v19 = vpop.f32.mrf.mxu0  ;;  %v4100_v15 = vrot.slane %v4079_v49, 6  ;;  %v4124_v49 = vadd.f32 0.5, %v4122_v20 }
 0x970   :  { %v4114_v2 = vadd.f32 %v4098_v1, %v3918_v31  ;;  %v4099_v40 = vrot.slane %v4040_v19, 6  ;;  %v4081_v0 = vpop.f32.mrf.mxu1  ;;  %v4123_v1 = vmul.f32 0.5, %v8083_v56  ;;  %v4146_v31 = vrot.slane %v10738_v59, 6 }
 0x971   :  { %v4042_v50 = vpop.f32.mrf.mxu0  ;;  %v4116_v16 = vadd.f32 %v4100_v15, %v3920_v28 }
 0x972   :  { %8084 = vtanh.f32 %v4114_v2  ;;  %v4115_v34 = vadd.f32 %v4099_v40, %v3919_v17  ;;  %v4083_v4 = vpop.f32.mrf.mxu1  ;;  %v4150_v2 = vmul.f32 %v4146_v31, %v4132_v14  ;;  %v4125_v40 = vadd.f32 0.5, %v4123_v1  ;;  %v13465_v31 = vld [vmem:[#allocation31_spill] sm:$0xff] }
 0x973   :  { %v4043_v12 = vpop.f32.mrf.mxu0  ;;  %v4136_v27 = vmul.f32 0.5, %v4116_v16  ;;  %v4101_v16 = vrot.slane %v4081_v0, 6  ;;  %v13458_v0 = vld [vmem:[#allocation180_spill] sm:$0xff] }
 0x974   :  { %8086 = vtanh.f32 %v4115_v34  ;;  %v4084_v41 = vpop.f32.mrf.mxu1 }
 0x975   :  { %8088 = vtanh.f32 %v4136_v27  ;;  %v3921_v41 = vld [vmem:[#allocation2 + $0x28] sm:$0xc] }
 0x976   :  { %v4117_v33 = vadd.f32 %v4101_v16, %v3921_v41  ;;  %v13474_v16 = vld [vmem:[#allocation40_spill] sm:$0xff]  ;;  %v13475_v41 = vld [vmem:[#allocation41_spill] sm:$0xff] }
 0x978   :  { %v4137_v56 = vmul.f32 0.5, %v4117_v33  ;;  %v13477_v33 = vld [vmem:[#allocation43_spill] sm:$0xff] }
 0x97f   :  { %v8085_v19 = vpop.eup %8084 }
 0x980   :  { %v4152_v17 = vmul.f32 %v8085_v19, %v4124_v49  ;;  %v13464_v49 = vld [vmem:[#allocation30_spill] sm:$0xff]  ;;  %v13466_v19 = vld [vmem:[#allocation32_spill] sm:$0xff] }
 0x981   :  { %v8087_v50 = vpop.eup %8086 }
 0x982   :  { %v11018_v15 = vadd.f32 %v4152_v17, %v4150_v2  ;;  %v4153_v34 = vmul.f32 %v8087_v50, %v4125_v40  ;;  %v8089_v28 = vpop.eup %8088  ;;  %v13467_v2 = vld [vmem:[#allocation33_spill] sm:$0xff]  ;;  %v13468_v40 = vld [vmem:[#allocation34_spill] sm:$0xff]  ;;  %v13469_v17 = vld [vmem:[#allocation35_spill] sm:$0xff] }
 0x983   :  { %v4140_v12 = vmul.f32 0.5, %v8089_v28  ;;  %v13470_v50 = vld [vmem:[#allocation36_spill] sm:$0xff]  ;;  %v13472_v28 = vld [vmem:[#allocation38_spill] sm:$0xff] }
 0x984   :  { %8090 = vtanh.f32 %v11018_v15  ;;  %v11021_v4 = vadd.f32 %v4153_v34, %v4151_v37  ;;  %v13457_v37 = vld [vmem:[#allocation179_spill] sm:$0xff]  ;;  %v13471_v34 = vld [vmem:[#allocation37_spill] sm:$0xff] }
 0x985   :  { %v4142_v57 = vadd.f32 0.5, %v4140_v12  ;;  %8092 = vtanh.f32 %v4137_v56  ;;  %v13473_v12 = vld [vmem:[#allocation39_spill] sm:$0xff] }
 0x986   :  { %8094 = vtanh.f32 %v11021_v4  ;;  %v13481_v56 = vld [vmem:[#allocation47_spill] sm:$0xff] }
 0x991   :  { %v8091_v35 = vpop.eup %8090 }
 0x992   :  { %v4158_v59 = vmul.f32 %v8091_v35, %v4142_v57  ;;  %v13476_v57 = vld [vmem:[#allocation42_spill] sm:$0xff]  ;;  %v13478_v35 = vld [vmem:[#allocation44_spill] sm:$0xff] }
 0x994   :  { %v4160_v27 = vpack.c.bf16 %v4158_v59, %v4158_v59  ;;  %v13479_v59 = vld [vmem:[#allocation45_spill] sm:$0xff] }
 0x996   :  { %v11023_v20 = vrot.slane %v4160_v27, 1  ;;  %v13480_v27 = vld [vmem:[#allocation46_spill] sm:$0xff] }
 0x998   :  { %4202 = vmatmul.mubr.bf16.vlgmr.msra.gmra.mxu0 %v11023_v20  ;;  %4243 = vmatmul.mubr.bf16.vlgmr.msra.gmra.mxu1 %v11023_v20 }
 0x999   :  { %4279 = vmatpush1.bf16.msra.mxu0 %v10747_v43  ;;  %4320 = vmatpush1.bf16.msra.mxu1 %v10750_v32  ;;  %v8093_v43 = vpop.eup %8092  ;;  %v13448_v32 = vld [vmem:[#allocation170_spill] sm:$0xff] }
 0x99a   :  { %4280 = vmatprep.subr.bf16.mxu0 %v10753_v26  ;;  %4321 = vmatprep.subr.bf16.mxu1 %v10756_v36  ;;  %v13449_v26 = vld [vmem:[#allocation171_spill] sm:$0xff]  ;;  %v4141_v36 = vmul.f32 0.5, %v8093_v43  ;;  %v13482_v43 = vld [vmem:[#allocation48_spill] sm:$0xff] }
 0x99b   :  { %4310 = vmatprep.mubr.bf16.mxu0 %v12638_v48  ;;  %4351 = vmatprep.mubr.bf16.mxu1 %v12638_v48 }
 0x99d   :  { %4281 = vmatpush1.bf16.msra.mxu0 %v10761_v58  ;;  %4322 = vmatpush1.bf16.msra.mxu1 %v10764_v51  ;;  %v13450_v58 = vld [vmem:[#allocation172_spill] sm:$0xff]  ;;  %v13451_v51 = vld [vmem:[#allocation173_spill] sm:$0xff] }
 0x99e   :  { %4282 = vmatprep.subr.bf16.mxu0 %v10767_v23  ;;  %4323 = vmatprep.subr.bf16.mxu1 %v10770_v9  ;;  %v13452_v23 = vld [vmem:[#allocation174_spill] sm:$0xff]  ;;  %v13453_v9 = vld [vmem:[#allocation175_spill] sm:$0xff] }
 0x9a1   :  { %4283 = vmatpush1.bf16.msra.mxu0 %v10773_v10  ;;  %4324 = vmatpush1.bf16.msra.mxu1 %v10776_v22  ;;  %v8095_v10 = vpop.eup %8094  ;;  %v4143_v22 = vadd.f32 0.5, %v4141_v36  ;;  %v13485_v36 = vld [vmem:[#allocation51_spill] sm:$0xff] }
 0x9a2   :  { %4284 = vmatprep.subr.bf16.mxu0 %v10780_v13  ;;  %4325 = vmatprep.subr.bf16.mxu1 %v10783_v30  ;;  %v13454_v13 = vld [vmem:[#allocation176_spill] sm:$0xff]  ;;  %v13455_v30 = vld [vmem:[#allocation177_spill] sm:$0xff] }
 0x9a5   :  { %4285 = vmatpush1.bf16.msra.mxu0 %v10786_v29  ;;  %4326 = vmatpush1.bf16.msra.mxu1 %v10789_v8  ;;  %v4159_v29 = vmul.f32 %v8095_v10, %v4143_v22  ;;  %v13456_v8 = vld [vmem:[#allocation178_spill] sm:$0xff]  ;;  %v13490_v10 = vld [vmem:[#allocation56_spill] sm:$0xff]  ;;  %v13491_v22 = vld [vmem:[#allocation57_spill] sm:$0xff] }
 0x9a6   :  { %4286 = vmatprep.subr.bf16.mxu0 %v13448_v32  ;;  %4327 = vmatprep.subr.bf16.mxu1 %v13449_v26  ;;  %v13483_v32 = vld [vmem:[#allocation49_spill] sm:$0xff]  ;;  %v13484_v26 = vld [vmem:[#allocation50_spill] sm:$0xff] }
 0x9a7   :  { %v4161_v14 = vpack.c.bf16 %v4159_v29, %v4159_v29  ;;  %v13494_v29 = vld [vmem:[#allocation60_spill] sm:$0xff] }
 0x9a9   :  { %4287 = vmatpush1.bf16.msra.mxu0 %v13450_v58  ;;  %4328 = vmatpush1.bf16.msra.mxu1 %v13451_v51  ;;  %v11060_v1 = vrot.slane %v4161_v14, 1  ;;  %v13486_v58 = vld [vmem:[#allocation52_spill] sm:$0xff]  ;;  %v13487_v51 = vld [vmem:[#allocation53_spill] sm:$0xff] }
 0x9aa   :  { %4288 = vmatprep.subr.bf16.mxu0 %v13452_v23  ;;  %4329 = vmatprep.subr.bf16.mxu1 %v13453_v9  ;;  %v13488_v23 = vld [vmem:[#allocation54_spill] sm:$0xff]  ;;  %v13489_v9 = vld [vmem:[#allocation55_spill] sm:$0xff]  ;;  %v13498_v14 = vld [vmem:[#allocation64_spill] sm:$0xff] }
 0x9ad   :  { %4289 = vmatpush1.bf16.msra.mxu0 %v13454_v13  ;;  %4330 = vmatpush1.bf16.msra.mxu1 %v13455_v30  ;;  %v13492_v13 = vld [vmem:[#allocation58_spill] sm:$0xff]  ;;  %v13493_v30 = vld [vmem:[#allocation59_spill] sm:$0xff] }
 0x9ae   :  { %4290 = vmatprep.subr.bf16.mxu0 %v13456_v8  ;;  %4331 = vmatprep.subr.bf16.mxu1 %v13457_v37  ;;  %v13495_v8 = vld [vmem:[#allocation61_spill] sm:$0xff]  ;;  %v13496_v37 = vld [vmem:[#allocation62_spill] sm:$0xff] }
 0x9b1   :  { %4291 = vmatpush1.bf16.msra.mxu0 %v13458_v0  ;;  %4332 = vmatpush1.bf16.msra.mxu1 %v10825_v18  ;;  %v13462_v18 = vld [vmem:[#allocation28_spill] sm:$0xff]  ;;  %v13497_v0 = vld [vmem:[#allocation63_spill] sm:$0xff] }
 0x9b2   :  { %4292 = vmatprep.subr.bf16.mxu0 %v10828_v3  ;;  %4333 = vmatprep.subr.bf16.mxu1 %v10831_v21  ;;  %v13459_v3 = vld [vmem:[#allocation25_spill] sm:$0xff]  ;;  %v13460_v21 = vld [vmem:[#allocation26_spill] sm:$0xff] }
 0x9b5   :  { %4293 = vmatpush1.bf16.msra.mxu0 %v10834_v25  ;;  %4334 = vmatpush1.bf16.msra.mxu1 %v10837_v11  ;;  %v13461_v25 = vld [vmem:[#allocation27_spill] sm:$0xff]  ;;  %v13463_v11 = vld [vmem:[#allocation29_spill] sm:$0xff] }
 0x9b6   :  { %4388 = vmatprep.subr.bf16.mxu0 %v8785_v38  ;;  %4429 = vmatprep.subr.bf16.mxu1 %v8788_v39 }
 0x9b8   :  { %4311 = vmatmul.mubr.bf16.vlgmr.msra.gmra.mxu0 %v11060_v1  ;;  %4352 = vmatmul.mubr.bf16.vlgmr.msra.gmra.mxu1 %v11060_v1 }
 0x9b9   :  { %4389 = vmatpush1.bf16.msra.mxu0 %v8791_v44  ;;  %4420 = vmatprep.mubr.bf16.mxu0 %v11060_v1 }
 0x9ba   :  { %4430 = vmatpush1.bf16.msra.mxu1 %v8794_v45  ;;  %4461 = vmatprep.mubr.bf16.mxu1 %v11060_v1 }
 0x9bb   :  { %4390 = vmatprep.subr.bf16.mxu0 %v8796_v46  ;;  %4431 = vmatprep.subr.bf16.mxu1 %v8799_v47 }
 0x9bd   :  { %4391 = vmatpush1.bf16.msra.mxu0 %v8804_v52 }
 0x9be   :  { %4432 = vmatpush1.bf16.msra.mxu1 %v8808_v53  ;;  %4392 = vmatprep.subr.bf16.mxu0 %v8810_v54 }
 0x9bf   :  { %4433 = vmatprep.subr.bf16.mxu1 %v8813_v55 }
 0x9c1   :  { %4393 = vmatpush1.bf16.msra.mxu0 %v8818_v60 }
 0x9c2   :  { %4434 = vmatpush1.bf16.msra.mxu1 %v8822_v61  ;;  %4394 = vmatprep.subr.bf16.mxu0 %v8824_v62 }
 0x9c3   :  { %4435 = vmatprep.subr.bf16.mxu1 %v8827_v63 }
 0x9c5   :  { %4395 = vmatpush1.bf16.msra.mxu0 %v8830_v5 }
 0x9c6   :  { %4436 = vmatpush1.bf16.msra.mxu1 %v8834_v6  ;;  %4396 = vmatprep.subr.bf16.mxu0 %v8836_v7 }
 0x9c7   :  { %4437 = vmatprep.subr.bf16.mxu1 %v13167_v24 }
 0x9c9   :  { %4397 = vmatpush1.bf16.msra.mxu0 %v13168_v42 }
 0x9ca   :  { %4438 = vmatpush1.bf16.msra.mxu1 %v13459_v3  ;;  %4398 = vmatprep.subr.bf16.mxu0 %v13460_v21 }
 0x9cb   :  { %4439 = vmatprep.subr.bf16.mxu1 %v13461_v25 }
 0x9cd   :  { %4399 = vmatpush1.bf16.msra.mxu0 %v13462_v18 }
 0x9ce   :  { %4440 = vmatpush1.bf16.msra.mxu1 %v13463_v11  ;;  %4400 = vmatprep.subr.bf16.mxu0 %v13464_v49 }
 0x9cf   :  { %4441 = vmatprep.subr.bf16.mxu1 %v13465_v31 }
 0x9d1   :  { %4401 = vmatpush1.bf16.msra.mxu0 %v13466_v19 }
 0x9d2   :  { %4442 = vmatpush1.bf16.msra.mxu1 %v13467_v2  ;;  %4402 = vmatprep.subr.bf16.mxu0 %v13468_v40 }
 0x9d3   :  { %4443 = vmatprep.subr.bf16.mxu1 %v13469_v17 }
 0x9d5   :  { %4403 = vmatpush1.bf16.msra.mxu0 %v13470_v50 }
 0x9d6   :  { %4444 = vmatpush1.bf16.msra.mxu1 %v13471_v34  ;;  %4404 = vmatprep.subr.bf16.mxu0 %v13472_v28 }
 0x9d7   :  { %4445 = vmatprep.subr.bf16.mxu1 %v13473_v12 }
 0x9d9   :  { %4405 = vmatpush2.bf16.msra.mxu0 %v13474_v16 }
 0x9da   :  { %4446 = vmatpush2.bf16.msra.mxu1 %v13475_v41  ;;  %4406 = vmatprep.subr.bf16.mxu0 %v13476_v57 }
 0x9db   :  { %4447 = vmatprep.subr.bf16.mxu1 %v13477_v33 }
 0x9dd   :  { %4407 = vmatpush2.bf16.msra.mxu0 %v13478_v35  ;;  %v4381_v35 = vld [vmem:[#allocation2 + $0x20] sm:$0x30] }
 0x9de   :  { %4448 = vmatpush2.bf16.msra.mxu1 %v13479_v59  ;;  %4408 = vmatprep.subr.bf16.mxu0 %v13480_v27 }
 0x9df   :  { %4449 = vmatprep.subr.bf16.mxu1 %v13481_v56 }
 0x9e1   :  { %4409 = vmatpush2.bf16.msra.mxu0 %v13482_v43 }
 0x9e2   :  { %4450 = vmatpush2.bf16.msra.mxu1 %v13483_v32  ;;  %4410 = vmatprep.subr.bf16.mxu0 %v13484_v26 }
 0x9e3   :  { %4451 = vmatprep.subr.bf16.mxu1 %v13485_v36  ;;  %v4165_v36 = vld [vmem:[#allocation3 + $0x30] sm:$0xc] }
 0x9e5   :  { %4411 = vmatpush2.bf16.msra.mxu0 %v13486_v58  ;;  %v4163_v58 = vld [vmem:[#allocation3 + $0x8] sm:$0xc] }
 0x9e6   :  { %4452 = vmatpush2.bf16.msra.mxu1 %v13487_v51  ;;  %4412 = vmatprep.subr.bf16.mxu0 %v13488_v23  ;;  %v13499_v23 = vld [vmem:[#allocation65_spill] sm:$0xff] }
 0x9e7   :  { %4453 = vmatprep.subr.bf16.mxu1 %v13489_v9  ;;  %v13500_v9 = vld [vmem:[#allocation66_spill] sm:$0xff] }
 0x9e9   :  { %4413 = vmatpush2.bf16.msra.mxu0 %v13490_v10  ;;  %v13501_v10 = vld [vmem:[#allocation67_spill] sm:$0xff] }
 0x9ea   :  { %4454 = vmatpush2.bf16.msra.mxu1 %v13491_v22  ;;  %4414 = vmatprep.subr.bf16.mxu0 %v13492_v13  ;;  %v13502_v22 = vld [vmem:[#allocation68_spill] sm:$0xff]  ;;  %v13503_v13 = vld [vmem:[#allocation69_spill] sm:$0xff] }
 0x9eb   :  { %4455 = vmatprep.subr.bf16.mxu1 %v13493_v30  ;;  %v13504_v30 = vld [vmem:[#allocation70_spill] sm:$0xff] }
 0x9ed   :  { %4415 = vmatpush2.bf16.msra.mxu0 %v13494_v29  ;;  %v13505_v29 = vld [vmem:[#allocation71_spill] sm:$0xff] }
 0x9ee   :  { %4456 = vmatpush2.bf16.msra.mxu1 %v13495_v8  ;;  %4416 = vmatprep.subr.bf16.mxu0 %v13496_v37  ;;  %v13516_v37 = vld [vmem:[#allocation85_spill] sm:$0xff] }
 0x9ef   :  { %4457 = vmatprep.subr.bf16.mxu1 %v13497_v0  ;;  %v13506_v0 = vld [vmem:[#allocation73_spill] sm:$0xff] }
 0x9f1   :  { %4417 = vmatpush2.bf16.msra.mxu0 %v13498_v14  ;;  %v13514_v14 = vld [vmem:[#allocation83_spill] sm:$0xff] }
 0x9f2   :  { %4458 = vmatpush2.bf16.msra.mxu1 %v13499_v23  ;;  %4418 = vmatprep.subr.bf16.mxu0 %v13500_v9  ;;  %v13507_v23 = vld [vmem:[#allocation74_spill] sm:$0xff]  ;;  %v13513_v9 = vld [vmem:[#allocation81_spill] sm:$0xff] }
 0x9f3   :  { %4459 = vmatprep.subr.bf16.mxu1 %v13501_v10  ;;  %v13508_v10 = vld [vmem:[#allocation75_spill] sm:$0xff] }
 0x9f5   :  { %4419 = vmatpush2.bf16.msra.mxu0 %v13502_v22  ;;  %v13509_v22 = vld [vmem:[#allocation76_spill] sm:$0xff] }
 0x9f6   :  { %4460 = vmatpush2.bf16.msra.mxu1 %v13503_v13  ;;  %4470 = vmatprep.subr.bf16.mxu0 %v13504_v30  ;;  %v13510_v13 = vld [vmem:[#allocation77_spill] sm:$0xff]  ;;  %v13511_v30 = vld [vmem:[#allocation79_spill] sm:$0xff] }
 0x9f7   :  { %4511 = vmatprep.subr.bf16.mxu1 %v13505_v29  ;;  %v13512_v29 = vld [vmem:[#allocation80_spill] sm:$0xff] }
 0x9f8   :  { %4421 = vmatmul.mubr.bf16.vlgmr.msra.gmra.mxu0 %v11023_v20 }
 0x9f9   :  { %4462 = vmatmul.mubr.bf16.vlgmr.msra.gmra.mxu1 %v11023_v20  ;;  %4471 = vmatpush1.bf16.msra.mxu0 %v13506_v0  ;;  %v13515_v0 = vld [vmem:[#allocation84_spill] sm:$0xff] }
 0x9fa   :  { %4502 = vmatprep.mubr.bf16.mxu0 %v11060_v1  ;;  %4512 = vmatpush1.bf16.msra.mxu1 %v13507_v23  ;;  %v13517_v23 = vld [vmem:[#allocation86_spill] sm:$0xff] }
 0x9fb   :  { %4543 = vmatprep.mubr.bf16.mxu1 %v11060_v1  ;;  %4472 = vmatprep.subr.bf16.mxu0 %v13508_v10  ;;  %v13518_v1 = vld [vmem:[#allocation87_spill] sm:$0xff]  ;;  %v13519_v10 = vld [vmem:[#allocation88_spill] sm:$0xff] }
 0x9fc   :  { %4513 = vmatprep.subr.bf16.mxu1 %v13509_v22  ;;  %v13520_v22 = vld [vmem:[#allocation89_spill] sm:$0xff] }
 0x9fd   :  { %4473 = vmatpush1.bf16.msra.mxu0 %v13510_v13  ;;  %v13521_v13 = vld [vmem:[#allocation90_spill] sm:$0xff] }
 0x9fe   :  { %4514 = vmatpush1.bf16.msra.mxu1 %v13511_v30  ;;  %4474 = vmatprep.subr.bf16.mxu0 %v13512_v29  ;;  %v13522_v30 = vld [vmem:[#allocation91_spill] sm:$0xff]  ;;  %v13523_v29 = vld [vmem:[#allocation92_spill] sm:$0xff] }
 0x9ff   :  { %4515 = vmatprep.subr.bf16.mxu1 %v13513_v9  ;;  %v13524_v9 = vld [vmem:[#allocation93_spill] sm:$0xff] }
 0xa01   :  { %4475 = vmatpush1.bf16.msra.mxu0 %v13514_v14  ;;  %v13525_v14 = vld [vmem:[#allocation94_spill] sm:$0xff] }
 0xa02   :  { %4516 = vmatpush1.bf16.msra.mxu1 %v13515_v0  ;;  %4476 = vmatprep.subr.bf16.mxu0 %v13516_v37  ;;  %v13526_v0 = vld [vmem:[#allocation95_spill] sm:$0xff]  ;;  %v13527_v37 = vld [vmem:[#allocation96_spill] sm:$0xff] }
 0xa03   :  { %4517 = vmatprep.subr.bf16.mxu1 %v13517_v23  ;;  %v13528_v23 = vld [vmem:[#allocation97_spill] sm:$0xff] }
 0xa05   :  { %4477 = vmatpush1.bf16.msra.mxu0 %v13518_v1  ;;  %v13529_v1 = vld [vmem:[#allocation98_spill] sm:$0xff] }
 0xa06   :  { %4518 = vmatpush1.bf16.msra.mxu1 %v13519_v10  ;;  %4478 = vmatprep.subr.bf16.mxu0 %v13520_v22  ;;  %v13530_v10 = vld [vmem:[#allocation99_spill] sm:$0xff]  ;;  %v13531_v22 = vld [vmem:[#allocation100_spill] sm:$0xff] }
 0xa07   :  { %4519 = vmatprep.subr.bf16.mxu1 %v13521_v13  ;;  %v13532_v13 = vld [vmem:[#allocation101_spill] sm:$0xff] }
 0xa09   :  { %4479 = vmatpush1.bf16.msra.mxu0 %v13522_v30  ;;  %v13533_v30 = vld [vmem:[#allocation102_spill] sm:$0xff] }
 0xa0a   :  { %4520 = vmatpush1.bf16.msra.mxu1 %v13523_v29  ;;  %4480 = vmatprep.subr.bf16.mxu0 %v13524_v9  ;;  %v13534_v29 = vld [vmem:[#allocation103_spill] sm:$0xff]  ;;  %v13535_v9 = vld [vmem:[#allocation104_spill] sm:$0xff] }
 0xa0b   :  { %4521 = vmatprep.subr.bf16.mxu1 %v13525_v14  ;;  %v13536_v14 = vld [vmem:[#allocation105_spill] sm:$0xff] }
 0xa0d   :  { %4481 = vmatpush1.bf16.msra.mxu0 %v13526_v0  ;;  %v13537_v0 = vld [vmem:[#allocation106_spill] sm:$0xff] }
 0xa0e   :  { %4522 = vmatpush1.bf16.msra.mxu1 %v13527_v37  ;;  %4482 = vmatprep.subr.bf16.mxu0 %v13528_v23  ;;  %v13538_v37 = vld [vmem:[#allocation107_spill] sm:$0xff]  ;;  %v13539_v23 = vld [vmem:[#allocation108_spill] sm:$0xff] }
 0xa0f   :  { %4523 = vmatprep.subr.bf16.mxu1 %v13529_v1  ;;  %v13540_v1 = vld [vmem:[#allocation109_spill] sm:$0xff] }
 0xa11   :  { %4483 = vmatpush1.bf16.msra.mxu0 %v13530_v10  ;;  %v13541_v10 = vld [vmem:[#allocation110_spill] sm:$0xff] }
 0xa12   :  { %4524 = vmatpush1.bf16.msra.mxu1 %v13531_v22  ;;  %4484 = vmatprep.subr.bf16.mxu0 %v13532_v13  ;;  %v13542_v22 = vld [vmem:[#allocation111_spill] sm:$0xff]  ;;  %v13543_v13 = vld [vmem:[#allocation112_spill] sm:$0xff] }
 0xa13   :  { %4525 = vmatprep.subr.bf16.mxu1 %v13533_v30  ;;  %v13544_v30 = vld [vmem:[#allocation113_spill] sm:$0xff] }
 0xa15   :  { %4485 = vmatpush1.bf16.msra.mxu0 %v13534_v29  ;;  %v13545_v29 = vld [vmem:[#allocation114_spill] sm:$0xff] }
 0xa16   :  { %4526 = vmatpush1.bf16.msra.mxu1 %v13535_v9  ;;  %4486 = vmatprep.subr.bf16.mxu0 %v13536_v14  ;;  %v13546_v9 = vld [vmem:[#allocation115_spill] sm:$0xff]  ;;  %v13547_v14 = vld [vmem:[#allocation116_spill] sm:$0xff] }
 0xa17   :  { %4527 = vmatprep.subr.bf16.mxu1 %v13537_v0  ;;  %v13548_v0 = vld [vmem:[#allocation117_spill] sm:$0xff] }
 0xa19   :  { %4487 = vmatpush2.bf16.msra.mxu0 %v13538_v37  ;;  %v13549_v37 = vld [vmem:[#allocation118_spill] sm:$0xff] }
 0xa1a   :  { %4528 = vmatpush2.bf16.msra.mxu1 %v13539_v23  ;;  %4488 = vmatprep.subr.bf16.mxu0 %v13540_v1  ;;  %v13550_v23 = vld [vmem:[#allocation119_spill] sm:$0xff]  ;;  %v13551_v1 = vld [vmem:[#allocation120_spill] sm:$0xff] }
 0xa1b   :  { %4529 = vmatprep.subr.bf16.mxu1 %v13541_v10  ;;  %v13552_v10 = vld [vmem:[#allocation121_spill] sm:$0xff] }
 0xa1d   :  { %4489 = vmatpush2.bf16.msra.mxu0 %v13542_v22  ;;  %v13553_v22 = vld [vmem:[#allocation122_spill] sm:$0xff] }
 0xa1e   :  { %4530 = vmatpush2.bf16.msra.mxu1 %v13543_v13  ;;  %4490 = vmatprep.subr.bf16.mxu0 %v13544_v30  ;;  %v13554_v13 = vld [vmem:[#allocation123_spill] sm:$0xff]  ;;  %v13555_v30 = vld [vmem:[#allocation124_spill] sm:$0xff] }
 0xa1f   :  { %4531 = vmatprep.subr.bf16.mxu1 %v13545_v29  ;;  %v13556_v29 = vld [vmem:[#allocation125_spill] sm:$0xff] }
 0xa21   :  { %4491 = vmatpush2.bf16.msra.mxu0 %v13546_v9  ;;  %v13557_v9 = vld [vmem:[#allocation126_spill] sm:$0xff] }
 0xa22   :  { %4532 = vmatpush2.bf16.msra.mxu1 %v13547_v14  ;;  %4492 = vmatprep.subr.bf16.mxu0 %v13548_v0  ;;  %v13558_v14 = vld [vmem:[#allocation127_spill] sm:$0xff]  ;;  %v13559_v0 = vld [vmem:[#allocation128_spill] sm:$0xff] }
 0xa23   :  { %4533 = vmatprep.subr.bf16.mxu1 %v13549_v37  ;;  %v13560_v37 = vld [vmem:[#allocation129_spill] sm:$0xff] }
 0xa25   :  { %4493 = vmatpush2.bf16.msra.mxu0 %v13550_v23  ;;  %v13561_v23 = vld [vmem:[#allocation130_spill] sm:$0xff] }
 0xa26   :  { %4534 = vmatpush2.bf16.msra.mxu1 %v13551_v1  ;;  %4494 = vmatprep.subr.bf16.mxu0 %v13552_v10  ;;  %v13562_v1 = vld [vmem:[#allocation131_spill] sm:$0xff]  ;;  %v13563_v10 = vld [vmem:[#allocation132_spill] sm:$0xff] }
 0xa27   :  { %4535 = vmatprep.subr.bf16.mxu1 %v13553_v22  ;;  %v13564_v22 = vld [vmem:[#allocation133_spill] sm:$0xff] }
 0xa29   :  { %4495 = vmatpush2.bf16.msra.mxu0 %v13554_v13  ;;  %v13565_v13 = vld [vmem:[#allocation134_spill] sm:$0xff] }
 0xa2a   :  { %4536 = vmatpush2.bf16.msra.mxu1 %v13555_v30  ;;  %4496 = vmatprep.subr.bf16.mxu0 %v13556_v29  ;;  %v13566_v30 = vld [vmem:[#allocation135_spill] sm:$0xff]  ;;  %v13567_v29 = vld [vmem:[#allocation136_spill] sm:$0xff] }
 0xa2b   :  { %4537 = vmatprep.subr.bf16.mxu1 %v13557_v9 }
 0xa2d   :  { %4497 = vmatpush2.bf16.msra.mxu0 %v13558_v14 }
 0xa2e   :  { %4538 = vmatpush2.bf16.msra.mxu1 %v13559_v0  ;;  %4498 = vmatprep.subr.bf16.mxu0 %v13560_v37  ;;  %v11201_v0 = vld [vmem:[%s12131_s4 + $0xe4] ss:$16 sps:$4 sm:$0xff]  }
 0xa2f   :  { %4539 = vmatprep.subr.bf16.mxu1 %v13561_v23  ;;  %13568 = vst [vmem:[#allocation23_spill] sm:$0xff] %v11201_v0  ;;  %v4164_v23 = vld [vmem:[#allocation3 + $0x38] sm:$0xc] }
 0xa31   :  { %4499 = vmatpush2.bf16.msra.mxu0 %v13562_v1  ;;  %v11207_v1 = vld [vmem:[%s12131_s4 + $0xec] ss:$16 sps:$4 sm:$0xff]  }
 0xa32   :  { %4540 = vmatpush2.bf16.msra.mxu1 %v13563_v10  ;;  %4500 = vmatprep.subr.bf16.mxu0 %v13564_v22  ;;  %13569 = vst [vmem:[#allocation24_spill] sm:$0xff] %v11207_v1 }
 0xa33   :  { %4541 = vmatprep.subr.bf16.mxu1 %v13565_v13 }
 0xa35   :  { %4501 = vmatpush2.bf16.msra.mxu0 %v13566_v30  ;;  %v11397_v30 = vld [vmem:[#allocation9 + $0xec] ss:$16 sps:$4 sm:$0xff]  }
 0xa36   :  { %4542 = vmatpush2.bf16.msra.mxu1 %v13567_v29  ;;  %4635 = vmatprep.subr.bf16.mxu0 %v11201_v0  ;;  %v11215_v29 = vld [vmem:[%s12131_s4 + $0xe0] ss:$16 sps:$4 sm:$0xff]   ;;  %v11221_v0 = vld [vmem:[%s12131_s4 + $0xe8] ss:$16 sps:$4 sm:$0xff]   ;;  %13601 = vst [vmem:[#allocation167_spill] sm:$0xff] %v11397_v30 }
 0xa37   :  { %4676 = vmatprep.subr.bf16.mxu1 %v11207_v1  ;;  %13570 = vst [vmem:[#allocation181_spill] sm:$0xff] %v11215_v29  ;;  %13571 = vst [vmem:[#allocation137_spill] sm:$0xff] %v11221_v0  ;;  %v11227_v1 = vld [vmem:[%s12131_s4 + $0xc4] ss:$16 sps:$4 sm:$0xff]  }
 0xa38   :  { %4503 = vmatmul.mubr.bf16.vlgmr.msra.gmra.mxu0 %v11023_v20  ;;  %13572 = vst [vmem:[#allocation138_spill] sm:$0xff] %v11227_v1 }
 0xa39   :  { %4544 = vmatmul.mubr.bf16.vlgmr.msra.gmra.mxu1 %v11023_v20  ;;  %4636 = vmatpush1.bf16.msra.mxu0 %v11215_v29  ;;  %v11233_v20 = vld [vmem:[%s12131_s4 + $0xcc] ss:$16 sps:$4 sm:$0xff]  }
 0xa3a   :  { %4677 = vmatpush1.bf16.msra.mxu1 %v11221_v0  ;;  %4637 = vmatprep.subr.bf16.mxu0 %v11227_v1  ;;  %13573 = vst [vmem:[#allocation139_spill] sm:$0xff] %v11233_v20  ;;  %v11241_v0 = vld [vmem:[%s12131_s4 + $0xc0] ss:$16 sps:$4 sm:$0xff]   ;;  %v11247_v1 = vld [vmem:[%s12131_s4 + $0xc8] ss:$16 sps:$4 sm:$0xff]  }
 0xa3b   :  { %4678 = vmatprep.subr.bf16.mxu1 %v11233_v20  ;;  %4667 = vmatprep.mubr.bf16.mxu0 %v12638_v48  ;;  %13574 = vst [vmem:[#allocation140_spill] sm:$0xff] %v11241_v0  ;;  %13575 = vst [vmem:[#allocation141_spill] sm:$0xff] %v11247_v1  ;;  %v11253_v20 = vld [vmem:[%s12131_s4 + $0xa4] ss:$16 sps:$4 sm:$0xff]   ;;  %v11259_v29 = vld [vmem:[%s12131_s4 + $0xac] ss:$16 sps:$4 sm:$0xff]  }
 0xa3c   :  { %4708 = vmatprep.mubr.bf16.mxu1 %v12638_v48  ;;  %13576 = vst [vmem:[#allocation142_spill] sm:$0xff] %v11253_v20  ;;  %13577 = vst [vmem:[#allocation143_spill] sm:$0xff] %v11259_v29 }
 0xa3d   :  { %4638 = vmatpush1.bf16.msra.mxu0 %v11241_v0  ;;  %v11265_v0 = vld [vmem:[%s12131_s4 + $0xa0] ss:$16 sps:$4 sm:$0xff]  }
 0xa3e   :  { %4679 = vmatpush1.bf16.msra.mxu1 %v11247_v1  ;;  %4639 = vmatprep.subr.bf16.mxu0 %v11253_v20  ;;  %13578 = vst [vmem:[#allocation144_spill] sm:$0xff] %v11265_v0  ;;  %v11271_v1 = vld [vmem:[%s12131_s4 + $0xa8] ss:$16 sps:$4 sm:$0xff]   ;;  %v11277_v20 = vld [vmem:[%s12131_s4 + $0x84] ss:$16 sps:$4 sm:$0xff]  }
 0xa3f   :  { %4680 = vmatprep.subr.bf16.mxu1 %v11259_v29  ;;  %13579 = vst [vmem:[#allocation145_spill] sm:$0xff] %v11271_v1  ;;  %13580 = vst [vmem:[#allocation146_spill] sm:$0xff] %v11277_v20  ;;  %v11283_v29 = vld [vmem:[%s12131_s4 + $0x8c] ss:$16 sps:$4 sm:$0xff]  }
 0xa40   :  { %13581 = vst [vmem:[#allocation147_spill] sm:$0xff] %v11283_v29 }
 0xa41   :  { %4640 = vmatpush1.bf16.msra.mxu0 %v11265_v0  ;;  %v11289_v0 = vld [vmem:[%s12131_s4 + $0x80] ss:$16 sps:$4 sm:$0xff]  }
 0xa42   :  { %4681 = vmatpush1.bf16.msra.mxu1 %v11271_v1  ;;  %4641 = vmatprep.subr.bf16.mxu0 %v11277_v20  ;;  %13582 = vst [vmem:[#allocation148_spill] sm:$0xff] %v11289_v0  ;;  %v11295_v1 = vld [vmem:[%s12131_s4 + $0x88] ss:$16 sps:$4 sm:$0xff]   ;;  %v11301_v20 = vld [vmem:[%s12131_s4 + $0x64] ss:$16 sps:$4 sm:$0xff]  }
 0xa43   :  { %4682 = vmatprep.subr.bf16.mxu1 %v11283_v29  ;;  %13583 = vst [vmem:[#allocation149_spill] sm:$0xff] %v11295_v1  ;;  %13584 = vst [vmem:[#allocation150_spill] sm:$0xff] %v11301_v20  ;;  %v11307_v29 = vld [vmem:[%s12131_s4 + $0x6c] ss:$16 sps:$4 sm:$0xff]  }
 0xa44   :  { %13585 = vst [vmem:[#allocation151_spill] sm:$0xff] %v11307_v29 }
 0xa45   :  { %4642 = vmatpush1.bf16.msra.mxu0 %v11289_v0  ;;  %v11313_v0 = vld [vmem:[%s12131_s4 + $0x60] ss:$16 sps:$4 sm:$0xff]  }
 0xa46   :  { %4683 = vmatpush1.bf16.msra.mxu1 %v11295_v1  ;;  %4643 = vmatprep.subr.bf16.mxu0 %v11301_v20  ;;  %13586 = vst [vmem:[#allocation152_spill] sm:$0xff] %v11313_v0  ;;  %v11319_v1 = vld [vmem:[%s12131_s4 + $0x68] ss:$16 sps:$4 sm:$0xff]   ;;  %v11325_v20 = vld [vmem:[%s12131_s4 + $0x44] ss:$16 sps:$4 sm:$0xff]  }
 0xa47   :  { %4684 = vmatprep.subr.bf16.mxu1 %v11307_v29  ;;  %13587 = vst [vmem:[#allocation153_spill] sm:$0xff] %v11319_v1  ;;  %13588 = vst [vmem:[#allocation154_spill] sm:$0xff] %v11325_v20  ;;  %v11331_v29 = vld [vmem:[%s12131_s4 + $0x4c] ss:$16 sps:$4 sm:$0xff]  }
 0xa48   :  { %13589 = vst [vmem:[#allocation155_spill] sm:$0xff] %v11331_v29 }
 0xa49   :  { %4644 = vmatpush1.bf16.msra.mxu0 %v11313_v0  ;;  %v11337_v0 = vld [vmem:[%s12131_s4 + $0x40] ss:$16 sps:$4 sm:$0xff]  }
 0xa4a   :  { %4685 = vmatpush1.bf16.msra.mxu1 %v11319_v1  ;;  %4645 = vmatprep.subr.bf16.mxu0 %v11325_v20  ;;  %13590 = vst [vmem:[#allocation156_spill] sm:$0xff] %v11337_v0  ;;  %v11343_v1 = vld [vmem:[%s12131_s4 + $0x48] ss:$16 sps:$4 sm:$0xff]   ;;  %v11349_v20 = vld [vmem:[%s12131_s4 + $0x24] ss:$16 sps:$4 sm:$0xff]  }
 0xa4b   :  { %4686 = vmatprep.subr.bf16.mxu1 %v11331_v29  ;;  %13591 = vst [vmem:[#allocation157_spill] sm:$0xff] %v11343_v1  ;;  %13592 = vst [vmem:[#allocation158_spill] sm:$0xff] %v11349_v20  ;;  %v11355_v29 = vld [vmem:[%s12131_s4 + $0x2c] ss:$16 sps:$4 sm:$0xff]  }
 0xa4c   :  { %13593 = vst [vmem:[#allocation159_spill] sm:$0xff] %v11355_v29 }
 0xa4d   :  { %4646 = vmatpush1.bf16.msra.mxu0 %v11337_v0  ;;  %v11361_v0 = vld [vmem:[%s12131_s4 + $0x20] ss:$16 sps:$4 sm:$0xff]  }
 0xa4e   :  { %4687 = vmatpush1.bf16.msra.mxu1 %v11343_v1  ;;  %4647 = vmatprep.subr.bf16.mxu0 %v11349_v20  ;;  %13594 = vst [vmem:[#allocation160_spill] sm:$0xff] %v11361_v0  ;;  %v11367_v1 = vld [vmem:[%s12131_s4 + $0x28] ss:$16 sps:$4 sm:$0xff]   ;;  %v11373_v20 = vld [vmem:[%s12131_s4 + $0x4] ss:$16 sps:$4 sm:$0xff]  }
 0xa4f   :  { %4688 = vmatprep.subr.bf16.mxu1 %v11355_v29  ;;  %13595 = vst [vmem:[#allocation161_spill] sm:$0xff] %v11367_v1  ;;  %13596 = vst [vmem:[#allocation162_spill] sm:$0xff] %v11373_v20  ;;  %v11379_v29 = vld [vmem:[%s12131_s4 + $0xc] ss:$16 sps:$4 sm:$0xff]  }
 0xa50   :  { %13597 = vst [vmem:[#allocation163_spill] sm:$0xff] %v11379_v29 }
 0xa51   :  { %4648 = vmatpush1.bf16.msra.mxu0 %v11361_v0  ;;  %v11385_v0 = vld [vmem:[%s12131_s4] ss:$16 sps:$4 sm:$0xff]  }
 0xa52   :  { %4689 = vmatpush1.bf16.msra.mxu1 %v11367_v1  ;;  %4649 = vmatprep.subr.bf16.mxu0 %v11373_v20  ;;  %13598 = vst [vmem:[#allocation164_spill] sm:$0xff] %v11385_v0  ;;  %v11391_v1 = vld [vmem:[%s12131_s4 + $0x8] ss:$16 sps:$4 sm:$0xff]   ;;  %v11394_v20 = vld [vmem:[#allocation9 + $0xe4] ss:$16 sps:$4 sm:$0xff]  }
 0xa53   :  { %4690 = vmatprep.subr.bf16.mxu1 %v11379_v29  ;;  %13599 = vst [vmem:[#allocation165_spill] sm:$0xff] %v11391_v1  ;;  %13600 = vst [vmem:[#allocation166_spill] sm:$0xff] %v11394_v20 }
 0xa55   :  { %4650 = vmatpush1.bf16.msra.mxu0 %v11385_v0  ;;  %v4162_v0 = vld [vmem:[#allocation3 + $0x18] sm:$0xc] }
 0xa56   :  { %4691 = vmatpush1.bf16.msra.mxu1 %v11391_v1  ;;  %4744 = vmatprep.subr.bf16.mxu0 %v11394_v20 }
 0xa57   :  { %4785 = vmatprep.subr.bf16.mxu1 %v11397_v30 }
 0xa58   :  { %v4203_v29 = vpop.f32.mrf.mxu0  ;;  %v4244_v13 = vpop.f32.mrf.mxu1 }
 0xa59   :  { %v4255_v22 = vrot.slane %v4203_v29, 6  ;;  %v4257_v10 = vrot.slane %v4244_v13, 6 }
 0xa5a   :  { %v4205_v37 = vpop.f32.mrf.mxu0  ;;  %v4246_v14 = vpop.f32.mrf.mxu1 }
 0xa5b   :  { %v4263_v9 = vadd.f32 %v4255_v22, %v4162_v0  ;;  %v4265_v8 = vadd.f32 %v4257_v10, %v4164_v23  ;;  %v4256_v51 = vrot.slane %v4205_v37, 6  ;;  %v4258_v1 = vrot.slane %v4246_v14, 6  ;;  %v4271_v22 = vld [vmem:[#allocation3 + $0x28] sm:$0x30]  ;;  %v4273_v23 = vld [vmem:[#allocation3 + $0x10] sm:$0x30] }
 0xa5c   :  { %v4207_v26 = vpop.f32.mrf.mxu0  ;;  %v4248_v20 = vpop.f32.mrf.mxu1 }
 0xa5d   :  { %4267 = vst [vmem:[#allocation3 + $0x18] sm:$0xc] %v4263_v9  ;;  %4269 = vst [vmem:[#allocation3 + $0x38] sm:$0xc] %v4265_v8  ;;  %v4264_v32 = vadd.f32 %v4256_v51, %v4163_v58  ;;  %v4266_v30 = vadd.f32 %v4258_v1, %v4165_v36  ;;  %v4272_v9 = vld [vmem:[#allocation3] sm:$0x30] }
 0xa5e   :  { %v4208_v43 = vpop.f32.mrf.mxu0  ;;  %v4249_v56 = vpop.f32.mrf.mxu1  ;;  %v4274_v8 = vld [vmem:[#allocation3 + $0x20] sm:$0x30] }
 0xa5f   :  { %4268 = vst [vmem:[#allocation3 + $0x8] sm:$0xc] %v4264_v32  ;;  %4270 = vst [vmem:[#allocation3 + $0x30] sm:$0xc] %v4266_v30 }
 0xa78   :  { %v4312_v13 = vpop.f32.mrf.mxu0  ;;  %v4353_v29 = vpop.f32.mrf.mxu1 }
 0xa79   :  { %v4364_v27 = vrot.slane %v4312_v13, 4  ;;  %v4366_v59 = vrot.slane %v4353_v29, 4 }
 0xa7a   :  { %v4314_v10 = vpop.f32.mrf.mxu0  ;;  %v4355_v37 = vpop.f32.mrf.mxu1 }
 0xa7b   :  { %v4372_v0 = vadd.f32 %v4364_v27, %v4271_v22  ;;  %v4374_v14 = vadd.f32 %v4366_v59, %v4273_v23  ;;  %v4365_v26 = vrot.slane %v4314_v10, 4  ;;  %v4367_v20 = vrot.slane %v4355_v37, 4  ;;  %v4383_v22 = vld [vmem:[#allocation2 + $0x38] sm:$0x30] }
 0xa7c   :  { %v4316_v58 = vpop.f32.mrf.mxu0  ;;  %v4357_v36 = vpop.f32.mrf.mxu1 }
 0xa7d   :  { %4376 = vst [vmem:[#allocation3 + $0x28] sm:$0x30] %v4372_v0  ;;  %4378 = vst [vmem:[#allocation3 + $0x10] sm:$0x30] %v4374_v14  ;;  %v4373_v56 = vadd.f32 %v4365_v26, %v4272_v9  ;;  %v4375_v43 = vadd.f32 %v4367_v20, %v4274_v8  ;;  %v4613_v20 = vrot.slane %v11021_v4, 6 }
 0xa7e   :  { %v4317_v32 = vpop.f32.mrf.mxu0  ;;  %v4358_v51 = vpop.f32.mrf.mxu1  ;;  %v4384_v4 = vld [vmem:[#allocation2 + $0x60] sm:$0x30] }
 0xa7f   :  { %4377 = vst [vmem:[#allocation3] sm:$0x30] %v4373_v56  ;;  %4379 = vst [vmem:[#allocation3 + $0x20] sm:$0x30] %v4375_v43  ;;  %v4382_v43 = vld [vmem:[#allocation2 + $0x10] sm:$0x30] }
 0xab8   :  { %v4422_v30 = vpop.f32.mrf.mxu0 }
 0xab9   :  { %v4463_v1 = vpop.f32.mrf.mxu1  ;;  %v4560_v56 = vrot.slane %v4422_v30, 4 }
 0xaba   :  { %v4424_v13 = vpop.f32.mrf.mxu0  ;;  %v4562_v8 = vrot.slane %v4463_v1, 4 }
 0xabb   :  { %v4465_v29 = vpop.f32.mrf.mxu1  ;;  %v4561_v51 = vrot.slane %v4424_v13, 4  ;;  %v4385_v13 = vld [vmem:[#allocation2 + $0x70] sm:$0x30] }
 0xabc   :  { %v4563_v27 = vrot.slane %v4465_v29, 4  ;;  %v4426_v59 = vpop.f32.mrf.mxu0  ;;  %v4578_v32 = vadd.f32 %v4562_v8, %v4382_v43  ;;  %v4380_v29 = vld [vmem:[#allocation2 + $0x40] sm:$0x30] }
 0xabd   :  { %v4467_v23 = vpop.f32.mrf.mxu1  ;;  %v4576_v59 = vadd.f32 %v4560_v56, %v4380_v29 }
 0xabe   :  { %v4579_v10 = vadd.f32 %v4563_v27, %v4383_v22  ;;  %v4427_v37 = vpop.f32.mrf.mxu0  ;;  %v4592_v23 = vmul.f32 0.5, %v4578_v32  ;;  %v4577_v27 = vadd.f32 %v4561_v51, %v4381_v35  ;;  %v4386_v35 = vld [vmem:[#allocation2 + $0x78] sm:$0x30] }
 0xabf   :  { %v4468_v58 = vpop.f32.mrf.mxu1  ;;  %v4584_v22 = vmul.f32 0.5, %v4576_v59 }
 0xac0   :  { %v4593_v36 = vmul.f32 0.5, %v4579_v10  ;;  %v4585_v10 = vmul.f32 0.5, %v4577_v27 }
 0xac2   :  { %8096 = vtanh.f32 %v4593_v36 }
 0xac3   :  { %8098 = vtanh.f32 %v4592_v23 }
 0xac4   :  { %8100 = vtanh.f32 %v4584_v22 }
 0xac5   :  { %8102 = vtanh.f32 %v4585_v10 }
 0xacf   :  { %v8097_v0 = vpop.eup %8096 }
 0xad0   :  { %v4597_v14 = vmul.f32 0.5, %v8097_v0  ;;  %v8099_v29 = vpop.eup %8098 }
 0xad1   :  { %v8101_v59 = vpop.eup %8100  ;;  %v4596_v23 = vmul.f32 0.5, %v8099_v29 }
 0xad2   :  { %v4599_v26 = vadd.f32 0.5, %v4597_v14  ;;  %v8103_v22 = vpop.eup %8102  ;;  %v4588_v10 = vmul.f32 0.5, %v8101_v59 }
 0xad4   :  { %v4617_v9 = vmul.f32 %v4613_v20, %v4599_v26 }
 0xaf8   :  { %v4504_v37 = vpop.f32.mrf.mxu0 }
 0xaf9   :  { %v4564_v58 = vrot.slane %v4504_v37, 4  ;;  %v4545_v36 = vpop.f32.mrf.mxu1  ;;  %v4598_v37 = vadd.f32 0.5, %v4596_v23 }
 0xafa   :  { %v4506_v0 = vpop.f32.mrf.mxu0  ;;  %v4566_v30 = vrot.slane %v4545_v36, 4  ;;  %v4590_v36 = vadd.f32 0.5, %v4588_v10 }
 0xafb   :  { %v4580_v1 = vadd.f32 %v4564_v58, %v4384_v4  ;;  %v4565_v14 = vrot.slane %v4506_v0, 4  ;;  %v4547_v26 = vpop.f32.mrf.mxu1  ;;  %v4589_v58 = vmul.f32 0.5, %v8103_v22  ;;  %v4612_v4 = vrot.slane %v11018_v15, 6 }
 0xafc   :  { %v4508_v20 = vpop.f32.mrf.mxu0  ;;  %v4582_v32 = vadd.f32 %v4566_v30, %v4386_v35 }
 0xafd   :  { %8104 = vtanh.f32 %v4580_v1  ;;  %v4581_v8 = vadd.f32 %v4565_v14, %v4385_v13  ;;  %v4549_v56 = vpop.f32.mrf.mxu1  ;;  %v4616_v1 = vmul.f32 %v4612_v4, %v4598_v37  ;;  %v4591_v14 = vadd.f32 0.5, %v4589_v58  ;;  %v11411_v37 = vld [vmem:[#allocation9 + $0xe0] ss:$16 sps:$4 sm:$0xff]   ;;  %v11420_v58 = vld [vmem:[#allocation9 + $0xcc] ss:$16 sps:$4 sm:$0xff]  }
 0xafe   :  { %v4509_v43 = vpop.f32.mrf.mxu0  ;;  %v4602_v27 = vmul.f32 0.5, %v4582_v32  ;;  %v4567_v32 = vrot.slane %v4547_v26, 4  ;;  %v11417_v26 = vld [vmem:[#allocation9 + $0xc4] ss:$16 sps:$4 sm:$0xff]   ;;  %v11428_v4 = vld [vmem:[#allocation9 + $0xc8] ss:$16 sps:$4 sm:$0xff]  }
 0xaff   :  { %8106 = vtanh.f32 %v4581_v8  ;;  %v4550_v51 = vpop.f32.mrf.mxu1 }
 0xb00   :  { %8108 = vtanh.f32 %v4602_v27  ;;  %v4387_v51 = vld [vmem:[#allocation2 + $0x28] sm:$0x30] }
 0xb01   :  { %v4583_v59 = vadd.f32 %v4567_v32, %v4387_v51  ;;  %v11453_v32 = vld [vmem:[#allocation9 + $0x88] ss:$16 sps:$4 sm:$0xff]   ;;  %v11456_v51 = vld [vmem:[#allocation9 + $0x64] ss:$16 sps:$4 sm:$0xff]  }
 0xb02   :  { %13603 = vst [vmem:[#allocation169_spill] sm:$0xff] %v11453_v32  ;;  %13604 = vst [vmem:[#allocation170_spill] sm:$0xff] %v11456_v51 }
 0xb03   :  { %v4603_v22 = vmul.f32 0.5, %v4583_v59 }
 0xb0a   :  { %v8105_v0 = vpop.eup %8104 }
 0xb0b   :  { %v4618_v13 = vmul.f32 %v8105_v0, %v4590_v36  ;;  %v11425_v36 = vld [vmem:[#allocation9 + $0xc0] ss:$16 sps:$4 sm:$0xff]   ;;  %v11432_v0 = vld [vmem:[#allocation9 + $0xa4] ss:$16 sps:$4 sm:$0xff]  }
 0xb0c   :  { %v8107_v20 = vpop.eup %8106 }
 0xb0d   :  { %v11402_v30 = vadd.f32 %v4618_v13, %v4616_v1  ;;  %v4619_v8 = vmul.f32 %v8107_v20, %v4591_v14  ;;  %v8109_v35 = vpop.eup %8108  ;;  %v11435_v1 = vld [vmem:[#allocation9 + $0xac] ss:$16 sps:$4 sm:$0xff]   ;;  %v11438_v14 = vld [vmem:[#allocation9 + $0xa0] ss:$16 sps:$4 sm:$0xff]   ;;  %v11441_v13 = vld [vmem:[#allocation9 + $0xa8] ss:$16 sps:$4 sm:$0xff]  }
 0xb0e   :  { %v4606_v43 = vmul.f32 0.5, %v8109_v35  ;;  %v11444_v20 = vld [vmem:[#allocation9 + $0x84] ss:$16 sps:$4 sm:$0xff]  }
 0xb0f   :  { %8110 = vtanh.f32 %v11402_v30  ;;  %v11405_v56 = vadd.f32 %v4619_v8, %v4617_v9  ;;  %v11414_v9 = vld [vmem:[#allocation9 + $0xe8] ss:$16 sps:$4 sm:$0xff]   ;;  %v11447_v8 = vld [vmem:[#allocation9 + $0x8c] ss:$16 sps:$4 sm:$0xff]  }
 0xb10   :  { %v4608_v29 = vadd.f32 0.5, %v4606_v43  ;;  %8112 = vtanh.f32 %v4603_v22  ;;  %v11450_v43 = vld [vmem:[#allocation9 + $0x80] ss:$16 sps:$4 sm:$0xff]   ;;  %v11471_v22 = vld [vmem:[#allocation9 + $0x4c] ss:$16 sps:$4 sm:$0xff]  }
 0xb11   :  { %8114 = vtanh.f32 %v11405_v56  ;;  %13602 = vst [vmem:[#allocation168_spill] sm:$0xff] %v11450_v43  ;;  %13609 = vst [vmem:[#allocation175_spill] sm:$0xff] %v11471_v22 }
 0xb1c   :  { %v8111_v23 = vpop.eup %8110 }
 0xb1d   :  { %v4624_v15 = vmul.f32 %v8111_v23, %v4608_v29  ;;  %v8113_v35 = vpop.eup %8112  ;;  %v11459_v29 = vld [vmem:[#allocation9 + $0x6c] ss:$16 sps:$4 sm:$0xff]   ;;  %v11462_v23 = vld [vmem:[#allocation9 + $0x60] ss:$16 sps:$4 sm:$0xff]  }
 0xb1e   :  { %13605 = vst [vmem:[#allocation171_spill] sm:$0xff] %v11459_v29  ;;  %v4607_v59 = vmul.f32 0.5, %v8113_v35  ;;  %13606 = vst [vmem:[#allocation172_spill] sm:$0xff] %v11462_v23  ;;  %v11477_v35 = vld [vmem:[#allocation9 + $0x48] ss:$16 sps:$4 sm:$0xff]  }
 0xb1f   :  { %v4626_v27 = vpack.c.bf16 %v4624_v15, %v4624_v15  ;;  %v11465_v15 = vld [vmem:[#allocation9 + $0x68] ss:$16 sps:$4 sm:$0xff]  }
 0xb20   :  { %13607 = vst [vmem:[#allocation173_spill] sm:$0xff] %v11465_v15 }
 0xb21   :  { %v11407_v10 = vrot.slane %v4626_v27, 2  ;;  %v11468_v27 = vld [vmem:[#allocation9 + $0x44] ss:$16 sps:$4 sm:$0xff]  }
 0xb22   :  { %13608 = vst [vmem:[#allocation174_spill] sm:$0xff] %v11468_v27 }
 0xb23   :  { %4668 = vmatmul.mubr.bf16.vlgmr.msra.gmra.mxu0 %v11407_v10  ;;  %4709 = vmatmul.mubr.bf16.vlgmr.msra.gmra.mxu1 %v11407_v10 }
 0xb24   :  { %4745 = vmatpush1.bf16.msra.mxu0 %v11411_v37  ;;  %4786 = vmatpush1.bf16.msra.mxu1 %v11414_v9 }
 0xb25   :  { %4746 = vmatprep.subr.bf16.mxu0 %v11417_v26  ;;  %4787 = vmatprep.subr.bf16.mxu1 %v11420_v58 }
 0xb26   :  { %4776 = vmatprep.mubr.bf16.mxu0 %v12638_v48  ;;  %4817 = vmatprep.mubr.bf16.mxu1 %v12638_v48 }
 0xb28   :  { %4747 = vmatpush1.bf16.msra.mxu0 %v11425_v36  ;;  %4788 = vmatpush1.bf16.msra.mxu1 %v11428_v4 }
 0xb29   :  { %4748 = vmatprep.subr.bf16.mxu0 %v11432_v0  ;;  %4789 = vmatprep.subr.bf16.mxu1 %v11435_v1 }
 0xb2c   :  { %4749 = vmatpush1.bf16.msra.mxu0 %v11438_v14  ;;  %4790 = vmatpush1.bf16.msra.mxu1 %v11441_v13 }
 0xb2d   :  { %4750 = vmatprep.subr.bf16.mxu0 %v11444_v20  ;;  %4791 = vmatprep.subr.bf16.mxu1 %v11447_v8 }
 0xb30   :  { %4751 = vmatpush1.bf16.msra.mxu0 %v11450_v43  ;;  %4792 = vmatpush1.bf16.msra.mxu1 %v11453_v32  ;;  %v4609_v32 = vadd.f32 0.5, %v4607_v59  ;;  %v11489_v59 = vld [vmem:[#allocation9 + $0x28] ss:$16 sps:$4 sm:$0xff]   ;;  %v11492_v43 = vld [vmem:[#allocation9 + $0x4] ss:$16 sps:$4 sm:$0xff]  }
 0xb31   :  { %4752 = vmatprep.subr.bf16.mxu0 %v11456_v51  ;;  %4793 = vmatprep.subr.bf16.mxu1 %v11459_v29  ;;  %v8115_v51 = vpop.eup %8114  ;;  %v11474_v29 = vld [vmem:[#allocation9 + $0x40] ss:$16 sps:$4 sm:$0xff]  }
 0xb32   :  { %13610 = vst [vmem:[#allocation176_spill] sm:$0xff] %v11474_v29 }
 0xb34   :  { %4753 = vmatpush1.bf16.msra.mxu0 %v11462_v23  ;;  %4794 = vmatpush1.bf16.msra.mxu1 %v11465_v15  ;;  %v4625_v23 = vmul.f32 %v8115_v51, %v4609_v32  ;;  %v11480_v15 = vld [vmem:[#allocation9 + $0x24] ss:$16 sps:$4 sm:$0xff]   ;;  %v11495_v32 = vld [vmem:[#allocation9 + $0xc] ss:$16 sps:$4 sm:$0xff]   ;;  %v11498_v51 = vld [vmem:[#allocation9] ss:$16 sps:$4 sm:$0xff]  }
 0xb35   :  { %4754 = vmatprep.subr.bf16.mxu0 %v11468_v27  ;;  %4795 = vmatprep.subr.bf16.mxu1 %v11471_v22  ;;  %v11483_v27 = vld [vmem:[#allocation9 + $0x2c] ss:$16 sps:$4 sm:$0xff]   ;;  %v11486_v22 = vld [vmem:[#allocation9 + $0x20] ss:$16 sps:$4 sm:$0xff]  }
 0xb36   :  { %13611 = vst [vmem:[#allocation177_spill] sm:$0xff] %v11483_v27  ;;  %13612 = vst [vmem:[#allocation178_spill] sm:$0xff] %v11486_v22 }
 0xb38   :  { %4755 = vmatpush1.bf16.msra.mxu0 %v11474_v29  ;;  %4796 = vmatpush1.bf16.msra.mxu1 %v11477_v35  ;;  %v4627_v29 = vpack.c.bf16 %v4625_v23, %v4625_v23  ;;  %v13652_v23 = vld [vmem:[#allocation86_spill] sm:$0xff] }
 0xb39   :  { %4756 = vmatprep.subr.bf16.mxu0 %v11480_v15  ;;  %4797 = vmatprep.subr.bf16.mxu1 %v11483_v27  ;;  %v11501_v27 = vld [vmem:[#allocation9 + $0x8] ss:$16 sps:$4 sm:$0xff]  }
 0xb3c   :  { %4757 = vmatpush1.bf16.msra.mxu0 %v11486_v22  ;;  %4798 = vmatpush1.bf16.msra.mxu1 %v11489_v59  ;;  %v11504_v22 = vrot.slane %v4627_v29, 2  ;;  %v13651_v29 = vld [vmem:[#allocation85_spill] sm:$0xff] }
 0xb3d   :  { %4758 = vmatprep.subr.bf16.mxu0 %v11492_v43  ;;  %4799 = vmatprep.subr.bf16.mxu1 %v11495_v32 }
 0xb40   :  { %4759 = vmatpush1.bf16.msra.mxu0 %v11498_v51  ;;  %4800 = vmatpush1.bf16.msra.mxu1 %v11501_v27 }
 0xb41   :  { %4854 = vmatprep.subr.bf16.mxu0 %v8785_v38  ;;  %4895 = vmatprep.subr.bf16.mxu1 %v8788_v39  ;;  %v13613_v38 = vld [vmem:[#allocation44_spill] sm:$0xff]  ;;  %v13614_v39 = vld [vmem:[#allocation45_spill] sm:$0xff] }
 0xb43   :  { %4777 = vmatmul.mubr.bf16.vlgmr.msra.gmra.mxu0 %v11504_v22  ;;  %4818 = vmatmul.mubr.bf16.vlgmr.msra.gmra.mxu1 %v11504_v22 }
 0xb44   :  { %4855 = vmatpush1.bf16.msra.mxu0 %v8791_v44  ;;  %4886 = vmatprep.mubr.bf16.mxu0 %v11504_v22  ;;  %v13615_v44 = vld [vmem:[#allocation46_spill] sm:$0xff] }
 0xb45   :  { %4896 = vmatpush1.bf16.msra.mxu1 %v8794_v45  ;;  %4927 = vmatprep.mubr.bf16.mxu1 %v11504_v22  ;;  %v13616_v45 = vld [vmem:[#allocation47_spill] sm:$0xff] }
 0xb46   :  { %4856 = vmatprep.subr.bf16.mxu0 %v8796_v46  ;;  %4897 = vmatprep.subr.bf16.mxu1 %v8799_v47  ;;  %v13617_v46 = vld [vmem:[#allocation48_spill] sm:$0xff]  ;;  %v13618_v47 = vld [vmem:[#allocation49_spill] sm:$0xff] }
 0xb48   :  { %4857 = vmatpush1.bf16.msra.mxu0 %v8804_v52  ;;  %v13619_v52 = vld [vmem:[#allocation50_spill] sm:$0xff] }
 0xb49   :  { %4898 = vmatpush1.bf16.msra.mxu1 %v8808_v53  ;;  %4858 = vmatprep.subr.bf16.mxu0 %v8810_v54  ;;  %v13620_v53 = vld [vmem:[#allocation51_spill] sm:$0xff]  ;;  %v13621_v54 = vld [vmem:[#allocation52_spill] sm:$0xff] }
 0xb4a   :  { %4899 = vmatprep.subr.bf16.mxu1 %v8813_v55  ;;  %v13622_v55 = vld [vmem:[#allocation53_spill] sm:$0xff] }
 0xb4c   :  { %4859 = vmatpush1.bf16.msra.mxu0 %v8818_v60  ;;  %v13623_v60 = vld [vmem:[#allocation54_spill] sm:$0xff] }
 0xb4d   :  { %4900 = vmatpush1.bf16.msra.mxu1 %v8822_v61  ;;  %4860 = vmatprep.subr.bf16.mxu0 %v8824_v62  ;;  %v13624_v61 = vld [vmem:[#allocation55_spill] sm:$0xff]  ;;  %v13625_v62 = vld [vmem:[#allocation56_spill] sm:$0xff] }
 0xb4e   :  { %4901 = vmatprep.subr.bf16.mxu1 %v8827_v63  ;;  %v13626_v63 = vld [vmem:[#allocation57_spill] sm:$0xff] }
 0xb50   :  { %4861 = vmatpush1.bf16.msra.mxu0 %v8830_v5  ;;  %v13627_v5 = vld [vmem:[#allocation58_spill] sm:$0xff] }
 0xb51   :  { %4902 = vmatpush1.bf16.msra.mxu1 %v8834_v6  ;;  %4862 = vmatprep.subr.bf16.mxu0 %v8836_v7  ;;  %v13628_v6 = vld [vmem:[#allocation59_spill] sm:$0xff]  ;;  %v13629_v7 = vld [vmem:[#allocation60_spill] sm:$0xff] }
 0xb52   :  { %4903 = vmatprep.subr.bf16.mxu1 %v13167_v24  ;;  %v13630_v24 = vld [vmem:[#allocation61_spill] sm:$0xff] }
 0xb54   :  { %4863 = vmatpush1.bf16.msra.mxu0 %v13168_v42  ;;  %v13631_v42 = vld [vmem:[#allocation62_spill] sm:$0xff] }
 0xb55   :  { %4904 = vmatpush1.bf16.msra.mxu1 %v13459_v3  ;;  %4864 = vmatprep.subr.bf16.mxu0 %v13460_v21  ;;  %v13632_v3 = vld [vmem:[#allocation63_spill] sm:$0xff]  ;;  %v13633_v21 = vld [vmem:[#allocation64_spill] sm:$0xff] }
 0xb56   :  { %4905 = vmatprep.subr.bf16.mxu1 %v13461_v25  ;;  %v13634_v25 = vld [vmem:[#allocation65_spill] sm:$0xff] }
 0xb58   :  { %4865 = vmatpush1.bf16.msra.mxu0 %v13462_v18  ;;  %v13635_v18 = vld [vmem:[#allocation66_spill] sm:$0xff] }
 0xb59   :  { %4906 = vmatpush1.bf16.msra.mxu1 %v13463_v11  ;;  %4866 = vmatprep.subr.bf16.mxu0 %v13464_v49  ;;  %v13636_v11 = vld [vmem:[#allocation67_spill] sm:$0xff]  ;;  %v13637_v49 = vld [vmem:[#allocation68_spill] sm:$0xff] }
 0xb5a   :  { %4907 = vmatprep.subr.bf16.mxu1 %v13465_v31  ;;  %v13638_v31 = vld [vmem:[#allocation69_spill] sm:$0xff] }
 0xb5c   :  { %4867 = vmatpush1.bf16.msra.mxu0 %v13466_v19  ;;  %v13639_v19 = vld [vmem:[#allocation70_spill] sm:$0xff] }
 0xb5d   :  { %4908 = vmatpush1.bf16.msra.mxu1 %v13467_v2  ;;  %4868 = vmatprep.subr.bf16.mxu0 %v13468_v40  ;;  %v13640_v2 = vld [vmem:[#allocation71_spill] sm:$0xff]  ;;  %v13641_v40 = vld [vmem:[#allocation73_spill] sm:$0xff] }
 0xb5e   :  { %4909 = vmatprep.subr.bf16.mxu1 %v13469_v17  ;;  %v13642_v17 = vld [vmem:[#allocation74_spill] sm:$0xff] }
 0xb60   :  { %4869 = vmatpush1.bf16.msra.mxu0 %v13470_v50  ;;  %v13643_v50 = vld [vmem:[#allocation75_spill] sm:$0xff] }
 0xb61   :  { %4910 = vmatpush1.bf16.msra.mxu1 %v13471_v34  ;;  %4870 = vmatprep.subr.bf16.mxu0 %v13472_v28  ;;  %v13644_v34 = vld [vmem:[#allocation76_spill] sm:$0xff]  ;;  %v13645_v28 = vld [vmem:[#allocation77_spill] sm:$0xff] }
 0xb62   :  { %4911 = vmatprep.subr.bf16.mxu1 %v13473_v12  ;;  %v13646_v12 = vld [vmem:[#allocation79_spill] sm:$0xff] }
 0xb64   :  { %4871 = vmatpush2.bf16.msra.mxu0 %v13474_v16  ;;  %v13647_v16 = vld [vmem:[#allocation80_spill] sm:$0xff] }
 0xb65   :  { %4912 = vmatpush2.bf16.msra.mxu1 %v13475_v41  ;;  %4872 = vmatprep.subr.bf16.mxu0 %v13476_v57  ;;  %v13648_v41 = vld [vmem:[#allocation81_spill] sm:$0xff]  ;;  %v13649_v57 = vld [vmem:[#allocation83_spill] sm:$0xff] }
 0xb66   :  { %4913 = vmatprep.subr.bf16.mxu1 %v13477_v33  ;;  %v13650_v33 = vld [vmem:[#allocation84_spill] sm:$0xff] }
 0xb68   :  { %4873 = vmatpush2.bf16.msra.mxu0 %v13613_v38  ;;  %v13654_v38 = vld [vmem:[#allocation88_spill] sm:$0xff] }
 0xb69   :  { %4914 = vmatpush2.bf16.msra.mxu1 %v13614_v39  ;;  %4874 = vmatprep.subr.bf16.mxu0 %v13615_v44  ;;  %v13655_v39 = vld [vmem:[#allocation89_spill] sm:$0xff]  ;;  %v13656_v44 = vld [vmem:[#allocation90_spill] sm:$0xff] }
 0xb6a   :  { %4915 = vmatprep.subr.bf16.mxu1 %v13616_v45  ;;  %v13657_v45 = vld [vmem:[#allocation91_spill] sm:$0xff] }
 0xb6c   :  { %4875 = vmatpush2.bf16.msra.mxu0 %v13617_v46  ;;  %v13658_v46 = vld [vmem:[#allocation92_spill] sm:$0xff] }
 0xb6d   :  { %4916 = vmatpush2.bf16.msra.mxu1 %v13618_v47  ;;  %4876 = vmatprep.subr.bf16.mxu0 %v13619_v52  ;;  %v13659_v47 = vld [vmem:[#allocation93_spill] sm:$0xff]  ;;  %v13660_v52 = vld [vmem:[#allocation94_spill] sm:$0xff] }
 0xb6e   :  { %4917 = vmatprep.subr.bf16.mxu1 %v13620_v53  ;;  %v13661_v53 = vld [vmem:[#allocation95_spill] sm:$0xff] }
 0xb70   :  { %4877 = vmatpush2.bf16.msra.mxu0 %v13621_v54  ;;  %v13662_v54 = vld [vmem:[#allocation96_spill] sm:$0xff] }
 0xb71   :  { %4918 = vmatpush2.bf16.msra.mxu1 %v13622_v55  ;;  %4878 = vmatprep.subr.bf16.mxu0 %v13623_v60  ;;  %v13663_v55 = vld [vmem:[#allocation97_spill] sm:$0xff]  ;;  %v13664_v60 = vld [vmem:[#allocation98_spill] sm:$0xff] }
 0xb72   :  { %4919 = vmatprep.subr.bf16.mxu1 %v13624_v61  ;;  %v13665_v61 = vld [vmem:[#allocation99_spill] sm:$0xff] }
 0xb74   :  { %4879 = vmatpush2.bf16.msra.mxu0 %v13625_v62  ;;  %v13666_v62 = vld [vmem:[#allocation100_spill] sm:$0xff] }
 0xb75   :  { %4920 = vmatpush2.bf16.msra.mxu1 %v13626_v63  ;;  %4880 = vmatprep.subr.bf16.mxu0 %v13627_v5  ;;  %v13667_v63 = vld [vmem:[#allocation101_spill] sm:$0xff]  ;;  %v13668_v5 = vld [vmem:[#allocation102_spill] sm:$0xff] }
 0xb76   :  { %4921 = vmatprep.subr.bf16.mxu1 %v13628_v6  ;;  %v13669_v6 = vld [vmem:[#allocation103_spill] sm:$0xff] }
 0xb78   :  { %4881 = vmatpush2.bf16.msra.mxu0 %v13629_v7  ;;  %v13670_v7 = vld [vmem:[#allocation104_spill] sm:$0xff] }
 0xb79   :  { %4922 = vmatpush2.bf16.msra.mxu1 %v13630_v24  ;;  %4882 = vmatprep.subr.bf16.mxu0 %v13631_v42  ;;  %v13671_v24 = vld [vmem:[#allocation105_spill] sm:$0xff]  ;;  %v13672_v42 = vld [vmem:[#allocation106_spill] sm:$0xff] }
 0xb7a   :  { %4923 = vmatprep.subr.bf16.mxu1 %v13632_v3  ;;  %v13673_v3 = vld [vmem:[#allocation107_spill] sm:$0xff] }
 0xb7c   :  { %4883 = vmatpush2.bf16.msra.mxu0 %v13633_v21  ;;  %v13674_v21 = vld [vmem:[#allocation108_spill] sm:$0xff] }
 0xb7d   :  { %4924 = vmatpush2.bf16.msra.mxu1 %v13634_v25  ;;  %4884 = vmatprep.subr.bf16.mxu0 %v13635_v18  ;;  %v13675_v25 = vld [vmem:[#allocation109_spill] sm:$0xff]  ;;  %v13676_v18 = vld [vmem:[#allocation110_spill] sm:$0xff] }
 0xb7e   :  { %4925 = vmatprep.subr.bf16.mxu1 %v13636_v11  ;;  %v13677_v11 = vld [vmem:[#allocation111_spill] sm:$0xff] }
 0xb80   :  { %4885 = vmatpush2.bf16.msra.mxu0 %v13637_v49  ;;  %v13678_v49 = vld [vmem:[#allocation112_spill] sm:$0xff] }
 0xb81   :  { %4926 = vmatpush2.bf16.msra.mxu1 %v13638_v31  ;;  %4936 = vmatprep.subr.bf16.mxu0 %v13639_v19  ;;  %v13679_v31 = vld [vmem:[#allocation113_spill] sm:$0xff]  ;;  %v13680_v19 = vld [vmem:[#allocation114_spill] sm:$0xff] }
 0xb82   :  { %4977 = vmatprep.subr.bf16.mxu1 %v13640_v2  ;;  %v13681_v2 = vld [vmem:[#allocation115_spill] sm:$0xff] }
 0xb83   :  { %4887 = vmatmul.mubr.bf16.vlgmr.msra.gmra.mxu0 %v11407_v10 }
 0xb84   :  { %4928 = vmatmul.mubr.bf16.vlgmr.msra.gmra.mxu1 %v11407_v10  ;;  %4937 = vmatpush1.bf16.msra.mxu0 %v13641_v40  ;;  %v13682_v40 = vld [vmem:[#allocation116_spill] sm:$0xff] }
 0xb85   :  { %4968 = vmatprep.mubr.bf16.mxu0 %v11504_v22  ;;  %4978 = vmatpush1.bf16.msra.mxu1 %v13642_v17  ;;  %v13683_v17 = vld [vmem:[#allocation117_spill] sm:$0xff] }
 0xb86   :  { %5009 = vmatprep.mubr.bf16.mxu1 %v11504_v22  ;;  %4938 = vmatprep.subr.bf16.mxu0 %v13643_v50  ;;  %v13653_v22 = vld [vmem:[#allocation87_spill] sm:$0xff]  ;;  %v13684_v50 = vld [vmem:[#allocation118_spill] sm:$0xff] }
 0xb87   :  { %4979 = vmatprep.subr.bf16.mxu1 %v13644_v34  ;;  %v13685_v34 = vld [vmem:[#allocation119_spill] sm:$0xff] }
 0xb88   :  { %4939 = vmatpush1.bf16.msra.mxu0 %v13645_v28  ;;  %v13686_v28 = vld [vmem:[#allocation120_spill] sm:$0xff] }
 0xb89   :  { %4980 = vmatpush1.bf16.msra.mxu1 %v13646_v12  ;;  %4940 = vmatprep.subr.bf16.mxu0 %v13647_v16  ;;  %v13687_v12 = vld [vmem:[#allocation121_spill] sm:$0xff]  ;;  %v13688_v16 = vld [vmem:[#allocation122_spill] sm:$0xff] }
 0xb8a   :  { %4981 = vmatprep.subr.bf16.mxu1 %v13648_v41  ;;  %v13689_v41 = vld [vmem:[#allocation123_spill] sm:$0xff] }
 0xb8c   :  { %4941 = vmatpush1.bf16.msra.mxu0 %v13649_v57  ;;  %v13690_v57 = vld [vmem:[#allocation124_spill] sm:$0xff] }
 0xb8d   :  { %4982 = vmatpush1.bf16.msra.mxu1 %v13650_v33  ;;  %4942 = vmatprep.subr.bf16.mxu0 %v13651_v29  ;;  %v13691_v33 = vld [vmem:[#allocation125_spill] sm:$0xff]  ;;  %v13692_v29 = vld [vmem:[#allocation126_spill] sm:$0xff] }
 0xb8e   :  { %4983 = vmatprep.subr.bf16.mxu1 %v13652_v23  ;;  %v13693_v23 = vld [vmem:[#allocation127_spill] sm:$0xff] }
 0xb90   :  { %4943 = vmatpush1.bf16.msra.mxu0 %v13653_v22  ;;  %v13694_v22 = vld [vmem:[#allocation128_spill] sm:$0xff] }
 0xb91   :  { %4984 = vmatpush1.bf16.msra.mxu1 %v13654_v38  ;;  %4944 = vmatprep.subr.bf16.mxu0 %v13655_v39  ;;  %v13695_v38 = vld [vmem:[#allocation129_spill] sm:$0xff]  ;;  %v13696_v39 = vld [vmem:[#allocation130_spill] sm:$0xff] }
 0xb92   :  { %4985 = vmatprep.subr.bf16.mxu1 %v13656_v44  ;;  %v13697_v44 = vld [vmem:[#allocation131_spill] sm:$0xff] }
 0xb94   :  { %4945 = vmatpush1.bf16.msra.mxu0 %v13657_v45  ;;  %v13698_v45 = vld [vmem:[#allocation132_spill] sm:$0xff] }
 0xb95   :  { %4986 = vmatpush1.bf16.msra.mxu1 %v13658_v46  ;;  %4946 = vmatprep.subr.bf16.mxu0 %v13659_v47  ;;  %v13699_v46 = vld [vmem:[#allocation133_spill] sm:$0xff]  ;;  %v13700_v47 = vld [vmem:[#allocation134_spill] sm:$0xff] }
 0xb96   :  { %4987 = vmatprep.subr.bf16.mxu1 %v13660_v52  ;;  %v13701_v52 = vld [vmem:[#allocation135_spill] sm:$0xff] }
 0xb98   :  { %4947 = vmatpush1.bf16.msra.mxu0 %v13661_v53  ;;  %v13702_v53 = vld [vmem:[#allocation136_spill] sm:$0xff] }
 0xb99   :  { %4988 = vmatpush1.bf16.msra.mxu1 %v13662_v54  ;;  %4948 = vmatprep.subr.bf16.mxu0 %v13663_v55  ;;  %v13703_v54 = vld [vmem:[#allocation23_spill] sm:$0xff]  ;;  %v13704_v55 = vld [vmem:[#allocation24_spill] sm:$0xff] }
 0xb9a   :  { %4989 = vmatprep.subr.bf16.mxu1 %v13664_v60  ;;  %v13705_v60 = vld [vmem:[#allocation181_spill] sm:$0xff] }
 0xb9c   :  { %4949 = vmatpush1.bf16.msra.mxu0 %v13665_v61  ;;  %v13706_v61 = vld [vmem:[#allocation137_spill] sm:$0xff] }
 0xb9d   :  { %4990 = vmatpush1.bf16.msra.mxu1 %v13666_v62  ;;  %4950 = vmatprep.subr.bf16.mxu0 %v13667_v63  ;;  %v13707_v62 = vld [vmem:[#allocation138_spill] sm:$0xff]  ;;  %v13708_v63 = vld [vmem:[#allocation139_spill] sm:$0xff] }
 0xb9e   :  { %4991 = vmatprep.subr.bf16.mxu1 %v13668_v5  ;;  %v13709_v5 = vld [vmem:[#allocation140_spill] sm:$0xff] }
 0xba0   :  { %4951 = vmatpush1.bf16.msra.mxu0 %v13669_v6  ;;  %v13710_v6 = vld [vmem:[#allocation141_spill] sm:$0xff] }
 0xba1   :  { %4992 = vmatpush1.bf16.msra.mxu1 %v13670_v7  ;;  %4952 = vmatprep.subr.bf16.mxu0 %v13671_v24  ;;  %v13711_v7 = vld [vmem:[#allocation142_spill] sm:$0xff]  ;;  %v13712_v24 = vld [vmem:[#allocation143_spill] sm:$0xff] }
 0xba2   :  { %4993 = vmatprep.subr.bf16.mxu1 %v13672_v42  ;;  %v13714_v42 = vld [vmem:[#allocation145_spill] sm:$0xff] }
 0xba4   :  { %4953 = vmatpush2.bf16.msra.mxu0 %v13673_v3  ;;  %v13715_v3 = vld [vmem:[#allocation146_spill] sm:$0xff] }
 0xba5   :  { %4994 = vmatpush2.bf16.msra.mxu1 %v13674_v21  ;;  %4954 = vmatprep.subr.bf16.mxu0 %v13675_v25  ;;  %v13716_v21 = vld [vmem:[#allocation147_spill] sm:$0xff]  ;;  %v13717_v25 = vld [vmem:[#allocation148_spill] sm:$0xff] }
 0xba6   :  { %4995 = vmatprep.subr.bf16.mxu1 %v13676_v18  ;;  %v13718_v18 = vld [vmem:[#allocation149_spill] sm:$0xff] }
 0xba8   :  { %4955 = vmatpush2.bf16.msra.mxu0 %v13677_v11  ;;  %v13719_v11 = vld [vmem:[#allocation150_spill] sm:$0xff] }
 0xba9   :  { %4996 = vmatpush2.bf16.msra.mxu1 %v13678_v49  ;;  %4956 = vmatprep.subr.bf16.mxu0 %v13679_v31  ;;  %v13720_v49 = vld [vmem:[#allocation151_spill] sm:$0xff]  ;;  %v13721_v31 = vld [vmem:[#allocation152_spill] sm:$0xff] }
 0xbaa   :  { %4997 = vmatprep.subr.bf16.mxu1 %v13680_v19  ;;  %v13722_v19 = vld [vmem:[#allocation153_spill] sm:$0xff] }
 0xbac   :  { %4957 = vmatpush2.bf16.msra.mxu0 %v13681_v2  ;;  %v13723_v2 = vld [vmem:[#allocation154_spill] sm:$0xff] }
 0xbad   :  { %4998 = vmatpush2.bf16.msra.mxu1 %v13682_v40  ;;  %4958 = vmatprep.subr.bf16.mxu0 %v13683_v17  ;;  %v13724_v40 = vld [vmem:[#allocation155_spill] sm:$0xff]  ;;  %v13725_v17 = vld [vmem:[#allocation156_spill] sm:$0xff] }
 0xbae   :  { %4999 = vmatprep.subr.bf16.mxu1 %v13684_v50  ;;  %v13726_v50 = vld [vmem:[#allocation157_spill] sm:$0xff] }
 0xbb0   :  { %4959 = vmatpush2.bf16.msra.mxu0 %v13685_v34  ;;  %v13727_v34 = vld [vmem:[#allocation158_spill] sm:$0xff] }
 0xbb1   :  { %5000 = vmatpush2.bf16.msra.mxu1 %v13686_v28  ;;  %4960 = vmatprep.subr.bf16.mxu0 %v13687_v12  ;;  %v13728_v28 = vld [vmem:[#allocation159_spill] sm:$0xff]  ;;  %v13729_v12 = vld [vmem:[#allocation160_spill] sm:$0xff] }
 0xbb2   :  { %5001 = vmatprep.subr.bf16.mxu1 %v13688_v16  ;;  %v13730_v16 = vld [vmem:[#allocation161_spill] sm:$0xff] }
 0xbb4   :  { %4961 = vmatpush2.bf16.msra.mxu0 %v13689_v41  ;;  %v13731_v41 = vld [vmem:[#allocation162_spill] sm:$0xff] }
 0xbb5   :  { %5002 = vmatpush2.bf16.msra.mxu1 %v13690_v57  ;;  %4962 = vmatprep.subr.bf16.mxu0 %v13691_v33  ;;  %v13732_v57 = vld [vmem:[#allocation163_spill] sm:$0xff]  ;;  %v13733_v33 = vld [vmem:[#allocation164_spill] sm:$0xff] }
 0xbb6   :  { %5003 = vmatprep.subr.bf16.mxu1 %v13692_v29  ;;  %v13734_v29 = vld [vmem:[#allocation165_spill] sm:$0xff] }
 0xbb8   :  { %4963 = vmatpush2.bf16.msra.mxu0 %v13693_v23  ;;  %v13735_v23 = vld [vmem:[#allocation166_spill] sm:$0xff] }
 0xbb9   :  { %5004 = vmatpush2.bf16.msra.mxu1 %v13694_v22  ;;  %4964 = vmatprep.subr.bf16.mxu0 %v13695_v38  ;;  %v13736_v22 = vld [vmem:[#allocation167_spill] sm:$0xff] }
 0xbba   :  { %5005 = vmatprep.subr.bf16.mxu1 %v13696_v39 }
 0xbbc   :  { %4965 = vmatpush2.bf16.msra.mxu0 %v13697_v44 }
 0xbbd   :  { %5006 = vmatpush2.bf16.msra.mxu1 %v13698_v45  ;;  %4966 = vmatprep.subr.bf16.mxu0 %v13699_v46  ;;  %v4628_v46 = vld [vmem:[#allocation3 + $0x18] sm:$0x30] }
 0xbbe   :  { %5007 = vmatprep.subr.bf16.mxu1 %v13700_v47  ;;  %v4630_v47 = vld [vmem:[#allocation3 + $0x38] sm:$0x30] }
 0xbc0   :  { %4967 = vmatpush2.bf16.msra.mxu0 %v13701_v52 }
 0xbc1   :  { %5008 = vmatpush2.bf16.msra.mxu1 %v13702_v53  ;;  %5101 = vmatprep.subr.bf16.mxu0 %v13703_v54 }
 0xbc2   :  { %5142 = vmatprep.subr.bf16.mxu1 %v13704_v55 }
 0xbc3   :  { %4969 = vmatmul.mubr.bf16.vlgmr.msra.gmra.mxu0 %v11407_v10 }
 0xbc4   :  { %5010 = vmatmul.mubr.bf16.vlgmr.msra.gmra.mxu1 %v11407_v10  ;;  %5102 = vmatpush1.bf16.msra.mxu0 %v13705_v60  ;;  %v13713_v10 = vld [vmem:[#allocation144_spill] sm:$0xff] }
 0xbc5   :  { %5143 = vmatpush1.bf16.msra.mxu1 %v13706_v61  ;;  %5103 = vmatprep.subr.bf16.mxu0 %v13707_v62  ;;  %v4629_v62 = vld [vmem:[#allocation3 + $0x8] sm:$0x30] }
 0xbc6   :  { %5144 = vmatprep.subr.bf16.mxu1 %v13708_v63  ;;  %5133 = vmatprep.mubr.bf16.mxu0 %v12638_v48  ;;  %v4631_v63 = vld [vmem:[#allocation3 + $0x30] sm:$0x30] }
 0xbc7   :  { %5174 = vmatprep.mubr.bf16.mxu1 %v12638_v48 }
 0xbc8   :  { %5104 = vmatpush1.bf16.msra.mxu0 %v13709_v5 }
 0xbc9   :  { %5145 = vmatpush1.bf16.msra.mxu1 %v13710_v6  ;;  %5105 = vmatprep.subr.bf16.mxu0 %v13711_v7 }
 0xbca   :  { %5146 = vmatprep.subr.bf16.mxu1 %v13712_v24 }
 0xbcc   :  { %5106 = vmatpush1.bf16.msra.mxu0 %v13713_v10 }
 0xbcd   :  { %5147 = vmatpush1.bf16.msra.mxu1 %v13714_v42  ;;  %5107 = vmatprep.subr.bf16.mxu0 %v13715_v3 }
 0xbce   :  { %5148 = vmatprep.subr.bf16.mxu1 %v13716_v21 }
 0xbd0   :  { %5108 = vmatpush1.bf16.msra.mxu0 %v13717_v25 }
 0xbd1   :  { %5149 = vmatpush1.bf16.msra.mxu1 %v13718_v18  ;;  %5109 = vmatprep.subr.bf16.mxu0 %v13719_v11  ;;  %v4737_v11 = vld [vmem:[#allocation3 + $0x28] sm:$0xc] }
 0xbd2   :  { %5150 = vmatprep.subr.bf16.mxu1 %v13720_v49  ;;  %v4739_v49 = vld [vmem:[#allocation3 + $0x10] sm:$0xc] }
 0xbd4   :  { %5110 = vmatpush1.bf16.msra.mxu0 %v13721_v31 }
 0xbd5   :  { %5151 = vmatpush1.bf16.msra.mxu1 %v13722_v19  ;;  %5111 = vmatprep.subr.bf16.mxu0 %v13723_v2 }
 0xbd6   :  { %5152 = vmatprep.subr.bf16.mxu1 %v13724_v40 }
 0xbd8   :  { %5112 = vmatpush1.bf16.msra.mxu0 %v13725_v17 }
 0xbd9   :  { %5153 = vmatpush1.bf16.msra.mxu1 %v13726_v50  ;;  %5113 = vmatprep.subr.bf16.mxu0 %v13727_v34  ;;  %v4738_v34 = vld [vmem:[#allocation3] sm:$0xc] }
 0xbda   :  { %5154 = vmatprep.subr.bf16.mxu1 %v13728_v28  ;;  %v4740_v28 = vld [vmem:[#allocation3 + $0x20] sm:$0xc] }
 0xbdc   :  { %5114 = vmatpush1.bf16.msra.mxu0 %v13729_v12 }
 0xbdd   :  { %5155 = vmatpush1.bf16.msra.mxu1 %v13730_v16  ;;  %5115 = vmatprep.subr.bf16.mxu0 %v13731_v41 }
 0xbde   :  { %5156 = vmatprep.subr.bf16.mxu1 %v13732_v57 }
 0xbe0   :  { %5116 = vmatpush1.bf16.msra.mxu0 %v13733_v33 }
 0xbe1   :  { %5157 = vmatpush1.bf16.msra.mxu1 %v13734_v29  ;;  %5210 = vmatprep.subr.bf16.mxu0 %v13735_v23 }
 0xbe2   :  { %5251 = vmatprep.subr.bf16.mxu1 %v13736_v22 }
 0xbe3   :  { %v4669_v38 = vpop.f32.mrf.mxu0  ;;  %v4710_v39 = vpop.f32.mrf.mxu1 }
 0xbe4   :  { %v4721_v44 = vrot.slane %v4669_v38, 4  ;;  %v4723_v45 = vrot.slane %v4710_v39, 4 }
 0xbe5   :  { %v4671_v52 = vpop.f32.mrf.mxu0  ;;  %v4712_v53 = vpop.f32.mrf.mxu1 }
 0xbe6   :  { %v4729_v54 = vadd.f32 %v4721_v44, %v4628_v46  ;;  %v4731_v55 = vadd.f32 %v4723_v45, %v4630_v47  ;;  %v4722_v60 = vrot.slane %v4671_v52, 4  ;;  %v4724_v61 = vrot.slane %v4712_v53, 4  ;;  %v4849_v46 = vld [vmem:[#allocation2 + $0x38] sm:$0xc0] }
 0xbe7   :  { %v4673_v5 = vpop.f32.mrf.mxu0  ;;  %v4714_v6 = vpop.f32.mrf.mxu1 }
 0xbe8   :  { %4733 = vst [vmem:[#allocation3 + $0x18] sm:$0x30] %v4729_v54  ;;  %4735 = vst [vmem:[#allocation3 + $0x38] sm:$0x30] %v4731_v55  ;;  %v4730_v7 = vadd.f32 %v4722_v60, %v4629_v62  ;;  %v4732_v24 = vadd.f32 %v4724_v61, %v4631_v63  ;;  %v5079_v63 = vrot.slane %v11405_v56, 6 }
 0xbe9   :  { %v4674_v10 = vpop.f32.mrf.mxu0  ;;  %v4715_v42 = vpop.f32.mrf.mxu1  ;;  %v4850_v56 = vld [vmem:[#allocation2 + $0x60] sm:$0xc0] }
 0xbea   :  { %4734 = vst [vmem:[#allocation3 + $0x8] sm:$0x30] %v4730_v7  ;;  %4736 = vst [vmem:[#allocation3 + $0x30] sm:$0x30] %v4732_v24  ;;  %v4848_v24 = vld [vmem:[#allocation2 + $0x10] sm:$0xc0] }
 0xc03   :  { %v4778_v3 = vpop.f32.mrf.mxu0  ;;  %v4819_v21 = vpop.f32.mrf.mxu1 }
 0xc04   :  { %v4830_v25 = vrot.slane %v4778_v3, 6  ;;  %v4832_v18 = vrot.slane %v4819_v21, 6  ;;  %v4846_v3 = vld [vmem:[#allocation2 + $0x40] sm:$0xc0] }
 0xc05   :  { %v4780_v31 = vpop.f32.mrf.mxu0  ;;  %v4821_v19 = vpop.f32.mrf.mxu1 }
 0xc06   :  { %v4838_v2 = vadd.f32 %v4830_v25, %v4737_v11  ;;  %v4840_v40 = vadd.f32 %v4832_v18, %v4739_v49  ;;  %v4831_v17 = vrot.slane %v4780_v31, 6  ;;  %v4833_v50 = vrot.slane %v4821_v19, 6  ;;  %v4847_v25 = vld [vmem:[#allocation2 + $0x20] sm:$0xc0] }
 0xc07   :  { %v4782_v12 = vpop.f32.mrf.mxu0  ;;  %v4823_v16 = vpop.f32.mrf.mxu1 }
 0xc08   :  { %4842 = vst [vmem:[#allocation3 + $0x28] sm:$0xc] %v4838_v2  ;;  %4844 = vst [vmem:[#allocation3 + $0x10] sm:$0xc] %v4840_v40  ;;  %v4839_v41 = vadd.f32 %v4831_v17, %v4738_v34  ;;  %v4841_v57 = vadd.f32 %v4833_v50, %v4740_v28  ;;  %v4851_v16 = vld [vmem:[#allocation2 + $0x70] sm:$0xc0] }
 0xc09   :  { %v4783_v33 = vpop.f32.mrf.mxu0  ;;  %v4824_v29 = vpop.f32.mrf.mxu1 }
 0xc0a   :  { %4843 = vst [vmem:[#allocation3] sm:$0xc] %v4839_v41  ;;  %4845 = vst [vmem:[#allocation3 + $0x20] sm:$0xc] %v4841_v57  ;;  %v4852_v29 = vld [vmem:[#allocation2 + $0x78] sm:$0xc0] }
 0xc43   :  { %v4888_v23 = vpop.f32.mrf.mxu0 }
 0xc44   :  { %v4929_v22 = vpop.f32.mrf.mxu1  ;;  %v5026_v7 = vrot.slane %v4888_v23, 2 }
 0xc45   :  { %v4890_v38 = vpop.f32.mrf.mxu0  ;;  %v5028_v6 = vrot.slane %v4929_v22, 2 }
 0xc46   :  { %v4931_v39 = vpop.f32.mrf.mxu1  ;;  %v5027_v42 = vrot.slane %v4890_v38, 2  ;;  %v5042_v21 = vadd.f32 %v5026_v7, %v4846_v3 }
 0xc47   :  { %v5029_v44 = vrot.slane %v4931_v39, 2  ;;  %v4892_v45 = vpop.f32.mrf.mxu0  ;;  %v5044_v10 = vadd.f32 %v5028_v6, %v4848_v24 }
 0xc48   :  { %v4933_v47 = vpop.f32.mrf.mxu1  ;;  %v5043_v11 = vadd.f32 %v5027_v42, %v4847_v25  ;;  %v5050_v49 = vmul.f32 0.5, %v5042_v21 }
 0xc49   :  { %v5045_v52 = vadd.f32 %v5029_v44, %v4849_v46  ;;  %v4893_v53 = vpop.f32.mrf.mxu0  ;;  %v5058_v18 = vmul.f32 0.5, %v5044_v10 }
 0xc4a   :  { %v4934_v54 = vpop.f32.mrf.mxu1  ;;  %v5051_v31 = vmul.f32 0.5, %v5043_v11 }
 0xc4b   :  { %v5059_v55 = vmul.f32 0.5, %v5045_v52 }
 0xc4d   :  { %8116 = vtanh.f32 %v5059_v55 }
 0xc4e   :  { %8118 = vtanh.f32 %v5058_v18  ;;  %v4853_v18 = vld [vmem:[#allocation2 + $0x28] sm:$0xc0] }
 0xc4f   :  { %8120 = vtanh.f32 %v5050_v49 }
 0xc50   :  { %8122 = vtanh.f32 %v5051_v31 }
 0xc5a   :  { %v8117_v60 = vpop.eup %8116 }
 0xc5b   :  { %v5063_v61 = vmul.f32 0.5, %v8117_v60  ;;  %v8119_v39 = vpop.eup %8118  ;;  %v5078_v60 = vrot.slane %v11402_v30, 6 }
 0xc5c   :  { %v8121_v44 = vpop.eup %8120  ;;  %v5062_v45 = vmul.f32 0.5, %v8119_v39  ;;  %v11766_v39 = vld [vmem:[#allocation11 + $0x64] ss:$16 sps:$4 sm:$0xff]  }
 0xc5d   :  { %v5065_v62 = vadd.f32 0.5, %v5063_v61  ;;  %v8123_v47 = vpop.eup %8122  ;;  %v5054_v52 = vmul.f32 0.5, %v8121_v44  ;;  %v11768_v44 = vld [vmem:[#allocation11 + $0x6c] ss:$16 sps:$4 sm:$0xff]  }
 0xc5e   :  { %v5064_v53 = vadd.f32 0.5, %v5062_v45  ;;  %v5055_v54 = vmul.f32 0.5, %v8123_v47  ;;  %v11772_v45 = vld [vmem:[#allocation11 + $0x60] ss:$16 sps:$4 sm:$0xff]   ;;  %v11778_v47 = vld [vmem:[#allocation11 + $0x44] ss:$16 sps:$4 sm:$0xff]  }
 0xc5f   :  { %v5083_v5 = vmul.f32 %v5079_v63, %v5065_v62  ;;  %v5056_v55 = vadd.f32 0.5, %v5054_v52  ;;  %v11780_v52 = vld [vmem:[#allocation11 + $0x4c] ss:$16 sps:$4 sm:$0xff]  }
 0xc60   :  { %v5082_v62 = vmul.f32 %v5078_v60, %v5064_v53  ;;  %v5057_v63 = vadd.f32 0.5, %v5055_v54  ;;  %v11784_v53 = vld [vmem:[#allocation11 + $0x40] ss:$16 sps:$4 sm:$0xff]   ;;  %v11786_v54 = vld [vmem:[#allocation11 + $0x48] ss:$16 sps:$4 sm:$0xff]  }
 0xc61   :  { %v11792_v60 = vld [vmem:[#allocation11 + $0x2c] ss:$16 sps:$4 sm:$0xff]  }
 0xc83   :  { %v4970_v19 = vpop.f32.mrf.mxu0 }
 0xc84   :  { %v5030_v2 = vrot.slane %v4970_v19, 2  ;;  %v5011_v40 = vpop.f32.mrf.mxu1 }
 0xc85   :  { %v4972_v17 = vpop.f32.mrf.mxu0  ;;  %v5032_v34 = vrot.slane %v5011_v40, 2 }
 0xc86   :  { %v5046_v50 = vadd.f32 %v5030_v2, %v4850_v56  ;;  %v5031_v28 = vrot.slane %v4972_v17, 2  ;;  %v5013_v12 = vpop.f32.mrf.mxu1  ;;  %v13746_v17 = vld [vmem:[#allocation177_spill] sm:$0xff] }
 0xc87   :  { %v4974_v41 = vpop.f32.mrf.mxu0  ;;  %v5048_v22 = vadd.f32 %v5032_v34, %v4852_v29  ;;  %v5033_v25 = vrot.slane %v5013_v12, 2  ;;  %v11718_v12 = vld [vmem:[#allocation11 + $0xec] ss:$16 sps:$4 sm:$0xff]   ;;  %v11754_v29 = vld [vmem:[#allocation11 + $0x84] ss:$16 sps:$4 sm:$0xff]  }
 0xc88   :  { %8124 = vtanh.f32 %v5046_v50  ;;  %v5047_v57 = vadd.f32 %v5031_v28, %v4851_v16  ;;  %v5015_v33 = vpop.f32.mrf.mxu1  ;;  %v13747_v50 = vld [vmem:[#allocation178_spill] sm:$0xff] }
 0xc89   :  { %v4975_v23 = vpop.f32.mrf.mxu0  ;;  %v5068_v46 = vmul.f32 0.5, %v5048_v22  ;;  %v5049_v49 = vadd.f32 %v5033_v25, %v4853_v18  ;;  %v11716_v28 = vld [vmem:[#allocation11 + $0xe4] ss:$16 sps:$4 sm:$0xff]   ;;  %v11742_v41 = vld [vmem:[#allocation11 + $0xac] ss:$16 sps:$4 sm:$0xff]  }
 0xc8a   :  { %8126 = vtanh.f32 %v5047_v57  ;;  %v5016_v38 = vpop.f32.mrf.mxu1  ;;  %v11748_v57 = vld [vmem:[#allocation11 + $0xa0] ss:$16 sps:$4 sm:$0xff]   ;;  %v11750_v33 = vld [vmem:[#allocation11 + $0xa8] ss:$16 sps:$4 sm:$0xff]   ;;  %v11756_v23 = vld [vmem:[#allocation11 + $0x8c] ss:$16 sps:$4 sm:$0xff]  }
 0xc8b   :  { %8128 = vtanh.f32 %v5068_v46  ;;  %v5069_v40 = vmul.f32 0.5, %v5049_v49  ;;  %v11760_v22 = vld [vmem:[#allocation11 + $0x80] ss:$16 sps:$4 sm:$0xff]   ;;  %v11762_v38 = vld [vmem:[#allocation11 + $0x88] ss:$16 sps:$4 sm:$0xff]  }
 0xc8c   :  { %v11774_v46 = vld [vmem:[#allocation11 + $0x68] ss:$16 sps:$4 sm:$0xff]   ;;  %v5094_v25 = vld [vmem:[#allocation3 + $0x18] sm:$0xc0] }
 0xc8d   :  { %v5096_v18 = vld [vmem:[#allocation3 + $0x38] sm:$0xc0] }
 0xc95   :  { %v8125_v61 = vpop.eup %8124 }
 0xc96   :  { %v5084_v6 = vmul.f32 %v8125_v61, %v5056_v55  ;;  %v11790_v55 = vld [vmem:[#allocation11 + $0x24] ss:$16 sps:$4 sm:$0xff]   ;;  %v11796_v61 = vld [vmem:[#allocation11 + $0x20] ss:$16 sps:$4 sm:$0xff]  }
 0xc97   :  { %v8127_v7 = vpop.eup %8126 }
 0xc98   :  { %v5086_v24 = vadd.f32 %v5084_v6, %v5082_v62  ;;  %v5085_v10 = vmul.f32 %v8127_v7, %v5057_v63  ;;  %v8129_v3 = vpop.eup %8128  ;;  %v11798_v62 = vld [vmem:[#allocation11 + $0x28] ss:$16 sps:$4 sm:$0xff]   ;;  %v11802_v63 = vld [vmem:[#allocation11 + $0x4] ss:$16 sps:$4 sm:$0xff]   ;;  %v11804_v6 = vld [vmem:[#allocation11 + $0xc] ss:$16 sps:$4 sm:$0xff]  }
 0xc99   :  { %v5072_v21 = vmul.f32 0.5, %v8129_v3  ;;  %v11808_v7 = vld [vmem:[#allocation11] ss:$16 sps:$4 sm:$0xff]  }
 0xc9a   :  { %8130 = vtanh.f32 %v5086_v24  ;;  %v5087_v42 = vadd.f32 %v5085_v10, %v5083_v5  ;;  %v13745_v5 = vld [vmem:[#allocation176_spill] sm:$0xff]  ;;  %v11810_v24 = vld [vmem:[#allocation11 + $0x8] ss:$16 sps:$4 sm:$0xff]  }
 0xc9b   :  { %v5074_v11 = vadd.f32 0.5, %v5072_v21  ;;  %8132 = vtanh.f32 %v5069_v40 }
 0xc9c   :  { %8134 = vtanh.f32 %v5087_v42 }
 0xca7   :  { %v8131_v31 = vpop.eup %8130 }
 0xca8   :  { %v5090_v19 = vmul.f32 %v8131_v31, %v5074_v11 }
 0xcaa   :  { %v5092_v2 = vpack.c.bf16 %v5090_v19, %v5090_v19 }
 0xcac   :  { %v11682_v30 = vrot.slane %v5092_v2, 3 }
 0xcae   :  { %5134 = vmatmul.mubr.bf16.vlgmr.msra.gmra.mxu0 %v11682_v30  ;;  %5175 = vmatmul.mubr.bf16.vlgmr.msra.gmra.mxu1 %v11682_v30 }
 0xcaf   :  { %5211 = vmatpush1.bf16.msra.mxu0 %v11411_v37  ;;  %5252 = vmatpush1.bf16.msra.mxu1 %v11414_v9  ;;  %v8133_v37 = vpop.eup %8132  ;;  %v13737_v9 = vld [vmem:[#allocation168_spill] sm:$0xff] }
 0xcb0   :  { %5212 = vmatprep.subr.bf16.mxu0 %v11417_v26  ;;  %5253 = vmatprep.subr.bf16.mxu1 %v11420_v58  ;;  %v13738_v26 = vld [vmem:[#allocation169_spill] sm:$0xff]  ;;  %v13739_v58 = vld [vmem:[#allocation170_spill] sm:$0xff] }
 0xcb1   :  { %5242 = vmatprep.mubr.bf16.mxu0 %v12638_v48  ;;  %5283 = vmatprep.mubr.bf16.mxu1 %v12638_v48 }
 0xcb3   :  { %5213 = vmatpush1.bf16.msra.mxu0 %v11425_v36  ;;  %5254 = vmatpush1.bf16.msra.mxu1 %v11428_v4  ;;  %v13740_v36 = vld [vmem:[#allocation171_spill] sm:$0xff]  ;;  %v5073_v4 = vmul.f32 0.5, %v8133_v37 }
 0xcb4   :  { %5214 = vmatprep.subr.bf16.mxu0 %v11432_v0  ;;  %5255 = vmatprep.subr.bf16.mxu1 %v11435_v1  ;;  %v13741_v0 = vld [vmem:[#allocation172_spill] sm:$0xff]  ;;  %v13742_v1 = vld [vmem:[#allocation173_spill] sm:$0xff]  ;;  %v5095_v37 = vld [vmem:[#allocation3 + $0x8] sm:$0xc0] }
 0xcb7   :  { %5215 = vmatpush1.bf16.msra.mxu0 %v11438_v14  ;;  %5256 = vmatpush1.bf16.msra.mxu1 %v11441_v13  ;;  %v13743_v14 = vld [vmem:[#allocation174_spill] sm:$0xff]  ;;  %v13744_v13 = vld [vmem:[#allocation175_spill] sm:$0xff] }
 0xcb8   :  { %5216 = vmatprep.subr.bf16.mxu0 %v11444_v20  ;;  %5257 = vmatprep.subr.bf16.mxu1 %v11447_v8  ;;  %v8135_v20 = vpop.eup %8134  ;;  %v5075_v8 = vadd.f32 0.5, %v5073_v4 }
 0xcba   :  { %v5091_v56 = vmul.f32 %v8135_v20, %v5075_v8  ;;  %v5205_v20 = vld [vmem:[#allocation3 + $0x10] sm:$0x3] }
 0xcbb   :  { %5217 = vmatpush1.bf16.msra.mxu0 %v13737_v9  ;;  %5258 = vmatpush1.bf16.msra.mxu1 %v13738_v26  ;;  %v5097_v9 = vld [vmem:[#allocation3 + $0x30] sm:$0xc0] }
 0xcbc   :  { %5218 = vmatprep.subr.bf16.mxu0 %v13739_v58  ;;  %5259 = vmatprep.subr.bf16.mxu1 %v13740_v36  ;;  %v5093_v34 = vpack.c.bf16 %v5091_v56, %v5091_v56 }
 0xcbe   :  { %v5208_v16 = vrot.slane %v5093_v34, 3  ;;  %v5206_v34 = vld [vmem:[#allocation3 + $0x20] sm:$0x3] }
 0xcbf   :  { %5219 = vmatpush1.bf16.msra.mxu0 %v13741_v0  ;;  %5260 = vmatpush1.bf16.msra.mxu1 %v13742_v1 }
 0xcc0   :  { %5220 = vmatprep.subr.bf16.mxu0 %v13743_v14  ;;  %5261 = vmatprep.subr.bf16.mxu1 %v13744_v13  ;;  %v5203_v14 = vld [vmem:[#allocation3 + $0x28] sm:$0x3] }
 0xcc3   :  { %5221 = vmatpush1.bf16.msra.mxu0 %v13745_v5  ;;  %5262 = vmatpush1.bf16.msra.mxu1 %v11477_v35  ;;  %v11724_v35 = vld [vmem:[#allocation11 + $0xe8] ss:$16 sps:$4 sm:$0xff]  }
 0xcc4   :  { %5222 = vmatprep.subr.bf16.mxu0 %v11480_v15  ;;  %5263 = vmatprep.subr.bf16.mxu1 %v13746_v17  ;;  %v11722_v15 = vld [vmem:[#allocation11 + $0xe0] ss:$16 sps:$4 sm:$0xff]   ;;  %v5204_v17 = vld [vmem:[#allocation3] sm:$0x3] }
 0xcc7   :  { %5223 = vmatpush1.bf16.msra.mxu0 %v13747_v50  ;;  %5264 = vmatpush1.bf16.msra.mxu1 %v11489_v59  ;;  %v11730_v59 = vld [vmem:[#allocation11 + $0xcc] ss:$16 sps:$4 sm:$0xff]  }
 0xcc8   :  { %5224 = vmatprep.subr.bf16.mxu0 %v11492_v43  ;;  %5265 = vmatprep.subr.bf16.mxu1 %v11495_v32  ;;  %v11728_v43 = vld [vmem:[#allocation11 + $0xc4] ss:$16 sps:$4 sm:$0xff]   ;;  %v11736_v32 = vld [vmem:[#allocation11 + $0xc8] ss:$16 sps:$4 sm:$0xff]  }
 0xccb   :  { %5225 = vmatpush1.bf16.msra.mxu0 %v11498_v51  ;;  %5266 = vmatpush1.bf16.msra.mxu1 %v11501_v27  ;;  %v11734_v27 = vld [vmem:[#allocation11 + $0xc0] ss:$16 sps:$4 sm:$0xff]   ;;  %v11740_v51 = vld [vmem:[#allocation11 + $0xa4] ss:$16 sps:$4 sm:$0xff]  }
 0xccc   :  { %5496 = vmatprep.subr.bf16.mxu0 %v11716_v28  ;;  %5537 = vmatprep.subr.bf16.mxu1 %v11718_v12 }
 0xcce   :  { %5243 = vmatmul.mubr.bf16.vlgmr.msra.gmra.mxu0 %v5208_v16  ;;  %5284 = vmatmul.mubr.bf16.vlgmr.msra.gmra.mxu1 %v5208_v16 }
 0xccf   :  { %5497 = vmatpush1.bf16.msra.mxu0 %v11722_v15  ;;  %5538 = vmatpush1.bf16.msra.mxu1 %v11724_v35 }
 0xcd0   :  { %5498 = vmatprep.subr.bf16.mxu0 %v11728_v43  ;;  %5539 = vmatprep.subr.bf16.mxu1 %v11730_v59 }
 0xcd1   :  { %5528 = vmatprep.mubr.bf16.mxu0 %v12638_v48  ;;  %5569 = vmatprep.mubr.bf16.mxu1 %v12638_v48 }
 0xcd3   :  { %5499 = vmatpush1.bf16.msra.mxu0 %v11734_v27  ;;  %5540 = vmatpush1.bf16.msra.mxu1 %v11736_v32 }
 0xcd4   :  { %5500 = vmatprep.subr.bf16.mxu0 %v11740_v51  ;;  %5541 = vmatprep.subr.bf16.mxu1 %v11742_v41 }
 0xcd7   :  { %5501 = vmatpush1.bf16.msra.mxu0 %v11748_v57  ;;  %5542 = vmatpush1.bf16.msra.mxu1 %v11750_v33 }
 0xcd8   :  { %5502 = vmatprep.subr.bf16.mxu0 %v11754_v29  ;;  %5543 = vmatprep.subr.bf16.mxu1 %v11756_v23 }
 0xcdb   :  { %5503 = vmatpush1.bf16.msra.mxu0 %v11760_v22  ;;  %5544 = vmatpush1.bf16.msra.mxu1 %v11762_v38 }
 0xcdc   :  { %5504 = vmatprep.subr.bf16.mxu0 %v11766_v39  ;;  %5545 = vmatprep.subr.bf16.mxu1 %v11768_v44 }
 0xcdf   :  { %5505 = vmatpush1.bf16.msra.mxu0 %v11772_v45  ;;  %5546 = vmatpush1.bf16.msra.mxu1 %v11774_v46 }
 0xce0   :  { %5506 = vmatprep.subr.bf16.mxu0 %v11778_v47  ;;  %5547 = vmatprep.subr.bf16.mxu1 %v11780_v52 }
 0xce3   :  { %5507 = vmatpush1.bf16.msra.mxu0 %v11784_v53  ;;  %5548 = vmatpush1.bf16.msra.mxu1 %v11786_v54 }
 0xce4   :  { %5508 = vmatprep.subr.bf16.mxu0 %v11790_v55  ;;  %5549 = vmatprep.subr.bf16.mxu1 %v11792_v60 }
 0xce7   :  { %5509 = vmatpush1.bf16.msra.mxu0 %v11796_v61  ;;  %5550 = vmatpush1.bf16.msra.mxu1 %v11798_v62 }
 0xce8   :  { %5510 = vmatprep.subr.bf16.mxu0 %v11802_v63  ;;  %5551 = vmatprep.subr.bf16.mxu1 %v11804_v6 }
 0xceb   :  { %5511 = vmatpush1.bf16.msra.mxu0 %v11808_v7  ;;  %5552 = vmatpush1.bf16.msra.mxu1 %v11810_v24 }
 0xcec   :  { %5605 = vmatprep.subr.bf16.mxu0 %v11716_v28  ;;  %5646 = vmatprep.subr.bf16.mxu1 %v11718_v12 }
 0xcee   :  { %5529 = vmatmul.mubr.bf16.vlgmr.msra.gmra.mxu0 %v12638_v48  ;;  %5570 = vmatmul.mubr.bf16.vlgmr.msra.gmra.mxu1 %v12638_v48 }
 0xcef   :  { %5606 = vmatpush1.bf16.msra.mxu0 %v11722_v15  ;;  %5647 = vmatpush1.bf16.msra.mxu1 %v11724_v35 }
 0xcf0   :  { %5607 = vmatprep.subr.bf16.mxu0 %v11728_v43  ;;  %5648 = vmatprep.subr.bf16.mxu1 %v11730_v59 }
 0xcf1   :  { %5637 = vmatprep.mubr.bf16.mxu0 %v12638_v48  ;;  %5678 = vmatprep.mubr.bf16.mxu1 %v12638_v48 }
 0xcf3   :  { %5608 = vmatpush1.bf16.msra.mxu0 %v11734_v27  ;;  %5649 = vmatpush1.bf16.msra.mxu1 %v11736_v32 }
 0xcf4   :  { %5609 = vmatprep.subr.bf16.mxu0 %v11740_v51  ;;  %5650 = vmatprep.subr.bf16.mxu1 %v11742_v41 }
 0xcf7   :  { %5610 = vmatpush1.bf16.msra.mxu0 %v11748_v57  ;;  %5651 = vmatpush1.bf16.msra.mxu1 %v11750_v33 }
 0xcf8   :  { %5611 = vmatprep.subr.bf16.mxu0 %v11754_v29  ;;  %5652 = vmatprep.subr.bf16.mxu1 %v11756_v23 }
 0xcfb   :  { %5612 = vmatpush1.bf16.msra.mxu0 %v11760_v22  ;;  %5653 = vmatpush1.bf16.msra.mxu1 %v11762_v38 }
 0xcfc   :  { %5613 = vmatprep.subr.bf16.mxu0 %v11766_v39  ;;  %5654 = vmatprep.subr.bf16.mxu1 %v11768_v44 }
 0xcff   :  { %5614 = vmatpush1.bf16.msra.mxu0 %v11772_v45  ;;  %5655 = vmatpush1.bf16.msra.mxu1 %v11774_v46 }
 0xd00   :  { %5615 = vmatprep.subr.bf16.mxu0 %v11778_v47  ;;  %5656 = vmatprep.subr.bf16.mxu1 %v11780_v52 }
 0xd03   :  { %5616 = vmatpush1.bf16.msra.mxu0 %v11784_v53  ;;  %5657 = vmatpush1.bf16.msra.mxu1 %v11786_v54 }
 0xd04   :  { %5617 = vmatprep.subr.bf16.mxu0 %v11790_v55  ;;  %5658 = vmatprep.subr.bf16.mxu1 %v11792_v60 }
 0xd07   :  { %5618 = vmatpush1.bf16.msra.mxu0 %v11796_v61  ;;  %5659 = vmatpush1.bf16.msra.mxu1 %v11798_v62 }
 0xd08   :  { %5619 = vmatprep.subr.bf16.mxu0 %v11802_v63  ;;  %5660 = vmatprep.subr.bf16.mxu1 %v11804_v6 }
 0xd0b   :  { %5620 = vmatpush1.bf16.msra.mxu0 %v11808_v7  ;;  %5661 = vmatpush1.bf16.msra.mxu1 %v11810_v24 }
 0xd0c   :  { %5732 = vmatprep.subr.bf16.mxu0 %v11716_v28  ;;  %5773 = vmatprep.subr.bf16.mxu1 %v11718_v12 }
 0xd6e   :  { %v5135_v10 = vpop.f32.mrf.mxu0  ;;  %v5176_v42 = vpop.f32.mrf.mxu1 }
 0xd6f   :  { %v5187_v3 = vrot.slane %v5135_v10, 2  ;;  %v5189_v21 = vrot.slane %v5176_v42, 2 }
 0xd70   :  { %v5137_v11 = vpop.f32.mrf.mxu0  ;;  %v5178_v49 = vpop.f32.mrf.mxu1 }
 0xd71   :  { %v5195_v31 = vadd.f32 %v5187_v3, %v5094_v25  ;;  %v5197_v19 = vadd.f32 %v5189_v21, %v5096_v18  ;;  %v5188_v2 = vrot.slane %v5137_v11, 2  ;;  %v5190_v40 = vrot.slane %v5178_v49, 2 }
 0xd72   :  { %v5139_v26 = vpop.f32.mrf.mxu0  ;;  %v5180_v58 = vpop.f32.mrf.mxu1 }
 0xd73   :  { %5199 = vst [vmem:[#allocation3 + $0x18] sm:$0xc0] %v5195_v31  ;;  %5201 = vst [vmem:[#allocation3 + $0x38] sm:$0xc0] %v5197_v19  ;;  %v5196_v36 = vadd.f32 %v5188_v2, %v5095_v37  ;;  %v5198_v4 = vadd.f32 %v5190_v40, %v5097_v9 }
 0xd74   :  { %v5140_v0 = vpop.f32.mrf.mxu0  ;;  %v5181_v1 = vpop.f32.mrf.mxu1 }
 0xd75   :  { %5200 = vst [vmem:[#allocation3 + $0x8] sm:$0xc0] %v5196_v36  ;;  %5202 = vst [vmem:[#allocation3 + $0x30] sm:$0xc0] %v5198_v4 }
 0xd8e   :  { %v5244_v13 = vpop.f32.mrf.mxu0  ;;  %v5285_v8 = vpop.f32.mrf.mxu1 }
 0xd8f   :  { %v5292_v5 = vadd.f32 %v5244_v13, %v5203_v14  ;;  %v5294_v56 = vadd.f32 %v5285_v8, %v5205_v20 }
 0xd90   :  { %v5246_v50 = vpop.f32.mrf.mxu0  ;;  %v5287_v16 = vpop.f32.mrf.mxu1 }
 0xd91   :  { %5296 = vst [vmem:[#allocation3 + $0x28] sm:$0x3] %v5292_v5  ;;  %5298 = vst [vmem:[#allocation3 + $0x10] sm:$0x3] %v5294_v56  ;;  %v5293_v10 = vadd.f32 %v5246_v50, %v5204_v17  ;;  %v5295_v42 = vadd.f32 %v5287_v16, %v5206_v34 }
 0xd92   :  { %v5248_v3 = vpop.f32.mrf.mxu0  ;;  %v5289_v21 = vpop.f32.mrf.mxu1 }
 0xd93   :  { %5297 = vst [vmem:[#allocation3] sm:$0x3] %v5293_v10  ;;  %5299 = vst [vmem:[#allocation3 + $0x20] sm:$0x3] %v5295_v42 }
 0xd94   :  { %v5249_v25 = vpop.f32.mrf.mxu0  ;;  %v5290_v18 = vpop.f32.mrf.mxu1 }
 0xd98   :  { %v5332_v11 = vld [vmem:[#allocation3 + $0x28] sm:$0x3]  ;;  %v5334_v0 = vld [vmem:[#allocation3 + $0x10] sm:$0x3] }
 0xd9a   :  { %v5333_v2 = vld [vmem:[#allocation3] sm:$0x3] }
 0xd9b   :  { %v5335_v20 = vld [vmem:[#allocation3 + $0x20] sm:$0x3] }
 0xdae   :  { %v5530_v49 = vpop.f32.mrf.mxu0  ;;  %v5571_v31 = vpop.f32.mrf.mxu1 }
 0xdaf   :  { %v5578_v19 = vadd.f32 %v5530_v49, %v5332_v11  ;;  %v5580_v13 = vadd.f32 %v5571_v31, %v5334_v0 }
 0xdb0   :  { %v5532_v40 = vpop.f32.mrf.mxu0  ;;  %v5573_v37 = vpop.f32.mrf.mxu1 }
 0xdb1   :  { %v5582_v9 = vmul.f32 0.5, %v5578_v19  ;;  %v5579_v26 = vadd.f32 %v5532_v40, %v5333_v2  ;;  %v5581_v8 = vadd.f32 %v5573_v37, %v5335_v20 }
 0xdb2   :  { %v5534_v58 = vpop.f32.mrf.mxu0  ;;  %v5575_v36 = vpop.f32.mrf.mxu1 }
 0xdb3   :  { %8136 = vtanh.f32 %v5582_v9  ;;  %v5586_v4 = vmul.f32 0.5, %v5579_v26  ;;  %v5591_v5 = vmul.f32 0.5, %v5581_v8  ;;  %v5600_v26 = vld [vmem:[#allocation3 + $0x28] sm:$0xc] }
 0xdb4   :  { %v5535_v1 = vpop.f32.mrf.mxu0  ;;  %v5576_v14 = vpop.f32.mrf.mxu1 }
 0xdb5   :  { %8138 = vtanh.f32 %v5586_v4  ;;  %v5601_v1 = vld [vmem:[#allocation3] sm:$0xc] }
 0xdb6   :  { %8140 = vtanh.f32 %v5580_v13 }
 0xdb7   :  { %8142 = vtanh.f32 %v5591_v5 }
 0xdc0   :  { %v8137_v56 = vpop.eup %8136 }
 0xdc1   :  { %v5584_v17 = vmul.f32 0.5, %v8137_v56 }
 0xdc2   :  { %v8139_v50 = vpop.eup %8138 }
 0xdc3   :  { %v5585_v34 = vadd.f32 0.5, %v5584_v17  ;;  %v5588_v16 = vmul.f32 0.5, %v8139_v50  ;;  %v8141_v42 = vpop.eup %8140 }
 0xdc4   :  { %v8143_v18 = vpop.eup %8142 }
 0xdc5   :  { %v5589_v10 = vadd.f32 0.5, %v5588_v16  ;;  %v5596_v21 = vmul.f32 %v8141_v42, %v5585_v34  ;;  %v5593_v11 = vmul.f32 0.5, %v8143_v18  ;;  %v5602_v34 = vld [vmem:[#allocation3 + $0x10] sm:$0xc]  ;;  %v5603_v42 = vld [vmem:[#allocation3 + $0x20] sm:$0xc] }
 0xdc7   :  { %v5595_v3 = vmul.f32 0.0, %v5589_v10  ;;  %v5594_v49 = vadd.f32 0.5, %v5593_v11 }
 0xdc9   :  { %v11854_v25 = vadd.f32 %v5596_v21, %v5595_v3 }
 0xdcb   :  { %8144 = vtanh.f32 %v11854_v25 }
 0xdd8   :  { %v8145_v31 = vpop.eup %8144 }
 0xdd9   :  { %v5599_v19 = vmul.f32 %v8145_v31, %v5594_v49 }
 0xddb   :  { %v5604_v2 = vpack.c.bf16 %v5599_v19, %v5599_v19 }
 0xddd   :  { %5638 = vmatmul.mubr.bf16.vlgmr.msra.gmra.mxu0 %v5604_v2  ;;  %5679 = vmatmul.mubr.bf16.vlgmr.msra.gmra.mxu1 %v5604_v2  ;;  %v5717_v2 = vrot.slane %v11854_v25, 6 }
 0xdde   :  { %5733 = vmatpush1.bf16.msra.mxu0 %v11722_v15  ;;  %5774 = vmatpush1.bf16.msra.mxu1 %v11724_v35 }
 0xddf   :  { %5734 = vmatprep.subr.bf16.mxu0 %v11728_v43  ;;  %5775 = vmatprep.subr.bf16.mxu1 %v11730_v59 }
 0xde0   :  { %5764 = vmatprep.mubr.bf16.mxu0 %v12638_v48  ;;  %5805 = vmatprep.mubr.bf16.mxu1 %v12638_v48 }
 0xde2   :  { %5735 = vmatpush1.bf16.msra.mxu0 %v11734_v27  ;;  %5776 = vmatpush1.bf16.msra.mxu1 %v11736_v32 }
 0xde3   :  { %5736 = vmatprep.subr.bf16.mxu0 %v11740_v51  ;;  %5777 = vmatprep.subr.bf16.mxu1 %v11742_v41 }
 0xde6   :  { %5737 = vmatpush1.bf16.msra.mxu0 %v11748_v57  ;;  %5778 = vmatpush1.bf16.msra.mxu1 %v11750_v33 }
 0xde7   :  { %5738 = vmatprep.subr.bf16.mxu0 %v11754_v29  ;;  %5779 = vmatprep.subr.bf16.mxu1 %v11756_v23 }
 0xdea   :  { %5739 = vmatpush1.bf16.msra.mxu0 %v11760_v22  ;;  %5780 = vmatpush1.bf16.msra.mxu1 %v11762_v38 }
 0xdeb   :  { %5740 = vmatprep.subr.bf16.mxu0 %v11766_v39  ;;  %5781 = vmatprep.subr.bf16.mxu1 %v11768_v44 }
 0xdee   :  { %5741 = vmatpush1.bf16.msra.mxu0 %v11772_v45  ;;  %5782 = vmatpush1.bf16.msra.mxu1 %v11774_v46 }
 0xdef   :  { %5742 = vmatprep.subr.bf16.mxu0 %v11778_v47  ;;  %5783 = vmatprep.subr.bf16.mxu1 %v11780_v52 }
 0xdf2   :  { %5743 = vmatpush1.bf16.msra.mxu0 %v11784_v53  ;;  %5784 = vmatpush1.bf16.msra.mxu1 %v11786_v54 }
 0xdf3   :  { %5744 = vmatprep.subr.bf16.mxu0 %v11790_v55  ;;  %5785 = vmatprep.subr.bf16.mxu1 %v11792_v60 }
 0xdf6   :  { %5745 = vmatpush1.bf16.msra.mxu0 %v11796_v61  ;;  %5786 = vmatpush1.bf16.msra.mxu1 %v11798_v62 }
 0xdf7   :  { %5746 = vmatprep.subr.bf16.mxu0 %v11802_v63  ;;  %5787 = vmatprep.subr.bf16.mxu1 %v11804_v6 }
 0xdfa   :  { %5747 = vmatpush1.bf16.msra.mxu0 %v11808_v7  ;;  %5788 = vmatpush1.bf16.msra.mxu1 %v11810_v24 }
 0xdfb   :  { %5859 = vmatprep.subr.bf16.mxu0 %v11716_v28  ;;  %5900 = vmatprep.subr.bf16.mxu1 %v11718_v12 }
 0xe9d   :  { %v5639_v40 = vpop.f32.mrf.mxu0  ;;  %v5680_v37 = vpop.f32.mrf.mxu1 }
 0xe9e   :  { %v5691_v9 = vrot.slane %v5639_v40, 6  ;;  %v5693_v8 = vrot.slane %v5680_v37, 6 }
 0xe9f   :  { %v5641_v58 = vpop.f32.mrf.mxu0  ;;  %v5682_v36 = vpop.f32.mrf.mxu1 }
 0xea0   :  { %v5699_v4 = vadd.f32 %v5691_v9, %v5600_v26  ;;  %v5692_v0 = vrot.slane %v5641_v58, 6  ;;  %v5701_v16 = vadd.f32 %v5693_v8, %v5602_v34  ;;  %v5694_v10 = vrot.slane %v5682_v36, 6 }
 0xea1   :  { %v5643_v14 = vpop.f32.mrf.mxu0  ;;  %v5684_v13 = vpop.f32.mrf.mxu1 }
 0xea2   :  { %v5703_v20 = vmul.f32 0.5, %v5699_v4  ;;  %v5700_v5 = vadd.f32 %v5692_v0, %v5601_v1  ;;  %v5702_v3 = vadd.f32 %v5694_v10, %v5603_v42  ;;  %v5725_v10 = vld [vmem:[#allocation3] sm:$0x30] }
 0xea3   :  { %v5644_v56 = vpop.f32.mrf.mxu0  ;;  %v5685_v17 = vpop.f32.mrf.mxu1 }
 0xea4   :  { %8146 = vtanh.f32 %v5703_v20  ;;  %v5707_v50 = vmul.f32 0.5, %v5700_v5  ;;  %v5712_v21 = vmul.f32 0.5, %v5702_v3  ;;  %v5724_v56 = vld [vmem:[#allocation3 + $0x28] sm:$0x30] }
 0xea6   :  { %8148 = vtanh.f32 %v5707_v50 }
 0xea7   :  { %8150 = vtanh.f32 %v5701_v16 }
 0xea8   :  { %8152 = vtanh.f32 %v5712_v21 }
 0xeb1   :  { %v8147_v18 = vpop.eup %8146 }
 0xeb2   :  { %v5705_v11 = vmul.f32 0.5, %v8147_v18 }
 0xeb3   :  { %v8149_v49 = vpop.eup %8148 }
 0xeb4   :  { %v5706_v31 = vadd.f32 0.5, %v5705_v11  ;;  %v5709_v19 = vmul.f32 0.5, %v8149_v49  ;;  %v8151_v37 = vpop.eup %8150 }
 0xeb5   :  { %v8153_v36 = vpop.eup %8152 }
 0xeb6   :  { %v5710_v40 = vadd.f32 0.5, %v5709_v19  ;;  %v5720_v26 = vmul.f32 %v8151_v37, %v5706_v31  ;;  %v5714_v4 = vmul.f32 0.5, %v8153_v36 }
 0xeb8   :  { %v5719_v9 = vmul.f32 %v5717_v2, %v5710_v40  ;;  %v5715_v0 = vadd.f32 0.5, %v5714_v4  ;;  %v5726_v2 = vld [vmem:[#allocation3 + $0x10] sm:$0x30] }
 0xeba   :  { %v11892_v58 = vadd.f32 %v5720_v26, %v5719_v9  ;;  %v5727_v9 = vld [vmem:[#allocation3 + $0x20] sm:$0x30] }
 0xebc   :  { %8154 = vtanh.f32 %v11892_v58 }
 0xec9   :  { %v8155_v1 = vpop.eup %8154 }
 0xeca   :  { %v5723_v14 = vmul.f32 %v8155_v1, %v5715_v0 }
 0xecc   :  { %v5728_v13 = vpack.c.bf16 %v5723_v14, %v5723_v14 }
 0xece   :  { %v5730_v20 = vrot.slane %v5728_v13, 1 }
 0xed0   :  { %5765 = vmatmul.mubr.bf16.vlgmr.msra.gmra.mxu0 %v5730_v20  ;;  %5806 = vmatmul.mubr.bf16.vlgmr.msra.gmra.mxu1 %v5730_v20 }
 0xed1   :  { %5860 = vmatpush1.bf16.msra.mxu0 %v11722_v15  ;;  %5901 = vmatpush1.bf16.msra.mxu1 %v11724_v35 }
 0xed2   :  { %5861 = vmatprep.subr.bf16.mxu0 %v11728_v43  ;;  %5902 = vmatprep.subr.bf16.mxu1 %v11730_v59 }
 0xed3   :  { %5891 = vmatprep.mubr.bf16.mxu0 %v12638_v48  ;;  %5932 = vmatprep.mubr.bf16.mxu1 %v12638_v48 }
 0xed5   :  { %5862 = vmatpush1.bf16.msra.mxu0 %v11734_v27  ;;  %5903 = vmatpush1.bf16.msra.mxu1 %v11736_v32 }
 0xed6   :  { %5863 = vmatprep.subr.bf16.mxu0 %v11740_v51  ;;  %5904 = vmatprep.subr.bf16.mxu1 %v11742_v41 }
 0xed9   :  { %5864 = vmatpush1.bf16.msra.mxu0 %v11748_v57  ;;  %5905 = vmatpush1.bf16.msra.mxu1 %v11750_v33 }
 0xeda   :  { %5865 = vmatprep.subr.bf16.mxu0 %v11754_v29  ;;  %5906 = vmatprep.subr.bf16.mxu1 %v11756_v23 }
 0xedd   :  { %5866 = vmatpush1.bf16.msra.mxu0 %v11760_v22  ;;  %5907 = vmatpush1.bf16.msra.mxu1 %v11762_v38 }
 0xede   :  { %5867 = vmatprep.subr.bf16.mxu0 %v11766_v39  ;;  %5908 = vmatprep.subr.bf16.mxu1 %v11768_v44 }
 0xee1   :  { %5868 = vmatpush1.bf16.msra.mxu0 %v11772_v45  ;;  %5909 = vmatpush1.bf16.msra.mxu1 %v11774_v46 }
 0xee2   :  { %5869 = vmatprep.subr.bf16.mxu0 %v11778_v47  ;;  %5910 = vmatprep.subr.bf16.mxu1 %v11780_v52 }
 0xee5   :  { %5870 = vmatpush1.bf16.msra.mxu0 %v11784_v53  ;;  %5911 = vmatpush1.bf16.msra.mxu1 %v11786_v54 }
 0xee6   :  { %5871 = vmatprep.subr.bf16.mxu0 %v11790_v55  ;;  %5912 = vmatprep.subr.bf16.mxu1 %v11792_v60 }
 0xee9   :  { %5872 = vmatpush1.bf16.msra.mxu0 %v11796_v61  ;;  %5913 = vmatpush1.bf16.msra.mxu1 %v11798_v62 }
 0xeea   :  { %5873 = vmatprep.subr.bf16.mxu0 %v11802_v63  ;;  %5914 = vmatprep.subr.bf16.mxu1 %v11804_v6 }
 0xeed   :  { %5874 = vmatpush1.bf16.msra.mxu0 %v11808_v7  ;;  %5915 = vmatpush1.bf16.msra.mxu1 %v11810_v24 }
 0xeee   :  { %5986 = vmatprep.subr.bf16.mxu0 %v11716_v28  ;;  %6027 = vmatprep.subr.bf16.mxu1 %v11718_v12 }
 0xf90   :  { %v5766_v25 = vpop.f32.mrf.mxu0  ;;  %v5807_v8 = vpop.f32.mrf.mxu1 }
 0xf91   :  { %v5818_v5 = vrot.slane %v5766_v25, 4  ;;  %v5820_v18 = vrot.slane %v5807_v8, 4  ;;  %v5844_v25 = vrot.slane %v11892_v58, 6 }
 0xf92   :  { %v5768_v17 = vpop.f32.mrf.mxu0  ;;  %v5809_v50 = vpop.f32.mrf.mxu1 }
 0xf93   :  { %v5826_v34 = vadd.f32 %v5818_v5, %v5724_v56  ;;  %v5819_v16 = vrot.slane %v5768_v17, 4  ;;  %v5828_v40 = vadd.f32 %v5820_v18, %v5726_v2  ;;  %v5821_v37 = vrot.slane %v5809_v50, 4 }
 0xf94   :  { %v5770_v42 = vpop.f32.mrf.mxu0  ;;  %v5811_v3 = vpop.f32.mrf.mxu1 }
 0xf95   :  { %v5830_v21 = vmul.f32 0.5, %v5826_v34  ;;  %v5827_v11 = vadd.f32 %v5819_v16, %v5725_v10  ;;  %v5829_v26 = vadd.f32 %v5821_v37, %v5727_v9  ;;  %v5852_v37 = vld [vmem:[#allocation3] sm:$0xc0] }
 0xf96   :  { %v5771_v49 = vpop.f32.mrf.mxu0  ;;  %v5812_v31 = vpop.f32.mrf.mxu1 }
 0xf97   :  { %8156 = vtanh.f32 %v5830_v21  ;;  %v5834_v19 = vmul.f32 0.5, %v5827_v11  ;;  %v5839_v36 = vmul.f32 0.5, %v5829_v26  ;;  %v5851_v49 = vld [vmem:[#allocation3 + $0x28] sm:$0xc0] }
 0xf99   :  { %8158 = vtanh.f32 %v5834_v19 }
 0xf9a   :  { %8160 = vtanh.f32 %v5828_v40 }
 0xf9b   :  { %8162 = vtanh.f32 %v5839_v36 }
 0xfa4   :  { %v8157_v4 = vpop.eup %8156 }
 0xfa5   :  { %v5832_v0 = vmul.f32 0.5, %v8157_v4 }
 0xfa6   :  { %v8159_v1 = vpop.eup %8158 }
 0xfa7   :  { %v5833_v14 = vadd.f32 0.5, %v5832_v0  ;;  %v5836_v13 = vmul.f32 0.5, %v8159_v1  ;;  %v8161_v8 = vpop.eup %8160 }
 0xfa8   :  { %v8163_v50 = vpop.eup %8162 }
 0xfa9   :  { %v5837_v20 = vadd.f32 0.5, %v5836_v13  ;;  %v5847_v56 = vmul.f32 %v8161_v8, %v5833_v14  ;;  %v5841_v34 = vmul.f32 0.5, %v8163_v50 }
 0xfab   :  { %v5846_v5 = vmul.f32 %v5844_v25, %v5837_v20  ;;  %v5842_v16 = vadd.f32 0.5, %v5841_v34  ;;  %v5853_v20 = vld [vmem:[#allocation3 + $0x10] sm:$0xc0] }
 0xfad   :  { %v11930_v17 = vadd.f32 %v5847_v56, %v5846_v5  ;;  %v5854_v5 = vld [vmem:[#allocation3 + $0x20] sm:$0xc0] }
 0xfaf   :  { %8164 = vtanh.f32 %v11930_v17 }
 0xfbc   :  { %v8165_v10 = vpop.eup %8164 }
 0xfbd   :  { %v5850_v42 = vmul.f32 %v8165_v10, %v5842_v16 }
 0xfbf   :  { %v5855_v3 = vpack.c.bf16 %v5850_v42, %v5850_v42 }
 0xfc1   :  { %v5857_v21 = vrot.slane %v5855_v3, 2 }
 0xfc3   :  { %5892 = vmatmul.mubr.bf16.vlgmr.msra.gmra.mxu0 %v5857_v21  ;;  %5933 = vmatmul.mubr.bf16.vlgmr.msra.gmra.mxu1 %v5857_v21 }
 0xfc4   :  { %5987 = vmatpush1.bf16.msra.mxu0 %v11722_v15  ;;  %6028 = vmatpush1.bf16.msra.mxu1 %v11724_v35 }
 0xfc5   :  { %5988 = vmatprep.subr.bf16.mxu0 %v11728_v43  ;;  %6029 = vmatprep.subr.bf16.mxu1 %v11730_v59 }
 0xfc6   :  { %6018 = vmatprep.mubr.bf16.mxu0 %v12638_v48  ;;  %6059 = vmatprep.mubr.bf16.mxu1 %v12638_v48 }
 0xfc8   :  { %5989 = vmatpush1.bf16.msra.mxu0 %v11734_v27  ;;  %6030 = vmatpush1.bf16.msra.mxu1 %v11736_v32 }
 0xfc9   :  { %5990 = vmatprep.subr.bf16.mxu0 %v11740_v51  ;;  %6031 = vmatprep.subr.bf16.mxu1 %v11742_v41 }
 0xfcc   :  { %5991 = vmatpush1.bf16.msra.mxu0 %v11748_v57  ;;  %6032 = vmatpush1.bf16.msra.mxu1 %v11750_v33 }
 0xfcd   :  { %5992 = vmatprep.subr.bf16.mxu0 %v11754_v29  ;;  %6033 = vmatprep.subr.bf16.mxu1 %v11756_v23 }
 0xfd0   :  { %5993 = vmatpush1.bf16.msra.mxu0 %v11760_v22  ;;  %6034 = vmatpush1.bf16.msra.mxu1 %v11762_v38 }
 0xfd1   :  { %5994 = vmatprep.subr.bf16.mxu0 %v11766_v39  ;;  %6035 = vmatprep.subr.bf16.mxu1 %v11768_v44 }
 0xfd4   :  { %5995 = vmatpush1.bf16.msra.mxu0 %v11772_v45  ;;  %6036 = vmatpush1.bf16.msra.mxu1 %v11774_v46 }
 0xfd5   :  { %5996 = vmatprep.subr.bf16.mxu0 %v11778_v47  ;;  %6037 = vmatprep.subr.bf16.mxu1 %v11780_v52 }
 0xfd8   :  { %5997 = vmatpush1.bf16.msra.mxu0 %v11784_v53  ;;  %6038 = vmatpush1.bf16.msra.mxu1 %v11786_v54 }
 0xfd9   :  { %5998 = vmatprep.subr.bf16.mxu0 %v11790_v55  ;;  %6039 = vmatprep.subr.bf16.mxu1 %v11792_v60 }
 0xfdc   :  { %5999 = vmatpush1.bf16.msra.mxu0 %v11796_v61  ;;  %6040 = vmatpush1.bf16.msra.mxu1 %v11798_v62 }
 0xfdd   :  { %6000 = vmatprep.subr.bf16.mxu0 %v11802_v63  ;;  %6041 = vmatprep.subr.bf16.mxu1 %v11804_v6 }
 0xfe0   :  { %6001 = vmatpush1.bf16.msra.mxu0 %v11808_v7  ;;  %6042 = vmatpush1.bf16.msra.mxu1 %v11810_v24 }
 0xfe1   :  { %6098 = vmatprep.subr.bf16.mxu0 %v11716_v28  ;;  %6139 = vmatprep.subr.bf16.mxu1 %v11718_v12 }
0x1083   :  { %v5893_v58 = vpop.f32.mrf.mxu0  ;;  %v5934_v18 = vpop.f32.mrf.mxu1 }
0x1084   :  { %v5945_v11 = vrot.slane %v5893_v58, 2  ;;  %v5947_v4 = vrot.slane %v5934_v18, 2  ;;  %v5971_v58 = vrot.slane %v11930_v17, 6 }
0x1085   :  { %v5895_v31 = vpop.f32.mrf.mxu0  ;;  %v5936_v19 = vpop.f32.mrf.mxu1 }
0x1086   :  { %v5953_v2 = vadd.f32 %v5945_v11, %v5851_v49  ;;  %v5946_v40 = vrot.slane %v5895_v31, 2  ;;  %v5955_v25 = vadd.f32 %v5947_v4, %v5853_v20  ;;  %v5948_v8 = vrot.slane %v5936_v19, 2 }
0x1087   :  { %v5897_v9 = vpop.f32.mrf.mxu0  ;;  %v5938_v26 = vpop.f32.mrf.mxu1 }
0x1088   :  { %v5957_v36 = vmul.f32 0.5, %v5953_v2  ;;  %v5954_v0 = vadd.f32 %v5946_v40, %v5852_v37  ;;  %v5956_v56 = vadd.f32 %v5948_v8, %v5854_v5 }
0x1089   :  { %v5898_v1 = vpop.f32.mrf.mxu0  ;;  %v5939_v14 = vpop.f32.mrf.mxu1 }
0x108a   :  { %8166 = vtanh.f32 %v5957_v36  ;;  %v5961_v13 = vmul.f32 0.5, %v5954_v0  ;;  %v5966_v50 = vmul.f32 0.5, %v5956_v56  ;;  %v5979_v0 = vld [vmem:[#allocation3 + $0x8] sm:$0x3]  ;;  %v5980_v56 = vld [vmem:[#allocation3 + $0x38] sm:$0x3] }
0x108c   :  { %8168 = vtanh.f32 %v5961_v13 }
0x108d   :  { %8170 = vtanh.f32 %v5955_v25 }
0x108e   :  { %8172 = vtanh.f32 %v5966_v50 }
0x1097   :  { %v8167_v34 = vpop.eup %8166 }
0x1098   :  { %v5959_v16 = vmul.f32 0.5, %v8167_v34 }
0x1099   :  { %v8169_v10 = vpop.eup %8168 }
0x109a   :  { %v5960_v42 = vadd.f32 0.5, %v5959_v16  ;;  %v5963_v3 = vmul.f32 0.5, %v8169_v10  ;;  %v8171_v18 = vpop.eup %8170 }
0x109b   :  { %v8173_v19 = vpop.eup %8172 }
0x109c   :  { %v5964_v21 = vadd.f32 0.5, %v5963_v3  ;;  %v5974_v49 = vmul.f32 %v8171_v18, %v5960_v42  ;;  %v5968_v2 = vmul.f32 0.5, %v8173_v19 }
0x109e   :  { %v5973_v11 = vmul.f32 %v5971_v58, %v5964_v21  ;;  %v5969_v40 = vadd.f32 0.5, %v5968_v2 }
0x10a0   :  { %v11968_v31 = vadd.f32 %v5974_v49, %v5973_v11 }
0x10a2   :  { %8174 = vtanh.f32 %v11968_v31  ;;  %v6086_v49 = vrot.slane %v11968_v31, 6  ;;  %v12012_v31 = vld [vmem:[#allocation11 + $0xe8] ss:$16 sps:$4 sm:$0xff]  }
0x10af   :  { %v8175_v37 = vpop.eup %8174 }
0x10b0   :  { %v5977_v9 = vmul.f32 %v8175_v37, %v5969_v40 }
0x10b2   :  { %v5982_v26 = vpack.c.bf16 %v5977_v9, %v5977_v9 }
0x10b4   :  { %v5984_v36 = vrot.slane %v5982_v26, 3 }
0x10b6   :  { %6019 = vmatmul.mubr.bf16.vlgmr.msra.gmra.mxu0 %v5984_v36  ;;  %6060 = vmatmul.mubr.bf16.vlgmr.msra.gmra.mxu1 %v5984_v36 }
0x10b7   :  { %6099 = vmatpush1.bf16.msra.mxu0 %v11722_v15  ;;  %6140 = vmatpush1.bf16.msra.mxu1 %v11724_v35  ;;  %v5978_v15 = vld [vmem:[#allocation3 + $0x18] sm:$0x3] }
0x10b8   :  { %6100 = vmatprep.subr.bf16.mxu0 %v11728_v43  ;;  %6141 = vmatprep.subr.bf16.mxu1 %v11730_v59 }
0x10b9   :  { %6130 = vmatprep.mubr.bf16.mxu0 %v12638_v48  ;;  %6171 = vmatprep.mubr.bf16.mxu1 %v12638_v48 }
0x10bb   :  { %6101 = vmatpush1.bf16.msra.mxu0 %v11734_v27  ;;  %6142 = vmatpush1.bf16.msra.mxu1 %v11736_v32 }
0x10bc   :  { %6102 = vmatprep.subr.bf16.mxu0 %v11740_v51  ;;  %6143 = vmatprep.subr.bf16.mxu1 %v11742_v41 }
0x10bf   :  { %6103 = vmatpush1.bf16.msra.mxu0 %v11748_v57  ;;  %6144 = vmatpush1.bf16.msra.mxu1 %v11750_v33 }
0x10c0   :  { %6104 = vmatprep.subr.bf16.mxu0 %v11754_v29  ;;  %6145 = vmatprep.subr.bf16.mxu1 %v11756_v23 }
0x10c3   :  { %6105 = vmatpush1.bf16.msra.mxu0 %v11760_v22  ;;  %6146 = vmatpush1.bf16.msra.mxu1 %v11762_v38 }
0x10c4   :  { %6106 = vmatprep.subr.bf16.mxu0 %v11766_v39  ;;  %6147 = vmatprep.subr.bf16.mxu1 %v11768_v44 }
0x10c7   :  { %6107 = vmatpush1.bf16.msra.mxu0 %v11772_v45  ;;  %6148 = vmatpush1.bf16.msra.mxu1 %v11774_v46 }
0x10c8   :  { %6108 = vmatprep.subr.bf16.mxu0 %v11778_v47  ;;  %6149 = vmatprep.subr.bf16.mxu1 %v11780_v52 }
0x10cb   :  { %6109 = vmatpush1.bf16.msra.mxu0 %v11784_v53  ;;  %6150 = vmatpush1.bf16.msra.mxu1 %v11786_v54 }
0x10cc   :  { %6110 = vmatprep.subr.bf16.mxu0 %v11790_v55  ;;  %6151 = vmatprep.subr.bf16.mxu1 %v11792_v60 }
0x10cf   :  { %6111 = vmatpush1.bf16.msra.mxu0 %v11796_v61  ;;  %6152 = vmatpush1.bf16.msra.mxu1 %v11798_v62 }
0x10d0   :  { %6112 = vmatprep.subr.bf16.mxu0 %v11802_v63  ;;  %6153 = vmatprep.subr.bf16.mxu1 %v11804_v6 }
0x10d3   :  { %6113 = vmatpush1.bf16.msra.mxu0 %v11808_v7  ;;  %6154 = vmatpush1.bf16.msra.mxu1 %v11810_v24 }
0x10d4   :  { %6225 = vmatprep.subr.bf16.mxu0 %v11716_v28  ;;  %6266 = vmatprep.subr.bf16.mxu1 %v11718_v12  ;;  %v5981_v28 = vld [vmem:[#allocation3 + $0x30] sm:$0x3] }
0x1176   :  { %v6020_v35 = vpop.f32.mrf.mxu0  ;;  %v6061_v17 = vpop.f32.mrf.mxu1 }
0x1177   :  { %v6068_v4 = vadd.f32 %v6020_v35, %v5978_v15  ;;  %v6070_v16 = vadd.f32 %v6061_v17, %v5980_v56 }
0x1178   :  { %v6022_v1 = vpop.f32.mrf.mxu0  ;;  %v6063_v14 = vpop.f32.mrf.mxu1 }
0x1179   :  { %v6072_v13 = vmul.f32 0.5, %v6068_v4  ;;  %v6069_v20 = vadd.f32 %v6022_v1, %v5979_v0  ;;  %v6071_v12 = vadd.f32 %v6063_v14, %v5981_v28  ;;  %v12009_v4 = vld [vmem:[#allocation11 + $0xe0] ss:$16 sps:$4 sm:$0xff]  }
0x117a   :  { %v6024_v25 = vpop.f32.mrf.mxu0  ;;  %v6065_v8 = vpop.f32.mrf.mxu1 }
0x117b   :  { %8176 = vtanh.f32 %v6072_v13  ;;  %v6076_v5 = vmul.f32 0.5, %v6069_v20  ;;  %v6081_v10 = vmul.f32 0.5, %v6071_v12 }
0x117c   :  { %v6025_v50 = vpop.f32.mrf.mxu0  ;;  %v6066_v34 = vpop.f32.mrf.mxu1 }
0x117d   :  { %8178 = vtanh.f32 %v6076_v5 }
0x117e   :  { %8180 = vtanh.f32 %v6070_v16 }
0x117f   :  { %8182 = vtanh.f32 %v6081_v10 }
0x1188   :  { %v8177_v42 = vpop.eup %8176 }
0x1189   :  { %v6074_v3 = vmul.f32 0.5, %v8177_v42  ;;  %v8424_v42 = vld [vmem:[#allocation11 + $0xc4] ss:$16 sps:$4 sm:$0xff]  }
0x118a   :  { %v8179_v21 = vpop.eup %8178 }
0x118b   :  { %v6075_v58 = vadd.f32 0.5, %v6074_v3  ;;  %v6078_v18 = vmul.f32 0.5, %v8179_v21  ;;  %v8181_v19 = vpop.eup %8180  ;;  %v8425_v3 = vld [vmem:[#allocation11 + $0xcc] ss:$16 sps:$4 sm:$0xff]   ;;  %v8426_v21 = vld [vmem:[#allocation11 + $0xc0] ss:$16 sps:$4 sm:$0xff]  }
0x118c   :  { %v8183_v9 = vpop.eup %8182 }
0x118d   :  { %v6079_v11 = vadd.f32 0.5, %v6078_v18  ;;  %v6089_v40 = vmul.f32 %v8181_v19, %v6075_v58  ;;  %v6083_v26 = vmul.f32 0.5, %v8183_v9  ;;  %v8427_v58 = vld [vmem:[#allocation11 + $0xc8] ss:$16 sps:$4 sm:$0xff]   ;;  %v8428_v18 = vld [vmem:[#allocation11 + $0xa4] ss:$16 sps:$4 sm:$0xff]  }
0x118e   :  { %v8431_v19 = vld [vmem:[#allocation11 + $0xa8] ss:$16 sps:$4 sm:$0xff]  }
0x118f   :  { %v6088_v2 = vmul.f32 %v6086_v49, %v6079_v11  ;;  %v6084_v36 = vadd.f32 0.5, %v6083_v26  ;;  %v8429_v11 = vld [vmem:[#allocation11 + $0xac] ss:$16 sps:$4 sm:$0xff]   ;;  %v8430_v49 = vld [vmem:[#allocation11 + $0xa0] ss:$16 sps:$4 sm:$0xff]  }
0x1190   :  { %v8435_v9 = vld [vmem:[#allocation11 + $0x88] ss:$16 sps:$4 sm:$0xff]   ;;  %v8436_v26 = vld [vmem:[#allocation11 + $0x64] ss:$16 sps:$4 sm:$0xff]  }
0x1191   :  { %v12006_v37 = vadd.f32 %v6089_v40, %v6088_v2  ;;  %v8432_v2 = vld [vmem:[#allocation11 + $0x84] ss:$16 sps:$4 sm:$0xff]   ;;  %v8433_v40 = vld [vmem:[#allocation11 + $0x8c] ss:$16 sps:$4 sm:$0xff]  }
0x1193   :  { %8184 = vtanh.f32 %v12006_v37  ;;  %v6210_v13 = vrot.slane %v12006_v37, 6  ;;  %v8434_v37 = vld [vmem:[#allocation11 + $0x80] ss:$16 sps:$4 sm:$0xff]  }
0x11a0   :  { %v8185_v15 = vpop.eup %8184 }
0x11a1   :  { %v6092_v35 = vmul.f32 %v8185_v15, %v6084_v36  ;;  %v8437_v36 = vld [vmem:[#allocation11 + $0x6c] ss:$16 sps:$4 sm:$0xff]   ;;  %v8438_v15 = vld [vmem:[#allocation11 + $0x60] ss:$16 sps:$4 sm:$0xff]  }
0x11a3   :  { %v6097_v17 = vpack.c.bf16 %v6092_v35, %v6092_v35  ;;  %v8439_v35 = vld [vmem:[#allocation11 + $0x68] ss:$16 sps:$4 sm:$0xff]  }
0x11a5   :  { %6131 = vmatmul.mubr.bf16.vlgmr.msra.gmra.mxu0 %v6097_v17  ;;  %6172 = vmatmul.mubr.bf16.vlgmr.msra.gmra.mxu1 %v6097_v17  ;;  %v8440_v17 = vld [vmem:[#allocation11 + $0x44] ss:$16 sps:$4 sm:$0xff]  }
0x11a6   :  { %6226 = vmatpush1.bf16.msra.mxu0 %v12009_v4  ;;  %6267 = vmatpush1.bf16.msra.mxu1 %v12012_v31 }
0x11a7   :  { %6227 = vmatprep.subr.bf16.mxu0 %v11728_v43  ;;  %6268 = vmatprep.subr.bf16.mxu1 %v11730_v59  ;;  %v8422_v43 = vld [vmem:[#allocation11 + $0xe4] ss:$16 sps:$4 sm:$0xff]   ;;  %v8423_v59 = vld [vmem:[#allocation11 + $0xec] ss:$16 sps:$4 sm:$0xff]  }
0x11a8   :  { %6257 = vmatprep.mubr.bf16.mxu0 %v12638_v48  ;;  %6298 = vmatprep.mubr.bf16.mxu1 %v12638_v48 }
0x11aa   :  { %6228 = vmatpush1.bf16.msra.mxu0 %v11734_v27  ;;  %6269 = vmatpush1.bf16.msra.mxu1 %v11736_v32 }
0x11ab   :  { %6229 = vmatprep.subr.bf16.mxu0 %v11740_v51  ;;  %6270 = vmatprep.subr.bf16.mxu1 %v11742_v41  ;;  %v6093_v41 = vld [vmem:[#allocation3 + $0x18] sm:$0xc] }
0x11ae   :  { %6230 = vmatpush1.bf16.msra.mxu0 %v11748_v57  ;;  %6271 = vmatpush1.bf16.msra.mxu1 %v11750_v33 }
0x11af   :  { %6231 = vmatprep.subr.bf16.mxu0 %v11754_v29  ;;  %6272 = vmatprep.subr.bf16.mxu1 %v11756_v23 }
0x11b2   :  { %6232 = vmatpush1.bf16.msra.mxu0 %v11760_v22  ;;  %6273 = vmatpush1.bf16.msra.mxu1 %v11762_v38  ;;  %v6094_v22 = vld [vmem:[#allocation3 + $0x8] sm:$0xc] }
0x11b3   :  { %6233 = vmatprep.subr.bf16.mxu0 %v11766_v39  ;;  %6274 = vmatprep.subr.bf16.mxu1 %v11768_v44 }
0x11b6   :  { %6234 = vmatpush1.bf16.msra.mxu0 %v11772_v45  ;;  %6275 = vmatpush1.bf16.msra.mxu1 %v11774_v46 }
0x11b7   :  { %6235 = vmatprep.subr.bf16.mxu0 %v11778_v47  ;;  %6276 = vmatprep.subr.bf16.mxu1 %v11780_v52 }
0x11ba   :  { %6236 = vmatpush1.bf16.msra.mxu0 %v11784_v53  ;;  %6277 = vmatpush1.bf16.msra.mxu1 %v11786_v54  ;;  %v6095_v54 = vld [vmem:[#allocation3 + $0x38] sm:$0xc] }
0x11bb   :  { %6237 = vmatprep.subr.bf16.mxu0 %v11790_v55  ;;  %6278 = vmatprep.subr.bf16.mxu1 %v11792_v60 }
0x11be   :  { %6238 = vmatpush1.bf16.msra.mxu0 %v11796_v61  ;;  %6279 = vmatpush1.bf16.msra.mxu1 %v11798_v62  ;;  %v6096_v61 = vld [vmem:[#allocation3 + $0x30] sm:$0xc] }
0x11bf   :  { %6239 = vmatprep.subr.bf16.mxu0 %v11802_v63  ;;  %6280 = vmatprep.subr.bf16.mxu1 %v11804_v6 }
0x11c2   :  { %6240 = vmatpush1.bf16.msra.mxu0 %v11808_v7  ;;  %6281 = vmatpush1.bf16.msra.mxu1 %v11810_v24 }
0x11c3   :  { %6352 = vmatprep.subr.bf16.mxu0 %v8422_v43  ;;  %6393 = vmatprep.subr.bf16.mxu1 %v8423_v59  ;;  %v8443_v43 = vld [vmem:[#allocation11 + $0x48] ss:$16 sps:$4 sm:$0xff]   ;;  %v8444_v59 = vld [vmem:[#allocation11 + $0x24] ss:$16 sps:$4 sm:$0xff]  }
0x1265   :  { %v6132_v27 = vpop.f32.mrf.mxu0  ;;  %v6173_v32 = vpop.f32.mrf.mxu1 }
0x1266   :  { %v6184_v51 = vrot.slane %v6132_v27, 6  ;;  %v6186_v45 = vrot.slane %v6173_v32, 6  ;;  %v8445_v27 = vld [vmem:[#allocation11 + $0x2c] ss:$16 sps:$4 sm:$0xff]   ;;  %v8446_v32 = vld [vmem:[#allocation11 + $0x20] ss:$16 sps:$4 sm:$0xff]  }
0x1267   :  { %v6134_v57 = vpop.f32.mrf.mxu0  ;;  %v6175_v33 = vpop.f32.mrf.mxu1 }
0x1268   :  { %v6192_v29 = vadd.f32 %v6184_v51, %v6093_v41  ;;  %v6185_v23 = vrot.slane %v6134_v57, 6  ;;  %v6194_v55 = vadd.f32 %v6186_v45, %v6095_v54  ;;  %v6187_v60 = vrot.slane %v6175_v33, 6  ;;  %v8447_v51 = vld [vmem:[#allocation11 + $0x28] ss:$16 sps:$4 sm:$0xff]   ;;  %v8448_v41 = vld [vmem:[#allocation11 + $0x4] ss:$16 sps:$4 sm:$0xff]  }
0x1269   :  { %v6136_v38 = vpop.f32.mrf.mxu0  ;;  %v6177_v39 = vpop.f32.mrf.mxu1  ;;  %v8449_v57 = vld [vmem:[#allocation11 + $0xc] ss:$16 sps:$4 sm:$0xff]   ;;  %v8450_v33 = vld [vmem:[#allocation11] ss:$16 sps:$4 sm:$0xff]   ;;  %v6217_v45 = vld [vmem:[#allocation3 + $0x18] sm:$0x30] }
0x126a   :  { %v6196_v44 = vmul.f32 0.5, %v6192_v29  ;;  %v6193_v46 = vadd.f32 %v6185_v23, %v6094_v22  ;;  %v6195_v62 = vadd.f32 %v6187_v60, %v6096_v61  ;;  %v8451_v29 = vld [vmem:[#allocation11 + $0x8] ss:$16 sps:$4 sm:$0xff]   ;;  %v7866_v23 = vld [vmem:[#allocation14 + $0xe4] ss:$16 sps:$4 sm:$0xff]  }
0x126b   :  { %v6137_v47 = vpop.f32.mrf.mxu0  ;;  %v6178_v52 = vpop.f32.mrf.mxu1  ;;  %v7869_v22 = vld [vmem:[#allocation14 + $0xec] ss:$16 sps:$4 sm:$0xff]   ;;  %v6218_v54 = vld [vmem:[#allocation3 + $0x8] sm:$0x30] }
0x126c   :  { %8186 = vtanh.f32 %v6196_v44  ;;  %v6200_v53 = vmul.f32 0.5, %v6193_v46  ;;  %v6205_v63 = vmul.f32 0.5, %v6195_v62 }
0x126e   :  { %8188 = vtanh.f32 %v6200_v53 }
0x126f   :  { %8190 = vtanh.f32 %v6194_v55 }
0x1270   :  { %8192 = vtanh.f32 %v6205_v63 }
0x1279   :  { %v8187_v6 = vpop.eup %8186 }
0x127a   :  { %v6198_v7 = vmul.f32 0.5, %v8187_v6 }
0x127b   :  { %v8189_v24 = vpop.eup %8188 }
0x127c   :  { %v6199_v0 = vadd.f32 0.5, %v6198_v7  ;;  %v6202_v1 = vmul.f32 0.5, %v8189_v24  ;;  %v8191_v20 = vpop.eup %8190 }
0x127d   :  { %v8193_v56 = vpop.eup %8192 }
0x127e   :  { %v6203_v14 = vadd.f32 0.5, %v6202_v1  ;;  %v6213_v8 = vmul.f32 %v8191_v20, %v6199_v0  ;;  %v6207_v50 = vmul.f32 0.5, %v8193_v56  ;;  %v6219_v0 = vld [vmem:[#allocation3 + $0x38] sm:$0x30] }
0x1280   :  { %v6212_v25 = vmul.f32 %v6210_v13, %v6203_v14  ;;  %v6208_v34 = vadd.f32 0.5, %v6207_v50  ;;  %v6220_v13 = vld [vmem:[#allocation3 + $0x30] sm:$0x30] }
0x1282   :  { %v12046_v5 = vadd.f32 %v6213_v8, %v6212_v25 }
0x1284   :  { %8194 = vtanh.f32 %v12046_v5 }
0x1291   :  { %v8195_v16 = vpop.eup %8194 }
0x1292   :  { %v6216_v28 = vmul.f32 %v8195_v16, %v6208_v34 }
0x1294   :  { %v6221_v12 = vpack.c.bf16 %v6216_v28, %v6216_v28 }
0x1296   :  { %v6223_v10 = vrot.slane %v6221_v12, 1  ;;  %v6337_v12 = vrot.slane %v12046_v5, 6  ;;  %v7870_v5 = vld [vmem:[#allocation14 + $0xc0] ss:$16 sps:$4 sm:$0xff]  }
0x1298   :  { %6258 = vmatmul.mubr.bf16.vlgmr.msra.gmra.mxu0 %v6223_v10  ;;  %6299 = vmatmul.mubr.bf16.vlgmr.msra.gmra.mxu1 %v6223_v10 }
0x1299   :  { %6353 = vmatpush1.bf16.msra.mxu0 %v12009_v4  ;;  %6394 = vmatpush1.bf16.msra.mxu1 %v12012_v31  ;;  %v8441_v4 = vld [vmem:[#allocation11 + $0x4c] ss:$16 sps:$4 sm:$0xff]   ;;  %v8442_v31 = vld [vmem:[#allocation11 + $0x40] ss:$16 sps:$4 sm:$0xff]  }
0x129a   :  { %6354 = vmatprep.subr.bf16.mxu0 %v8424_v42  ;;  %6395 = vmatprep.subr.bf16.mxu1 %v8425_v3 }
0x129b   :  { %6384 = vmatprep.mubr.bf16.mxu0 %v12638_v48  ;;  %6425 = vmatprep.mubr.bf16.mxu1 %v12638_v48 }
0x129d   :  { %6355 = vmatpush1.bf16.msra.mxu0 %v8426_v21  ;;  %6396 = vmatpush1.bf16.msra.mxu1 %v8427_v58 }
0x129e   :  { %6356 = vmatprep.subr.bf16.mxu0 %v8428_v18  ;;  %6397 = vmatprep.subr.bf16.mxu1 %v8429_v11 }
0x12a1   :  { %6357 = vmatpush1.bf16.msra.mxu0 %v8430_v49  ;;  %6398 = vmatpush1.bf16.msra.mxu1 %v8431_v19 }
0x12a2   :  { %6358 = vmatprep.subr.bf16.mxu0 %v8432_v2  ;;  %6399 = vmatprep.subr.bf16.mxu1 %v8433_v40  ;;  %v7864_v40 = vld [vmem:[#allocation14 + $0xe0] ss:$16 sps:$4 sm:$0xff]  }
0x12a5   :  { %6359 = vmatpush1.bf16.msra.mxu0 %v8434_v37  ;;  %6400 = vmatpush1.bf16.msra.mxu1 %v8435_v9  ;;  %v7867_v37 = vld [vmem:[#allocation14 + $0xe8] ss:$16 sps:$4 sm:$0xff]  }
0x12a6   :  { %6360 = vmatprep.subr.bf16.mxu0 %v8436_v26  ;;  %6401 = vmatprep.subr.bf16.mxu1 %v8437_v36  ;;  %v7872_v26 = vld [vmem:[#allocation14 + $0xc4] ss:$16 sps:$4 sm:$0xff]   ;;  %v7875_v36 = vld [vmem:[#allocation14 + $0xcc] ss:$16 sps:$4 sm:$0xff]  }
0x12a9   :  { %6361 = vmatpush1.bf16.msra.mxu0 %v8438_v15  ;;  %6402 = vmatpush1.bf16.msra.mxu1 %v8439_v35  ;;  %v7873_v15 = vld [vmem:[#allocation14 + $0xc8] ss:$16 sps:$4 sm:$0xff]   ;;  %v7878_v35 = vld [vmem:[#allocation14 + $0xa4] ss:$16 sps:$4 sm:$0xff]  }
0x12aa   :  { %6362 = vmatprep.subr.bf16.mxu0 %v8440_v17  ;;  %6403 = vmatprep.subr.bf16.mxu1 %v8441_v4  ;;  %v7881_v17 = vld [vmem:[#allocation14 + $0xac] ss:$16 sps:$4 sm:$0xff]   ;;  %v7876_v4 = vld [vmem:[#allocation14 + $0xa0] ss:$16 sps:$4 sm:$0xff]  }
0x12ad   :  { %6363 = vmatpush1.bf16.msra.mxu0 %v8442_v31  ;;  %6404 = vmatpush1.bf16.msra.mxu1 %v8443_v43  ;;  %v7879_v31 = vld [vmem:[#allocation14 + $0xa8] ss:$16 sps:$4 sm:$0xff]   ;;  %v7884_v43 = vld [vmem:[#allocation14 + $0x84] ss:$16 sps:$4 sm:$0xff]  }
0x12ae   :  { %6364 = vmatprep.subr.bf16.mxu0 %v8444_v59  ;;  %6405 = vmatprep.subr.bf16.mxu1 %v8445_v27  ;;  %v7887_v59 = vld [vmem:[#allocation14 + $0x8c] ss:$16 sps:$4 sm:$0xff]   ;;  %v7882_v27 = vld [vmem:[#allocation14 + $0x80] ss:$16 sps:$4 sm:$0xff]  }
0x12b1   :  { %6365 = vmatpush1.bf16.msra.mxu0 %v8446_v32  ;;  %6406 = vmatpush1.bf16.msra.mxu1 %v8447_v51  ;;  %v7885_v32 = vld [vmem:[#allocation14 + $0x88] ss:$16 sps:$4 sm:$0xff]   ;;  %v7890_v51 = vld [vmem:[#allocation14 + $0x64] ss:$16 sps:$4 sm:$0xff]  }
0x12b2   :  { %6366 = vmatprep.subr.bf16.mxu0 %v8448_v41  ;;  %6407 = vmatprep.subr.bf16.mxu1 %v8449_v57  ;;  %v7893_v41 = vld [vmem:[#allocation14 + $0x6c] ss:$16 sps:$4 sm:$0xff]   ;;  %v7888_v57 = vld [vmem:[#allocation14 + $0x60] ss:$16 sps:$4 sm:$0xff]  }
0x12b5   :  { %6367 = vmatpush1.bf16.msra.mxu0 %v8450_v33  ;;  %6408 = vmatpush1.bf16.msra.mxu1 %v8451_v29  ;;  %v7891_v33 = vld [vmem:[#allocation14 + $0x68] ss:$16 sps:$4 sm:$0xff]   ;;  %v7896_v29 = vld [vmem:[#allocation14 + $0x44] ss:$16 sps:$4 sm:$0xff]  }
0x12b6   :  { %6695 = vmatprep.subr.bf16.mxu0 %v7866_v23  ;;  %6735 = vmatprep.subr.bf16.mxu1 %v7869_v22  ;;  %v7899_v23 = vld [vmem:[#allocation14 + $0x4c] ss:$16 sps:$4 sm:$0xff]   ;;  %v7894_v22 = vld [vmem:[#allocation14 + $0x40] ss:$16 sps:$4 sm:$0xff]  }
0x1358   :  { %v6259_v38 = vpop.f32.mrf.mxu0  ;;  %v6300_v39 = vpop.f32.mrf.mxu1 }
0x1359   :  { %v6311_v44 = vrot.slane %v6259_v38, 4  ;;  %v6313_v62 = vrot.slane %v6300_v39, 4  ;;  %v7897_v38 = vld [vmem:[#allocation14 + $0x48] ss:$16 sps:$4 sm:$0xff]   ;;  %v7902_v39 = vld [vmem:[#allocation14 + $0x24] ss:$16 sps:$4 sm:$0xff]  }
0x135a   :  { %v6261_v46 = vpop.f32.mrf.mxu0  ;;  %v6302_v47 = vpop.f32.mrf.mxu1 }
0x135b   :  { %v6319_v52 = vadd.f32 %v6311_v44, %v6217_v45  ;;  %v6312_v53 = vrot.slane %v6261_v46, 4  ;;  %v6321_v1 = vadd.f32 %v6313_v62, %v6219_v0  ;;  %v6314_v14 = vrot.slane %v6302_v47, 4  ;;  %v7905_v44 = vld [vmem:[#allocation14 + $0x2c] ss:$16 sps:$4 sm:$0xff]   ;;  %v7900_v45 = vld [vmem:[#allocation14 + $0x20] ss:$16 sps:$4 sm:$0xff]  }
0x135c   :  { %v6263_v55 = vpop.f32.mrf.mxu0  ;;  %v6304_v60 = vpop.f32.mrf.mxu1  ;;  %v7903_v46 = vld [vmem:[#allocation14 + $0x28] ss:$16 sps:$4 sm:$0xff]   ;;  %v7908_v47 = vld [vmem:[#allocation14 + $0x4] ss:$16 sps:$4 sm:$0xff]  }
0x135d   :  { %v6323_v61 = vmul.f32 0.5, %v6319_v52  ;;  %v6320_v63 = vadd.f32 %v6312_v53, %v6218_v54  ;;  %v6322_v20 = vadd.f32 %v6314_v14, %v6220_v13  ;;  %v7911_v52 = vld [vmem:[#allocation14 + $0xc] ss:$16 sps:$4 sm:$0xff]   ;;  %v7906_v53 = vld [vmem:[#allocation14] ss:$16 sps:$4 sm:$0xff]  }
0x135e   :  { %v6264_v6 = vpop.f32.mrf.mxu0  ;;  %v6305_v7 = vpop.f32.mrf.mxu1  ;;  %v7909_v54 = vld [vmem:[#allocation14 + $0x8] ss:$16 sps:$4 sm:$0xff]   ;;  %v7914_v55 = vld [vmem:[#allocation12 + $0xe4] ss:$16 sps:$4 sm:$0xff]   ;;  %v7917_v60 = vld [vmem:[#allocation12 + $0xec] ss:$16 sps:$4 sm:$0xff]  }
0x135f   :  { %8196 = vtanh.f32 %v6323_v61  ;;  %v6327_v24 = vmul.f32 0.5, %v6320_v63  ;;  %v6332_v25 = vmul.f32 0.5, %v6322_v20  ;;  %v7912_v61 = vld [vmem:[#allocation12 + $0xe0] ss:$16 sps:$4 sm:$0xff]   ;;  %v7915_v62 = vld [vmem:[#allocation12 + $0xe8] ss:$16 sps:$4 sm:$0xff]  }
0x1360   :  { %v7920_v63 = vld [vmem:[#allocation12 + $0xc4] ss:$16 sps:$4 sm:$0xff]   ;;  %v7923_v6 = vld [vmem:[#allocation12 + $0xcc] ss:$16 sps:$4 sm:$0xff]   ;;  %v7921_v0 = vld [vmem:[#allocation12 + $0xc8] ss:$16 sps:$4 sm:$0xff]  }
0x1361   :  { %8198 = vtanh.f32 %v6327_v24  ;;  %v13748_v7 = vld [vmem:[#allocation182_spill] sm:$0xff]  ;;  %v7927_v20 = vld [vmem:[#allocation12 + $0xa8] ss:$16 sps:$4 sm:$0xff]  }
0x1362   :  { %8200 = vtanh.f32 %v6321_v1  ;;  %v7918_v24 = vld [vmem:[#allocation12 + $0xc0] ss:$16 sps:$4 sm:$0xff]   ;;  %v7926_v1 = vld [vmem:[#allocation12 + $0xa4] ss:$16 sps:$4 sm:$0xff]   ;;  %v7929_v14 = vld [vmem:[#allocation12 + $0xac] ss:$16 sps:$4 sm:$0xff]  }
0x1363   :  { %8202 = vtanh.f32 %v6332_v25  ;;  %v7924_v13 = vld [vmem:[#allocation12 + $0xa0] ss:$16 sps:$4 sm:$0xff]   ;;  %v7932_v25 = vld [vmem:[#allocation12 + $0x84] ss:$16 sps:$4 sm:$0xff]  }
0x136c   :  { %v8197_v8 = vpop.eup %8196 }
0x136d   :  { %v6325_v56 = vmul.f32 0.5, %v8197_v8  ;;  %v7935_v8 = vld [vmem:[#allocation12 + $0x8c] ss:$16 sps:$4 sm:$0xff]  }
0x136e   :  { %v8199_v50 = vpop.eup %8198 }
0x136f   :  { %v6326_v34 = vadd.f32 0.5, %v6325_v56  ;;  %v6329_v16 = vmul.f32 0.5, %v8199_v50  ;;  %v8201_v10 = vpop.eup %8200  ;;  %v7930_v56 = vld [vmem:[#allocation12 + $0x80] ss:$16 sps:$4 sm:$0xff]   ;;  %v7933_v50 = vld [vmem:[#allocation12 + $0x88] ss:$16 sps:$4 sm:$0xff]  }
0x1370   :  { %v8203_v58 = vpop.eup %8202 }
0x1371   :  { %v6330_v28 = vadd.f32 0.5, %v6329_v16  ;;  %v6340_v3 = vmul.f32 %v8201_v10, %v6326_v34  ;;  %v6334_v18 = vmul.f32 0.5, %v8203_v58  ;;  %v7938_v34 = vld [vmem:[#allocation12 + $0x64] ss:$16 sps:$4 sm:$0xff]   ;;  %v7941_v16 = vld [vmem:[#allocation12 + $0x6c] ss:$16 sps:$4 sm:$0xff]  }
0x1372   :  { %v7947_v10 = vld [vmem:[#allocation12 + $0x4c] ss:$16 sps:$4 sm:$0xff]   ;;  %v7950_v58 = vld [vmem:[#allocation12 + $0x24] ss:$16 sps:$4 sm:$0xff]  }
0x1373   :  { %v6339_v42 = vmul.f32 %v6337_v12, %v6330_v28  ;;  %v6335_v11 = vadd.f32 0.5, %v6334_v18  ;;  %v7936_v28 = vld [vmem:[#allocation12 + $0x60] ss:$16 sps:$4 sm:$0xff]   ;;  %v7944_v12 = vld [vmem:[#allocation12 + $0x44] ss:$16 sps:$4 sm:$0xff]  }
0x1374   :  { %v7953_v18 = vld [vmem:[#allocation12 + $0x2c] ss:$16 sps:$4 sm:$0xff]  }
0x1375   :  { %v12054_v21 = vadd.f32 %v6340_v3, %v6339_v42  ;;  %v7942_v42 = vld [vmem:[#allocation12 + $0x40] ss:$16 sps:$4 sm:$0xff]   ;;  %v7945_v3 = vld [vmem:[#allocation12 + $0x48] ss:$16 sps:$4 sm:$0xff]  }
0x1377   :  { %8204 = vtanh.f32 %v12054_v21 }
0x1384   :  { %v8205_v49 = vpop.eup %8204 }
0x1385   :  { %v6343_v19 = vmul.f32 %v8205_v49, %v6335_v11  ;;  %v7948_v11 = vld [vmem:[#allocation12 + $0x20] ss:$16 sps:$4 sm:$0xff]   ;;  %v7951_v49 = vld [vmem:[#allocation12 + $0x28] ss:$16 sps:$4 sm:$0xff]  }
0x1387   :  { %v6348_v2 = vpack.c.bf16 %v6343_v19, %v6343_v19  ;;  %v7956_v19 = vld [vmem:[#allocation12 + $0x4] ss:$16 sps:$4 sm:$0xff]  }
0x1389   :  { %v6350_v9 = vrot.slane %v6348_v2, 2  ;;  %v7959_v2 = vld [vmem:[#allocation12 + $0xc] ss:$16 sps:$4 sm:$0xff]  }
0x138b   :  { %6385 = vmatmul.mubr.bf16.vlgmr.msra.gmra.mxu0 %v6350_v9  ;;  %6426 = vmatmul.mubr.bf16.vlgmr.msra.gmra.mxu1 %v6350_v9  ;;  %v7960_v9 = vld [vmem:[%s12138_s11 + $0x38] sm:$0xff]  }
0x138c   :  { %6696 = vmatpush1.bf16.msra.mxu0 %v7864_v40  ;;  %6736 = vmatpush1.bf16.msra.mxu1 %v7867_v37  ;;  %v7954_v40 = vld [vmem:[#allocation12] ss:$16 sps:$4 sm:$0xff]   ;;  %v7957_v37 = vld [vmem:[#allocation12 + $0x8] ss:$16 sps:$4 sm:$0xff]  }
0x138d   :  { %6697 = vmatprep.subr.bf16.mxu0 %v7872_v26  ;;  %6737 = vmatprep.subr.bf16.mxu1 %v7875_v36  ;;  %v8656_v26 = vmov 0.0   ;;  %v7961_v36 = vld [vmem:[%s12138_s11 + $0x30] sm:$0xff]  }
0x138e   :  { %6727 = vmatprep.mubr.bf16.mxu0 %v12638_v48  ;;  %6767 = vmatprep.mubr.bf16.mxu1 %v12638_v48 }
0x1390   :  { %6698 = vmatpush1.bf16.msra.mxu0 %v7870_v5  ;;  %6738 = vmatpush1.bf16.msra.mxu1 %v7873_v15  ;;  %v7962_v5 = vld [vmem:[%s12138_s11 + $0x28] sm:$0xff]   ;;  %v7964_v15 = vld [vmem:[%s12138_s11 + $0x18] sm:$0xff]  }
0x1391   :  { %6699 = vmatprep.subr.bf16.mxu0 %v7878_v35  ;;  %6739 = vmatprep.subr.bf16.mxu1 %v7881_v17  ;;  %v7965_v35 = vld [vmem:[%s12138_s11 + $0x10] sm:$0xff]   ;;  %v7966_v17 = vld [vmem:[%s12138_s11 + $0x8] sm:$0xff]  }
0x1394   :  { %6700 = vmatpush1.bf16.msra.mxu0 %v7876_v4  ;;  %6740 = vmatpush1.bf16.msra.mxu1 %v7879_v31  ;;  %v7967_v4 = vld [vmem:[%s12138_s11] sm:$0xff]   ;;  %v7968_v31 = vld [vmem:[%s12139_s12 + $0x38] sm:$0xff]  }
0x1395   :  { %6701 = vmatprep.subr.bf16.mxu0 %v7884_v43  ;;  %6741 = vmatprep.subr.bf16.mxu1 %v7887_v59  ;;  %v7969_v43 = vld [vmem:[%s12139_s12 + $0x30] sm:$0xff]   ;;  %v7970_v59 = vld [vmem:[%s12139_s12 + $0x28] sm:$0xff]  }
0x1398   :  { %6702 = vmatpush1.bf16.msra.mxu0 %v7882_v27  ;;  %6742 = vmatpush1.bf16.msra.mxu1 %v7885_v32  ;;  %v7971_v27 = vld [vmem:[%s12139_s12 + $0x20] sm:$0xff]   ;;  %v7972_v32 = vld [vmem:[%s12139_s12 + $0x18] sm:$0xff]  }
0x1399   :  { %6703 = vmatprep.subr.bf16.mxu0 %v7890_v51  ;;  %6743 = vmatprep.subr.bf16.mxu1 %v7893_v41  ;;  %v7973_v51 = vld [vmem:[%s12139_s12 + $0x10] sm:$0xff]   ;;  %v7285_v41 = vld [vmem:[#allocation17] sm:$0x3] }
0x139a   :  { %7287 = vrot.lane.b32.xlu0 %v7285_v41, %s8645_s27 }
0x139c   :  { %6704 = vmatpush1.bf16.msra.mxu0 %v7888_v57  ;;  %6744 = vmatpush1.bf16.msra.mxu1 %v7891_v33  ;;  %v7974_v57 = vld [vmem:[%s12139_s12 + $0x8] sm:$0xff]   ;;  %v7975_v33 = vld [vmem:[%s12139_s12] sm:$0xff]  }
0x139d   :  { %6705 = vmatprep.subr.bf16.mxu0 %v7896_v29  ;;  %6745 = vmatprep.subr.bf16.mxu1 %v7899_v23 }
0x13a0   :  { %6706 = vmatpush1.bf16.msra.mxu0 %v7894_v22  ;;  %6746 = vmatpush1.bf16.msra.mxu1 %v7897_v38  ;;  %v6344_v38 = vld [vmem:[#allocation3 + $0x18] sm:$0xc0] }
0x13a1   :  { %6707 = vmatprep.subr.bf16.mxu0 %v7902_v39  ;;  %6747 = vmatprep.subr.bf16.mxu1 %v7905_v44 }
0x13a4   :  { %6708 = vmatpush1.bf16.msra.mxu0 %v7900_v45  ;;  %6748 = vmatpush1.bf16.msra.mxu1 %v7903_v46 }
0x13a5   :  { %6709 = vmatprep.subr.bf16.mxu0 %v7908_v47  ;;  %6749 = vmatprep.subr.bf16.mxu1 %v7911_v52  ;;  %v6345_v47 = vld [vmem:[#allocation3 + $0x8] sm:$0xc0] }
0x13a8   :  { %6710 = vmatpush1.bf16.msra.mxu0 %v7906_v53  ;;  %6750 = vmatpush1.bf16.msra.mxu1 %v7909_v54 }
0x13a9   :  { %6936 = vmatprep.subr.bf16.mxu0 %v7914_v55  ;;  %6976 = vmatprep.subr.bf16.mxu1 %v7917_v60 }
0x13ab   :  { %6728 = vmatmul.mubr.bf16.vlgmr.msra.gmra.mxu0 %v13748_v7  ;;  %6768 = vmatmul.mubr.bf16.vlgmr.msra.gmra.mxu1 %v13748_v7 }
0x13ac   :  { %6937 = vmatpush1.bf16.msra.mxu0 %v7912_v61  ;;  %6977 = vmatpush1.bf16.msra.mxu1 %v7915_v62 }
0x13ad   :  { %6938 = vmatprep.subr.bf16.mxu0 %v7920_v63  ;;  %6978 = vmatprep.subr.bf16.mxu1 %v7923_v6  ;;  %v6346_v6 = vld [vmem:[#allocation3 + $0x38] sm:$0xc0] }
0x13ae   :  { %6968 = vmatprep.mubr.bf16.mxu0 %v12638_v48  ;;  %7008 = vmatprep.mubr.bf16.mxu1 %v12638_v48  ;;  %v7939_v48 = vld [vmem:[#allocation12 + $0x68] ss:$16 sps:$4 sm:$0xff]  }
0x13b0   :  { %6939 = vmatpush1.bf16.msra.mxu0 %v7918_v24  ;;  %6979 = vmatpush1.bf16.msra.mxu1 %v7921_v0  ;;  %v6347_v0 = vld [vmem:[#allocation3 + $0x30] sm:$0xc0] }
0x13b1   :  { %6940 = vmatprep.subr.bf16.mxu0 %v7926_v1  ;;  %6980 = vmatprep.subr.bf16.mxu1 %v7929_v14 }
0x13b4   :  { %6941 = vmatpush1.bf16.msra.mxu0 %v7924_v13  ;;  %6981 = vmatpush1.bf16.msra.mxu1 %v7927_v20 }
0x13b5   :  { %6942 = vmatprep.subr.bf16.mxu0 %v7932_v25  ;;  %6982 = vmatprep.subr.bf16.mxu1 %v7935_v8 }
0x13b8   :  { %6943 = vmatpush1.bf16.msra.mxu0 %v7930_v56  ;;  %6983 = vmatpush1.bf16.msra.mxu1 %v7933_v50 }
0x13b9   :  { %6944 = vmatprep.subr.bf16.mxu0 %v7938_v34  ;;  %6984 = vmatprep.subr.bf16.mxu1 %v7941_v16  ;;  %v6464_v34 = vrot.slane %v12054_v21, 6 }
0x13bc   :  { %6945 = vmatpush1.bf16.msra.mxu0 %v7936_v28  ;;  %6985 = vmatpush1.bf16.msra.mxu1 %v7939_v48 }
0x13bd   :  { %6946 = vmatprep.subr.bf16.mxu0 %v7944_v12  ;;  %6986 = vmatprep.subr.bf16.mxu1 %v7947_v10 }
0x13c0   :  { %6947 = vmatpush1.bf16.msra.mxu0 %v7942_v42  ;;  %6987 = vmatpush1.bf16.msra.mxu1 %v7945_v3 }
0x13c1   :  { %6948 = vmatprep.subr.bf16.mxu0 %v7950_v58  ;;  %6988 = vmatprep.subr.bf16.mxu1 %v7953_v18 }
0x13c4   :  { %6949 = vmatpush1.bf16.msra.mxu0 %v7948_v11  ;;  %6989 = vmatpush1.bf16.msra.mxu1 %v7951_v49 }
0x13c5   :  { %6950 = vmatprep.subr.bf16.mxu0 %v7956_v19  ;;  %6990 = vmatprep.subr.bf16.mxu1 %v7959_v2 }
0x13c8   :  { %6951 = vmatpush1.bf16.msra.mxu0 %v7954_v40  ;;  %6991 = vmatpush1.bf16.msra.mxu1 %v7957_v37 }
0x13c9   :  { %7682 = vmatprep.subr.bf16.mxu1 %v8656_v26  ;;  %7662 = vmatprep.subr.bf16.mxu0 %v8656_v26 }
0x13cb   :  { %6969 = vmatmul.mubr.bf16.vlgmr.msra.gmra.mxu0 %v11682_v30  ;;  %7009 = vmatmul.mubr.bf16.vlgmr.msra.gmra.mxu1 %v11682_v30  ;;  %v7963_v30 = vld [vmem:[%s12138_s11 + $0x20] sm:$0xff]  }
0x13cc   :  { %7683 = vmatpush3.bf16.msra.mxu1 %v7960_v9  ;;  %7698 = vmatprep.mubr.msk.bf16.mxu1 %vm8657_vm1, %v8656_v26 }
0x13cd   :  { %7684 = vmatprep.subr.bf16.mxu1 %v8656_v26  ;;  %7678 = vmatprep.mubr.msk.bf16.mxu0 %vm8657_vm1, %v8656_v26 }
0x13ce   :  { %7663 = vmatpush3.bf16.msra.mxu0 %v7968_v31 }
0x13cf   :  { %7664 = vmatprep.subr.bf16.mxu0 %v8656_v26 }
0x13d0   :  { %7685 = vmatpush3.bf16.msra.mxu1 %v7961_v36 }
0x13d1   :  { %7686 = vmatprep.subr.bf16.mxu1 %v8656_v26 }
0x13d2   :  { %7665 = vmatpush3.bf16.msra.mxu0 %v7969_v43 }
0x13d3   :  { %7666 = vmatprep.subr.bf16.mxu0 %v8656_v26 }
0x13d4   :  { %7687 = vmatpush3.bf16.msra.mxu1 %v7962_v5  ;;  %v7017_v5 = vld [vmem:[#allocation15] sm:$0xf] }
0x13d5   :  { %7688 = vmatprep.subr.bf16.mxu1 %v8656_v26 }
0x13d6   :  { %7667 = vmatpush3.bf16.msra.mxu0 %v7970_v59 }
0x13d7   :  { %7668 = vmatprep.subr.bf16.mxu0 %v8656_v26 }
0x13d8   :  { %7689 = vmatpush3.bf16.msra.mxu1 %v7963_v30  ;;  %v13749_v30 = vld [vmem:[#allocation72_spill] sm:$0xff] }
0x13d9   :  { %7690 = vmatprep.subr.bf16.mxu1 %v8656_v26 }
0x13da   :  { %7669 = vmatpush3.bf16.msra.mxu0 %v7971_v27 }
0x13db   :  { %7670 = vmatprep.subr.bf16.mxu0 %v8656_v26 }
0x13dc   :  { %7691 = vmatpush3.bf16.msra.mxu1 %v7964_v15  ;;  %v7022_v15 = vrot.slane %v7017_v5, %v13749_v30 }
0x13dd   :  { %7692 = vmatprep.subr.bf16.mxu1 %v8656_v26 }
0x13de   :  { %7671 = vmatpush3.bf16.msra.mxu0 %v7972_v32  ;;  %v13750_v32 = vld [vmem:[#allocation78_spill] sm:$0xff] }
0x13df   :  { %7672 = vmatprep.subr.bf16.mxu0 %v8656_v26 }
0x13e0   :  { %7693 = vmatpush3.bf16.msra.mxu1 %v7965_v35 }
0x13e1   :  { %7694 = vmatprep.subr.bf16.mxu1 %v8656_v26 }
0x13e2   :  { %7673 = vmatpush3.bf16.msra.mxu0 %v7973_v51  ;;  %v7026_v51 = vrot.slane %v7017_v5, %v13750_v32 }
0x13e3   :  { %7674 = vmatprep.subr.bf16.mxu0 %v8656_v26 }
0x13e4   :  { %7695 = vmatpush3.bf16.msra.mxu1 %v7966_v17 }
0x13e5   :  { %7696 = vmatprep.subr.bf16.mxu1 %v8656_v26 }
0x13e6   :  { %7675 = vmatpush3.bf16.msra.mxu0 %v7974_v57 }
0x13e7   :  { %7676 = vmatprep.subr.bf16.mxu0 %v8656_v26 }
0x13e8   :  { %7697 = vmatpush3.bf16.msra.mxu1 %v7967_v4 }
0x13ea   :  { %7677 = vmatpush3.bf16.msra.mxu0 %v7975_v33 }
0x144b   :  { %v6386_v29 = vpop.f32.mrf.mxu0  ;;  %v6427_v23 = vpop.f32.mrf.mxu1 }
0x144c   :  { %v6438_v22 = vrot.slane %v6386_v29, 2  ;;  %v6440_v55 = vrot.slane %v6427_v23, 2 }
0x144d   :  { %v6388_v39 = vpop.f32.mrf.mxu0  ;;  %v6429_v44 = vpop.f32.mrf.mxu1 }
0x144e   :  { %v6446_v45 = vadd.f32 %v6438_v22, %v6344_v38  ;;  %v6439_v46 = vrot.slane %v6388_v39, 2  ;;  %v6448_v7 = vadd.f32 %v6440_v55, %v6346_v6  ;;  %v6441_v24 = vrot.slane %v6429_v44, 2  ;;  %v13751_v39 = vld [vmem:[#allocation82_spill] sm:$0xff] }
0x144f   :  { %v6390_v52 = vpop.f32.mrf.mxu0  ;;  %v6431_v53 = vpop.f32.mrf.mxu1  ;;  %v7030_v44 = vrot.slane %v7017_v5, %v13751_v39 }
0x1450   :  { %v6450_v54 = vmul.f32 0.5, %v6446_v45  ;;  %v6447_v60 = vadd.f32 %v6439_v46, %v6345_v47  ;;  %v6449_v1 = vadd.f32 %v6441_v24, %v6347_v0 }
0x1451   :  { %v6391_v61 = vpop.f32.mrf.mxu0  ;;  %v6432_v62 = vpop.f32.mrf.mxu1 }
0x1452   :  { %8206 = vtanh.f32 %v6450_v54  ;;  %v6454_v63 = vmul.f32 0.5, %v6447_v60  ;;  %v6459_v14 = vmul.f32 0.5, %v6449_v1 }
0x1454   :  { %8208 = vtanh.f32 %v6454_v63 }
0x1455   :  { %8210 = vtanh.f32 %v6448_v7 }
0x1456   :  { %8212 = vtanh.f32 %v6459_v14 }
0x145f   :  { %v8207_v13 = vpop.eup %8206 }
0x1460   :  { %v6452_v20 = vmul.f32 0.5, %v8207_v13 }
0x1461   :  { %v8209_v25 = vpop.eup %8208 }
0x1462   :  { %v6453_v8 = vadd.f32 0.5, %v6452_v20  ;;  %v6456_v56 = vmul.f32 0.5, %v8209_v25  ;;  %v8211_v16 = vpop.eup %8210  ;;  %v7643_v20 = vld [vmem:[%s12140_s13] ss:$0 sm:$0xff]  ;;  %s8658_s13 = smov 112  }
0x1463   :  { %v8213_v18 = vpop.eup %8212 }
0x1464   :  { %v6457_v50 = vadd.f32 0.5, %v6456_v56  ;;  %v6467_v48 = vmul.f32 %v8211_v16, %v6453_v8  ;;  %v6461_v40 = vmul.f32 0.5, %v8213_v18 }
0x1466   :  { %v6466_v28 = vmul.f32 %v6464_v34, %v6457_v50  ;;  %v6462_v37 = vadd.f32 0.5, %v6461_v40 }
0x1468   :  { %v6468_v12 = vadd.f32 %v6467_v48, %v6466_v28 }
0x146a   :  { %8214 = vtanh.f32 %v6468_v12 }
0x146b   :  { %v6729_v10 = vpop.f32.mrf.mxu0  ;;  %v6769_v42 = vpop.f32.mrf.mxu1 }
0x146d   :  { %v6731_v3 = vpop.f32.mrf.mxu0  ;;  %v6771_v58 = vpop.f32.mrf.mxu1 }
0x146f   :  { %v6732_v11 = vpop.f32.mrf.mxu0  ;;  %v6773_v49 = vpop.f32.mrf.mxu1 }
0x1471   :  { %v6733_v19 = vpop.f32.mrf.mxu0  ;;  %v6774_v2 = vpop.f32.mrf.mxu1 }
0x1472   :  { %v7288_v19 = vpop.permute.xlu0 %7287 }
0x1477   :  { %v8215_v9 = vpop.eup %8214 }
0x1478   :  { %v6470_v26 = vmul.f32 %v8215_v9, %v6462_v37 }
0x147a   :  { %v7049_v36 = vpack.c.bf16 %v6470_v26, %v6470_v26 }
0x147c   :  { %v7172_v21 = vrot.slane %v7049_v36, 3 }
0x147e   :  { %7699 = vmatmul.mubr.bf16.vlgmr.msra.gmra.mxu1 %v7172_v21 }
0x148b   :  { %v6970_v35 = vpop.f32.mrf.mxu0  ;;  %v7010_v17 = vpop.f32.mrf.mxu1 }
0x148c   :  { %v6971_v4 = vadd.f32 %v6970_v35, %v6729_v10  ;;  %v7011_v27 = vadd.f32 %v7010_v17, %v6769_v42 }
0x148d   :  { %v6972_v31 = vpop.f32.mrf.mxu0  ;;  %v7012_v43 = vpop.f32.mrf.mxu1 }
0x148e   :  { %v7034_v59 = vadd.f32 %v7022_v15, %v6971_v4  ;;  %v7035_v22 = vadd.f32 %v7026_v51, %v7011_v27  ;;  %v7013_v38 = vadd.f32 %v7012_v43, %v6771_v58 }
0x148f   :  { %v6973_v41 = vpop.f32.mrf.mxu0  ;;  %v7014_v57 = vpop.f32.mrf.mxu1 }
0x1490   :  { %v7037_v33 = vmul.f32 0.5, %v7034_v59  ;;  %v7036_v45 = vadd.f32 %v7030_v44, %v7013_v38 }
0x1491   :  { %v6974_v29 = vpop.f32.mrf.mxu0  ;;  %v7015_v23 = vpop.f32.mrf.mxu1 }
0x1492   :  { %8216 = vtanh.f32 %v7037_v33  ;;  %v7043_v46 = vmul.f32 0.5, %v7036_v45 }
0x1493   :  { %8218 = vtanh.f32 %v7035_v22 }
0x1494   :  { %8220 = vtanh.f32 %v7043_v46 }
0x149f   :  { %v8217_v47 = vpop.eup %8216 }
0x14a0   :  { %v7039_v52 = vmul.f32 0.5, %v8217_v47  ;;  %v8219_v54 = vpop.eup %8218 }
0x14a1   :  { %v8221_v60 = vpop.eup %8220 }
0x14a2   :  { %v7040_v53 = vadd.f32 0.5, %v7039_v52  ;;  %v7045_v61 = vmul.f32 0.5, %v8221_v60 }
0x14a4   :  { %v7042_v55 = vmul.f32 %v8219_v54, %v7040_v53  ;;  %v7046_v62 = vadd.f32 0.5, %v7045_v61 }
0x14a6   :  { %8222 = vtanh.f32 %v7042_v55 }
0x14b3   :  { %v8223_v63 = vpop.eup %8222 }
0x14b4   :  { %v7048_v6 = vmul.f32 %v8223_v63, %v7046_v62 }
0x14b6   :  { %v7066_v7 = vpack.c.bf16 %v7048_v6, %v7048_v6 }
0x14b8   :  { %7679 = vmatmul.mubr.bf16.vlgmr.msra.gmra.mxu0 %v7066_v7 }
0x153e   :  { %v7256_v24 = vpop.f32.mrf.mxu1 }
0x1540   :  { %v7700_v0 = vpop.f32.mrf.mxu1 }
0x1542   :  { %v7259_v1 = vpop.f32.mrf.mxu1 }
0x1544   :  { %v7701_v14 = vpop.f32.mrf.mxu1 }
0x1578   :  { %v7165_v13 = vpop.f32.mrf.mxu0 }
0x1579   :  { %v7257_v25 = vadd.f32 %v7256_v24, %v7165_v13 }
0x157a   :  { %v7680_v8 = vpop.f32.mrf.mxu0 }
0x157b   :  { %v7269_v56 = vadd.f32 %v7643_v20, %v7257_v25 }
0x157c   :  { %v7168_v50 = vpop.f32.mrf.mxu0 }
0x157d   :  { %v7271_v34 = vmin.f32 %v7269_v56, 20.0  ;;  %7297 = vrot.lane.b32.xlu1 %v7269_v56, %s8645_s27  ;;  %vm7270_vm3 = vcmp.gt.f32.partialorder %v7269_v56, 20.0 }
0x157e   :  { %v7681_v16 = vpop.f32.mrf.mxu0 }
0x157f   :  { %v7272_v28 = vmul.f32 1.442695, %v7271_v34 }
0x1581   :  { %8224 = vpow2.f32 %v7272_v28 }
0x158e   :  { %v8225_v48 = vpop.eup %8224 }
0x158f   :  { %v7274_v12 = vadd.f32 1.0, %v8225_v48  ;;  %v7277_v10 = vmul.f32 -0.5, %v8225_v48  ;;  %v7280_v3 = vand.u32 2147483647, %v8225_v48 }
0x1591   :  { %8226 = vlog2.f32 %v7274_v12  ;;  %v7278_v42 = vadd.f32 1.0, %v7277_v10  ;;  %vm7281_vm2 = vcmp.lt.f32.partialorder %v7280_v3, 0.0004427343 }
0x1593   :  { %v7279_v11 = vmul.f32 %v8225_v48, %v7278_v42 }
0x159e   :  { %v8227_v58 = vpop.eup %8226 }
0x159f   :  { %v7276_v18 = vmul.f32 0.6931472, %v8227_v58 }
0x15a1   :  { %v7282_v49 = vsel %vm7281_vm2, %v7279_v11, %v7276_v18 }
0x15a2   :  { %v7283_v2 = vsel %vm7270_vm3, %v7269_v56, %v7282_v49 }
0x15a3   :  { %v7284_v40 = vadd.f32 0.0001, %v7283_v2 }
0x15a5   :  { %v7290_v37 = vmul.f32 %v7288_v19, %v7284_v40  ;;  %7301 = vrot.lane.b32.xlu1 %v7284_v40, %s8645_s27 }
0x15a7   :  { %7292 = vrot.lane.b32.xlu0 %v7290_v37, %s8658_s13 }
0x15ef   :  { %v7298_v9 = vpop.permute.xlu1 %7297 }
0x1617   :  { %v7302_v21 = vpop.permute.xlu1 %7301 }
0x1619   :  { %v7293_v26 = vpop.permute.xlu0 %7292 }
0x161a   :  { %v7295_v36 = vadd.f32 %v7293_v26, %v7269_v56 }
0x161c   :  { %v7305_v5 = vsel %vm7304_vm4, %v7295_v36, %v7298_v9 }
0x161d   :  { %v7306_v30 = vsel %vm312_vm0, %v7305_v5, %v7302_v21 }
0x161e   :  { %7308 = vst.msk [vmem:[%s12142_s15] sm:$0x3] %vm7307_vm5, %v7306_v30 }
0x161f   :  { %7313 = vsyncpa [#allocation5], 1 }
0x1620   :  { %7314 = vsyncpa [#allocation7], 1 }
0x1621   :  { %7315 = vsyncpa [#allocation10], 1 }
0x1622   :  { %7316 = vsyncpa [#allocation13], 1 }
0x1623   :  { %7317 = vsyncpa [#allocation16], 1 }

</bundles_post_ra>
